<compile_context>
chip_gen: v7x
topology: tpu7x:2x2x1
jax: 0.10.0
libtpu: 0.0.40
codegen_flags: <defaults>
</compile_context>

<pallas_src>
import functools

import jax
import jax.numpy as jnp
from jax.experimental import pallas as pl
from jax.experimental.pallas import tpu as pltpu


# ----------------------------------------------------------------------------
# Kernel helpers
# ----------------------------------------------------------------------------
def _zero_halo(pad_ref):
    """Zero only the 1-wide halo border of the padded scratch (4 thin strips)."""
    Hp, Wp, C = pad_ref.shape
    dt = pad_ref.dtype
    pad_ref[0:1, :, :] = jnp.zeros((1, Wp, C), dt)
    pad_ref[Hp - 1:Hp, :, :] = jnp.zeros((1, Wp, C), dt)
    pad_ref[:, 0:1, :] = jnp.zeros((Hp, 1, C), dt)
    pad_ref[:, Wp - 1:Wp, :] = jnp.zeros((Hp, 1, C), dt)


def _conv_bn_silu_stage(pad_ref, w_ref, b_ref):
    """3x3/s1/SAME conv (BN folded) + SiLU as 9 accumulated MXU matmuls.

    pad_ref: Ref[(H+2, W+2, Cin)]  bf16, halo rows/cols already zero, interior
             holds the stage input.
    w_ref:   Ref[(9, Cin, Cout)]   bf16 weights with BN scale folded in.
    b_ref:   Ref[(1, Cout)]        f32 folded BN bias.
    returns: (H*W, Cout) float32.
    """
    Hp, Wp, cin = pad_ref.shape
    H, W = Hp - 2, Wp - 2
    cout = w_ref.shape[-1]

    acc = jnp.zeros((H * W, cout), jnp.float32)
    for kh in range(3):
        for kw in range(3):
            # Shifted (H, W, Cin) window -- a plain VMEM load, no im2col copy.
            patch = pad_ref[kh:kh + H, kw:kw + W, :]
            acc = acc + jnp.dot(patch.reshape(H * W, cin),
                                w_ref[kh * 3 + kw],
                                preferred_element_type=jnp.float32)

    y = acc + b_ref[...]          # folded BatchNorm bias (f32)
    return y * jax.nn.sigmoid(y)  # SiLU in f32 (EUP)


def _bottleneck_kernel(x_ref, w1_ref, b1_ref, w2_ref, b2_ref, o_ref, pad_ref,
                       *, add):
    _, H, W, C = x_ref.shape

    # Halo is shared by both stages; the interior is fully overwritten below.
    _zero_halo(pad_ref)

    # --- cv1: stage input x into the padded scratch interior (bf16) -------
    pad_ref[1:H + 1, 1:W + 1, :] = x_ref[0].astype(pad_ref.dtype)
    y1 = _conv_bn_silu_stage(pad_ref, w1_ref, b1_ref)          # (H*W, C) f32

    # --- cv2: stage y1 through the same explicit VMEM scratch --------------
    # (bounds y1's live range; stage-2 taps are cheap VMEM loads)
    pad_ref[1:H + 1, 1:W + 1, :] = y1.reshape(H, W, C).astype(pad_ref.dtype)
    y2 = _conv_bn_silu_stage(pad_ref, w2_ref, b2_ref)          # (H*W, C) f32

    if add:
        y2 = y2 + x_ref[0].astype(jnp.float32).reshape(H * W, C)

    o_ref[0] = y2.reshape(H, W, C).astype(o_ref.dtype)


# ----------------------------------------------------------------------------
# Wrapper: ONE pallas_call for the whole Bottleneck (grid over batch)
# ----------------------------------------------------------------------------
def bottleneck_forward(x_nhwc, w1p, b1, w2p, b2, *, add):
    N, H, W, C = x_nhwc.shape
    # The spec's Bottleneck is channels->channels for both convs; the shared
    # padded scratch below relies on that.  Fail loudly otherwise.
    if w1p.shape != (9, C, C) or w2p.shape != (9, C, C):
        raise ValueError("Bottleneck kernel assumes Cin == Cmid == Cout == C; "
                         f"got x C={C}, w1 {w1p.shape}, w2 {w2p.shape}")
    cout = C

    x_bf16 = x_nhwc.astype(jnp.bfloat16)   # bf16 HBM activations (half the DMA)

    img_in_spec = pl.BlockSpec((1, H, W, C), lambda n: (n, 0, 0, 0))
    img_out_spec = pl.BlockSpec((1, H, W, cout), lambda n: (n, 0, 0, 0))
    w_spec = pl.BlockSpec((9, C, cout), lambda n: (0, 0, 0))
    b_spec = pl.BlockSpec((1, cout), lambda n: (0, 0))

    cost = pl.CostEstimate(
        flops=2 * (2 * N * H * W * 9 * C * cout),         # two 3x3 convs
        transcendentals=2 * N * H * W * cout,             # two SiLU sigmoids
        bytes_accessed=(2 * N * H * W * C * 2             # bf16 in + out
                        + 2 * 9 * C * cout * 2            # bf16 weights
                        + 2 * cout * 4))                  # f32 biases

    kernel = functools.partial(_bottleneck_kernel, add=add)

    return pl.pallas_call(
        kernel,
        out_shape=jax.ShapeDtypeStruct((N, H, W, cout), jnp.bfloat16),
        grid=(N,),
        in_specs=[img_in_spec, w_spec, b_spec, w_spec, b_spec],
        out_specs=img_out_spec,
        scratch_shapes=[pltpu.VMEM((H + 2, W + 2, C), jnp.bfloat16)],
        compiler_params=pltpu.CompilerParams(
            dimension_semantics=("parallel",),
            vmem_limit_bytes=64 * 1024 * 1024),
        cost_estimate=cost,
    )(x_bf16, w1p, b1.reshape(1, -1), w2p, b2.reshape(1, -1))


# ----------------------------------------------------------------------------
# Bottleneck module (parameters built deterministically in-script)
# ----------------------------------------------------------------------------
class BottleneckPallas:
    """Mirrors PyTorch Bottleneck(channels, add) in eval mode (folded BN)."""

    def __init__(self, channels, add, key):
        self.add = add
        C = channels
        eps = 1e-5
        keys = jax.random.split(key, 10)

        def make_conv(k_w, k_g, k_b, k_m, k_v):
            # conv weight in HWIO layout (PyTorch OIHW transposed)
            w = jax.random.normal(k_w, (3, 3, C, C), jnp.float32) * 0.1
            gamma = 1.0 + 0.1 * jax.random.normal(k_g, (C,), jnp.float32)
            beta = 0.1 * jax.random.normal(k_b, (C,), jnp.float32)
            mean = 0.1 * jax.random.normal(k_m, (C,), jnp.float32)
            var = jnp.abs(jax.random.normal(k_v, (C,), jnp.float32)) + 1.0
            scale = gamma / jnp.sqrt(var + eps)            # eval-mode BN fold
            bias = (beta - mean * scale).astype(jnp.float32)
            # Fold BN scale into the conv weights (per out-channel), pre-cast
            # to bf16 for the MXU and pack to (9, Cin, Cout) for per-tap dots.
            w_folded = (w * scale).astype(jnp.bfloat16)    # (3,3,Cin,Cout)
            w_packed = w_folded.reshape(9, C, C)           # (9, Cin, Cout)
            return w_folded, w_packed, bias

        self.w1f, self.w1p, self.b1 = make_conv(*keys[0:5])
        self.w2f, self.w2p, self.b2 = make_conv(*keys[5:10])

    def forward_nhwc(self, x_nhwc):
        # Channels-last fast path: bf16 in / bf16 out, no layout round trips.
        return bottleneck_forward(x_nhwc, self.w1p, self.b1,
                                  self.w2p, self.b2, add=self.add)

    def __call__(self, x_nchw):
        x = jnp.transpose(x_nchw, (0, 2, 3, 1))            # NCHW -> NHWC
        y = self.forward_nhwc(x)
        return jnp.transpose(y.astype(jnp.float32), (0, 3, 1, 2))


# ----------------------------------------------------------------------------
# Pure-JAX reference (same folded bf16 weights / same rounding points)
# ----------------------------------------------------------------------------
def _ref_conv_block(x_nhwc, w_folded_bf16, bias):
    y = jax.lax.conv_general_dilated(
        x_nhwc.astype(jnp.bfloat16), w_folded_bf16,
        window_strides=(1, 1), padding="SAME",
        dimension_numbers=("NHWC", "HWIO", "NHWC"),
        preferred_element_type=jnp.float32)
    y = y + bias
    return y * jax.nn.sigmoid(y)


def bottleneck_ref(m, x_nchw):
    x = jnp.transpose(x_nchw, (0, 2, 3, 1)).astype(jnp.bfloat16)
    y = _ref_conv_block(_ref_conv_block(x, m.w1f, m.b1), m.w2f, m.b2)
    if m.add:
        y = y + x.astype(jnp.float32)
    y = y.astype(jnp.bfloat16).astype(jnp.float32)   # match kernel bf16 output
    return jnp.transpose(y, (0, 3, 1, 2))


if __name__ == "__main__":
    key = jax.random.PRNGKey(0)
    k_x, k_p = jax.random.split(key)

    B, C, H, W = 2, 4, 16, 16
    x = jax.random.normal(k_x, (B, C, H, W), jnp.float32)

    model = BottleneckPallas(channels=C, add=True, key=k_p)

    out = jax.block_until_ready(model(x))
    ref = jax.block_until_ready(bottleneck_ref(model, x))

    assert out.shape == (B, C, H, W)
    max_err = float(jnp.max(jnp.abs(out - ref)))
    assert jnp.allclose(out, ref, atol=1e-2, rtol=1e-2), max_err

    print("KERNEL_OK")
</pallas_src>

<mosaic_0001>
module attributes {stable_mosaic.version = 11 : i64} {
  func.func @_bottleneck_kernel(%arg0: i32, %arg1: memref<1x16x16x4xbf16, #tpu.memory_space<vmem>>, %arg2: memref<9x4x4xbf16, #tpu.memory_space<vmem>>, %arg3: memref<1x4xf32, #tpu.memory_space<vmem>>, %arg4: memref<9x4x4xbf16, #tpu.memory_space<vmem>>, %arg5: memref<1x4xf32, #tpu.memory_space<vmem>>, %arg6: memref<1x16x16x4xbf16, #tpu.memory_space<vmem>>, %arg7: memref<18x18x4xbf16, #tpu.memory_space<vmem>>) attributes {dimension_semantics = [#tpu.dimension_semantics<parallel>], iteration_bounds = array<i64: 2>, scalar_prefetch = 0 : i64, scratch_operands = 1 : i64, tpu.core_type = #tpu.core_type<tc>, window_params = [{transform_indices = @transform_0, window_bounds = array<i64: 1, 16, 16, 4>}, {pipeline_mode = #tpu.pipeline_mode<synchronous>, transform_indices = @transform_1, window_bounds = array<i64: 9, 4, 4>}, {pipeline_mode = #tpu.pipeline_mode<synchronous>, transform_indices = @transform_2, window_bounds = array<i64: 1, 4>}, {pipeline_mode = #tpu.pipeline_mode<synchronous>, transform_indices = @transform_3, window_bounds = array<i64: 9, 4, 4>}, {pipeline_mode = #tpu.pipeline_mode<synchronous>, transform_indices = @transform_4, window_bounds = array<i64: 1, 4>}, {transform_indices = @transform_5, window_bounds = array<i64: 1, 16, 16, 4>}]} {
    %cst = arith.constant 0.000000e+00 : bf16
    %0 = vector.broadcast %cst : bf16 to vector<1x18x4xbf16>
    %c0 = arith.constant 0 : index
    %c0_0 = arith.constant 0 : index
    %c0_1 = arith.constant 0 : index
    %1 = vector.load %arg7[%c0, %c0_0, %c0_1] : memref<18x18x4xbf16, #tpu.memory_space<vmem>>, vector<1x18x4xbf16>
    tpu.vector_store %arg7[%c0, %c0_0, %c0_1], %0 {strides = array<i32>} : memref<18x18x4xbf16, #tpu.memory_space<vmem>>, vector<1x18x4xbf16>,
    %cst_2 = arith.constant 0.000000e+00 : bf16
    %2 = vector.broadcast %cst_2 : bf16 to vector<1x18x4xbf16>
    %c17 = arith.constant 17 : index
    %c0_3 = arith.constant 0 : index
    %c0_4 = arith.constant 0 : index
    %3 = vector.load %arg7[%c17, %c0_3, %c0_4] : memref<18x18x4xbf16, #tpu.memory_space<vmem>>, vector<1x18x4xbf16>
    tpu.vector_store %arg7[%c17, %c0_3, %c0_4], %2 {strides = array<i32>} : memref<18x18x4xbf16, #tpu.memory_space<vmem>>, vector<1x18x4xbf16>,
    %cst_5 = arith.constant 0.000000e+00 : bf16
    %4 = vector.broadcast %cst_5 : bf16 to vector<18x1x4xbf16>
    %c0_6 = arith.constant 0 : index
    %c0_7 = arith.constant 0 : index
    %c0_8 = arith.constant 0 : index
    %5 = vector.load %arg7[%c0_6, %c0_7, %c0_8] : memref<18x18x4xbf16, #tpu.memory_space<vmem>>, vector<18x1x4xbf16>
    tpu.vector_store %arg7[%c0_6, %c0_7, %c0_8], %4 {strides = array<i32>} : memref<18x18x4xbf16, #tpu.memory_space<vmem>>, vector<18x1x4xbf16>,
    %cst_9 = arith.constant 0.000000e+00 : bf16
    %6 = vector.broadcast %cst_9 : bf16 to vector<18x1x4xbf16>
    %c0_10 = arith.constant 0 : index
    %c17_11 = arith.constant 17 : index
    %c0_12 = arith.constant 0 : index
    %7 = vector.load %arg7[%c0_10, %c17_11, %c0_12] : memref<18x18x4xbf16, #tpu.memory_space<vmem>>, vector<18x1x4xbf16>
    tpu.vector_store %arg7[%c0_10, %c17_11, %c0_12], %6 {strides = array<i32>} : memref<18x18x4xbf16, #tpu.memory_space<vmem>>, vector<18x1x4xbf16>,
    %c0_13 = arith.constant 0 : index
    %c0_14 = arith.constant 0 : index
    %c0_15 = arith.constant 0 : index
    %c0_16 = arith.constant 0 : index
    %8 = vector.load %arg1[%c0_13, %c0_14, %c0_15, %c0_16] : memref<1x16x16x4xbf16, #tpu.memory_space<vmem>>, vector<1x16x16x4xbf16>
    %9 = vector.shape_cast %8 : vector<1x16x16x4xbf16> to vector<16x16x4xbf16>
    %c1 = arith.constant 1 : index
    %c1_17 = arith.constant 1 : index
    %c0_18 = arith.constant 0 : index
    %10 = vector.load %arg7[%c1, %c1_17, %c0_18] : memref<18x18x4xbf16, #tpu.memory_space<vmem>>, vector<16x16x4xbf16>
    tpu.vector_store %arg7[%c1, %c1_17, %c0_18], %9 {strides = array<i32>} : memref<18x18x4xbf16, #tpu.memory_space<vmem>>, vector<16x16x4xbf16>,
    %cst_19 = arith.constant 0.000000e+00 : f32
    %11 = vector.broadcast %cst_19 : f32 to vector<256x4xf32>
    %c0_20 = arith.constant 0 : index
    %c0_21 = arith.constant 0 : index
    %c0_22 = arith.constant 0 : index
    %12 = vector.load %arg7[%c0_20, %c0_21, %c0_22] : memref<18x18x4xbf16, #tpu.memory_space<vmem>>, vector<16x16x4xbf16>
    %13 = vector.shape_cast %12 : vector<16x16x4xbf16> to vector<256x4xbf16>
    %c0_23 = arith.constant 0 : index
    %c0_24 = arith.constant 0 : index
    %c0_25 = arith.constant 0 : index
    %14 = vector.load %arg2[%c0_23, %c0_24, %c0_25] : memref<9x4x4xbf16, #tpu.memory_space<vmem>>, vector<1x4x4xbf16>
    %15 = vector.shape_cast %14 : vector<1x4x4xbf16> to vector<4x4xbf16>
    %cst_26 = arith.constant dense<0.000000e+00> : vector<256x4xf32>
    %16 = tpu.matmul %13, %15, %cst_26 {dimension_numbers = #tpu.dot_dimension_numbers<[1], [0], [0], [1], [0, 0, 1, 1], [], []>} : vector<256x4xbf16>, vector<4x4xbf16>, vector<256x4xf32> -> vector<256x4xf32>
    %17 = arith.addf %11, %16 : vector<256x4xf32>
    %c0_27 = arith.constant 0 : index
    %c1_28 = arith.constant 1 : index
    %c0_29 = arith.constant 0 : index
    %18 = vector.load %arg7[%c0_27, %c1_28, %c0_29] : memref<18x18x4xbf16, #tpu.memory_space<vmem>>, vector<16x16x4xbf16>
    %19 = vector.shape_cast %18 : vector<16x16x4xbf16> to vector<256x4xbf16>
    %c1_30 = arith.constant 1 : index
    %c0_31 = arith.constant 0 : index
    %c0_32 = arith.constant 0 : index
    %20 = vector.load %arg2[%c1_30, %c0_31, %c0_32] : memref<9x4x4xbf16, #tpu.memory_space<vmem>>, vector<1x4x4xbf16>
    %21 = vector.shape_cast %20 : vector<1x4x4xbf16> to vector<4x4xbf16>
    %cst_33 = arith.constant dense<0.000000e+00> : vector<256x4xf32>
    %22 = tpu.matmul %19, %21, %cst_33 {dimension_numbers = #tpu.dot_dimension_numbers<[1], [0], [0], [1], [0, 0, 1, 1], [], []>} : vector<256x4xbf16>, vector<4x4xbf16>, vector<256x4xf32> -> vector<256x4xf32>
    %23 = arith.addf %17, %22 : vector<256x4xf32>
    %c0_34 = arith.constant 0 : index
    %c2 = arith.constant 2 : index
    %c0_35 = arith.constant 0 : index
    %24 = vector.load %arg7[%c0_34, %c2, %c0_35] : memref<18x18x4xbf16, #tpu.memory_space<vmem>>, vector<16x16x4xbf16>
    %25 = vector.shape_cast %24 : vector<16x16x4xbf16> to vector<256x4xbf16>
    %c2_36 = arith.constant 2 : index
    %c0_37 = arith.constant 0 : index
    %c0_38 = arith.constant 0 : index
    %26 = vector.load %arg2[%c2_36, %c0_37, %c0_38] : memref<9x4x4xbf16, #tpu.memory_space<vmem>>, vector<1x4x4xbf16>
    %27 = vector.shape_cast %26 : vector<1x4x4xbf16> to vector<4x4xbf16>
    %cst_39 = arith.constant dense<0.000000e+00> : vector<256x4xf32>
    %28 = tpu.matmul %25, %27, %cst_39 {dimension_numbers = #tpu.dot_dimension_numbers<[1], [0], [0], [1], [0, 0, 1, 1], [], []>} : vector<256x4xbf16>, vector<4x4xbf16>, vector<256x4xf32> -> vector<256x4xf32>
    %29 = arith.addf %23, %28 : vector<256x4xf32>
    %c1_40 = arith.constant 1 : index
    %c0_41 = arith.constant 0 : index
    %c0_42 = arith.constant 0 : index
    %30 = vector.load %arg7[%c1_40, %c0_41, %c0_42] : memref<18x18x4xbf16, #tpu.memory_space<vmem>>, vector<16x16x4xbf16>
    %31 = vector.shape_cast %30 : vector<16x16x4xbf16> to vector<256x4xbf16>
    %c3 = arith.constant 3 : index
    %c0_43 = arith.constant 0 : index
    %c0_44 = arith.constant 0 : index
    %32 = vector.load %arg2[%c3, %c0_43, %c0_44] : memref<9x4x4xbf16, #tpu.memory_space<vmem>>, vector<1x4x4xbf16>
    %33 = vector.shape_cast %32 : vector<1x4x4xbf16> to vector<4x4xbf16>
    %cst_45 = arith.constant dense<0.000000e+00> : vector<256x4xf32>
    %34 = tpu.matmul %31, %33, %cst_45 {dimension_numbers = #tpu.dot_dimension_numbers<[1], [0], [0], [1], [0, 0, 1, 1], [], []>} : vector<256x4xbf16>, vector<4x4xbf16>, vector<256x4xf32> -> vector<256x4xf32>
    %35 = arith.addf %29, %34 : vector<256x4xf32>
    %c1_46 = arith.constant 1 : index
    %c1_47 = arith.constant 1 : index
    %c0_48 = arith.constant 0 : index
    %36 = vector.load %arg7[%c1_46, %c1_47, %c0_48] : memref<18x18x4xbf16, #tpu.memory_space<vmem>>, vector<16x16x4xbf16>
    %37 = vector.shape_cast %36 : vector<16x16x4xbf16> to vector<256x4xbf16>
    %c4 = arith.constant 4 : index
    %c0_49 = arith.constant 0 : index
    %c0_50 = arith.constant 0 : index
    %38 = vector.load %arg2[%c4, %c0_49, %c0_50] : memref<9x4x4xbf16, #tpu.memory_space<vmem>>, vector<1x4x4xbf16>
    %39 = vector.shape_cast %38 : vector<1x4x4xbf16> to vector<4x4xbf16>
    %cst_51 = arith.constant dense<0.000000e+00> : vector<256x4xf32>
    %40 = tpu.matmul %37, %39, %cst_51 {dimension_numbers = #tpu.dot_dimension_numbers<[1], [0], [0], [1], [0, 0, 1, 1], [], []>} : vector<256x4xbf16>, vector<4x4xbf16>, vector<256x4xf32> -> vector<256x4xf32>
    %41 = arith.addf %35, %40 : vector<256x4xf32>
    %c1_52 = arith.constant 1 : index
    %c2_53 = arith.constant 2 : index
    %c0_54 = arith.constant 0 : index
    %42 = vector.load %arg7[%c1_52, %c2_53, %c0_54] : memref<18x18x4xbf16, #tpu.memory_space<vmem>>, vector<16x16x4xbf16>
    %43 = vector.shape_cast %42 : vector<16x16x4xbf16> to vector<256x4xbf16>
    %c5 = arith.constant 5 : index
    %c0_55 = arith.constant 0 : index
    %c0_56 = arith.constant 0 : index
    %44 = vector.load %arg2[%c5, %c0_55, %c0_56] : memref<9x4x4xbf16, #tpu.memory_space<vmem>>, vector<1x4x4xbf16>
    %45 = vector.shape_cast %44 : vector<1x4x4xbf16> to vector<4x4xbf16>
    %cst_57 = arith.constant dense<0.000000e+00> : vector<256x4xf32>
    %46 = tpu.matmul %43, %45, %cst_57 {dimension_numbers = #tpu.dot_dimension_numbers<[1], [0], [0], [1], [0, 0, 1, 1], [], []>} : vector<256x4xbf16>, vector<4x4xbf16>, vector<256x4xf32> -> vector<256x4xf32>
    %47 = arith.addf %41, %46 : vector<256x4xf32>
    %c2_58 = arith.constant 2 : index
    %c0_59 = arith.constant 0 : index
    %c0_60 = arith.constant 0 : index
    %48 = vector.load %arg7[%c2_58, %c0_59, %c0_60] : memref<18x18x4xbf16, #tpu.memory_space<vmem>>, vector<16x16x4xbf16>
    %49 = vector.shape_cast %48 : vector<16x16x4xbf16> to vector<256x4xbf16>
    %c6 = arith.constant 6 : index
    %c0_61 = arith.constant 0 : index
    %c0_62 = arith.constant 0 : index
    %50 = vector.load %arg2[%c6, %c0_61, %c0_62] : memref<9x4x4xbf16, #tpu.memory_space<vmem>>, vector<1x4x4xbf16>
    %51 = vector.shape_cast %50 : vector<1x4x4xbf16> to vector<4x4xbf16>
    %cst_63 = arith.constant dense<0.000000e+00> : vector<256x4xf32>
    %52 = tpu.matmul %49, %51, %cst_63 {dimension_numbers = #tpu.dot_dimension_numbers<[1], [0], [0], [1], [0, 0, 1, 1], [], []>} : vector<256x4xbf16>, vector<4x4xbf16>, vector<256x4xf32> -> vector<256x4xf32>
    %53 = arith.addf %47, %52 : vector<256x4xf32>
    %c2_64 = arith.constant 2 : index
    %c1_65 = arith.constant 1 : index
    %c0_66 = arith.constant 0 : index
    %54 = vector.load %arg7[%c2_64, %c1_65, %c0_66] : memref<18x18x4xbf16, #tpu.memory_space<vmem>>, vector<16x16x4xbf16>
    %55 = vector.shape_cast %54 : vector<16x16x4xbf16> to vector<256x4xbf16>
    %c7 = arith.constant 7 : index
    %c0_67 = arith.constant 0 : index
    %c0_68 = arith.constant 0 : index
    %56 = vector.load %arg2[%c7, %c0_67, %c0_68] : memref<9x4x4xbf16, #tpu.memory_space<vmem>>, vector<1x4x4xbf16>
    %57 = vector.shape_cast %56 : vector<1x4x4xbf16> to vector<4x4xbf16>
    %cst_69 = arith.constant dense<0.000000e+00> : vector<256x4xf32>
    %58 = tpu.matmul %55, %57, %cst_69 {dimension_numbers = #tpu.dot_dimension_numbers<[1], [0], [0], [1], [0, 0, 1, 1], [], []>} : vector<256x4xbf16>, vector<4x4xbf16>, vector<256x4xf32> -> vector<256x4xf32>
    %59 = arith.addf %53, %58 : vector<256x4xf32>
    %c2_70 = arith.constant 2 : index
    %c2_71 = arith.constant 2 : index
    %c0_72 = arith.constant 0 : index
    %60 = vector.load %arg7[%c2_70, %c2_71, %c0_72] : memref<18x18x4xbf16, #tpu.memory_space<vmem>>, vector<16x16x4xbf16>
    %61 = vector.shape_cast %60 : vector<16x16x4xbf16> to vector<256x4xbf16>
    %c8 = arith.constant 8 : index
    %c0_73 = arith.constant 0 : index
    %c0_74 = arith.constant 0 : index
    %62 = vector.load %arg2[%c8, %c0_73, %c0_74] : memref<9x4x4xbf16, #tpu.memory_space<vmem>>, vector<1x4x4xbf16>
    %63 = vector.shape_cast %62 : vector<1x4x4xbf16> to vector<4x4xbf16>
    %cst_75 = arith.constant dense<0.000000e+00> : vector<256x4xf32>
    %64 = tpu.matmul %61, %63, %cst_75 {dimension_numbers = #tpu.dot_dimension_numbers<[1], [0], [0], [1], [0, 0, 1, 1], [], []>} : vector<256x4xbf16>, vector<4x4xbf16>, vector<256x4xf32> -> vector<256x4xf32>
    %65 = arith.addf %59, %64 : vector<256x4xf32>
    %c0_76 = arith.constant 0 : index
    %c0_77 = arith.constant 0 : index
    %66 = vector.load %arg3[%c0_76, %c0_77] : memref<1x4xf32, #tpu.memory_space<vmem>>, vector<1x4xf32>
    %67 = vector.broadcast %66 : vector<1x4xf32> to vector<256x4xf32>
    %68 = arith.addf %65, %67 : vector<256x4xf32>
    %69 = arith.negf %68 : vector<256x4xf32>
    %70 = math.exp %69 : vector<256x4xf32>
    %cst_78 = arith.constant 1.000000e+00 : f32
    %71 = vector.broadcast %cst_78 : f32 to vector<256x4xf32>
    %72 = arith.addf %71, %70 : vector<256x4xf32>
    %73 = arith.divf %71, %72 : vector<256x4xf32>
    %74 = arith.mulf %68, %73 : vector<256x4xf32>
    %75 = vector.shape_cast %74 : vector<256x4xf32> to vector<16x16x4xf32>
    %76 = arith.truncf %75 : vector<16x16x4xf32> to vector<16x16x4xbf16>
    %c1_79 = arith.constant 1 : index
    %c1_80 = arith.constant 1 : index
    %c0_81 = arith.constant 0 : index
    %77 = vector.load %arg7[%c1_79, %c1_80, %c0_81] : memref<18x18x4xbf16, #tpu.memory_space<vmem>>, vector<16x16x4xbf16>
    tpu.vector_store %arg7[%c1_79, %c1_80, %c0_81], %76 {strides = array<i32>} : memref<18x18x4xbf16, #tpu.memory_space<vmem>>, vector<16x16x4xbf16>,
    %cst_82 = arith.constant 0.000000e+00 : f32
    %78 = vector.broadcast %cst_82 : f32 to vector<256x4xf32>
    %c0_83 = arith.constant 0 : index
    %c0_84 = arith.constant 0 : index
    %c0_85 = arith.constant 0 : index
    %79 = vector.load %arg7[%c0_83, %c0_84, %c0_85] : memref<18x18x4xbf16, #tpu.memory_space<vmem>>, vector<16x16x4xbf16>
    %80 = vector.shape_cast %79 : vector<16x16x4xbf16> to vector<256x4xbf16>
    %c0_86 = arith.constant 0 : index
    %c0_87 = arith.constant 0 : index
    %c0_88 = arith.constant 0 : index
    %81 = vector.load %arg4[%c0_86, %c0_87, %c0_88] : memref<9x4x4xbf16, #tpu.memory_space<vmem>>, vector<1x4x4xbf16>
    %82 = vector.shape_cast %81 : vector<1x4x4xbf16> to vector<4x4xbf16>
    %cst_89 = arith.constant dense<0.000000e+00> : vector<256x4xf32>
    %83 = tpu.matmul %80, %82, %cst_89 {dimension_numbers = #tpu.dot_dimension_numbers<[1], [0], [0], [1], [0, 0, 1, 1], [], []>} : vector<256x4xbf16>, vector<4x4xbf16>, vector<256x4xf32> -> vector<256x4xf32>
    %84 = arith.addf %78, %83 : vector<256x4xf32>
    %c0_90 = arith.constant 0 : index
    %c1_91 = arith.constant 1 : index
    %c0_92 = arith.constant 0 : index
    %85 = vector.load %arg7[%c0_90, %c1_91, %c0_92] : memref<18x18x4xbf16, #tpu.memory_space<vmem>>, vector<16x16x4xbf16>
    %86 = vector.shape_cast %85 : vector<16x16x4xbf16> to vector<256x4xbf16>
    %c1_93 = arith.constant 1 : index
    %c0_94 = arith.constant 0 : index
    %c0_95 = arith.constant 0 : index
    %87 = vector.load %arg4[%c1_93, %c0_94, %c0_95] : memref<9x4x4xbf16, #tpu.memory_space<vmem>>, vector<1x4x4xbf16>
    %88 = vector.shape_cast %87 : vector<1x4x4xbf16> to vector<4x4xbf16>
    %cst_96 = arith.constant dense<0.000000e+00> : vector<256x4xf32>
    %89 = tpu.matmul %86, %88, %cst_96 {dimension_numbers = #tpu.dot_dimension_numbers<[1], [0], [0], [1], [0, 0, 1, 1], [], []>} : vector<256x4xbf16>, vector<4x4xbf16>, vector<256x4xf32> -> vector<256x4xf32>
    %90 = arith.addf %84, %89 : vector<256x4xf32>
    %c0_97 = arith.constant 0 : index
    %c2_98 = arith.constant 2 : index
    %c0_99 = arith.constant 0 : index
    %91 = vector.load %arg7[%c0_97, %c2_98, %c0_99] : memref<18x18x4xbf16, #tpu.memory_space<vmem>>, vector<16x16x4xbf16>
    %92 = vector.shape_cast %91 : vector<16x16x4xbf16> to vector<256x4xbf16>
    %c2_100 = arith.constant 2 : index
    %c0_101 = arith.constant 0 : index
    %c0_102 = arith.constant 0 : index
    %93 = vector.load %arg4[%c2_100, %c0_101, %c0_102] : memref<9x4x4xbf16, #tpu.memory_space<vmem>>, vector<1x4x4xbf16>
    %94 = vector.shape_cast %93 : vector<1x4x4xbf16> to vector<4x4xbf16>
    %cst_103 = arith.constant dense<0.000000e+00> : vector<256x4xf32>
    %95 = tpu.matmul %92, %94, %cst_103 {dimension_numbers = #tpu.dot_dimension_numbers<[1], [0], [0], [1], [0, 0, 1, 1], [], []>} : vector<256x4xbf16>, vector<4x4xbf16>, vector<256x4xf32> -> vector<256x4xf32>
    %96 = arith.addf %90, %95 : vector<256x4xf32>
    %c1_104 = arith.constant 1 : index
    %c0_105 = arith.constant 0 : index
    %c0_106 = arith.constant 0 : index
    %97 = vector.load %arg7[%c1_104, %c0_105, %c0_106] : memref<18x18x4xbf16, #tpu.memory_space<vmem>>, vector<16x16x4xbf16>
    %98 = vector.shape_cast %97 : vector<16x16x4xbf16> to vector<256x4xbf16>
    %c3_107 = arith.constant 3 : index
    %c0_108 = arith.constant 0 : index
    %c0_109 = arith.constant 0 : index
    %99 = vector.load %arg4[%c3_107, %c0_108, %c0_109] : memref<9x4x4xbf16, #tpu.memory_space<vmem>>, vector<1x4x4xbf16>
    %100 = vector.shape_cast %99 : vector<1x4x4xbf16> to vector<4x4xbf16>
    %cst_110 = arith.constant dense<0.000000e+00> : vector<256x4xf32>
    %101 = tpu.matmul %98, %100, %cst_110 {dimension_numbers = #tpu.dot_dimension_numbers<[1], [0], [0], [1], [0, 0, 1, 1], [], []>} : vector<256x4xbf16>, vector<4x4xbf16>, vector<256x4xf32> -> vector<256x4xf32>
    %102 = arith.addf %96, %101 : vector<256x4xf32>
    %c1_111 = arith.constant 1 : index
    %c1_112 = arith.constant 1 : index
    %c0_113 = arith.constant 0 : index
    %103 = vector.load %arg7[%c1_111, %c1_112, %c0_113] : memref<18x18x4xbf16, #tpu.memory_space<vmem>>, vector<16x16x4xbf16>
    %104 = vector.shape_cast %103 : vector<16x16x4xbf16> to vector<256x4xbf16>
    %c4_114 = arith.constant 4 : index
    %c0_115 = arith.constant 0 : index
    %c0_116 = arith.constant 0 : index
    %105 = vector.load %arg4[%c4_114, %c0_115, %c0_116] : memref<9x4x4xbf16, #tpu.memory_space<vmem>>, vector<1x4x4xbf16>
    %106 = vector.shape_cast %105 : vector<1x4x4xbf16> to vector<4x4xbf16>
    %cst_117 = arith.constant dense<0.000000e+00> : vector<256x4xf32>
    %107 = tpu.matmul %104, %106, %cst_117 {dimension_numbers = #tpu.dot_dimension_numbers<[1], [0], [0], [1], [0, 0, 1, 1], [], []>} : vector<256x4xbf16>, vector<4x4xbf16>, vector<256x4xf32> -> vector<256x4xf32>
    %108 = arith.addf %102, %107 : vector<256x4xf32>
    %c1_118 = arith.constant 1 : index
    %c2_119 = arith.constant 2 : index
    %c0_120 = arith.constant 0 : index
    %109 = vector.load %arg7[%c1_118, %c2_119, %c0_120] : memref<18x18x4xbf16, #tpu.memory_space<vmem>>, vector<16x16x4xbf16>
    %110 = vector.shape_cast %109 : vector<16x16x4xbf16> to vector<256x4xbf16>
    %c5_121 = arith.constant 5 : index
    %c0_122 = arith.constant 0 : index
    %c0_123 = arith.constant 0 : index
    %111 = vector.load %arg4[%c5_121, %c0_122, %c0_123] : memref<9x4x4xbf16, #tpu.memory_space<vmem>>, vector<1x4x4xbf16>
    %112 = vector.shape_cast %111 : vector<1x4x4xbf16> to vector<4x4xbf16>
    %cst_124 = arith.constant dense<0.000000e+00> : vector<256x4xf32>
    %113 = tpu.matmul %110, %112, %cst_124 {dimension_numbers = #tpu.dot_dimension_numbers<[1], [0], [0], [1], [0, 0, 1, 1], [], []>} : vector<256x4xbf16>, vector<4x4xbf16>, vector<256x4xf32> -> vector<256x4xf32>
    %114 = arith.addf %108, %113 : vector<256x4xf32>
    %c2_125 = arith.constant 2 : index
    %c0_126 = arith.constant 0 : index
    %c0_127 = arith.constant 0 : index
    %115 = vector.load %arg7[%c2_125, %c0_126, %c0_127] : memref<18x18x4xbf16, #tpu.memory_space<vmem>>, vector<16x16x4xbf16>
    %116 = vector.shape_cast %115 : vector<16x16x4xbf16> to vector<256x4xbf16>
    %c6_128 = arith.constant 6 : index
    %c0_129 = arith.constant 0 : index
    %c0_130 = arith.constant 0 : index
    %117 = vector.load %arg4[%c6_128, %c0_129, %c0_130] : memref<9x4x4xbf16, #tpu.memory_space<vmem>>, vector<1x4x4xbf16>
    %118 = vector.shape_cast %117 : vector<1x4x4xbf16> to vector<4x4xbf16>
    %cst_131 = arith.constant dense<0.000000e+00> : vector<256x4xf32>
    %119 = tpu.matmul %116, %118, %cst_131 {dimension_numbers = #tpu.dot_dimension_numbers<[1], [0], [0], [1], [0, 0, 1, 1], [], []>} : vector<256x4xbf16>, vector<4x4xbf16>, vector<256x4xf32> -> vector<256x4xf32>
    %120 = arith.addf %114, %119 : vector<256x4xf32>
    %c2_132 = arith.constant 2 : index
    %c1_133 = arith.constant 1 : index
    %c0_134 = arith.constant 0 : index
    %121 = vector.load %arg7[%c2_132, %c1_133, %c0_134] : memref<18x18x4xbf16, #tpu.memory_space<vmem>>, vector<16x16x4xbf16>
    %122 = vector.shape_cast %121 : vector<16x16x4xbf16> to vector<256x4xbf16>
    %c7_135 = arith.constant 7 : index
    %c0_136 = arith.constant 0 : index
    %c0_137 = arith.constant 0 : index
    %123 = vector.load %arg4[%c7_135, %c0_136, %c0_137] : memref<9x4x4xbf16, #tpu.memory_space<vmem>>, vector<1x4x4xbf16>
    %124 = vector.shape_cast %123 : vector<1x4x4xbf16> to vector<4x4xbf16>
    %cst_138 = arith.constant dense<0.000000e+00> : vector<256x4xf32>
    %125 = tpu.matmul %122, %124, %cst_138 {dimension_numbers = #tpu.dot_dimension_numbers<[1], [0], [0], [1], [0, 0, 1, 1], [], []>} : vector<256x4xbf16>, vector<4x4xbf16>, vector<256x4xf32> -> vector<256x4xf32>
    %126 = arith.addf %120, %125 : vector<256x4xf32>
    %c2_139 = arith.constant 2 : index
    %c2_140 = arith.constant 2 : index
    %c0_141 = arith.constant 0 : index
    %127 = vector.load %arg7[%c2_139, %c2_140, %c0_141] : memref<18x18x4xbf16, #tpu.memory_space<vmem>>, vector<16x16x4xbf16>
    %128 = vector.shape_cast %127 : vector<16x16x4xbf16> to vector<256x4xbf16>
    %c8_142 = arith.constant 8 : index
    %c0_143 = arith.constant 0 : index
    %c0_144 = arith.constant 0 : index
    %129 = vector.load %arg4[%c8_142, %c0_143, %c0_144] : memref<9x4x4xbf16, #tpu.memory_space<vmem>>, vector<1x4x4xbf16>
    %130 = vector.shape_cast %129 : vector<1x4x4xbf16> to vector<4x4xbf16>
    %cst_145 = arith.constant dense<0.000000e+00> : vector<256x4xf32>
    %131 = tpu.matmul %128, %130, %cst_145 {dimension_numbers = #tpu.dot_dimension_numbers<[1], [0], [0], [1], [0, 0, 1, 1], [], []>} : vector<256x4xbf16>, vector<4x4xbf16>, vector<256x4xf32> -> vector<256x4xf32>
    %132 = arith.addf %126, %131 : vector<256x4xf32>
    %c0_146 = arith.constant 0 : index
    %c0_147 = arith.constant 0 : index
    %133 = vector.load %arg5[%c0_146, %c0_147] : memref<1x4xf32, #tpu.memory_space<vmem>>, vector<1x4xf32>
    %134 = vector.broadcast %133 : vector<1x4xf32> to vector<256x4xf32>
    %135 = arith.addf %132, %134 : vector<256x4xf32>
    %136 = arith.negf %135 : vector<256x4xf32>
    %137 = math.exp %136 : vector<256x4xf32>
    %cst_148 = arith.constant 1.000000e+00 : f32
    %138 = vector.broadcast %cst_148 : f32 to vector<256x4xf32>
    %139 = arith.addf %138, %137 : vector<256x4xf32>
    %140 = arith.divf %138, %139 : vector<256x4xf32>
    %141 = arith.mulf %135, %140 : vector<256x4xf32>
    %c0_149 = arith.constant 0 : index
    %c0_150 = arith.constant 0 : index
    %c0_151 = arith.constant 0 : index
    %c0_152 = arith.constant 0 : index
    %142 = vector.load %arg1[%c0_149, %c0_150, %c0_151, %c0_152] : memref<1x16x16x4xbf16, #tpu.memory_space<vmem>>, vector<1x16x16x4xbf16>
    %143 = vector.shape_cast %142 : vector<1x16x16x4xbf16> to vector<16x16x4xbf16>
    %144 = arith.extf %143 : vector<16x16x4xbf16> to vector<16x16x4xf32>
    %145 = vector.shape_cast %144 : vector<16x16x4xf32> to vector<256x4xf32>
    %146 = arith.addf %141, %145 : vector<256x4xf32>
    %147 = vector.shape_cast %146 : vector<256x4xf32> to vector<16x16x4xf32>
    %148 = arith.truncf %147 : vector<16x16x4xf32> to vector<16x16x4xbf16>
    %c0_153 = arith.constant 0 : index
    %c0_154 = arith.constant 0 : index
    %c0_155 = arith.constant 0 : index
    %c0_156 = arith.constant 0 : index
    %149 = vector.load %arg6[%c0_153, %c0_154, %c0_155, %c0_156] : memref<1x16x16x4xbf16, #tpu.memory_space<vmem>>, vector<1x16x16x4xbf16>
    %150 = vector.shape_cast %149 : vector<1x16x16x4xbf16> to vector<16x16x4xbf16>
    %151 = vector.shape_cast %148 : vector<16x16x4xbf16> to vector<1x16x16x4xbf16>
    tpu.vector_store %arg6[%c0_153, %c0_154, %c0_155, %c0_156], %151 {strides = array<i32>} : memref<1x16x16x4xbf16, #tpu.memory_space<vmem>>, vector<1x16x16x4xbf16>,
    return
  }
  func.func @transform_0(%arg0: i32) -> (i32, i32, i32, i32) {
    %c0_i32 = arith.constant 0 : i32
    %c0_i32_0 = arith.constant 0 : i32
    %c0_i32_1 = arith.constant 0 : i32
    %c0_i32_2 = arith.constant 0 : i32
    return %arg0, %c0_i32, %c0_i32_0, %c0_i32_1 : i32, i32, i32, i32
  }
  func.func @transform_1(%arg0: i32) -> (i32, i32, i32) {
    %c0_i32 = arith.constant 0 : i32
    %c0_i32_0 = arith.constant 0 : i32
    %c0_i32_1 = arith.constant 0 : i32
    %c0_i32_2 = arith.constant 0 : i32
    return %c0_i32, %c0_i32_0, %c0_i32_1 : i32, i32, i32
  }
  func.func @transform_2(%arg0: i32) -> (i32, i32) {
    %c0_i32 = arith.constant 0 : i32
    %c0_i32_0 = arith.constant 0 : i32
    %c0_i32_1 = arith.constant 0 : i32
    return %c0_i32, %c0_i32_0 : i32, i32
  }
  func.func @transform_3(%arg0: i32) -> (i32, i32, i32) {
    %c0_i32 = arith.constant 0 : i32
    %c0_i32_0 = arith.constant 0 : i32
    %c0_i32_1 = arith.constant 0 : i32
    %c0_i32_2 = arith.constant 0 : i32
    return %c0_i32, %c0_i32_0, %c0_i32_1 : i32, i32, i32
  }
  func.func @transform_4(%arg0: i32) -> (i32, i32) {
    %c0_i32 = arith.constant 0 : i32
    %c0_i32_0 = arith.constant 0 : i32
    %c0_i32_1 = arith.constant 0 : i32
    return %c0_i32, %c0_i32_0 : i32, i32
  }
  func.func @transform_5(%arg0: i32) -> (i32, i32, i32, i32) {
    %c0_i32 = arith.constant 0 : i32
    %c0_i32_0 = arith.constant 0 : i32
    %c0_i32_1 = arith.constant 0 : i32
    %c0_i32_2 = arith.constant 0 : i32
    return %arg0, %c0_i32, %c0_i32_0, %c0_i32_1 : i32, i32, i32, i32
  }
}

</mosaic_0001>

<bundles_post_ra>
// kernel: tpu_custom_call.1
= control target key start
LH: loop header
LB: loop body
LE: loop exit
PB: predicated region body
PF: predicated region fallthrough
CT: control target
= control target key end

     0   :  { %10 = vsyncpa [#allocation4], 0  ;;  %s18654_s0 = inlined_call_operand.hbm [shape: bf16[2,16,16,4], index: 0, kind: input, shape index: {}]   ;;  %s18655_s1 = inlined_call_operand.hbm [shape: bf16[9,4,4], index: 1, kind: input, shape index: {}]   ;;  %s18656_s2 = inlined_call_operand.hbm [shape: f32[1,4], index: 2, kind: input, shape index: {}]   ;;  %s18657_s3 = inlined_call_operand.hbm [shape: bf16[9,4,4], index: 3, kind: input, shape index: {}]   ;;  %s18658_s4 = inlined_call_operand.hbm [shape: f32[1,4], index: 4, kind: input, shape index: {}]   ;;  %s18659_s5 = inlined_call_operand.hbm [shape: bf16[2,16,16,4], index: 5, kind: output, shape index: {}]  }
   0x1   :  { %12 = vsyncpa [#allocation4 + $0x1], 0 }
   0x2   :  { %13 = vsyncpa [#allocation7], 0 }
   0x3   :  { %14 = vsyncpa [#allocation10], 0 }
   0x4   :  { %15 = vsyncpa [#allocation5], 0 }
   0x5   :  { %17 = vsyncpa [#allocation5 + $0x1], 0  ;;  %s14572_s18 = smov 0   ;;  %s14574_s19 = smov 0  }
   0x6   :  { %s14576_s20 = smov 0   ;;  %s14578_s21 = smov 0  }
   0x7 LB: > { %s14593_s22 = sadd.s32 4294967295, %s14527_s21   ;;  %s11430_s23 = sadd.s32 4294967294, %s14527_s21   ;;  %s14527_s21 = sphi %s14578_s21, %s19046_s21   ;;  %s14523_s20 = sphi %s14576_s20, %s19045_s20   ;;  %s14519_s19 = sphi %s14574_s19, %s19044_s19   ;;  %s14515_s18 = sphi %s14572_s18, %s19043_s18  }
   0x8   : > { %p43_p0 = scmp.ne.s32.totalorder %s14519_s19, %s14515_s18  ;;  %p18660_p1 = scmp.eq.s32.totalorder %s14593_s22, 0 }
   0x9   : > { %p157_p3 = scmp.eq.s32.totalorder %s11430_s23, 1  ;;  %p11431_p5 = scmp.ge.s32.totalorder %s14527_s21, 1 }
   0xa   : > { %p14602_p4 = por %p18660_p1, %p43_p0  ;;  %p164_p7 = scmp.lt.s32.totalorder %s14527_s21, 3 }
   0xb   : > { %p14607_p6 = por %p157_p3, %p43_p0  ;;  %s14529_s27 = smov [#allocation6]  }
   0xc   : > { %s18770_s24 = scalar_select %p14602_p4, 1, 0 }
   0xd   : > { %s18771_s25 = scalar_select %p14607_p6, 1, 0 }
   0xe   : > { %p14612_p8 = pnand %p11431_p5, %p164_p7  ;;  %s176_s28 = sshll.u32 %s14529_s27, 4  ;;  %s14616_s28 = int_to_ptr.vmem [resolvable:$true] %s176_s28 }
   0xf   : > { %s14530_s30 = smov [#allocation9]   ;;  %s14531_s7 = smov [#allocation8]  }
  0x10   : > { %s18772_s26 = scalar_select %p14612_p8, 1, 0 }
  0x11   : > { %p13867_p9 = pneg %p14612_p8  ;;  %s200_s6 = sshll.u32 %s14530_s30, 4  ;;  %s14627_s6 = int_to_ptr.vmem [resolvable:$true] %s200_s6 }
  0x12   : > { %s14629_s8 = sshll.u32 %s14531_s7, 4  ;;  %s14311_s11 = scalar_lea.hbm %s18655_s1, 288  ;;  %s191_s8 = int_to_ptr.vmem [resolvable:$true] %s14629_s8 }
  0x13   : > { %p14623_p11 = pnand %p13867_p9, %p18660_p1  ;;  %p14312_p12 = scmp.ne.s32.totalorder %s18655_s1, %s14311_s11 }
  0x14   : > { %p14318_p5 = scmp.lt.u32.totalorder %s14311_s11, %s18655_s1 }
  0x15   : > { %p14639_p13 = pneg %p14623_p11 }
  0x17   : > { %p14314_p0 = pnand %p14639_p13, %p14312_p12 }
  0x19   : > { %p14315_p3 = pneg %p14314_p0 }
  0x1b   : > { %p14320_p7 = pnand %p14318_p5, %p14315_p3 }
  0x1d   : > { %14323 = shalt.err (!%p14320_p7)
}
  0x1e   : > { %s14324_s17 = scalar_lea.vmem %s14616_s28, 288  ;;  %p14332_p2 = scmp.lt.s32.totalorder %s14616_s28, %s14616_s28 }
  0x1f   : > { %p14325_p9 = scmp.ne.s32.totalorder %s14616_s28, %s14324_s17  ;;  %p14333_p6 = scmp.lt.s32.totalorder %s14324_s17, %s14324_s17 }
  0x21   : > { %p14327_p10 = pnand %p14325_p9, %p14639_p13  ;;  %p14334_p12 = por %p14333_p6, %p14332_p2 }
  0x23   : > { %p14328_p1 = pneg %p14327_p10 }
  0x25   : > { %p14335_p0 = pnand %p14334_p12, %p14328_p1 }
  0x27   : > { %14338 = shalt.err (!%p14335_p0)
}
  0x28   : > { %s14532_s23 = smov 32   ;;  %s14533_s27 = smov 2  }
  0x29   : > { %13870 = dma.hbm_to_vmem [thread:$0]  (!%p14623_p11), %s18655_s1, 288, %s14616_s28, [#allocation7], %s14532_s23, %s14532_s23, %s14533_s27  }
  0x2a   : > { %s14339_s11 = scalar_lea.hbm %s18657_s3, 288 }
  0x2b   : > { %p14340_p2 = scmp.ne.s32.totalorder %s18657_s3, %s14339_s11  ;;  %p14346_p10 = scmp.lt.u32.totalorder %s14339_s11, %s18657_s3 }
  0x2d   : > { %p14342_p1 = pnand %p14340_p2, %p14639_p13 }
  0x2f   : > { %p14343_p6 = pneg %p14342_p1 }
  0x31   : > { %p14348_p3 = pnand %p14346_p10, %p14343_p6 }
  0x33   : > { %14351 = shalt.err (!%p14348_p3)
}
  0x34   : > { %s14352_s28 = scalar_lea.vmem %s14627_s6, 288  ;;  %p14360_p12 = scmp.lt.s32.totalorder %s14627_s6, %s14627_s6 }
  0x35   : > { %p14353_p5 = scmp.ne.s32.totalorder %s14627_s6, %s14352_s28  ;;  %p14361_p0 = scmp.lt.s32.totalorder %s14352_s28, %s14352_s28 }
  0x37   : > { %p14355_p7 = pnand %p14353_p5, %p14639_p13  ;;  %p14362_p2 = por %p14361_p0, %p14360_p12 }
  0x39   : > { %p14356_p9 = pneg %p14355_p7 }
  0x3b   : > { %p14363_p1 = pnand %p14362_p2, %p14356_p9 }
  0x3d   : > { %14366 = shalt.err (!%p14363_p1)
}
  0x3e   : > { %13876 = dma.hbm_to_vmem [thread:$0]  (!%p14623_p11), %s18657_s3, 288, %s14627_s6, [#allocation10], %s14532_s23, %s14532_s23, %s14533_s27  }
  0x3f   : > { %s14367_s10 = scalar_lea.hbm %s18656_s2, 16 }
  0x40   : > { %p14368_p6 = scmp.ne.s32.totalorder %s18656_s2, %s14367_s10  ;;  %p14374_p5 = scmp.lt.u32.totalorder %s14367_s10, %s18656_s2 }
  0x42   : > { %p14370_p10 = pnand %p14368_p6, %p14639_p13 }
  0x44   : > { %p14371_p3 = pneg %p14370_p10 }
  0x46   : > { %p14376_p7 = pnand %p14374_p5, %p14371_p3 }
  0x48   : > { %14379 = shalt.err (!%p14376_p7)
}
  0x49   : > { %s14380_s16 = scalar_lea.vmem %s191_s8, 16  ;;  %s14387_s6 = scalar_lea.vmem %s191_s8, 32 }
  0x4a   : > { %p14381_p9 = scmp.ne.s32.totalorder %s191_s8, %s14380_s16  ;;  %p14388_p2 = scmp.lt.s32.totalorder %s191_s8, %s191_s8 }
  0x4b   : > { %p14389_p1 = scmp.lt.s32.totalorder %s14387_s6, %s14380_s16 }
  0x4c   : > { %p14383_p12 = pnand %p14381_p9, %p14639_p13 }
  0x4d   : > { %p14390_p4 = por %p14389_p1, %p14388_p2 }
  0x4e   : > { %p14384_p0 = pneg %p14383_p12 }
  0x50   : > { %p14391_p8 = pnand %p14390_p4, %p14384_p0 }
  0x52   : > { %14394 = shalt.err (!%p14391_p8)
}
  0x53   : > { %13873 = dma.hbm_to_vmem [thread:$0]  (!%p14623_p11), %s18656_s2, 16, %s191_s8, [#allocation7]  }
  0x54   : > { %s14534_s28 = smov [#allocation11]   ;;  %s14395_s9 = scalar_lea.hbm %s18658_s4, 16 }
  0x55   : > { %s214_s17 = sshll.u32 %s14534_s28, 4  ;;  %p14396_p6 = scmp.ne.s32.totalorder %s18658_s4, %s14395_s9  ;;  %s215_s17 = int_to_ptr.vmem [resolvable:$true] %s214_s17 }
  0x56   : > { %p14402_p10 = scmp.lt.u32.totalorder %s14395_s9, %s18658_s4 }
  0x57   : > { %p14398_p4 = pnand %p14396_p6, %p14639_p13 }
  0x59   : > { %p14399_p8 = pneg %p14398_p4 }
  0x5b   : > { %p14404_p3 = pnand %p14402_p10, %p14399_p8 }
  0x5d   : > { %14407 = shalt.err (!%p14404_p3)
}
  0x5e   : > { %s14408_s8 = scalar_lea.vmem %s215_s17, 16  ;;  %s14415_s15 = scalar_lea.vmem %s215_s17, 32 }
  0x5f   : > { %p14409_p5 = scmp.ne.s32.totalorder %s215_s17, %s14408_s8  ;;  %p14416_p12 = scmp.lt.s32.totalorder %s215_s17, %s215_s17 }
  0x60   : > { %p14417_p0 = scmp.lt.s32.totalorder %s14415_s15, %s14408_s8 }
  0x61   : > { %p14411_p7 = pnand %p14409_p5, %p14639_p13 }
  0x62   : > { %p14418_p2 = por %p14417_p0, %p14416_p12 }
  0x63   : > { %p14412_p9 = pneg %p14411_p7 }
  0x65   : > { %p14419_p1 = pnand %p14418_p2, %p14412_p9 }
  0x67   : > { %14422 = shalt.err (!%p14419_p1)
}
  0x68   : > { %13879 = dma.hbm_to_vmem [thread:$0]  (!%p14623_p11), %s18658_s4, 16, %s215_s17, [#allocation10]  }
  0x69   : > { %s14721_s14 = sadd.s32 1, %s14527_s21   ;;  %s30_s23 = sadd.s32 1, %s14523_s20 }
  0x6a   : > { %s27_s29 = ssub.s32 %s14527_s21, %s14721_s14  ;;  %p37_p13 = scmp.ne.s32.totalorder %s14523_s20, %s14519_s19 }
  0x6b   : > { %p28_p6 = scmp.eq.s32.totalorder %s27_s29, 0  ;;  %p38_p4 = scmp.eq.s32.totalorder %s14527_s21, 0 }
  0x6c   : > { %p18775_p8 = scmp.eq.s32.totalorder %s14593_s22, 1  ;;  %p13892_p3 = scmp.lt.s32.totalorder %s14527_s21, 2 }
  0x6d   : > { %s14737_s28 = scalar_select %p28_p6, %s14523_s20, %s30_s23  }
  0x6e   : > { %p14731_p10 = por %p18775_p8, %p37_p13  ;;  %p39_p5 = por %p38_p4, %p37_p13 }
  0x6f   : > { %s225_s30 = sand.u32 1, %s14523_s20   ;;  %s12254_s17 = sshll.u32 %s14527_s21, 11 }
  0x70   : > { %s11437_s7 = sshll.u32 %s225_s30, 7  ;;  %s14744_s11 = scalar_lea.hbm %s18654_s0, %s12254_s17 }
  0x71   : > { %s229_s12 = scalar_lea.vmem [#allocation3], %s11437_s7  ;;  %p14748_p11 = pnand %p13892_p3, %p39_p5 }
  0x72   : > { %s236_s13 = sshll.u32 %s229_s12, 4  ;;  %s14752_s15 = scalar_lea.sflag [#allocation4], %s225_s30  ;;  %s14746_s13 = int_to_ptr.vmem [resolvable:$true] %s236_s13 }
  0x73   : > { %s14423_s16 = scalar_lea.hbm %s14744_s11, 2048  ;;  %p14425_p9 = pneg %p14748_p11 }
  0x74   : > { %p14424_p7 = scmp.ne.s32.totalorder %s14744_s11, %s14423_s16  ;;  %s14428_s29 = scalar_lea.hbm %s18654_s0, 4096 }
  0x75   : > { %p14429_p2 = scmp.lt.u32.totalorder %s14744_s11, %s18654_s0  ;;  %p14430_p1 = scmp.lt.u32.totalorder %s14428_s29, %s14423_s16 }
  0x76   : > { %p14426_p12 = pnand %p14425_p9, %p14424_p7  ;;  %p14432_p6 = scmp.lt.u32.totalorder %s14423_s16, %s14744_s11 }
  0x77   : > { %p14431_p13 = por %p14430_p1, %p14429_p2 }
  0x78   : > { %p14427_p0 = pneg %p14426_p12 }
  0x79   : > { %p14433_p4 = por %p14432_p6, %p14431_p13 }
  0x7b   : > { %p14434_p8 = pnand %p14433_p4, %p14427_p0 }
  0x7d   : > { %14437 = shalt.err (!%p14434_p8)
}
  0x7e   : > { %s14438_s30 = scalar_lea.vmem %s14746_s13, 2048  ;;  %s14535_s9 = smov [#allocation3]  }
  0x7f   : > { %p14439_p3 = scmp.ne.s32.totalorder %s14746_s13, %s14438_s30  ;;  %s14443_s10 = sshll.u32 %s14535_s9, 4  ;;  %s14444_s10 = int_to_ptr.vmem [resolvable:$false] %s14443_s10 }
  0x80   : > { %s14445_s12 = scalar_lea.vmem %s14444_s10, 4096  ;;  %p14446_p12 = scmp.lt.s32.totalorder %s14746_s13, %s14444_s10 }
  0x81   : > { %p14441_p5 = pnand %p14439_p3, %p14425_p9  ;;  %p14447_p2 = scmp.lt.s32.totalorder %s14445_s12, %s14438_s30 }
  0x83   : > { %p14442_p7 = pneg %p14441_p5  ;;  %p14448_p1 = por %p14447_p2, %p14446_p12 }
  0x85   : > { %p14449_p13 = pnand %p14448_p1, %p14442_p7 }
  0x87   : > { %14452 = shalt.err (!%p14449_p13)
}
  0x88   : > { %s14536_s16 = smov 64   ;;  %s14537_s6 = smov 4  }
  0x89   : > { %13883 = dma.hbm_to_vmem [thread:$0]  (!%p14748_p11), %s14744_s11, 2048, %s14746_s13, %s14752_s15, %s14536_s16, %s14536_s16, %s14537_s6  }
  0x8a   : > { %p18778_p9 = scmp.ne.s32.totalorder %s18772_s26, 0 }
  0x8c   : > { %248 = sbr.rel (%p18778_p9) target bundleno = 1957 (0x7a5), region = 40 }
  0x93   : > { %s14783_s23 = sand.u32 1, %s14519_s19   ;;  %p18779_p0 = scmp.ne.s32.totalorder %s18770_s24, 0 }
  0x94   : > { %s11441_s29 = sshll.u32 %s14783_s23, 7  ;;  %s251_s7 = scalar_lea.sflag [#allocation4], %s14783_s23 }
  0x95   : > { %s14789_s17 = scalar_lea.vmem [#allocation3], %s11441_s29 }
  0x96   : > { %14498 = dma.done.wait (%p18779_p0), %s251_s7, 2048  }
  0x97   : > { %14500 = vsyncadd (%p18779_p0), %s251_s7, 4294965248  ;;  %p18780_p11 = scmp.eq.s32.totalorder %s14593_s22, 0 }
  0x99   : > { %14502 = dma.done.wait (%p18780_p11), [#allocation7], 304   ;;  %p18781_p6 = pmov %p18780_p11 }
  0x9b   : > { %14504 = vsyncadd (%p18781_p6), [#allocation7], 4294966992  ;;  %p18782_p4 = pmov %p18781_p6 }
  0x9d   : > { %14506 = dma.done.wait (%p18782_p4), [#allocation10], 304   ;;  %p18783_p8 = pmov %p18782_p4 }
  0x9e   : > { %vm298_vm0 = vcmask 27648   ;;  %vm301_vm1 = vcmask 24576   ;;  %v14538_v0 = vmov 0   ;;  %vm308_vm2 = vsmask.f32 256  ;;  %s18404_s24 = scalar_lea.vmem [#allocation12], %s11441_s29 }
  0x9f   : > { %14508 = vsyncadd (%p18783_p8), [#allocation10], 4294966992  ;;  %299 = vst.msk [vmem:[#allocation2] sm:$0xf] %vm298_vm0, %v14538_v0  ;;  %vm364_vm3 = vsmask.f32 7938 }
  0xa0   : > { %300 = vst.msk [vmem:[#allocation2 + $0x4] sm:$0xf] %vm298_vm0, %v14538_v0  ;;  %304 = vst.msk [vmem:[#allocation2 + $0xcc] sm:$0xf] %vm298_vm0, %v14538_v0  ;;  %vm1424_vm4 = vcmask 1041408   ;;  %v18784_v1 = vmov 0 }
  0xa1   : > { %302 = vst.msk [vmem:[#allocation2 + $0x8] sm:$0x1] %vm301_vm1, %v14538_v0  ;;  %306 = vst.msk [vmem:[#allocation2 + $0xd4] sm:$0x1] %vm301_vm1, %v14538_v0  ;;  %v18787_v2 = vmov 0  ;;  %v18790_v31 = vmov 0 }
  0xa2   : > { %305 = vst.msk [vmem:[#allocation2 + $0xd0] sm:$0xf] %vm298_vm0, %v14538_v0  ;;  %vm14808_vm5 = vmand %vm301_vm1, %vm308_vm2  ;;  %vm452_vm7 = vsmask.f32 4368  ;;  %v1326_v3 = vld [vmem:[#allocation6 + $0x2] sm:$0x3] }
  0xa3   : > { %v18785_v1 = vsel %vm14808_vm5, 4294967295, %v18784_v1  ;;  %vm14813_vm6 = vmand %vm301_vm1, %vm364_vm3  ;;  %v14817_v4 = vld [vmem:[#allocation6] sm:$0x3]  ;;  %v313_v5 = vld [vmem:[#allocation2 + $0xc] sm:$0x1]  ;;  %13829 = vmatprep.subr.msk.bf16.mxu0 %vm1424_vm4, %v1326_v3  ;;  %v1426_v6 = vsel %vm1424_vm4, %v1326_v3, 0 }
  0xa4   : > { %18786 = vst [vmem:[#allocation17_spill] sm:$0xff] %v18785_v1  ;;  %v18788_v2 = vsel %vm14813_vm6, 4294967295, %v18787_v2  ;;  %vm938_vm8 = vsmask.f32 3328  ;;  %v314_v9 = vsel %vm14808_vm5, 0, %v313_v5  ;;  %12706 = vmatpush3.bf16.msra.mxu0 %v1426_v6  ;;  %vm14842_vm9 = vmand %vm298_vm0, %vm364_vm3  ;;  %v18793_v41 = vmov 0 }
  0xa5   : > { %18789 = vst [vmem:[#allocation18_spill] sm:$0xff] %v18788_v2  ;;  %315 = vst [vmem:[#allocation2 + $0xc] sm:$0x1] %v314_v9  ;;  %v369_v13 = vld [vmem:[#allocation2 + $0x14] sm:$0x1]  ;;  %13830 = vmatprep.subr.msk.bf16.mxu0 %vm1424_vm4, %v14817_v4  ;;  %v18791_v31 = vsel %vm14842_vm9, 4294967295, %v18790_v31 }
  0xa6   : > { %v310_v7 = vld [vmem:[#allocation2] sm:$0x1]  ;;  %v370_v16 = vsel %vm14813_vm6, 0, %v369_v13  ;;  %v420_v17 = vld [vmem:[%s14789_s17] sm:$0xf]  ;;  %18792 = vst [vmem:[#allocation19_spill] sm:$0xff] %v18791_v31  ;;  %vm14850_vm11 = vmor %vm308_vm2, %vm452_vm7 }
  0xa7   : > { %v311_v10 = vsel %vm14808_vm5, 0, %v310_v7  ;;  %v890_v12 = vld [vmem:[#allocation2 + $0x4] sm:$0xf]  ;;  %371 = vst [vmem:[#allocation2 + $0x14] sm:$0x1] %v370_v16  ;;  %v455_v19 = vshrl.u32 %v420_v17, 16 }
  0xa8   : > { %v366_v8 = vld [vmem:[#allocation2 + $0x8] sm:$0x1]  ;;  %312 = vst [vmem:[#allocation2] sm:$0x1] %v311_v10  ;;  %v951_v14 = vshll.u32 %v890_v12, 16  ;;  %v955_v15 = vshrl.u32 %v890_v12, 16 }
  0xa9   : > { %v367_v11 = vsel %vm14813_vm6, 0, %v366_v8  ;;  %v421_v18 = vld [vmem:[%s14789_s17 + $0x4] sm:$0xf]  ;;  %v458_v20 = vshll.u32 %v420_v17, 16  ;;  %v316_v21 = vld [vmem:[#allocation2 + $0x18] sm:$0x1] }
  0xaa   : > { %368 = vst [vmem:[#allocation2 + $0x8] sm:$0x1] %v367_v11  ;;  %v14833_v22 = vrot.slane %v951_v14, 5  ;;  %v957_v23 = vrot.slane %v955_v15, 4  ;;  %v463_v24 = vshrl.u32 %v421_v18, 16  ;;  %v466_v25 = vshll.u32 %v421_v18, 16 }
  0xab   : > { %v372_v26 = vld [vmem:[#allocation2 + $0x20] sm:$0x1]  ;;  %v457_v27 = vrot.slane %v455_v19, 7  ;;  %v317_v28 = vsel %vm14808_vm5, 0, %v316_v21  ;;  %vm939_vm10 = vsmask.f32 7440 }
  0xac   : > { %v373_v29 = vsel %vm14813_vm6, 0, %v372_v26  ;;  %v422_v30 = vld [vmem:[%s14789_s17 + $0x8] sm:$0xf]  ;;  %v958_v32 = vor.u32 %v957_v23, %v14833_v22  ;;  %v465_v33 = vrot.slane %v463_v24, 7  ;;  %318 = vst [vmem:[#allocation2 + $0x18] sm:$0x1] %v317_v28  ;;  %vm14860_vm12 = vmor %vm938_vm8, %vm939_vm10 }
  0xad   : > { %374 = vst [vmem:[#allocation2 + $0x20] sm:$0x1] %v373_v29  ;;  %v423_v34 = vld [vmem:[%s14789_s17 + $0xc] sm:$0xf]  ;;  %v472_v35 = vshrl.u32 %v422_v30, 16  ;;  %v460_v36 = vor.u32 %v458_v20, %v457_v27  ;;  %v461_v37 = vrot.slane %v457_v27, 4 }
  0xae   : > { %v475_v38 = vshll.u32 %v422_v30, 16  ;;  %v480_v39 = vshrl.u32 %v423_v34, 16  ;;  %v319_v40 = vld [vmem:[#allocation2 + $0x24] sm:$0x1]  ;;  %v18794_v41 = vsel %vm14850_vm11, 4294967295, %v18793_v41  ;;  %v468_v42 = vor.u32 %v466_v25, %v465_v33  ;;  %s12319_s26 = sshll.u32 %s14593_s22, 11 }
  0xaf   : > { %18795 = vst [vmem:[#allocation20_spill] sm:$0xff] %v18794_v41  ;;  %v470_v43 = vrot.slane %v465_v33, 4  ;;  %v777_v44 = vld [vmem:[#allocation2 + $0xc] sm:$0xf]  ;;  %v474_v45 = vrot.slane %v472_v35, 7  ;;  %v483_v46 = vshll.u32 %v423_v34, 16  ;;  %s18602_s15 = scalar_lea.hbm %s18659_s5, %s12319_s26 }
  0xb0   : > { %v889_v47 = vld [vmem:[#allocation2] sm:$0xf]  ;;  %v778_v49 = vsel %vm14842_vm9, %v460_v36, %v777_v44  ;;  %v482_v50 = vrot.slane %v480_v39, 7  ;;  %v320_v51 = vsel %vm14808_vm5, 0, %v319_v40  ;;  %v959_v54 = vrot.slane %v958_v32, 4  ;;  %s11319_s11 = sshll.u32 %s18404_s24, 4  ;;  %s18604_s11 = int_to_ptr.vmem [resolvable:$true] %s11319_s11 }
  0xb1   : > { %v922_v48 = vld [vmem:[#allocation2 + $0x8] sm:$0x1]  ;;  %v942_v52 = vshrl.u32 %v889_v47, 16  ;;  %v945_v53 = vshll.u32 %v889_v47, 16  ;;  %779 = vst [vmem:[#allocation2 + $0xc] sm:$0xf] %v778_v49  ;;  %v469_v58 = vsel %vm14850_vm11, %v461_v37, %v468_v42  ;;  %v477_v60 = vor.u32 %v475_v38, %v474_v45 }
  0xb2   : > { %v961_v55 = vshll.u32 %v922_v48, 16  ;;  %v781_v56 = vld [vmem:[#allocation2 + $0x14] sm:$0x1]  ;;  %321 = vst [vmem:[#allocation2 + $0x24] sm:$0x1] %v320_v51  ;;  %v478_v61 = vrot.slane %v474_v45, 4  ;;  %v485_v6 = vor.u32 %v483_v46, %v482_v50 }
  0xb3   : > { %v782_v59 = vsel %vm14808_vm5, %v470_v43, %v781_v56  ;;  %v375_v62 = vld [vmem:[#allocation2 + $0x2c] sm:$0x1]  ;;  %v424_v63 = vld [vmem:[%s14789_s17 + $0x10] sm:$0xf]  ;;  %v944_v0 = vrot.slane %v942_v52, 4  ;;  %v947_v3 = vrot.slane %v945_v53, 5 }
  0xb4   : > { %v963_v5 = vrot.slane %v961_v55, 5  ;;  %780 = vst.msk [vmem:[#allocation2 + $0x10] sm:$0xf] %vm298_vm0, %v469_v58  ;;  %783 = vst [vmem:[#allocation2 + $0x14] sm:$0x1] %v782_v59  ;;  %v487_v8 = vrot.slane %v482_v50, 4  ;;  %v486_v14 = vsel %vm14850_vm11, %v478_v61, %v485_v6 }
  0xb5   : > { %v425_v7 = vld [vmem:[%s14789_s17 + $0x14] sm:$0xf]  ;;  %v784_v9 = vld [vmem:[#allocation2 + $0x18] sm:$0xf]  ;;  %v788_v10 = vld [vmem:[#allocation2 + $0x20] sm:$0x1]  ;;  %v948_v12 = vor.u32 %v947_v3, %v944_v0 }
  0xb6   : > { %v376_v11 = vsel %vm14813_vm6, 0, %v375_v62  ;;  %v964_v13 = vsel %vm14860_vm12, %v959_v54, %v963_v5  ;;  %v785_v15 = vsel %vm14842_vm9, %v477_v60, %v784_v9  ;;  %v322_v16 = vld [vmem:[#allocation2 + $0x30] sm:$0x1]  ;;  %v378_v17 = vld [vmem:[#allocation2 + $0x38] sm:$0x1]  ;;  %v789_v18 = vsel %vm14808_vm5, %v487_v8, %v788_v10  ;;  %s11306_s22 = scalar_lea.sflag [#allocation5], %s14783_s23 }
  0xb7   : > { %377 = vst [vmem:[#allocation2 + $0x2c] sm:$0x1] %v376_v11  ;;  %786 = vst [vmem:[#allocation2 + $0x18] sm:$0xf] %v785_v15  ;;  %v489_v19 = vshrl.u32 %v424_v63, 16  ;;  %v492_v20 = vshll.u32 %v424_v63, 16 }
  0xb8   : > { %787 = vst.msk [vmem:[#allocation2 + $0x1c] sm:$0xf] %vm298_vm0, %v486_v14  ;;  %v497_v21 = vshrl.u32 %v425_v7, 16  ;;  %v949_v23 = vrot.slane %v948_v12, 4  ;;  %790 = vst [vmem:[#allocation2 + $0x20] sm:$0x1] %v789_v18 }
  0xb9   : > { %v500_v24 = vshll.u32 %v425_v7, 16  ;;  %v323_v25 = vsel %vm14808_vm5, 0, %v322_v16  ;;  %v379_v26 = vsel %vm14813_vm6, 0, %v378_v17  ;;  %vm1375_vm13 = vcmask 31744   ;;  %v891_v27 = vld [vmem:[#allocation2 + $0xc] sm:$0xf] }
  0xba   : > { %v14888_v28 = vsel %vm1424_vm4, %v14817_v4, 0  ;;  %v491_v29 = vrot.slane %v489_v19, 7  ;;  %v499_v30 = vrot.slane %v497_v21, 7  ;;  %324 = vst [vmem:[#allocation2 + $0x30] sm:$0x1] %v323_v25  ;;  %v954_v32 = vsel %vm14860_vm12, %v949_v23, %v14833_v22  ;;  %s14453_s30 = scalar_lea.vmem %s18604_s11, 2048 }
  0xbb   : > { %380 = vst [vmem:[#allocation2 + $0x38] sm:$0x1] %v379_v26  ;;  %v966_v33 = vshrl.u32 %v891_v27, 16  ;;  %v969_v34 = vshll.u32 %v891_v27, 16  ;;  %v791_v35 = vld [vmem:[#allocation2 + $0x24] sm:$0xf]  ;;  %v11447_v37 = vcombine.low %v954_v32, %v964_v13  ;;  %p14454_p3 = scmp.ne.s32.totalorder %s18604_s11, %s14453_s30 }
  0xbc   : > { %v426_v36 = vld [vmem:[%s14789_s17 + $0x18] sm:$0xf]  ;;  %v923_v39 = vld [vmem:[#allocation2 + $0x14] sm:$0x1]  ;;  %v494_v40 = vor.u32 %v492_v20, %v491_v29  ;;  %v495_v42 = vrot.slane %v491_v29, 4  ;;  %v502_v43 = vor.u32 %v500_v24, %v499_v30  ;;  %v504_v48 = vrot.slane %v499_v30, 4 }
  0xbd   : > { %v892_v38 = vld [vmem:[#allocation2 + $0x10] sm:$0xf]  ;;  %v968_v4 = vrot.slane %v966_v33, 4  ;;  %v971_v44 = vrot.slane %v969_v34, 5  ;;  %12707 = vmatprep.mubr.msk.bf16.mxu0 %vm1375_vm13, %v11447_v37  ;;  %v985_v47 = vshll.u32 %v923_v39, 16  ;;  %v506_v50 = vshrl.u32 %v426_v36, 16  ;;  %p14455_p5 = pnand %p14454_p3, %p14731_p10 }
  0xbe   : > { %v975_v45 = vshll.u32 %v892_v38, 16  ;;  %v979_v46 = vshrl.u32 %v892_v38, 16  ;;  %v503_v22 = vsel %vm14850_vm11, %v495_v42, %v502_v43  ;;  %v795_v49 = vld [vmem:[#allocation2 + $0x2c] sm:$0x1]  ;;  %v893_v54 = vld [vmem:[#allocation2 + $0x18] sm:$0xf]  ;;  %v792_v56 = vsel %vm14842_vm9, %v494_v40, %v791_v35 }
  0xbf   : > { %v972_v51 = vor.u32 %v971_v44, %v968_v4  ;;  %v894_v55 = vld [vmem:[#allocation2 + $0x1c] sm:$0xf]  ;;  %794 = vst.msk [vmem:[#allocation2 + $0x28] sm:$0xf] %vm298_vm0, %v503_v22  ;;  %v987_v58 = vrot.slane %v985_v47, 5  ;;  %v990_v60 = vshrl.u32 %v893_v54, 16  ;;  %v796_v10 = vsel %vm14808_vm5, %v504_v48, %v795_v49  ;;  %p14456_p7 = pneg %p14455_p5 }
  0xc0   : > { %v977_v52 = vrot.slane %v975_v45, 5  ;;  %v981_v53 = vrot.slane %v979_v46, 4  ;;  %v924_v59 = vld [vmem:[#allocation2 + $0x20] sm:$0x1]  ;;  %v993_v61 = vshll.u32 %v893_v54, 16  ;;  %v999_v62 = vshll.u32 %v894_v55, 16 }
  0xc1   : > { %793 = vst [vmem:[#allocation2 + $0x24] sm:$0xf] %v792_v56  ;;  %v973_v63 = vrot.slane %v972_v51, 4  ;;  %v1003_v3 = vshrl.u32 %v894_v55, 16  ;;  %v1009_v5 = vshll.u32 %v924_v59, 16  ;;  %v992_v7 = vrot.slane %v990_v60, 4 }
  0xc2   : > { %v982_v0 = vor.u32 %v981_v53, %v977_v52  ;;  %v427_v6 = vld [vmem:[%s14789_s17 + $0x1c] sm:$0xf]  ;;  %v995_v8 = vrot.slane %v993_v61, 5  ;;  %v1001_v9 = vrot.slane %v999_v62, 5  ;;  %v325_v11 = vld [vmem:[#allocation2 + $0x3c] sm:$0x1] }
  0xc3   : > { %v978_v12 = vsel %vm14860_vm12, %v973_v63, %v977_v52  ;;  %v1005_v14 = vrot.slane %v1003_v3, 4  ;;  %v1011_v15 = vrot.slane %v1009_v5, 5  ;;  %797 = vst [vmem:[#allocation2 + $0x2c] sm:$0x1] %v796_v10  ;;  %v508_v17 = vrot.slane %v506_v50, 7  ;;  %s14539_s9 = smov [#allocation12]  }
  0xc4   : > { %v983_v13 = vrot.slane %v982_v0, 4  ;;  %v996_v16 = vor.u32 %v995_v8, %v992_v7  ;;  %v509_v18 = vshll.u32 %v426_v36, 16  ;;  %v514_v19 = vshrl.u32 %v427_v6, 16  ;;  %v798_v24 = vld [vmem:[#allocation2 + $0x30] sm:$0xf]  ;;  %s14457_s10 = sshll.u32 %s14539_s9, 4  ;;  %s14458_s10 = int_to_ptr.vmem [resolvable:$false] %s14457_s10 }
  0xc5   : > { %v1006_v21 = vor.u32 %v1005_v14, %v1001_v9  ;;  %v517_v23 = vshll.u32 %v427_v6, 16  ;;  %v326_v25 = vsel %vm14808_vm5, 0, %v325_v11  ;;  %v512_v32 = vrot.slane %v508_v17, 4  ;;  %v381_v43 = vld [vmem:[#allocation2 + $0x44] sm:$0x1]  ;;  %s14459_s12 = scalar_lea.vmem %s14458_s10, 4096  ;;  %p14460_p12 = scmp.lt.s32.totalorder %s18604_s11, %s14458_s10 }
  0xc6   : > { %v988_v20 = vsel %vm14860_vm12, %v983_v13, %v987_v58  ;;  %v997_v27 = vrot.slane %v996_v16, 4  ;;  %v896_v29 = vld [vmem:[#allocation2 + $0x28] sm:$0xf]  ;;  %v511_v30 = vor.u32 %v509_v18, %v508_v17  ;;  %327 = vst [vmem:[#allocation2 + $0x3c] sm:$0x1] %v326_v25  ;;  %v516_v37 = vrot.slane %v514_v19, 7  ;;  %p14461_p2 = scmp.lt.s32.totalorder %s14459_s12, %s14453_s30 }
  0xc7   : > { %v11448_v26 = vcombine.low %v978_v12, %v988_v20  ;;  %v1007_v33 = vrot.slane %v1006_v21, 4  ;;  %v1023_v35 = vshll.u32 %v896_v29, 16  ;;  %v1027_v36 = vshrl.u32 %v896_v29, 16  ;;  %v428_v4 = vld [vmem:[%s14789_s17 + $0x20] sm:$0xf] }
  0xc8   : > { %v895_v34 = vld [vmem:[#allocation2 + $0x24] sm:$0xf]  ;;  %v1002_v38 = vsel %vm14860_vm12, %v997_v27, %v1001_v9  ;;  %v799_v42 = vsel %vm14842_vm9, %v511_v30, %v798_v24  ;;  %v519_v47 = vor.u32 %v517_v23, %v516_v37  ;;  %v802_v22 = vld [vmem:[#allocation2 + $0x38] sm:$0x1]  ;;  %v429_v48 = vld [vmem:[%s14789_s17 + $0x24] sm:$0xf]  ;;  %p14462_p1 = por %p14461_p2, %p14460_p12 }
  0xc9   : > { %12708 = vmatmul.mubr.msk.bf16.vlgmr.msra.gmra.mrb[0].mxu0 %vm1375_vm13, %v11448_v26  ;;  %v1014_v39 = vshrl.u32 %v895_v34, 16  ;;  %v1017_v40 = vshll.u32 %v895_v34, 16  ;;  %v1012_v44 = vsel %vm14860_vm12, %v1007_v33, %v1011_v15  ;;  %v1025_v45 = vrot.slane %v1023_v35, 5  ;;  %800 = vst [vmem:[#allocation2 + $0x30] sm:$0xf] %v799_v42 }
  0xca   : > { %12740 = vmatpush3.bf16.msra.mxu0 %v14888_v28  ;;  %v1029_v46 = vrot.slane %v1027_v36, 4  ;;  %v11449_v49 = vcombine.low %v1002_v38, %v1012_v44  ;;  %v925_v50 = vld [vmem:[#allocation2 + $0x2c] sm:$0x1]  ;;  %v521_v53 = vrot.slane %v516_v37, 4  ;;  %v520_v28 = vsel %vm14850_vm11, %v512_v32, %v519_v47  ;;  %v328_v58 = vld [vmem:[#allocation2 + $0x48] sm:$0x1]  ;;  %p14463_p13 = pnand %p14462_p1, %p14456_p7 }
  0xcb   : > { %v1016_v51 = vrot.slane %v1014_v39, 4  ;;  %v1019_v52 = vrot.slane %v1017_v40, 5  ;;  %v1033_v55 = vshll.u32 %v925_v50, 16  ;;  %v382_v56 = vsel %vm14813_vm6, 0, %v381_v43  ;;  %v384_v59 = vld [vmem:[#allocation2 + $0x50] sm:$0x1] }
  0xcc   : > { %v1030_v54 = vor.u32 %v1029_v46, %v1025_v45  ;;  %12711 = vmatprep.mubr.msk.bf16.mxu0 %vm1375_vm13, %v11449_v49  ;;  %801 = vst.msk [vmem:[#allocation2 + $0x34] sm:$0xf] %vm298_vm0, %v520_v28  ;;  %v803_v61 = vsel %vm14808_vm5, %v521_v53, %v802_v22  ;;  %383 = vst [vmem:[#allocation2 + $0x44] sm:$0x1] %v382_v56  ;;  %v523_v62 = vshrl.u32 %v428_v4, 16  ;;  %v526_v63 = vshll.u32 %v428_v4, 16 }
  0xcd   : > { %v1020_v60 = vor.u32 %v1019_v52, %v1016_v51  ;;  %v430_v0 = vld [vmem:[%s14789_s17 + $0x28] sm:$0xf]  ;;  %v1035_v5 = vrot.slane %v1033_v55, 5  ;;  %804 = vst [vmem:[#allocation2 + $0x38] sm:$0x1] %v803_v61  ;;  %v531_v6 = vshrl.u32 %v429_v48, 16 }
  0xce   : > { %v1031_v3 = vrot.slane %v1030_v54, 4  ;;  %v534_v7 = vshll.u32 %v429_v48, 16  ;;  %v431_v8 = vld [vmem:[%s14789_s17 + $0x2c] sm:$0xf]  ;;  %v525_v10 = vrot.slane %v523_v62, 7  ;;  %v329_v11 = vsel %vm14808_vm5, 0, %v328_v58 }
  0xcf   : > { %v1021_v9 = vrot.slane %v1020_v60, 4  ;;  %v385_v12 = vsel %vm14813_vm6, 0, %v384_v59  ;;  %v533_v14 = vrot.slane %v531_v6, 7  ;;  %v805_v15 = vld [vmem:[#allocation2 + $0x3c] sm:$0xf]  ;;  %v540_v16 = vshrl.u32 %v430_v0, 16 }
  0xd0   : > { %v1036_v13 = vsel %vm14860_vm12, %v1031_v3, %v1035_v5  ;;  %330 = vst [vmem:[#allocation2 + $0x48] sm:$0x1] %v329_v11  ;;  %386 = vst [vmem:[#allocation2 + $0x50] sm:$0x1] %v385_v12  ;;  %v543_v17 = vshll.u32 %v430_v0, 16  ;;  %v528_v20 = vor.u32 %v526_v63, %v525_v10  ;;  %v529_v21 = vrot.slane %v525_v10, 4 }
  0xd1   : > { %v1026_v18 = vsel %vm14860_vm12, %v1021_v9, %v1025_v45  ;;  %v897_v19 = vld [vmem:[#allocation2 + $0x30] sm:$0xf]  ;;  %v548_v23 = vshrl.u32 %v431_v8, 16  ;;  %v536_v27 = vor.u32 %v534_v7, %v533_v14  ;;  %v538_v29 = vrot.slane %v533_v14, 4  ;;  %v331_v34 = vld [vmem:[#allocation2 + $0x54] sm:$0x1] }
  0xd2   : > { %v11450_v24 = vcombine.low %v1026_v18, %v1036_v13  ;;  %v1038_v25 = vshrl.u32 %v897_v19, 16  ;;  %v1041_v26 = vshll.u32 %v897_v19, 16  ;;  %v806_v30 = vsel %vm14842_vm9, %v528_v20, %v805_v15  ;;  %v387_v40 = vld [vmem:[#allocation2 + $0x5c] sm:$0x1]  ;;  %v432_v46 = vld [vmem:[%s14789_s17 + $0x30] sm:$0xf] }
  0xd3   : > { %v542_v32 = vrot.slane %v540_v16, 7  ;;  %v550_v33 = vrot.slane %v548_v23, 7  ;;  %v898_v35 = vld [vmem:[#allocation2 + $0x34] sm:$0xf]  ;;  %v537_v38 = vsel %vm14850_vm11, %v529_v21, %v536_v27  ;;  %807 = vst [vmem:[#allocation2 + $0x3c] sm:$0xf] %v806_v30 }
  0xd4   : > { %12712 = vmatmul.mubr.msk.bf16.gmra.mrb[4].mxu0 %vm1375_vm13, %v11450_v24  ;;  %v1040_v36 = vrot.slane %v1038_v25, 4  ;;  %v1043_v37 = vrot.slane %v1041_v26, 5  ;;  %v809_v39 = vld [vmem:[#allocation2 + $0x44] sm:$0x1]  ;;  %v926_v42 = vld [vmem:[#allocation2 + $0x38] sm:$0x1] }
  0xd5   : > { %v1047_v43 = vshll.u32 %v898_v35, 16  ;;  %v1051_v4 = vshrl.u32 %v898_v35, 16  ;;  %808 = vst.msk [vmem:[#allocation2 + $0x40] sm:$0xf] %vm298_vm0, %v537_v38  ;;  %v810_v44 = vsel %vm14808_vm5, %v538_v29, %v809_v39  ;;  %v545_v45 = vor.u32 %v543_v17, %v542_v32  ;;  %v433_v50 = vld [vmem:[%s14789_s17 + $0x34] sm:$0xf] }
  0xd6   : > { %v1044_v47 = vor.u32 %v1043_v37, %v1040_v36  ;;  %v1057_v22 = vshll.u32 %v926_v42, 16  ;;  %811 = vst [vmem:[#allocation2 + $0x44] sm:$0x1] %v810_v44  ;;  %v546_v48 = vrot.slane %v542_v32, 4  ;;  %v551_v49 = vshll.u32 %v431_v8, 16 }
  0xd7   : > { %v1049_v51 = vrot.slane %v1047_v43, 5  ;;  %v1053_v52 = vrot.slane %v1051_v4, 4  ;;  %v555_v53 = vrot.slane %v550_v33, 4  ;;  %v812_v54 = vld [vmem:[#allocation2 + $0x48] sm:$0xf]  ;;  %v332_v55 = vsel %vm14808_vm5, 0, %v331_v34 }
  0xd8   : > { %v1045_v28 = vrot.slane %v1044_v47, 4  ;;  %v1059_v56 = vrot.slane %v1057_v22, 5  ;;  %v553_v58 = vor.u32 %v551_v49, %v550_v33  ;;  %v813_v59 = vsel %vm14842_vm9, %v545_v45, %v812_v54  ;;  %v816_v60 = vld [vmem:[#allocation2 + $0x50] sm:$0x1]  ;;  %333 = vst [vmem:[#allocation2 + $0x54] sm:$0x1] %v332_v55 }
  0xd9   : > { %v334_v61 = vld [vmem:[#allocation2 + $0x60] sm:$0x1]  ;;  %v1054_v62 = vor.u32 %v1053_v52, %v1049_v51  ;;  %814 = vst [vmem:[#allocation2 + $0x48] sm:$0xf] %v813_v59  ;;  %v817_v63 = vsel %vm14808_vm5, %v555_v53, %v816_v60  ;;  %v388_v0 = vsel %vm14813_vm6, 0, %v387_v40  ;;  %v557_v3 = vshrl.u32 %v432_v46, 16 }
  0xda   : > { %v390_v5 = vld [vmem:[#allocation2 + $0x68] sm:$0x1]  ;;  %v1050_v6 = vsel %vm14860_vm12, %v1045_v28, %v1049_v51  ;;  %v554_v7 = vsel %vm14850_vm11, %v546_v48, %v553_v58  ;;  %818 = vst [vmem:[#allocation2 + $0x50] sm:$0x1] %v817_v63  ;;  %389 = vst [vmem:[#allocation2 + $0x5c] sm:$0x1] %v388_v0 }
  0xdb   : > { %v560_v8 = vshll.u32 %v432_v46, 16  ;;  %v565_v9 = vshrl.u32 %v433_v50, 16  ;;  %v1055_v10 = vrot.slane %v1054_v62, 4  ;;  %v899_v11 = vld [vmem:[#allocation2 + $0x3c] sm:$0xf]  ;;  %v559_v12 = vrot.slane %v557_v3, 7 }
  0xdc   : > { %815 = vst.msk [vmem:[#allocation2 + $0x4c] sm:$0xf] %vm298_vm0, %v554_v7  ;;  %v568_v13 = vshll.u32 %v433_v50, 16  ;;  %v335_v14 = vsel %vm14808_vm5, 0, %v334_v61  ;;  %v900_v15 = vld [vmem:[#allocation2 + $0x40] sm:$0xf] }
  0xdd   : > { %v1062_v16 = vshrl.u32 %v899_v11, 16  ;;  %v1065_v17 = vshll.u32 %v899_v11, 16  ;;  %v567_v18 = vrot.slane %v565_v9, 7  ;;  %336 = vst [vmem:[#allocation2 + $0x60] sm:$0x1] %v335_v14  ;;  %v391_v19 = vsel %vm14813_vm6, 0, %v390_v5 }
  0xde   : > { %v1060_v20 = vsel %vm14860_vm12, %v1055_v10, %v1059_v56  ;;  %v927_v21 = vld [vmem:[#allocation2 + $0x44] sm:$0x1]  ;;  %v1071_v23 = vshll.u32 %v900_v15, 16  ;;  %v1075_v24 = vshrl.u32 %v900_v15, 16  ;;  %v562_v25 = vor.u32 %v560_v8, %v559_v12  ;;  %392 = vst [vmem:[#allocation2 + $0x68] sm:$0x1] %v391_v19 }
  0xdf   : > { %v11451_v26 = vcombine.low %v1050_v6, %v1060_v20  ;;  %v1064_v27 = vrot.slane %v1062_v16, 4  ;;  %v1067_v29 = vrot.slane %v1065_v17, 5  ;;  %v1081_v30 = vshll.u32 %v927_v21, 16  ;;  %v434_v32 = vld [vmem:[%s14789_s17 + $0x38] sm:$0xf] }
  0xe0   : > { %v1073_v33 = vrot.slane %v1071_v23, 5  ;;  %v1077_v34 = vrot.slane %v1075_v24, 4  ;;  %v563_v35 = vrot.slane %v559_v12, 4  ;;  %v570_v36 = vor.u32 %v568_v13, %v567_v18  ;;  %v819_v37 = vld [vmem:[#allocation2 + $0x54] sm:$0xf] }
  0xe1   : > { %12715 = vmatprep.mubr.msk.bf16.mxu0 %vm1375_vm13, %v11451_v26  ;;  %v1068_v38 = vor.u32 %v1067_v29, %v1064_v27  ;;  %v1083_v39 = vrot.slane %v1081_v30, 5  ;;  %v14968_v40 = vld [vmem:[#allocation2 + $0x48] sm:$0xf]  ;;  %v572_v42 = vrot.slane %v567_v18, 4  ;;  %v820_v43 = vsel %vm14842_vm9, %v562_v25, %v819_v37  ;;  %v928_v44 = vld [vmem:[#allocation2 + $0x50] sm:$0x1] }
  0xe2   : > { %v1078_v4 = vor.u32 %v1077_v34, %v1073_v33  ;;  %v1086_v45 = vshrl.u32 %v14968_v40, 16  ;;  %v1089_v46 = vshll.u32 %v14968_v40, 16  ;;  %v571_v47 = vsel %vm14850_vm11, %v563_v35, %v570_v36  ;;  %821 = vst [vmem:[#allocation2 + $0x54] sm:$0xf] %v820_v43  ;;  %v823_v22 = vld [vmem:[#allocation2 + $0x5c] sm:$0x1] }
  0xe3   : > { %v1069_v48 = vrot.slane %v1068_v38, 4  ;;  %v14976_v49 = vld [vmem:[#allocation2 + $0x4c] sm:$0xf]  ;;  %v1105_v50 = vshll.u32 %v928_v44, 16  ;;  %822 = vst.msk [vmem:[#allocation2 + $0x58] sm:$0xf] %vm298_vm0, %v571_v47  ;;  %v824_v51 = vsel %vm14808_vm5, %v572_v42, %v823_v22 }
  0xe4   : > { %v574_v52 = vshrl.u32 %v434_v32, 16  ;;  %v1079_v53 = vrot.slane %v1078_v4, 4  ;;  %v1088_v54 = vrot.slane %v1086_v45, 4  ;;  %v1091_v55 = vrot.slane %v1089_v46, 5  ;;  %825 = vst [vmem:[#allocation2 + $0x5c] sm:$0x1] %v824_v51 }
  0xe5   : > { %v1095_v28 = vshll.u32 %v14976_v49, 16  ;;  %v435_v56 = vld [vmem:[%s14789_s17 + $0x3c] sm:$0xf]  ;;  %v1074_v58 = vsel %vm14860_vm12, %v1069_v48, %v1073_v33  ;;  %v1099_v59 = vshrl.u32 %v14976_v49, 16  ;;  %v1107_v60 = vrot.slane %v1105_v50, 5 }
  0xe6   : > { %v576_v61 = vrot.slane %v574_v52, 7  ;;  %v337_v62 = vld [vmem:[#allocation2 + $0x6c] sm:$0x1]  ;;  %v1084_v63 = vsel %vm14860_vm12, %v1079_v53, %v1083_v39  ;;  %v1092_v0 = vor.u32 %v1091_v55, %v1088_v54  ;;  %v577_v5 = vshll.u32 %v434_v32, 16  ;;  %v393_v6 = vld [vmem:[#allocation2 + $0x74] sm:$0x1] }
  0xe7   : > { %v1097_v3 = vrot.slane %v1095_v28, 5  ;;  %v436_v7 = vld [vmem:[%s14789_s17 + $0x40] sm:$0xf]  ;;  %v11452_v8 = vcombine.low %v1074_v58, %v1084_v63  ;;  %v1101_v9 = vrot.slane %v1099_v59, 4  ;;  %v582_v11 = vshrl.u32 %v435_v56, 16 }
  0xe8   : > { %v580_v10 = vrot.slane %v576_v61, 4  ;;  %v826_v12 = vld [vmem:[#allocation2 + $0x60] sm:$0xf]  ;;  %v1093_v13 = vrot.slane %v1092_v0, 4  ;;  %v579_v14 = vor.u32 %v577_v5, %v576_v61  ;;  %v585_v15 = vshll.u32 %v435_v56, 16 }
  0xe9   : > { %v338_v16 = vsel %vm14808_vm5, 0, %v337_v62  ;;  %12716 = vmatmul.mubr.msk.bf16.gmra.mrb[8].mxu0 %vm1375_vm13, %v11452_v8  ;;  %v1102_v17 = vor.u32 %v1101_v9, %v1097_v3  ;;  %v14992_v18 = vld [vmem:[#allocation2 + $0x54] sm:$0xf]  ;;  %v584_v19 = vrot.slane %v582_v11, 7  ;;  %v394_v20 = vsel %vm14813_vm6, 0, %v393_v6 }
  0xea   : > { %339 = vst [vmem:[#allocation2 + $0x6c] sm:$0x1] %v338_v16  ;;  %v591_v21 = vshrl.u32 %v436_v7, 16  ;;  %v1098_v23 = vsel %vm14860_vm12, %v1093_v13, %v1097_v3  ;;  %v14998_v24 = vld [vmem:[#allocation2 + $0x58] sm:$0xf]  ;;  %v1110_v25 = vshrl.u32 %v14992_v18, 16  ;;  %v827_v27 = vsel %vm14842_vm9, %v579_v14, %v826_v12 }
  0xeb   : > { %v1113_v26 = vshll.u32 %v14992_v18, 16  ;;  %v830_v29 = vld [vmem:[#allocation2 + $0x68] sm:$0x1]  ;;  %395 = vst [vmem:[#allocation2 + $0x74] sm:$0x1] %v394_v20  ;;  %v1103_v30 = vrot.slane %v1102_v17, 4  ;;  %v587_v35 = vor.u32 %v585_v15, %v584_v19 }
  0xec   : > { %v929_v32 = vld [vmem:[#allocation2 + $0x5c] sm:$0x1]  ;;  %v1119_v33 = vshll.u32 %v14998_v24, 16  ;;  %v1123_v34 = vshrl.u32 %v14998_v24, 16  ;;  %828 = vst [vmem:[#allocation2 + $0x60] sm:$0xf] %v827_v27 }
  0xed   : > { %v1112_v36 = vrot.slane %v1110_v25, 4  ;;  %v1115_v37 = vrot.slane %v1113_v26, 5  ;;  %v1129_v38 = vshll.u32 %v929_v32, 16  ;;  %v589_v39 = vrot.slane %v584_v19, 4  ;;  %v437_v42 = vld [vmem:[%s14789_s17 + $0x44] sm:$0xf] }
  0xee   : > { %v1108_v43 = vsel %vm14860_vm12, %v1103_v30, %v1107_v60  ;;  %v1121_v4 = vrot.slane %v1119_v33, 5  ;;  %v1125_v44 = vrot.slane %v1123_v34, 4  ;;  %v588_v45 = vsel %vm14850_vm11, %v580_v10, %v587_v35  ;;  %v340_v46 = vld [vmem:[#allocation2 + $0x78] sm:$0x1]  ;;  %v396_v47 = vld [vmem:[#allocation2 + $0x80] sm:$0x1] }
  0xef   : > { %v11453_v22 = vcombine.low %v1098_v23, %v1108_v43  ;;  %v1116_v48 = vor.u32 %v1115_v37, %v1112_v36  ;;  %v1131_v50 = vrot.slane %v1129_v38, 5  ;;  %829 = vst.msk [vmem:[#allocation2 + $0x64] sm:$0xf] %vm298_vm0, %v588_v45  ;;  %v831_v51 = vsel %vm14808_vm5, %v589_v39, %v830_v29  ;;  %v438_v52 = vld [vmem:[%s14789_s17 + $0x48] sm:$0xf] }
  0xf0   : > { %v1126_v53 = vor.u32 %v1125_v44, %v1121_v4  ;;  %832 = vst [vmem:[#allocation2 + $0x68] sm:$0x1] %v831_v51  ;;  %v593_v54 = vrot.slane %v591_v21, 7  ;;  %v594_v55 = vshll.u32 %v436_v7, 16  ;;  %v599_v28 = vshrl.u32 %v437_v42, 16 }
  0xf1   : > { %v439_v56 = vld [vmem:[%s14789_s17 + $0x4c] sm:$0xf]  ;;  %12719 = vmatprep.mubr.msk.bf16.mxu0 %vm1375_vm13, %v11453_v22  ;;  %v1117_v58 = vrot.slane %v1116_v48, 4  ;;  %v602_v59 = vshll.u32 %v437_v42, 16  ;;  %v341_v60 = vsel %vm14808_vm5, 0, %v340_v46  ;;  %v397_v61 = vsel %vm14813_vm6, 0, %v396_v47 }
  0xf2   : > { %v1127_v62 = vrot.slane %v1126_v53, 4  ;;  %v596_v63 = vor.u32 %v594_v55, %v593_v54  ;;  %v597_v0 = vrot.slane %v593_v54, 4  ;;  %v601_v3 = vrot.slane %v599_v28, 7  ;;  %v833_v5 = vld [vmem:[#allocation2 + $0x6c] sm:$0xf] }
  0xf3   : > { %342 = vst [vmem:[#allocation2 + $0x78] sm:$0x1] %v341_v60  ;;  %398 = vst [vmem:[#allocation2 + $0x80] sm:$0x1] %v397_v61  ;;  %v1122_v6 = vsel %vm14860_vm12, %v1117_v58, %v1121_v4  ;;  %v15023_v7 = vld [vmem:[#allocation2 + $0x60] sm:$0xf] }
  0xf4   : > { %v608_v8 = vshrl.u32 %v438_v52, 16  ;;  %v611_v9 = vshll.u32 %v438_v52, 16  ;;  %v616_v10 = vshrl.u32 %v439_v56, 16  ;;  %v1132_v11 = vsel %vm14860_vm12, %v1127_v62, %v1131_v50  ;;  %v837_v15 = vld [vmem:[#allocation2 + $0x74] sm:$0x1] }
  0xf5   : > { %v1134_v12 = vshrl.u32 %v15023_v7, 16  ;;  %v1137_v13 = vshll.u32 %v15023_v7, 16  ;;  %v604_v14 = vor.u32 %v602_v59, %v601_v3  ;;  %v343_v16 = vld [vmem:[#allocation2 + $0x84] sm:$0x1]  ;;  %v15029_v17 = vld [vmem:[#allocation6 + $0x4] sm:$0x3]  ;;  %v11454_v19 = vcombine.low %v1122_v6, %v1132_v11 }
  0xf6   : > { %v606_v20 = vrot.slane %v601_v3, 4  ;;  %v834_v21 = vsel %vm14842_vm9, %v596_v63, %v833_v5  ;;  %v610_v23 = vrot.slane %v608_v8, 7  ;;  %13831 = vmatprep.subr.msk.bf16.mxu0 %vm1424_vm4, %v15029_v17  ;;  %v15035_v25 = vld [vmem:[#allocation2 + $0x64] sm:$0xf]  ;;  %v618_v30 = vrot.slane %v616_v10, 7 }
  0xf7   : > { %v1136_v26 = vrot.slane %v1134_v12, 4  ;;  %v1139_v27 = vrot.slane %v1137_v13, 5  ;;  %v605_v29 = vsel %vm14850_vm11, %v597_v0, %v604_v14  ;;  %835 = vst [vmem:[#allocation2 + $0x6c] sm:$0xf] %v834_v21  ;;  %v399_v32 = vld [vmem:[#allocation2 + $0x8c] sm:$0x1]  ;;  %12720 = vmatmul.mubr.msk.bf16.gmra.mrb[12].mxu0 %vm1375_vm13, %v11454_v19 }
  0xf8   : > { %v440_v33 = vld [vmem:[%s14789_s17 + $0x50] sm:$0xf]  ;;  %v1143_v35 = vshll.u32 %v15035_v25, 16  ;;  %v1147_v36 = vshrl.u32 %v15035_v25, 16  ;;  %836 = vst.msk [vmem:[#allocation2 + $0x70] sm:$0xf] %vm298_vm0, %v605_v29  ;;  %v838_v37 = vsel %vm14808_vm5, %v606_v20, %v837_v15  ;;  %v613_v38 = vor.u32 %v611_v9, %v610_v23 }
  0xf9   : > { %v15041_v34 = vld [vmem:[#allocation2 + $0x68] sm:$0x1]  ;;  %v441_v39 = vld [vmem:[%s14789_s17 + $0x54] sm:$0xf]  ;;  %v1140_v42 = vor.u32 %v1139_v27, %v1136_v26  ;;  %839 = vst [vmem:[#allocation2 + $0x74] sm:$0x1] %v838_v37 }
  0xfa   : > { %v1153_v43 = vshll.u32 %v15041_v34, 16  ;;  %v614_v4 = vrot.slane %v610_v23, 4  ;;  %v619_v44 = vshll.u32 %v439_v56, 16  ;;  %v346_v45 = vld [vmem:[#allocation2 + $0x90] sm:$0x1]  ;;  %v1145_v46 = vrot.slane %v1143_v35, 5 }
  0xfb   : > { %v1149_v47 = vrot.slane %v1147_v36, 4  ;;  %v623_v22 = vrot.slane %v618_v30, 4  ;;  %v840_v48 = vld [vmem:[#allocation2 + $0x78] sm:$0xf]  ;;  %v344_v50 = vsel %vm14808_vm5, 0, %v343_v16  ;;  %v1141_v51 = vrot.slane %v1140_v42, 4 }
  0xfc   : > { %v1155_v52 = vrot.slane %v1153_v43, 5  ;;  %v621_v53 = vor.u32 %v619_v44, %v618_v30  ;;  %v841_v54 = vsel %vm14842_vm9, %v613_v38, %v840_v48  ;;  %v844_v55 = vld [vmem:[#allocation2 + $0x80] sm:$0x1]  ;;  %345 = vst [vmem:[#allocation2 + $0x84] sm:$0x1] %v344_v50  ;;  %v400_v59 = vsel %vm14813_vm6, 0, %v399_v32 }
  0xfd   : > { %v402_v28 = vld [vmem:[#allocation2 + $0x98] sm:$0x1]  ;;  %v1150_v58 = vor.u32 %v1149_v47, %v1145_v46  ;;  %842 = vst [vmem:[#allocation2 + $0x78] sm:$0xf] %v841_v54  ;;  %v845_v56 = vsel %vm14808_vm5, %v623_v22, %v844_v55  ;;  %v625_v60 = vshrl.u32 %v440_v33, 16  ;;  %v1146_v61 = vsel %vm14860_vm12, %v1141_v51, %v1145_v46 }
  0xfe   : > { %v622_v62 = vsel %vm14850_vm11, %v614_v4, %v621_v53  ;;  %846 = vst [vmem:[#allocation2 + $0x80] sm:$0x1] %v845_v56  ;;  %401 = vst [vmem:[#allocation2 + $0x8c] sm:$0x1] %v400_v59  ;;  %v628_v63 = vshll.u32 %v440_v33, 16  ;;  %v633_v0 = vshrl.u32 %v441_v39, 16 }
  0xff   : > { %v1151_v3 = vrot.slane %v1150_v58, 4  ;;  %v15062_v5 = vld [vmem:[#allocation2 + $0x6c] sm:$0xf]  ;;  %843 = vst.msk [vmem:[#allocation2 + $0x7c] sm:$0xf] %vm298_vm0, %v622_v62  ;;  %v627_v6 = vrot.slane %v625_v60, 7 }
 0x100   : > { %v636_v8 = vshll.u32 %v441_v39, 16  ;;  %v347_v9 = vsel %vm14808_vm5, 0, %v346_v45  ;;  %v15067_v10 = vld [vmem:[#allocation2 + $0x70] sm:$0xf]  ;;  %v1158_v11 = vshrl.u32 %v15062_v5, 16  ;;  %v1161_v12 = vshll.u32 %v15062_v5, 16 }
 0x101   : > { %v635_v13 = vrot.slane %v633_v0, 7  ;;  %348 = vst [vmem:[#allocation2 + $0x90] sm:$0x1] %v347_v9  ;;  %v403_v14 = vsel %vm14813_vm6, 0, %v402_v28  ;;  %v1156_v15 = vsel %vm14860_vm12, %v1151_v3, %v1155_v52  ;;  %v15075_v16 = vld [vmem:[#allocation2 + $0x74] sm:$0x1]  ;;  %v630_v21 = vor.u32 %v628_v63, %v627_v6 }
 0x102   : > { %v1167_v19 = vshll.u32 %v15067_v10, 16  ;;  %v1171_v20 = vshrl.u32 %v15067_v10, 16  ;;  %404 = vst [vmem:[#allocation2 + $0x98] sm:$0x1] %v403_v14  ;;  %v11455_v23 = vcombine.low %v1146_v61, %v1156_v15  ;;  %v1160_v26 = vrot.slane %v1158_v11, 4 }
 0x103   : > { %v1163_v27 = vrot.slane %v1161_v12, 5  ;;  %v1177_v29 = vshll.u32 %v15075_v16, 16  ;;  %v442_v30 = vld [vmem:[%s14789_s17 + $0x58] sm:$0xf]  ;;  %v631_v35 = vrot.slane %v627_v6, 4  ;;  %v638_v36 = vor.u32 %v636_v8, %v635_v13 }
 0x104   : > { %v1169_v32 = vrot.slane %v1167_v19, 5  ;;  %v1173_v33 = vrot.slane %v1171_v20, 4  ;;  %v847_v37 = vld [vmem:[#allocation2 + $0x84] sm:$0xf]  ;;  %12723 = vmatprep.mubr.msk.bf16.mxu0 %vm1375_vm13, %v11455_v23  ;;  %v15082_v42 = vld [vmem:[#allocation2 + $0x78] sm:$0xf] }
 0x105   : > { %v1164_v38 = vor.u32 %v1163_v27, %v1160_v26  ;;  %v1179_v39 = vrot.slane %v1177_v29, 5  ;;  %v640_v43 = vrot.slane %v635_v13, 4  ;;  %v848_v4 = vsel %vm14842_vm9, %v630_v21, %v847_v37  ;;  %v15086_v45 = vld [vmem:[#allocation2 + $0x80] sm:$0x1]  ;;  %v851_v48 = vld [vmem:[#allocation2 + $0x8c] sm:$0x1] }
 0x106   : > { %v1174_v44 = vor.u32 %v1173_v33, %v1169_v32  ;;  %v1182_v46 = vshrl.u32 %v15082_v42, 16  ;;  %v1185_v47 = vshll.u32 %v15082_v42, 16  ;;  %v639_v22 = vsel %vm14850_vm11, %v631_v35, %v638_v36  ;;  %849 = vst [vmem:[#allocation2 + $0x84] sm:$0xf] %v848_v4  ;;  %v443_v50 = vld [vmem:[%s14789_s17 + $0x5c] sm:$0xf] }
 0x107   : > { %v1165_v51 = vrot.slane %v1164_v38, 4  ;;  %v15093_v52 = vld [vmem:[#allocation2 + $0x7c] sm:$0xf]  ;;  %v1201_v53 = vshll.u32 %v15086_v45, 16  ;;  %850 = vst.msk [vmem:[#allocation2 + $0x88] sm:$0xf] %vm298_vm0, %v639_v22  ;;  %v852_v54 = vsel %vm14808_vm5, %v640_v43, %v851_v48 }
 0x108   : > { %v642_v55 = vshrl.u32 %v442_v30, 16  ;;  %v1175_v28 = vrot.slane %v1174_v44, 4  ;;  %v1184_v58 = vrot.slane %v1182_v46, 4  ;;  %v1187_v56 = vrot.slane %v1185_v47, 5  ;;  %853 = vst [vmem:[#allocation2 + $0x8c] sm:$0x1] %v852_v54 }
 0x109   : > { %v1191_v59 = vshll.u32 %v15093_v52, 16  ;;  %v349_v60 = vld [vmem:[#allocation2 + $0x9c] sm:$0x1]  ;;  %v1170_v61 = vsel %vm14860_vm12, %v1165_v51, %v1169_v32  ;;  %v1195_v62 = vshrl.u32 %v15093_v52, 16  ;;  %v1203_v63 = vrot.slane %v1201_v53, 5 }
 0x10a   : > { %v644_v0 = vrot.slane %v642_v55, 7  ;;  %v405_v3 = vld [vmem:[#allocation2 + $0xa4] sm:$0x1]  ;;  %v1180_v6 = vsel %vm14860_vm12, %v1175_v28, %v1179_v39  ;;  %v1188_v8 = vor.u32 %v1187_v56, %v1184_v58  ;;  %v645_v11 = vshll.u32 %v442_v30, 16  ;;  %v444_v12 = vld [vmem:[%s14789_s17 + $0x60] sm:$0xf] }
 0x10b   : > { %v1193_v9 = vrot.slane %v1191_v59, 5  ;;  %v11456_v13 = vcombine.low %v1170_v61, %v1180_v6  ;;  %v1197_v14 = vrot.slane %v1195_v62, 4  ;;  %v650_v19 = vshrl.u32 %v443_v50, 16  ;;  %v854_v20 = vld [vmem:[#allocation2 + $0x90] sm:$0xf] }
 0x10c   : > { %v648_v15 = vrot.slane %v644_v0, 4  ;;  %v1189_v21 = vrot.slane %v1188_v8, 4  ;;  %v647_v23 = vor.u32 %v645_v11, %v644_v0  ;;  %v653_v26 = vshll.u32 %v443_v50, 16  ;;  %v858_v30 = vld [vmem:[#allocation2 + $0x98] sm:$0x1] }
 0x10d   : > { %v350_v27 = vsel %vm14808_vm5, 0, %v349_v60  ;;  %12724 = vmatmul.mubr.msk.bf16.gmra.mrb[16].mxu0 %vm1375_vm13, %v11456_v13  ;;  %v1198_v29 = vor.u32 %v1197_v14, %v1193_v9  ;;  %v15109_v32 = vld [vmem:[#allocation2 + $0x84] sm:$0xf]  ;;  %v652_v33 = vrot.slane %v650_v19, 7  ;;  %v406_v35 = vsel %vm14813_vm6, 0, %v405_v3 }
 0x10e   : > { %351 = vst [vmem:[#allocation2 + $0x9c] sm:$0x1] %v350_v27  ;;  %v659_v36 = vshrl.u32 %v444_v12, 16  ;;  %v1194_v37 = vsel %vm14860_vm12, %v1189_v21, %v1193_v9  ;;  %v15115_v38 = vld [vmem:[#allocation2 + $0x88] sm:$0xf]  ;;  %v1206_v39 = vshrl.u32 %v15109_v32, 16  ;;  %v855_v4 = vsel %vm14842_vm9, %v647_v23, %v854_v20 }
 0x10f   : > { %v1209_v43 = vshll.u32 %v15109_v32, 16  ;;  %407 = vst [vmem:[#allocation2 + $0xa4] sm:$0x1] %v406_v35  ;;  %v445_v44 = vld [vmem:[%s14789_s17 + $0x64] sm:$0xf]  ;;  %v1199_v46 = vrot.slane %v1198_v29, 4  ;;  %v655_v50 = vor.u32 %v653_v26, %v652_v33 }
 0x110   : > { %v15122_v47 = vld [vmem:[#allocation2 + $0x8c] sm:$0x1]  ;;  %v1215_v22 = vshll.u32 %v15115_v38, 16  ;;  %v1219_v48 = vshrl.u32 %v15115_v38, 16  ;;  %856 = vst [vmem:[#allocation2 + $0x90] sm:$0xf] %v855_v4 }
 0x111   : > { %v352_v51 = vld [vmem:[#allocation2 + $0xa8] sm:$0x1]  ;;  %v408_v53 = vld [vmem:[#allocation2 + $0xb0] sm:$0x1]  ;;  %v1208_v54 = vrot.slane %v1206_v39, 4  ;;  %v1211_v55 = vrot.slane %v1209_v43, 5  ;;  %v1204_v56 = vsel %vm14860_vm12, %v1199_v46, %v1203_v63  ;;  %v656_v61 = vsel %vm14850_vm11, %v648_v15, %v655_v50 }
 0x112   : > { %v1225_v28 = vshll.u32 %v15122_v47, 16  ;;  %v657_v58 = vrot.slane %v652_v33, 4  ;;  %v1217_v59 = vrot.slane %v1215_v22, 5  ;;  %v1221_v60 = vrot.slane %v1219_v48, 4  ;;  %857 = vst.msk [vmem:[#allocation2 + $0x94] sm:$0xf] %vm298_vm0, %v656_v61 }
 0x113   : > { %v11457_v62 = vcombine.low %v1194_v37, %v1204_v56  ;;  %v1212_v0 = vor.u32 %v1211_v55, %v1208_v54  ;;  %v446_v8 = vld [vmem:[%s14789_s17 + $0x68] sm:$0xf]  ;;  %v661_v11 = vrot.slane %v659_v36, 7  ;;  %v662_v13 = vshll.u32 %v444_v12, 16  ;;  %v447_v63 = vld [vmem:[%s14789_s17 + $0x6c] sm:$0xf] }
 0x114   : > { %v1227_v3 = vrot.slane %v1225_v28, 5  ;;  %v859_v6 = vsel %vm14808_vm5, %v657_v58, %v858_v30  ;;  %v1222_v9 = vor.u32 %v1221_v60, %v1217_v59  ;;  %v667_v14 = vshrl.u32 %v445_v44, 16  ;;  %v355_v22 = vld [vmem:[#allocation2 + $0xb4] sm:$0x1] }
 0x115   : > { %860 = vst [vmem:[#allocation2 + $0x98] sm:$0x1] %v859_v6  ;;  %12727 = vmatprep.mubr.msk.bf16.mxu0 %vm1375_vm13, %v11457_v62  ;;  %v1213_v19 = vrot.slane %v1212_v0, 4  ;;  %v670_v20 = vshll.u32 %v445_v44, 16  ;;  %v861_v15 = vld [vmem:[#allocation2 + $0x9c] sm:$0xf]  ;;  %v664_v27 = vor.u32 %v662_v13, %v661_v11 }
 0x116   : > { %v353_v21 = vsel %vm14808_vm5, 0, %v352_v51  ;;  %v409_v23 = vsel %vm14813_vm6, 0, %v408_v53  ;;  %v1223_v26 = vrot.slane %v1222_v9, 4  ;;  %v665_v29 = vrot.slane %v661_v11, 4  ;;  %v865_v30 = vld [vmem:[#allocation2 + $0xa4] sm:$0x1] }
 0x117   : > { %v669_v33 = vrot.slane %v667_v14, 7  ;;  %354 = vst [vmem:[#allocation2 + $0xa8] sm:$0x1] %v353_v21  ;;  %410 = vst [vmem:[#allocation2 + $0xb0] sm:$0x1] %v409_v23  ;;  %v1218_v12 = vsel %vm14860_vm12, %v1213_v19, %v1217_v59  ;;  %v676_v36 = vshrl.u32 %v446_v8, 16  ;;  %v862_v51 = vsel %vm14842_vm9, %v664_v27, %v861_v15 }
 0x118   : > { %v15143_v35 = vld [vmem:[#allocation2 + $0x90] sm:$0xf]  ;;  %v679_v37 = vshll.u32 %v446_v8, 16  ;;  %v684_v39 = vshrl.u32 %v447_v63, 16  ;;  %v1228_v43 = vsel %vm14860_vm12, %v1223_v26, %v1227_v3  ;;  %863 = vst [vmem:[#allocation2 + $0x9c] sm:$0xf] %v862_v51 }
 0x119   : > { %v1230_v4 = vshrl.u32 %v15143_v35, 16  ;;  %v1233_v44 = vshll.u32 %v15143_v35, 16  ;;  %v672_v46 = vor.u32 %v670_v20, %v669_v33  ;;  %v11458_v48 = vcombine.low %v1218_v12, %v1228_v43  ;;  %v15151_v54 = vld [vmem:[#allocation2 + $0x94] sm:$0xf]  ;;  %v411_v59 = vld [vmem:[#allocation2 + $0xbc] sm:$0x1] }
 0x11a   : > { %v674_v50 = vrot.slane %v669_v33, 4  ;;  %v678_v53 = vrot.slane %v676_v36, 7  ;;  %v686_v56 = vrot.slane %v684_v39, 7  ;;  %v1239_v61 = vshll.u32 %v15151_v54, 16  ;;  %v448_v6 = vld [vmem:[%s14789_s17 + $0x70] sm:$0xf] }
 0x11b   : > { %v1232_v55 = vrot.slane %v1230_v4, 4  ;;  %v1235_v28 = vrot.slane %v1233_v44, 5  ;;  %v673_v58 = vsel %vm14850_vm11, %v665_v29, %v672_v46  ;;  %12728 = vmatmul.mubr.msk.bf16.gmra.mrb[20].mxu0 %vm1375_vm13, %v11458_v48  ;;  %v1243_v62 = vshrl.u32 %v15151_v54, 16  ;;  %v449_v14 = vld [vmem:[%s14789_s17 + $0x74] sm:$0xf] }
 0x11c   : > { %v15156_v60 = vld [vmem:[#allocation2 + $0x98] sm:$0x1]  ;;  %864 = vst.msk [vmem:[#allocation2 + $0xa0] sm:$0xf] %vm298_vm0, %v673_v58  ;;  %v866_v0 = vsel %vm14808_vm5, %v674_v50, %v865_v30  ;;  %v681_v3 = vor.u32 %v679_v37, %v678_v53  ;;  %v682_v11 = vrot.slane %v678_v53, 4  ;;  %v687_v13 = vshll.u32 %v447_v63, 16 }
 0x11d   : > { %v1236_v8 = vor.u32 %v1235_v28, %v1232_v55  ;;  %v1249_v9 = vshll.u32 %v15156_v60, 16  ;;  %867 = vst [vmem:[#allocation2 + $0xa4] sm:$0x1] %v866_v0  ;;  %v1241_v19 = vrot.slane %v1239_v61, 5  ;;  %v1245_v20 = vrot.slane %v1243_v62, 4 }
 0x11e   : > { %v691_v15 = vrot.slane %v686_v56, 4  ;;  %v868_v21 = vld [vmem:[#allocation2 + $0xa8] sm:$0xf]  ;;  %v356_v23 = vsel %vm14808_vm5, 0, %v355_v22  ;;  %v689_v29 = vor.u32 %v687_v13, %v686_v56  ;;  %v872_v30 = vld [vmem:[#allocation2 + $0xb0] sm:$0x1] }
 0x11f   : > { %v1237_v26 = vrot.slane %v1236_v8, 4  ;;  %v1251_v27 = vrot.slane %v1249_v9, 5  ;;  %v869_v33 = vsel %vm14842_vm9, %v681_v3, %v868_v21  ;;  %357 = vst [vmem:[#allocation2 + $0xb4] sm:$0x1] %v356_v23  ;;  %v1246_v12 = vor.u32 %v1245_v20, %v1241_v19  ;;  %v15178_v22 = vld [vmem:[#allocation2 + $0x9c] sm:$0xf] }
 0x120   : > { %870 = vst [vmem:[#allocation2 + $0xa8] sm:$0xf] %v869_v33  ;;  %v873_v63 = vsel %vm14808_vm5, %v691_v15, %v872_v30  ;;  %v412_v36 = vsel %vm14813_vm6, 0, %v411_v59  ;;  %v693_v37 = vshrl.u32 %v448_v6, 16  ;;  %v690_v39 = vsel %vm14850_vm11, %v682_v11, %v689_v29 }
 0x121   : > { %874 = vst [vmem:[#allocation2 + $0xb0] sm:$0x1] %v873_v63  ;;  %413 = vst [vmem:[#allocation2 + $0xbc] sm:$0x1] %v412_v36  ;;  %v696_v43 = vshll.u32 %v448_v6, 16  ;;  %v701_v4 = vshrl.u32 %v449_v14, 16  ;;  %v1242_v44 = vsel %vm14860_vm12, %v1237_v26, %v1241_v19 }
 0x122   : > { %v1247_v46 = vrot.slane %v1246_v12, 4  ;;  %871 = vst.msk [vmem:[#allocation2 + $0xac] sm:$0xf] %vm298_vm0, %v690_v39  ;;  %v695_v48 = vrot.slane %v693_v37, 7  ;;  %v704_v50 = vshll.u32 %v449_v14, 16  ;;  %v1254_v53 = vshrl.u32 %v15178_v22, 16 }
 0x123   : > { %v15181_v51 = vld [vmem:[#allocation2 + $0xa0] sm:$0xf]  ;;  %v1257_v55 = vshll.u32 %v15178_v22, 16  ;;  %v703_v28 = vrot.slane %v701_v4, 7  ;;  %vm1929_vm14 = vcmask 1042432   ;;  %vm1930_vm15 = vcmask 1046532  }
 0x124   : > { %v1252_v58 = vsel %vm14860_vm12, %v1247_v46, %v1251_v27  ;;  %v15187_v56 = vld [vmem:[#allocation2 + $0xa4] sm:$0x1]  ;;  %v1263_v59 = vshll.u32 %v15181_v51, 16  ;;  %v1267_v61 = vshrl.u32 %v15181_v51, 16  ;;  %v698_v62 = vor.u32 %v696_v43, %v695_v48  ;;  %vm15304_vm1 = vmor %vm1929_vm14, %vm1930_vm15 }
 0x125   : > { %v11459_v0 = vcombine.low %v1242_v44, %v1252_v58  ;;  %v1256_v3 = vrot.slane %v1254_v53, 4  ;;  %v1259_v6 = vrot.slane %v1257_v55, 5  ;;  %v1273_v8 = vshll.u32 %v15187_v56, 16 }
 0x126   : > { %v1265_v9 = vrot.slane %v1263_v59, 5  ;;  %v1269_v11 = vrot.slane %v1267_v61, 4  ;;  %v699_v13 = vrot.slane %v695_v48, 4  ;;  %v706_v14 = vor.u32 %v704_v50, %v703_v28  ;;  %v875_v19 = vld [vmem:[#allocation2 + $0xb4] sm:$0xf] }
 0x127   : > { %12731 = vmatprep.mubr.msk.bf16.mxu0 %vm1375_vm13, %v11459_v0  ;;  %v1260_v20 = vor.u32 %v1259_v6, %v1256_v3  ;;  %v1275_v15 = vrot.slane %v1273_v8, 5  ;;  %v15193_v21 = vld [vmem:[#allocation2 + $0xa8] sm:$0xf]  ;;  %v708_v23 = vrot.slane %v703_v28, 4  ;;  %v876_v26 = vsel %vm14842_vm9, %v698_v62, %v875_v19 }
 0x128   : > { %v1270_v27 = vor.u32 %v1269_v11, %v1265_v9  ;;  %v15197_v29 = vld [vmem:[#allocation2 + $0xb0] sm:$0x1]  ;;  %v1278_v33 = vshrl.u32 %v15193_v21, 16  ;;  %v1281_v30 = vshll.u32 %v15193_v21, 16  ;;  %v707_v12 = vsel %vm14850_vm11, %v699_v13, %v706_v14  ;;  %877 = vst [vmem:[#allocation2 + $0xb4] sm:$0xf] %v876_v26 }
 0x129   : > { %v879_v63 = vld [vmem:[#allocation2 + $0xbc] sm:$0x1]  ;;  %v1261_v36 = vrot.slane %v1260_v20, 4  ;;  %v15203_v37 = vld [vmem:[#allocation2 + $0xac] sm:$0xf]  ;;  %v1297_v39 = vshll.u32 %v15197_v29, 16 }
 0x12a   : > { %878 = vst.msk [vmem:[#allocation2 + $0xb8] sm:$0xf] %vm298_vm0, %v707_v12  ;;  %v880_v43 = vsel %vm14808_vm5, %v708_v23, %v879_v63  ;;  %v1271_v4 = vrot.slane %v1270_v27, 4  ;;  %v1280_v44 = vrot.slane %v1278_v33, 4  ;;  %v1283_v46 = vrot.slane %v1281_v30, 5 }
 0x12b   : > { %v1287_v48 = vshll.u32 %v15203_v37, 16  ;;  %881 = vst [vmem:[#allocation2 + $0xbc] sm:$0x1] %v880_v43  ;;  %v1266_v50 = vsel %vm14860_vm12, %v1261_v36, %v1265_v9  ;;  %v1291_v53 = vshrl.u32 %v15203_v37, 16  ;;  %v1299_v0 = vrot.slane %v1297_v39, 5 }
 0x12c   : > { %v1276_v55 = vsel %vm14860_vm12, %v1271_v4, %v1275_v15  ;;  %v1284_v28 = vor.u32 %v1283_v46, %v1280_v44  ;;  %v2735_v41 = vld [vmem:[#allocation2 + $0xa8] sm:$0xf]  ;;  %v15665_v2 = vld [vmem:[#allocation2 + $0xb0] sm:$0x1] }
 0x12d   : > { %v1289_v58 = vrot.slane %v1287_v48, 5  ;;  %v11460_v59 = vcombine.low %v1266_v50, %v1276_v55  ;;  %v1293_v61 = vrot.slane %v1291_v53, 4  ;;  %v15236_v50 = vld [vmem:[#allocation2 + $0x4] sm:$0xf]  ;;  %v14279_v53 = vld [vmem:[#allocation2] sm:$0xf] }
 0x12e   : > { %v1285_v62 = vrot.slane %v1284_v28, 4  ;;  %v11479_v55 = vcombine.low %v14279_v53, %v15236_v50  ;;  %v1881_v53 = vld [vmem:[#allocation2] sm:$0xe] }
 0x12f   : > { %12732 = vmatmul.mubr.msk.bf16.gmra.mrb[24].mxu0 %vm1375_vm13, %v11460_v59  ;;  %v1294_v3 = vor.u32 %v1293_v61, %v1289_v58  ;;  %v15216_v6 = vld [vmem:[#allocation2 + $0xb4] sm:$0xf]  ;;  %v15241_v59 = vld [vmem:[#allocation2 + $0x10] sm:$0xf] }
 0x130   : > { %v1302_v9 = vshrl.u32 %v15216_v6, 16  ;;  %v1305_v11 = vshll.u32 %v15216_v6, 16  ;;  %v1290_v13 = vsel %vm14860_vm12, %v1285_v62, %v1289_v58  ;;  %v14280_v58 = vld [vmem:[#allocation2 + $0xc] sm:$0xf]  ;;  %v14282_v62 = vld [vmem:[#allocation2 + $0x18] sm:$0xf] }
 0x131   : > { %v15218_v8 = vld [vmem:[#allocation2 + $0xb8] sm:$0xf]  ;;  %v1295_v14 = vrot.slane %v1294_v3, 4  ;;  %v11480_v61 = vcombine.low %v14280_v58, %v15241_v59 }
 0x132   : > { %v15224_v19 = vld [vmem:[#allocation2 + $0xbc] sm:$0x1]  ;;  %v1311_v20 = vshll.u32 %v15218_v8, 16  ;;  %v1315_v15 = vshrl.u32 %v15218_v8, 16  ;;  %v1304_v23 = vrot.slane %v1302_v9, 4  ;;  %v1307_v26 = vrot.slane %v1305_v11, 5 }
 0x133   : > { %v1321_v27 = vshll.u32 %v15224_v19, 16  ;;  %v1300_v33 = vsel %vm14860_vm12, %v1295_v14, %v1299_v0  ;;  %v15244_v0 = vld [vmem:[#allocation2 + $0x1c] sm:$0xf]  ;;  %v2143_v9 = vsel %vm1424_vm4, %v15029_v17, 0  ;;  %v14285_v14 = vld [vmem:[#allocation2 + $0x24] sm:$0xf] }
 0x134   : > { %v1313_v30 = vrot.slane %v1311_v20, 5  ;;  %v1317_v12 = vrot.slane %v1315_v15, 4  ;;  %v11461_v63 = vcombine.low %v1290_v13, %v1300_v33  ;;  %v1308_v36 = vor.u32 %v1307_v26, %v1304_v23  ;;  %v15249_v11 = vld [vmem:[#allocation6 + $0x6] sm:$0x3]  ;;  %v15255_v13 = vld [vmem:[#allocation2 + $0x28] sm:$0xf] }
 0x135   : > { %v1323_v43 = vrot.slane %v1321_v27, 5  ;;  %v11481_v3 = vcombine.low %v14282_v62, %v15244_v0  ;;  %v11482_v20 = vcombine.low %v14285_v14, %v15255_v13  ;;  %v14286_v15 = vld [vmem:[#allocation2 + $0x30] sm:$0xf]  ;;  %v15258_v23 = vld [vmem:[#allocation2 + $0x34] sm:$0xf] }
 0x136   : > { %v1318_v39 = vor.u32 %v1317_v12, %v1313_v30  ;;  %12735 = vmatprep.mubr.msk.bf16.mxu0 %vm1375_vm13, %v11461_v63  ;;  %v1309_v4 = vrot.slane %v1308_v36, 4  ;;  %v11483_v17 = vcombine.low %v14286_v15, %v15258_v23  ;;  %v14288_v26 = vld [vmem:[#allocation2 + $0x3c] sm:$0xf]  ;;  %v15263_v27 = vld [vmem:[#allocation2 + $0x40] sm:$0xf]  ;;  %v11486_v12 = vcombine.low %v14992_v18, %v14998_v24 }
 0x137   : > { %v11484_v33 = vcombine.low %v14288_v26, %v15263_v27  ;;  %v11487_v63 = vcombine.low %v15023_v7, %v15035_v25  ;;  %v11488_v36 = vcombine.low %v15062_v5, %v15067_v10  ;;  %v358_v18 = vld [vmem:[#allocation2 + $0xc0] sm:$0x1]  ;;  %v11491_v24 = vcombine.low %v15143_v35, %v15151_v54  ;;  %v451_v5 = vld [vmem:[%s14789_s17 + $0x7c] sm:$0xf] }
 0x138   : > { %v1319_v44 = vrot.slane %v1318_v39, 4  ;;  %v1314_v46 = vsel %vm14860_vm12, %v1309_v4, %v1313_v30  ;;  %v11485_v30 = vcombine.low %v14968_v40, %v14976_v49  ;;  %v11489_v40 = vcombine.low %v15082_v42, %v15093_v52  ;;  %v450_v39 = vld [vmem:[%s14789_s17 + $0x78] sm:$0xf] }
 0x139   : > { %v11490_v49 = vcombine.low %v15109_v32, %v15115_v38  ;;  %v359_v7 = vsel %vm14808_vm5, 0, %v358_v18  ;;  %v710_v42 = vshrl.u32 %v450_v39, 16  ;;  %v1934_v4 = vrot.slane %v15236_v50, 5 }
 0x13a   : > { %v1324_v48 = vsel %vm14860_vm12, %v1319_v44, %v1323_v43  ;;  %360 = vst [vmem:[#allocation2 + $0xc0] sm:$0x1] %v359_v7  ;;  %v718_v43 = vshrl.u32 %v451_v5, 16  ;;  %v713_v32 = vshll.u32 %v450_v39, 16  ;;  %v11492_v35 = vcombine.low %v15178_v22, %v15181_v51  ;;  %v14292_v39 = vld [vmem:[#allocation2 + $0x20] sm:$0x1] }
 0x13b   : > { %v11462_v28 = vcombine.low %v1314_v46, %v1324_v48  ;;  %v712_v44 = vrot.slane %v710_v42, 7  ;;  %v721_v48 = vshll.u32 %v451_v5, 16  ;;  %v11493_v50 = vcombine.low %v15193_v21, %v15203_v37 }
 0x13c   : > { %v15293_v46 = vrot.slane %v718_v43, 7  ;;  %v1936_v14 = vrot.slane %v1934_v4, 4  ;;  %v1941_v21 = vrot.slane %v15241_v59, 5  ;;  %v1951_v5 = vrot.slane %v14292_v39, 5 }
 0x13d   : > { %12736 = vmatmul.mubr.msk.bf16.gmra.mrb[28].mxu0 %vm1375_vm13, %v11462_v28  ;;  %v716_v28 = vrot.slane %v712_v44, 4  ;;  %v1955_v43 = vrot.slane %v15255_v13, 5 }
 0x13e   : > { %12741 = vmatprep.mubr.msk.bf16.mxu0 %vm1375_vm13, %v11479_v55  ;;  %v715_v55 = vor.u32 %v713_v32, %v712_v44  ;;  %v723_v58 = vor.u32 %v721_v48, %v15293_v46  ;;  %v1884_v44 = vld [vmem:[#allocation2 + $0x24] sm:$0xe]  ;;  %v1962_v32 = vrot.slane %v15258_v23, 5  ;;  %v1885_v48 = vld [vmem:[#allocation2 + $0x30] sm:$0xe] }
 0x13f   : > { %v11515_v13 = vrot.slane %v1885_v48, 9 }
 0x145   : > { %12742 = vmatmul.mubr.msk.bf16.vlgmr.msra.gmra.mrb[0].mxu0 %vm1375_vm13, %v11480_v61  ;;  %v14290_v61 = vld [vmem:[#allocation2 + $0x8] sm:$0x1] }
 0x146   : > { %12774 = vmatpush3.bf16.msra.mxu0 %v2143_v9  ;;  %12745 = vmatprep.mubr.msk.bf16.mxu0 %vm1375_vm13, %v11481_v3  ;;  %v1937_v62 = vrot.slane %v14290_v61, 5  ;;  %v882_v3 = vld [vmem:[#allocation2 + $0xc0] sm:$0xf]  ;;  %v11511_v9 = vrot.slane %v1881_v53, 9 }
 0x147   : > { %13832 = vmatprep.subr.msk.bf16.mxu0 %vm1424_vm4, %v15249_v11  ;;  %v883_v22 = vsel %vm14842_vm9, %v715_v55, %v882_v3  ;;  %v11514_v55 = vrot.slane %v1884_v44, 9  ;;  %v14294_v3 = vld [vmem:[#allocation2 + $0x38] sm:$0x1]  ;;  %v1990_v44 = vrot.slane %v15035_v25, 5 }
 0x148   : > { %884 = vst [vmem:[#allocation2 + $0xc0] sm:$0xf] %v883_v22  ;;  %v1938_v26 = vsel %vm15304_vm1, %v1936_v14, %v1937_v62  ;;  %v2501_v62 = vsel %vm1424_vm4, %v15249_v11, 0  ;;  %v15333_v14 = vld [vmem:[#allocation6 + $0x8] sm:$0x3]  ;;  %v1969_v22 = vrot.slane %v15263_v27, 5  ;;  %v1963_v11 = vsel %vm15304_vm1, %v11515_v13, %v1962_v32 }
 0x149   : > { %v1956_v23 = vsel %vm15304_vm1, %v11514_v55, %v1955_v43  ;;  %v1993_v13 = vrot.slane %v15041_v34, 5  ;;  %v2004_v34 = vrot.slane %v15093_v52, 5 }
 0x14d   : > { %12746 = vmatmul.mubr.msk.bf16.gmra.mrb[4].mxu0 %vm1375_vm13, %v11482_v20  ;;  %v724_v20 = vsel %vm14850_vm11, %v716_v28, %v723_v58  ;;  %v1957_v28 = vrot.slane %v1955_v43, 4  ;;  %v14293_v58 = vld [vmem:[#allocation2 + $0x2c] sm:$0x1] }
 0x14e   : > { %12749 = vmatprep.mubr.msk.bf16.mxu0 %vm1375_vm13, %v11483_v17  ;;  %885 = vst.msk [vmem:[#allocation2 + $0xc4] sm:$0xf] %vm298_vm0, %v724_v20  ;;  %v1935_v17 = vsel %vm15304_vm1, %v11511_v9, %v1934_v4  ;;  %v1958_v61 = vrot.slane %v14293_v58, 5  ;;  %v1965_v9 = vrot.slane %v14294_v3, 5  ;;  %v1997_v3 = vrot.slane %v15067_v10, 5 }
 0x14f   : > { %v2007_v10 = vrot.slane %v15086_v45, 5  ;;  %v2018_v45 = vrot.slane %v15151_v54, 5 }
 0x150   : > { %v1959_v20 = vsel %vm15304_vm1, %v1957_v28, %v1958_v61  ;;  %v14299_v28 = vld [vmem:[#allocation2 + $0x5c] sm:$0x1] }
 0x151   : > { %v1986_v58 = vrot.slane %v14299_v28, 5 }
 0x155   : > { %12750 = vmatmul.mubr.msk.bf16.gmra.mrb[8].mxu0 %vm1375_vm13, %v11484_v33  ;;  %v1882_v33 = vld [vmem:[#allocation2 + $0xc] sm:$0xe] }
 0x156   : > { %12753 = vmatprep.mubr.msk.bf16.mxu0 %vm1375_vm13, %v11485_v30  ;;  %v1883_v30 = vld [vmem:[#allocation2 + $0x18] sm:$0xe]  ;;  %v11512_v18 = vrot.slane %v1882_v33, 9 }
 0x157   : > { %v11513_v7 = vrot.slane %v1883_v30, 9  ;;  %v1887_v30 = vld [vmem:[#allocation2 + $0x48] sm:$0xe] }
 0x158   : > { %v1942_v42 = vsel %vm15304_vm1, %v11512_v18, %v1941_v21  ;;  %v11517_v27 = vrot.slane %v1887_v30, 9 }
 0x15d   : > { %12754 = vmatmul.mubr.msk.bf16.gmra.mrb[12].mxu0 %vm1375_vm13, %v11486_v12  ;;  %v1948_v12 = vrot.slane %v15244_v0, 5 }
 0x15e   : > { %12757 = vmatprep.mubr.msk.bf16.mxu0 %vm1375_vm13, %v11487_v63  ;;  %v14291_v63 = vld [vmem:[#allocation2 + $0x14] sm:$0x1] }
 0x15f   : > { %v1950_v59 = vrot.slane %v1948_v12, 4 }
 0x161   : > { %v1952_v4 = vsel %vm15304_vm1, %v1950_v59, %v1951_v5 }
 0x165   : > { %12758 = vmatmul.mubr.msk.bf16.gmra.mrb[16].mxu0 %vm1375_vm13, %v11488_v36  ;;  %v1944_v36 = vrot.slane %v14291_v63, 5 }
 0x166   : > { %12761 = vmatprep.mubr.msk.bf16.mxu0 %vm1375_vm13, %v11489_v40  ;;  %v11494_v40 = vcombine.low %v15216_v6, %v15218_v8  ;;  %v1949_v6 = vsel %vm15304_vm1, %v11513_v7, %v1948_v12  ;;  %v11530_v12 = vcombine.low %v1956_v23, %v1959_v20  ;;  %v14297_v7 = vld [vmem:[#allocation2 + $0x50] sm:$0x1]  ;;  %v1890_v20 = vld [vmem:[#allocation2 + $0x6c] sm:$0xe] }
 0x167   : > { %v11529_v53 = vcombine.low %v1949_v6, %v1952_v4  ;;  %v1979_v59 = vrot.slane %v14297_v7, 5  ;;  %v1888_v4 = vld [vmem:[#allocation2 + $0x54] sm:$0xe] }
 0x16d   : > { %12762 = vmatmul.mubr.msk.bf16.gmra.mrb[20].mxu0 %vm1375_vm13, %v11490_v49  ;;  %v11527_v49 = vcombine.low %v1935_v17, %v1938_v26  ;;  %v1886_v17 = vld [vmem:[#allocation2 + $0x3c] sm:$0xe]  ;;  %v14295_v26 = vld [vmem:[#allocation2 + $0x4c] sm:$0xf] }
 0x16e   : > { %12765 = vmatprep.mubr.msk.bf16.mxu0 %vm1375_vm13, %v11491_v24  ;;  %v1943_v24 = vrot.slane %v1941_v21, 4  ;;  %v1976_v33 = vrot.slane %v14295_v26, 5  ;;  %v1999_v26 = vrot.slane %v1997_v3, 4 }
 0x170   : > { %v1945_v0 = vsel %vm15304_vm1, %v1943_v24, %v1944_v36  ;;  %v11516_v36 = vrot.slane %v1886_v17, 9  ;;  %v1978_v24 = vrot.slane %v1976_v33, 4  ;;  %v1977_v43 = vsel %vm15304_vm1, %v11517_v27, %v1976_v33 }
 0x171   : > { %v11520_v17 = vrot.slane %v1890_v20, 9  ;;  %v2000_v33 = vrot.slane %v15075_v16, 5  ;;  %v414_v20 = vld [vmem:[#allocation2 + $0xc8] sm:$0x1] }
 0x172   : > { %v1970_v39 = vsel %vm15304_vm1, %v11516_v36, %v1969_v22  ;;  %v1980_v6 = vsel %vm15304_vm1, %v1978_v24, %v1979_v59  ;;  %v2011_v36 = vrot.slane %v15115_v38, 5  ;;  %v2021_v38 = vrot.slane %v15156_v60, 5 }
 0x173   : > { %v2001_v52 = vsel %vm15304_vm1, %v1999_v26, %v2000_v33  ;;  %v2032_v60 = vrot.slane %v15203_v37, 5  ;;  %v13943_v26 = vld [vmem:[#allocation2 + $0x18] sm:$0xff]  }
 0x174   : > { %v2013_v59 = vrot.slane %v2011_v36, 4 }
 0x175   : > { %12766 = vmatmul.mubr.msk.bf16.gmra.mrb[24].mxu0 %vm1375_vm13, %v11492_v35  ;;  %v11528_v35 = vcombine.low %v1942_v42, %v1945_v0  ;;  %v14298_v42 = vld [vmem:[#allocation2 + $0x58] sm:$0xf] }
 0x176   : > { %12769 = vmatprep.mubr.msk.bf16.mxu0 %vm1375_vm13, %v11493_v50  ;;  %v1964_v50 = vrot.slane %v1962_v32, 4  ;;  %v1983_v0 = vrot.slane %v14298_v42, 5  ;;  %v1889_v32 = vld [vmem:[#allocation2 + $0x60] sm:$0xe]  ;;  %v2020_v42 = vrot.slane %v2018_v45, 4 }
 0x177   : > { %v11519_v61 = vrot.slane %v1889_v32, 9 }
 0x178   : > { %v1966_v21 = vsel %vm15304_vm1, %v1964_v50, %v1965_v9  ;;  %v1985_v55 = vrot.slane %v1983_v0, 4 }
 0x179   : > { %v11531_v63 = vcombine.low %v1963_v11, %v1966_v21  ;;  %v1991_v9 = vsel %vm15304_vm1, %v11519_v61, %v1990_v44 }
 0x17a   : > { %v1987_v25 = vsel %vm15304_vm1, %v1985_v55, %v1986_v58  ;;  %v2028_v55 = vrot.slane %v15187_v56, 5  ;;  %v2034_v58 = vrot.slane %v2032_v60, 4 }
 0x17d   : > { %12770 = vmatmul.mubr.msk.bf16.gmra.mrb[28].mxu0 %vm1375_vm13, %v11494_v40  ;;  %v1971_v40 = vrot.slane %v1969_v22, 4  ;;  %v1891_v22 = vld [vmem:[#allocation2 + $0x78] sm:$0xe] }
 0x17e   : > { %12775 = vmatprep.mubr.msk.bf16.mxu0 %vm1375_vm13, %v11527_v49  ;;  %v14296_v49 = vld [vmem:[#allocation2 + $0x44] sm:$0x1]  ;;  %v11521_v30 = vrot.slane %v1891_v22, 9  ;;  %v415_v22 = vsel %vm14813_vm6, 0, %v414_v20 }
 0x17f   : > { %v1972_v18 = vrot.slane %v14296_v49, 5  ;;  %v1892_v49 = vld [vmem:[#allocation2 + $0x84] sm:$0xe]  ;;  %416 = vst [vmem:[#allocation2 + $0xc8] sm:$0x1] %v415_v22 }
 0x180   : > { %v11522_v7 = vrot.slane %v1892_v49, 9  ;;  %v15441_v49 = vld [vmem:[#allocation2 + $0x10] sm:$0xf] }
 0x181   : > { %v1973_v5 = vsel %vm15304_vm1, %v1971_v40, %v1972_v18  ;;  %v2005_v40 = vsel %vm15304_vm1, %v11521_v30, %v2004_v34  ;;  %v1893_v18 = vld [vmem:[#allocation2 + $0x90] sm:$0xe]  ;;  %v13944_v30 = vld [vmem:[#allocation2 + $0x24] sm:$0xff]  }
 0x182   : > { %v11532_v48 = vcombine.low %v1970_v39, %v1973_v5  ;;  %v2014_v39 = vrot.slane %v15122_v47, 5  ;;  %v11523_v5 = vrot.slane %v1893_v18, 9  ;;  %v2022_v47 = vsel %vm15304_vm1, %v2020_v42, %v2021_v38 }
 0x184   : > { %v2015_v54 = vsel %vm15304_vm1, %v2013_v59, %v2014_v39  ;;  %v2758_v59 = vshrl.u32 %v15441_v49, 16  ;;  %v2699_v39 = vld [vmem:[#allocation2 + $0x18] sm:$0xf] }
 0x185   : > { %12776 = vmatmul.mubr.msk.bf16.vlgmr.msra.gmra.mrb[0].mxu0 %vm1375_vm13, %v11528_v35  ;;  %v11533_v35 = vcombine.low %v1977_v43, %v1980_v6  ;;  %v2025_v43 = vrot.slane %v15181_v51, 5  ;;  %v2019_v6 = vsel %vm15304_vm1, %v11523_v5, %v2018_v45  ;;  %v2035_v51 = vrot.slane %v15197_v29, 5  ;;  %v13951_v45 = vld [vmem:[#allocation2 + $0x78] sm:$0xff]  }
 0x186   : > { %12808 = vmatpush3.bf16.msra.mxu0 %v2501_v62  ;;  %12779 = vmatprep.mubr.msk.bf16.mxu0 %vm1375_vm13, %v11529_v53  ;;  %v11518_v53 = vrot.slane %v1888_v4, 9  ;;  %v1992_v62 = vrot.slane %v1990_v44, 4  ;;  %v1894_v4 = vld [vmem:[#allocation2 + $0x9c] sm:$0xe]  ;;  %v1895_v44 = vld [vmem:[#allocation2 + $0xa8] sm:$0xe] }
 0x187   : > { %13833 = vmatprep.subr.msk.bf16.mxu0 %vm1424_vm4, %v15333_v14  ;;  %v11525_v28 = vrot.slane %v1895_v44, 9  ;;  %v2036_v56 = vsel %vm15304_vm1, %v2034_v58, %v2035_v51  ;;  %v15445_v5 = vld [vmem:[#allocation2 + $0x1c] sm:$0xf]  ;;  %v2702_v44 = vld [vmem:[#allocation2 + $0x24] sm:$0xf] }
 0x188   : > { %v1984_v50 = vsel %vm15304_vm1, %v11518_v53, %v1983_v0  ;;  %v1994_v23 = vsel %vm15304_vm1, %v1992_v62, %v1993_v13  ;;  %v2012_v0 = vsel %vm15304_vm1, %v11522_v7, %v2011_v36  ;;  %v2027_v53 = vrot.slane %v2025_v43, 4  ;;  %v13948_v36 = vld [vmem:[#allocation2 + $0x54] sm:$0xff]  }
 0x189   : > { %v11534_v11 = vcombine.low %v1984_v50, %v1987_v25  ;;  %v11535_v21 = vcombine.low %v1991_v9, %v1994_v23  ;;  %v11538_v32 = vcombine.low %v2012_v0, %v2015_v54  ;;  %v2039_v62 = vrot.slane %v15218_v8, 5  ;;  %v1896_v50 = vld [vmem:[#allocation2 + $0xb4] sm:$0xe] }
 0x18a   : > { %v2029_v37 = vsel %vm15304_vm1, %v2027_v53, %v2028_v55  ;;  %v2033_v13 = vsel %vm15304_vm1, %v11525_v28, %v2032_v60  ;;  %v2042_v23 = vrot.slane %v15224_v19, 5  ;;  %v725_v19 = vrot.slane %v15293_v46, 4  ;;  %v13945_v46 = vld [vmem:[#allocation2 + $0x30] sm:$0xff]   ;;  %v13954_v28 = vld [vmem:[#allocation2 + $0x9c] sm:$0xff]  }
 0x18b   : > { %v11541_v25 = vcombine.low %v2033_v13, %v2036_v56  ;;  %v2041_v9 = vrot.slane %v2039_v62, 4  ;;  %v2754_v7 = vshll.u32 %v15441_v49, 16  ;;  %v2769_v0 = vshrl.u32 %v2699_v39, 16 }
 0x18c   : > { %v2772_v54 = vshll.u32 %v2699_v39, 16  ;;  %v2782_v60 = vshrl.u32 %v15445_v5, 16  ;;  %v2793_v13 = vshrl.u32 %v2702_v44, 16  ;;  %v2796_v56 = vshll.u32 %v2702_v44, 16  ;;  %v2711_v39 = vld [vmem:[#allocation2 + $0x48] sm:$0xf] }
 0x18d   : > { %12780 = vmatmul.mubr.msk.bf16.gmra.mrb[4].mxu0 %vm1375_vm13, %v11530_v12  ;;  %v2006_v12 = vrot.slane %v2004_v34, 4  ;;  %v2043_v34 = vsel %vm15304_vm1, %v2041_v9, %v2042_v23  ;;  %v2771_v53 = vrot.slane %v2769_v0, 4  ;;  %v2705_v9 = vld [vmem:[#allocation2 + $0x30] sm:$0xf]  ;;  %v15467_v23 = vld [vmem:[#allocation2 + $0x34] sm:$0xf] }
 0x18e   : > { %12783 = vmatprep.mubr.msk.bf16.mxu0 %vm1375_vm13, %v11531_v63  ;;  %v1998_v63 = vsel %vm15304_vm1, %v11520_v17, %v1997_v3  ;;  %v11526_v3 = vrot.slane %v1896_v50, 9  ;;  %v886_v17 = vld [vmem:[#allocation2 + $0xc8] sm:$0x1]  ;;  %v2774_v55 = vrot.slane %v2772_v54, 5 }
 0x18f   : > { %v2008_v16 = vsel %vm15304_vm1, %v2006_v12, %v2007_v10  ;;  %v11536_v27 = vcombine.low %v1998_v63, %v2001_v52  ;;  %v887_v33 = vsel %vm14808_vm5, %v725_v19, %v886_v17  ;;  %v3227_v12 = vsel %vm1424_vm4, %v15333_v14, 0  ;;  %v15429_v10 = vld [vmem:[#allocation6 + $0xa] sm:$0x3]  ;;  %v13947_v52 = vld [vmem:[#allocation2 + $0x48] sm:$0xff]  }
 0x190   : > { %v11537_v24 = vcombine.low %v2005_v40, %v2008_v16  ;;  %v2040_v8 = vsel %vm15304_vm1, %v11526_v3, %v2039_v62  ;;  %888 = vst [vmem:[#allocation2 + $0xc8] sm:$0x1] %v887_v33  ;;  %v13946_v63 = vld [vmem:[#allocation2 + $0x3c] sm:$0xff]   ;;  %v13950_v40 = vld [vmem:[#allocation2 + $0x6c] sm:$0xff]   ;;  %v2784_v62 = vrot.slane %v2782_v60, 4  ;;  %v2798_v19 = vrot.slane %v2796_v56, 5 }
 0x191   : > { %v13949_v14 = vld [vmem:[#allocation2 + $0x60] sm:$0xff]   ;;  %v2696_v16 = vld [vmem:[#allocation2 + $0xc] sm:$0xf] }
 0x192   : > { %v2745_v18 = vshrl.u32 %v2696_v16, 16  ;;  %v15473_v33 = vld [vmem:[#allocation2 + $0x40] sm:$0xf] }
 0x194   : > { %v2747_v42 = vrot.slane %v2745_v18, 4  ;;  %v13956_v18 = vld [vmem:[#allocation2 + $0xb4] sm:$0xff]  }
 0x195   : > { %12784 = vmatmul.mubr.msk.bf16.gmra.mrb[8].mxu0 %vm1375_vm13, %v11532_v48  ;;  %v11539_v48 = vcombine.low %v2019_v6, %v2022_v47  ;;  %v15451_v6 = vrot.slane %v2754_v7, 5  ;;  %v2760_v47 = vrot.slane %v2758_v59, 4  ;;  %v2850_v7 = vshll.u32 %v15473_v33, 16 }
 0x196   : > { %12787 = vmatprep.mubr.msk.bf16.mxu0 %vm1375_vm13, %v11533_v35  ;;  %v11524_v35 = vrot.slane %v1894_v4, 9  ;;  %v2778_v4 = vshll.u32 %v15445_v5, 16  ;;  %v2854_v59 = vshrl.u32 %v15473_v33, 16 }
 0x197   : > { %v2761_v51 = vor.u32 %v2760_v47, %v15451_v6 }
 0x198   : > { %v2026_v61 = vsel %vm15304_vm1, %v11524_v35, %v2025_v43  ;;  %v15449_v43 = vld [vmem:[#allocation2 + $0x14] sm:$0x1] }
 0x199   : > { %v11540_v29 = vcombine.low %v2026_v61, %v2029_v37  ;;  %v2764_v35 = vshll.u32 %v15449_v43, 16  ;;  %v15459_v61 = vld [vmem:[#allocation2 + $0x20] sm:$0x1]  ;;  %v15461_v37 = vrot.slane %v2778_v4, 5 }
 0x19a   : > { %v2788_v3 = vshll.u32 %v15459_v61, 16 }
 0x19b   : > { %v2785_v22 = vor.u32 %v2784_v62, %v15461_v37  ;;  %v15499_v62 = vrot.slane %v2850_v7, 5 }
 0x19d   : > { %12788 = vmatmul.mubr.msk.bf16.gmra.mrb[12].mxu0 %vm1375_vm13, %v11534_v11  ;;  %v11542_v11 = vcombine.low %v2040_v8, %v2043_v34  ;;  %v2762_v8 = vrot.slane %v2761_v51, 4  ;;  %v2766_v34 = vrot.slane %v2764_v35, 5  ;;  %v15497_v51 = vld [vmem:[#allocation2 + $0x44] sm:$0x1] }
 0x19e   : > { %12791 = vmatprep.mubr.msk.bf16.mxu0 %vm1375_vm13, %v11535_v21  ;;  %v13942_v21 = vld [vmem:[#allocation2 + $0xc] sm:$0xff]  }
 0x1a5   : > { %12792 = vmatmul.mubr.msk.bf16.gmra.mrb[16].mxu0 %vm1375_vm13, %v11536_v27  ;;  %v2748_v27 = vshll.u32 %v2696_v16, 16 }
 0x1a6   : > { %12795 = vmatprep.mubr.msk.bf16.mxu0 %vm1375_vm13, %v11537_v24  ;;  %v13952_v24 = vld [vmem:[#allocation2 + $0x84] sm:$0xff]  }
 0x1a7   : > { %v2750_v38 = vrot.slane %v2748_v27, 5 }
 0x1a9   : > { %v2751_v58 = vor.u32 %v2750_v38, %v2747_v42  ;;  %v2786_v42 = vrot.slane %v2785_v22, 4  ;;  %v13957_v22 = vld [vmem:[#allocation2 + $0xc0] sm:$0xff]  }
 0x1ab   : > { %v2752_v20 = vrot.slane %v2751_v58, 4 }
 0x1ad   : > { %12796 = vmatmul.mubr.msk.bf16.gmra.mrb[20].mxu0 %vm1375_vm13, %v11538_v32  ;;  %v15455_v32 = vld [vmem:[#allocation2 + $0x28] sm:$0xf]  ;;  %v2757_v27 = vsel %vm14860_vm12, %v2752_v20, %v15451_v6  ;;  %v15491_v6 = vld [vmem:[#allocation2 + $0x38] sm:$0x1] }
 0x1ae   : > { %12799 = vmatprep.mubr.msk.bf16.mxu0 %vm1375_vm13, %v11539_v48  ;;  %v13953_v48 = vld [vmem:[#allocation2 + $0x90] sm:$0xff]   ;;  %v2802_v50 = vshll.u32 %v15455_v32, 16 }
 0x1b0   : > { %v15471_v17 = vrot.slane %v2802_v50, 5 }
 0x1b5   : > { %12800 = vmatmul.mubr.msk.bf16.gmra.mrb[24].mxu0 %vm1375_vm13, %v11540_v29  ;;  %v2806_v29 = vshrl.u32 %v15455_v32, 16 }
 0x1b6   : > { %12803 = vmatprep.mubr.msk.bf16.mxu0 %vm1375_vm13, %v11541_v25  ;;  %v2775_v25 = vor.u32 %v2774_v55, %v2771_v53  ;;  %v2865_v53 = vshrl.u32 %v2711_v39, 16  ;;  %v2868_v55 = vshll.u32 %v2711_v39, 16 }
 0x1bd   : > { %12804 = vmatmul.mubr.msk.bf16.gmra.mrb[28].mxu0 %vm1375_vm13, %v11542_v11  ;;  %v2708_v11 = vld [vmem:[#allocation2 + $0x3c] sm:$0xf] }
 0x1be   : > { %12809 = vmatprep.mubr.msk.bf16.mxu0 %vm1375_vm13, %v13942_v21  ;;  %v2795_v21 = vrot.slane %v2793_v13, 4  ;;  %v2841_v16 = vshrl.u32 %v2708_v11, 16  ;;  %v2856_v13 = vrot.slane %v2854_v59, 4  ;;  %v2717_v59 = vld [vmem:[#allocation2 + $0x60] sm:$0xf] }
 0x1c0   : > { %v2799_v38 = vor.u32 %v2798_v19, %v2795_v21  ;;  %v2860_v21 = vshll.u32 %v15497_v51, 16  ;;  %v2867_v19 = vrot.slane %v2865_v53, 4  ;;  %v2913_v53 = vshrl.u32 %v2717_v59, 16 }
 0x1c2   : > { %v2800_v50 = vrot.slane %v2799_v38, 4  ;;  %v2862_v38 = vrot.slane %v2860_v21, 5  ;;  %v2720_v21 = vld [vmem:[#allocation2 + $0x6c] sm:$0xf] }
 0x1c5   : > { %12810 = vmatmul.mubr.msk.bf16.vlgmr.msra.gmra.mrb[0].mxu0 %vm1375_vm13, %v13943_v26  ;;  %v2808_v26 = vrot.slane %v2806_v29, 4 }
 0x1c6   : > { %12842 = vmatpush3.bf16.msra.mxu0 %v3227_v12  ;;  %12813 = vmatprep.mubr.msk.bf16.mxu0 %vm1375_vm13, %v13944_v30  ;;  %v15475_v30 = vld [vmem:[#allocation2 + $0x2c] sm:$0x1]  ;;  %v2817_v12 = vshrl.u32 %v2705_v9, 16 }
 0x1c7   : > { %13834 = vmatprep.subr.msk.bf16.mxu0 %vm1424_vm4, %v15429_v10  ;;  %v2809_v0 = vor.u32 %v2808_v26, %v15471_v17  ;;  %v2812_v54 = vshll.u32 %v15475_v30, 16  ;;  %v2870_v26 = vrot.slane %v2868_v55, 5  ;;  %v2916_v55 = vshll.u32 %v2717_v59, 16 }
 0x1c8   : > { %v2819_v47 = vrot.slane %v2817_v12, 4  ;;  %v15512_v12 = vld [vmem:[#allocation2 + $0x58] sm:$0xf] }
 0x1c9   : > { %v2810_v29 = vrot.slane %v2809_v0, 4  ;;  %v2902_v7 = vshrl.u32 %v15512_v12, 16  ;;  %v15527_v0 = vld [vmem:[#allocation2 + $0x64] sm:$0xf] }
 0x1cd   : > { %12814 = vmatmul.mubr.msk.bf16.gmra.mrb[4].mxu0 %vm1375_vm13, %v13945_v46  ;;  %v2820_v46 = vshll.u32 %v2705_v9, 16  ;;  %v15507_v9 = vsel %vm1424_vm4, %v15429_v10, 0 }
 0x1ce   : > { %12817 = vmatprep.mubr.msk.bf16.mxu0 %vm1375_vm13, %v13946_v63  ;;  %v2826_v63 = vshll.u32 %v15467_v23, 16 }
 0x1cf   : > { %v2822_v4 = vrot.slane %v2820_v46, 5 }
 0x1d0   : > { %v15488_v60 = vrot.slane %v2826_v63, 5  ;;  %v2857_v63 = vor.u32 %v2856_v13, %v15499_v62 }
 0x1d1   : > { %v2823_v20 = vor.u32 %v2822_v4, %v2819_v47 }
 0x1d5   : > { %12818 = vmatmul.mubr.msk.bf16.gmra.mrb[8].mxu0 %vm1375_vm13, %v13947_v52  ;;  %v2830_v52 = vshrl.u32 %v15467_v23, 16 }
 0x1d6   : > { %12821 = vmatprep.mubr.msk.bf16.mxu0 %vm1375_vm13, %v13948_v36  ;;  %v13955_v36 = vld [vmem:[#allocation2 + $0xa8] sm:$0xff]  }
 0x1d7   : > { %v2832_v44 = vrot.slane %v2830_v52, 4 }
 0x1dd   : > { %12822 = vmatmul.mubr.msk.bf16.gmra.mrb[12].mxu0 %vm1375_vm13, %v13949_v14  ;;  %v2776_v14 = vrot.slane %v2775_v25, 4  ;;  %v2814_v25 = vrot.slane %v2812_v54, 5  ;;  %v2858_v54 = vrot.slane %v2857_v63, 4  ;;  %v2915_v63 = vrot.slane %v2913_v53, 4 }
 0x1de   : > { %12825 = vmatprep.mubr.msk.bf16.mxu0 %vm1375_vm13, %v13950_v40  ;;  %v2790_v40 = vrot.slane %v2788_v3, 5  ;;  %v15503_v3 = vld [vmem:[#allocation2 + $0x4c] sm:$0xf] }
 0x1df   : > { %v2781_v58 = vsel %vm14860_vm12, %v2776_v14, %v15461_v37  ;;  %v2833_v37 = vor.u32 %v2832_v44, %v15488_v60  ;;  %v2874_v10 = vshll.u32 %v15503_v3, 16  ;;  %v2878_v52 = vshrl.u32 %v15503_v3, 16 }
 0x1e0   : > { %v2791_v56 = vsel %vm14860_vm12, %v2786_v42, %v2790_v40  ;;  %v2815_v14 = vsel %vm14860_vm12, %v2810_v29, %v2814_v25  ;;  %v15522_v40 = vld [vmem:[#allocation2 + $0x50] sm:$0x1]  ;;  %v2926_v29 = vshrl.u32 %v15527_v0, 16 }
 0x1e1   : > { %v11592_v46 = vcombine.low %v2781_v58, %v2791_v56  ;;  %v2834_v39 = vrot.slane %v2833_v37, 4  ;;  %v15530_v47 = vrot.slane %v2874_v10, 5  ;;  %v2880_v4 = vrot.slane %v2878_v52, 4  ;;  %v15533_v58 = vld [vmem:[#allocation2 + $0x5c] sm:$0x1] }
 0x1e2   : > { %v2884_v44 = vshll.u32 %v15522_v40, 16  ;;  %v2904_v56 = vrot.slane %v2902_v7, 4  ;;  %v2918_v10 = vrot.slane %v2916_v55, 5  ;;  %v2723_v52 = vld [vmem:[#allocation2 + $0x78] sm:$0xf]  ;;  %v2940_v7 = vshll.u32 %v2720_v21, 16 }
 0x1e4   : > { %v2919_v53 = vor.u32 %v2918_v10, %v2915_v63  ;;  %v15592_v10 = vld [vmem:[#allocation2 + $0x88] sm:$0xf] }
 0x1e5   : > { %12826 = vmatmul.mubr.msk.bf16.gmra.mrb[16].mxu0 %vm1375_vm13, %v13951_v45  ;;  %v2844_v45 = vshll.u32 %v2708_v11, 16 }
 0x1e6   : > { %12829 = vmatprep.mubr.msk.bf16.mxu0 %vm1375_vm13, %v13952_v24  ;;  %v2767_v24 = vsel %vm14860_vm12, %v2762_v8, %v2766_v34  ;;  %v2836_v8 = vshll.u32 %v15491_v6, 16  ;;  %v2714_v34 = vld [vmem:[#allocation2 + $0x54] sm:$0xf] }
 0x1e7   : > { %v2846_v35 = vrot.slane %v2844_v45, 5  ;;  %v2892_v45 = vshll.u32 %v2714_v34, 16 }
 0x1ed   : > { %12830 = vmatmul.mubr.msk.bf16.gmra.mrb[20].mxu0 %vm1375_vm13, %v13953_v48  ;;  %v2843_v48 = vrot.slane %v2841_v16, 4  ;;  %v2889_v16 = vshrl.u32 %v2714_v34, 16 }
 0x1ee   : > { %12833 = vmatprep.mubr.msk.bf16.mxu0 %vm1375_vm13, %v13954_v28  ;;  %v11591_v28 = vcombine.low %v2757_v27, %v2767_v24  ;;  %v2838_v27 = vrot.slane %v2836_v8, 5  ;;  %v2898_v24 = vshll.u32 %v15512_v12, 16  ;;  %v2863_v8 = vsel %vm14860_vm12, %v2858_v54, %v2862_v38 }
 0x1ef   : > { %v2847_v11 = vor.u32 %v2846_v35, %v2843_v48  ;;  %v2891_v48 = vrot.slane %v2889_v16, 4  ;;  %v2894_v35 = vrot.slane %v2892_v45, 5  ;;  %v2928_v16 = vrot.slane %v2926_v29, 4  ;;  %v15560_v45 = vld [vmem:[#allocation2 + $0x7c] sm:$0xf] }
 0x1f0   : > { %v15535_v13 = vrot.slane %v2898_v24, 5  ;;  %v2937_v24 = vshrl.u32 %v2720_v21, 16  ;;  %v2964_v54 = vshll.u32 %v2723_v52, 16 }
 0x1f1   : > { %v2848_v42 = vrot.slane %v2847_v11, 4  ;;  %v15552_v11 = vrot.slane %v2884_v44, 5 }
 0x1f2   : > { %v2939_v29 = vrot.slane %v2937_v24, 4  ;;  %v2920_v24 = vrot.slane %v2919_v53, 4 }
 0x1f3   : > { %v2853_v37 = vsel %vm14860_vm12, %v2848_v42, %v15499_v62  ;;  %v2905_v62 = vor.u32 %v2904_v56, %v15535_v13  ;;  %v2726_v56 = vld [vmem:[#allocation2 + $0x84] sm:$0xf] }
 0x1f4   : > { %v11595_v42 = vcombine.low %v2853_v37, %v2863_v8 }
 0x1f5   : > { %12834 = vmatmul.mubr.msk.bf16.gmra.mrb[24].mxu0 %vm1375_vm13, %v13955_v36  ;;  %v2805_v36 = vsel %vm14860_vm12, %v2800_v50, %v15471_v17  ;;  %v2871_v17 = vor.u32 %v2870_v26, %v2867_v19  ;;  %v2922_v50 = vshll.u32 %v15527_v0, 16  ;;  %v15554_v19 = vld [vmem:[#allocation2 + $0x70] sm:$0xf]  ;;  %v2908_v26 = vshll.u32 %v15533_v58, 16 }
 0x1f6   : > { %12837 = vmatprep.mubr.msk.bf16.mxu0 %vm1375_vm13, %v13956_v18  ;;  %v2824_v18 = vrot.slane %v2823_v20, 4  ;;  %v2839_v20 = vsel %vm14860_vm12, %v2834_v39, %v2838_v27  ;;  %v15565_v27 = vld [vmem:[#allocation2 + $0x68] sm:$0x1]  ;;  %v2946_v59 = vshll.u32 %v15554_v19, 16  ;;  %v2950_v39 = vshrl.u32 %v15554_v19, 16 }
 0x1f7   : > { %v15549_v34 = vrot.slane %v2871_v17, 4  ;;  %v2961_v17 = vshrl.u32 %v2723_v52, 16  ;;  %v2910_v44 = vrot.slane %v2908_v26, 5  ;;  %v2985_v52 = vshrl.u32 %v2726_v56, 16 }
 0x1f8   : > { %v2829_v25 = vsel %vm14860_vm12, %v2824_v18, %v15488_v60  ;;  %v2895_v60 = vor.u32 %v2894_v35, %v2891_v48  ;;  %v15562_v18 = vld [vmem:[#allocation6 + $0xc] sm:$0x3]  ;;  %v2974_v48 = vshrl.u32 %v15560_v45, 16  ;;  %v2906_v35 = vrot.slane %v2905_v62, 4 }
 0x1f9   : > { %v2877_v37 = vsel %vm14860_vm12, %v15549_v34, %v15530_v47  ;;  %v2963_v21 = vrot.slane %v2961_v17, 4  ;;  %v2988_v62 = vshll.u32 %v2726_v56, 16  ;;  %v2994_v17 = vshll.u32 %v15592_v10, 16 }
 0x1fa   : > { %v2976_v63 = vrot.slane %v2974_v48, 4  ;;  %v2729_v48 = vld [vmem:[#allocation2 + $0x90] sm:$0xf] }
 0x1fd   : > { %12838 = vmatmul.mubr.msk.bf16.gmra.mrb[28].mxu0 %vm1375_vm13, %v13957_v22  ;;  %v2881_v22 = vor.u32 %v2880_v4, %v15530_v47  ;;  %v2896_v4 = vrot.slane %v2895_v60, 4  ;;  %v2966_v60 = vrot.slane %v2964_v54, 5  ;;  %v2911_v47 = vsel %vm14860_vm12, %v2906_v35, %v2910_v44 }
 0x1fe   : > { %12843 = vmatprep.mubr.msk.bf16.mxu0 %vm1375_vm13, %v11591_v28  ;;  %v11593_v28 = vcombine.low %v2805_v36, %v2815_v14  ;;  %v11594_v36 = vcombine.low %v2829_v25, %v2839_v20  ;;  %v15558_v14 = vrot.slane %v2922_v50, 5  ;;  %v15577_v50 = vld [vmem:[#allocation2 + $0x74] sm:$0x1]  ;;  %v15579_v25 = vrot.slane %v2946_v59, 5 }
 0x1ff   : > { %v2882_v38 = vrot.slane %v2881_v22, 4  ;;  %v2952_v20 = vrot.slane %v2950_v39, 4  ;;  %v15588_v22 = vld [vmem:[#allocation2 + $0x80] sm:$0x1]  ;;  %v2967_v54 = vor.u32 %v2966_v60, %v2963_v21  ;;  %v2987_v44 = vrot.slane %v2985_v52, 4 }
 0x200   : > { %v2929_v55 = vor.u32 %v2928_v16, %v15558_v14  ;;  %v2901_v16 = vsel %vm14860_vm12, %v2896_v4, %v15535_v13  ;;  %v2998_v13 = vshrl.u32 %v15592_v10, 16  ;;  %v3009_v60 = vshrl.u32 %v2729_v48, 16 }
 0x201   : > { %v2887_v8 = vsel %vm14860_vm12, %v2882_v38, %v15552_v11  ;;  %v2956_v11 = vshll.u32 %v15577_v50, 16  ;;  %v2953_v39 = vor.u32 %v2952_v20, %v15579_v25  ;;  %v2980_v38 = vshll.u32 %v15588_v22, 16 }
 0x202   : > { %v11597_v35 = vcombine.low %v2901_v16, %v2911_v47  ;;  %v15614_v20 = vrot.slane %v2994_v17, 5  ;;  %v3000_v21 = vrot.slane %v2998_v13, 4  ;;  %v15618_v16 = vld [vmem:[#allocation2 + $0x8c] sm:$0x1] }
 0x203   : > { %v2958_v53 = vrot.slane %v2956_v11, 5  ;;  %v2954_v56 = vrot.slane %v2953_v39, 4  ;;  %v3004_v13 = vshll.u32 %v15618_v16, 16 }
 0x204   : > { %v3001_v17 = vor.u32 %v3000_v21, %v15614_v20  ;;  %v15642_v21 = vld [vmem:[#allocation2 + $0xa4] sm:$0x1] }
 0x205   : > { %12844 = vmatmul.mubr.msk.bf16.vlgmr.msra.gmra.mrb[0].mxu0 %vm1375_vm13, %v11592_v46  ;;  %v2970_v46 = vshll.u32 %v15560_v45, 16  ;;  %18801 = vst [vmem:[#allocation22_spill] sm:$0xff] %v15642_v21 }
 0x206   : > { %12876 = vmatpush3.bf16.msra.mxu0 %v15507_v9  ;;  %12847 = vmatprep.mubr.msk.bf16.mxu0 %vm1375_vm13, %v11593_v28  ;;  %v2932_v9 = vshll.u32 %v15565_v27, 16  ;;  %v2942_v28 = vrot.slane %v2940_v7, 5  ;;  %v2930_v7 = vrot.slane %v2929_v55, 4  ;;  %v2925_v55 = vsel %vm14860_vm12, %v2920_v24, %v15558_v14 }
 0x207   : > { %13835 = vmatprep.subr.msk.bf16.mxu0 %vm1424_vm4, %v15562_v18  ;;  %v15590_v26 = vrot.slane %v2970_v46, 5  ;;  %v2990_v46 = vrot.slane %v2988_v62, 5  ;;  %v2982_v62 = vrot.slane %v2980_v38, 5 }
 0x208   : > { %v2934_v34 = vrot.slane %v2932_v9, 5  ;;  %v2943_v59 = vor.u32 %v2942_v28, %v2939_v29  ;;  %v15612_v29 = vld [vmem:[#allocation2 + $0x94] sm:$0xf]  ;;  %v2732_v28 = vld [vmem:[#allocation2 + $0x9c] sm:$0xf] }
 0x209   : > { %v2977_v4 = vor.u32 %v2976_v63, %v15590_v26  ;;  %v3012_v63 = vshll.u32 %v2729_v48, 16  ;;  %v2991_v14 = vor.u32 %v2990_v46, %v2987_v44  ;;  %v3018_v47 = vshll.u32 %v15612_v29, 16  ;;  %v15638_v48 = vld [vmem:[#allocation2 + $0x98] sm:$0x1] }
 0x20a   : > { %v2944_v9 = vrot.slane %v2943_v59, 4  ;;  %v3033_v11 = vshrl.u32 %v2732_v28, 16  ;;  %v3036_v24 = vshll.u32 %v2732_v28, 16  ;;  %v2959_v59 = vsel %vm14860_vm12, %v2954_v56, %v2958_v53  ;;  %18800 = vst [vmem:[#allocation21_spill] sm:$0xff] %v15638_v48 }
 0x20b   : > { %v2978_v52 = vrot.slane %v2977_v4, 4  ;;  %v3014_v4 = vrot.slane %v3012_v63, 5  ;;  %v2992_v46 = vrot.slane %v2991_v14, 4 }
 0x20d   : > { %12848 = vmatmul.mubr.msk.bf16.gmra.mrb[4].mxu0 %vm1375_vm13, %v11594_v36  ;;  %v11596_v36 = vcombine.low %v2877_v37, %v2887_v8  ;;  %v15616_v37 = vld [vmem:[#allocation2 + $0xa0] sm:$0xf]  ;;  %v2968_v8 = vrot.slane %v2967_v54, 4  ;;  %v3011_v54 = vrot.slane %v3009_v60, 4 }
 0x20e   : > { %12851 = vmatprep.mubr.msk.bf16.mxu0 %vm1375_vm13, %v11595_v42  ;;  %v2935_v42 = vsel %vm14860_vm12, %v2930_v7, %v2934_v34  ;;  %v3022_v34 = vshrl.u32 %v15612_v29, 16  ;;  %v2949_v7 = vsel %vm14860_vm12, %v2944_v9, %v15579_v25  ;;  %v3042_v39 = vshll.u32 %v15616_v37, 16 }
 0x20f   : > { %v3046_v38 = vshrl.u32 %v15616_v37, 16  ;;  %v2973_v44 = vsel %vm14860_vm12, %v2968_v8, %v15590_v26  ;;  %v2983_v25 = vsel %vm14860_vm12, %v2978_v52, %v2982_v62  ;;  %v3038_v9 = vrot.slane %v3036_v24, 5  ;;  %v15647_v62 = vld [vmem:[#allocation2 + $0xac] sm:$0xf]  ;;  %v15651_v24 = vld [vmem:[#allocation2 + $0xb8] sm:$0xf] }
 0x210   : > { %v3024_v53 = vrot.slane %v3022_v34, 4  ;;  %v11598_v56 = vcombine.low %v2925_v55, %v2935_v42  ;;  %v11599_v28 = vcombine.low %v2949_v7, %v2959_v59  ;;  %v15644_v60 = vrot.slane %v3042_v39, 5  ;;  %18802 = vst [vmem:[#allocation23_spill] sm:$0xff] %v15647_v62 }
 0x211   : > { %v3048_v63 = vrot.slane %v3046_v38, 4  ;;  %v3002_v26 = vrot.slane %v3001_v17, 4  ;;  %v3006_v8 = vrot.slane %v3004_v13, 5  ;;  %v3015_v31 = vor.u32 %v3014_v4, %v3011_v54 }
 0x212   : > { %v3028_v52 = vshll.u32 %v15638_v48, 16  ;;  %v11600_v14 = vcombine.low %v2973_v44, %v2983_v25  ;;  %v3052_v55 = vshll.u32 %v15642_v21, 16  ;;  %v3057_v42 = vshrl.u32 %v2735_v41, 16  ;;  %v15667_v48 = vld [vmem:[#allocation2 + $0xc4] sm:$0xf] }
 0x213   : > { %v3049_v7 = vor.u32 %v3048_v63, %v15644_v60  ;;  %v3060_v59 = vshll.u32 %v2735_v41, 16  ;;  %v3066_v39 = vshll.u32 %v15647_v62, 16  ;;  %v3070_v38 = vshrl.u32 %v15647_v62, 16 }
 0x214   : > { %v2997_v17 = vsel %vm14860_vm12, %v2992_v46, %v15614_v20  ;;  %v3007_v13 = vsel %vm14860_vm12, %v3002_v26, %v3006_v8  ;;  %v3016_v54 = vrot.slane %v3015_v31, 4  ;;  %v3030_v4 = vrot.slane %v3028_v52, 5  ;;  %v2741_v26 = vld [vmem:[#allocation2 + $0xc0] sm:$0xf] }
 0x215   : > { %12852 = vmatmul.mubr.msk.bf16.gmra.mrb[8].mxu0 %vm1375_vm13, %v11596_v36  ;;  %v15640_v36 = vrot.slane %v3018_v47, 5  ;;  %v3094_v41 = vshrl.u32 %v15651_v24, 16  ;;  %v3059_v63 = vrot.slane %v3057_v42, 4  ;;  %v3062_v62 = vrot.slane %v3060_v59, 5  ;;  %v15675_v42 = vld [vmem:[#allocation2 + $0xbc] sm:$0x1] }
 0x216   : > { %12855 = vmatprep.mubr.msk.bf16.mxu0 %vm1375_vm13, %v11597_v35  ;;  %v3035_v35 = vrot.slane %v3033_v11, 4  ;;  %v2738_v11 = vld [vmem:[#allocation2 + $0xb4] sm:$0xf]  ;;  %v3068_v20 = vrot.slane %v3066_v39, 5  ;;  %v3072_v46 = vrot.slane %v3070_v38, 4  ;;  %v11601_v21 = vcombine.low %v2997_v17, %v3007_v13 }
 0x217   : > { %v3025_v47 = vor.u32 %v3024_v53, %v15640_v36  ;;  %v3081_v44 = vshrl.u32 %v2738_v11, 16  ;;  %v3084_v25 = vshll.u32 %v2738_v11, 16  ;;  %v3090_v53 = vshll.u32 %v15651_v24, 16 }
 0x218   : > { %v3039_v34 = vor.u32 %v3038_v9, %v3035_v35  ;;  %v3096_v11 = vrot.slane %v3094_v41, 4  ;;  %v3063_v39 = vor.u32 %v3062_v62, %v3059_v63  ;;  %v3073_v38 = vor.u32 %v3072_v46, %v3068_v20 }
 0x219   : > { %v3026_v35 = vrot.slane %v3025_v47, 4  ;;  %v3083_v31 = vrot.slane %v3081_v44, 4  ;;  %v3086_v8 = vrot.slane %v3084_v25, 5  ;;  %v3092_v52 = vrot.slane %v3090_v53, 5 }
 0x21a   : > { %v3040_v9 = vrot.slane %v3039_v34, 4  ;;  %v3021_v47 = vsel %vm14860_vm12, %v3016_v54, %v15640_v36  ;;  %v3105_v36 = vshrl.u32 %v2741_v26, 16  ;;  %v3108_v17 = vshll.u32 %v2741_v26, 16  ;;  %v15687_v26 = vld [vmem:[#allocation2 + $0xc8] sm:$0x1] }
 0x21b   : > { %v3031_v34 = vsel %vm14860_vm12, %v3026_v35, %v3030_v4  ;;  %v3114_v13 = vshll.u32 %v15667_v48, 16  ;;  %v3118_v54 = vshrl.u32 %v15667_v48, 16  ;;  %v3087_v4 = vor.u32 %v3086_v8, %v3083_v31 }
 0x21c   : > { %v3097_v44 = vor.u32 %v3096_v11, %v3092_v52  ;;  %v11602_v25 = vcombine.low %v3021_v47, %v3031_v34  ;;  %v3074_v41 = vrot.slane %v3073_v38, 4  ;;  %v3110_v62 = vrot.slane %v3108_v17, 5 }
 0x21d   : > { %12856 = vmatmul.mubr.msk.bf16.gmra.mrb[12].mxu0 %vm1375_vm13, %v11598_v56  ;;  %v3054_v56 = vrot.slane %v3052_v55, 5  ;;  %v3076_v55 = vshll.u32 %v15665_v2, 16  ;;  %v3120_v63 = vrot.slane %v3118_v54, 4  ;;  %v3124_v34 = vshll.u32 %v15687_v26, 16  ;;  %v361_v54 = vld [vmem:[#allocation2 + $0xcc] sm:$0x1] }
 0x21e   : > { %12859 = vmatprep.mubr.msk.bf16.mxu0 %vm1375_vm13, %v11599_v28  ;;  %v3050_v28 = vrot.slane %v3049_v7, 4  ;;  %v3045_v7 = vsel %vm14860_vm12, %v3040_v9, %v15644_v60  ;;  %v3064_v60 = vrot.slane %v3063_v39, 4  ;;  %v3107_v9 = vrot.slane %v3105_v36, 4  ;;  %v3422_v39 = vld [vmem:[#allocation2 + $0xc] sm:$0xe] }
 0x21f   : > { %v3078_v35 = vrot.slane %v3076_v55, 5 }
 0x220   : > { %v3055_v59 = vsel %vm14860_vm12, %v3050_v28, %v3054_v56  ;;  %v3116_v56 = vrot.slane %v3114_v13, 5  ;;  %v3098_v28 = vrot.slane %v3097_v44, 4  ;;  %v3069_v31 = vsel %vm14860_vm12, %v3064_v60, %v3068_v20 }
 0x221   : > { %v11603_v53 = vcombine.low %v3045_v7, %v3055_v59  ;;  %v3079_v8 = vsel %vm14860_vm12, %v3074_v41, %v3078_v35  ;;  %v3111_v11 = vor.u32 %v3110_v62, %v3107_v9  ;;  %v3488_v59 = vrot.slane %v15441_v49, 5  ;;  %v3423_v41 = vld [vmem:[#allocation2 + $0x18] sm:$0xe]  ;;  %v3424_v9 = vld [vmem:[#allocation2 + $0x24] sm:$0xe] }
 0x222   : > { %v3121_v47 = vor.u32 %v3120_v63, %v3116_v56  ;;  %v11604_v38 = vcombine.low %v3069_v31, %v3079_v8  ;;  %v3126_v13 = vrot.slane %v3124_v34, 5  ;;  %v3502_v35 = vrot.slane %v15455_v32, 5  ;;  %v3425_v34 = vld [vmem:[#allocation2 + $0x30] sm:$0xe] }
 0x223   : > { %v3112_v36 = vrot.slane %v3111_v11, 4  ;;  %v3490_v44 = vrot.slane %v3488_v59, 4  ;;  %v3509_v11 = vrot.slane %v15467_v23, 5 }
 0x224   : > { %v3122_v17 = vrot.slane %v3121_v47, 4  ;;  %v3504_v31 = vrot.slane %v3502_v35, 4 }
 0x225   : > { %12860 = vmatmul.mubr.msk.bf16.gmra.mrb[16].mxu0 %vm1375_vm13, %v11600_v14  ;;  %v3100_v14 = vshll.u32 %v15675_v42, 16  ;;  %v3117_v49 = vsel %vm14860_vm12, %v3112_v36, %v3116_v56  ;;  %v3498_v56 = vrot.slane %v15459_v61, 5  ;;  %v4056_v36 = vsel %vm1424_vm4, %v15562_v18, 0 }
 0x226   : > { %12863 = vmatprep.mubr.msk.bf16.mxu0 %vm1375_vm13, %v11601_v21  ;;  %v3088_v21 = vrot.slane %v3087_v4, 4  ;;  %v11623_v4 = vrot.slane %v3422_v39, 9  ;;  %v11626_v39 = vrot.slane %v3425_v34, 9 }
 0x227   : > { %v3102_v46 = vrot.slane %v3100_v14, 5  ;;  %v3491_v14 = vrot.slane %v15449_v43, 5 }
 0x228   : > { %v3093_v55 = vsel %vm14860_vm12, %v3088_v21, %v3092_v52  ;;  %v3127_v52 = vsel %vm14860_vm12, %v3122_v17, %v3126_v13  ;;  %v3489_v60 = vsel %vm15304_vm1, %v11623_v4, %v3488_v59  ;;  %v11624_v21 = vrot.slane %v3423_v41, 9 }
 0x229   : > { %v3103_v7 = vsel %vm14860_vm12, %v3098_v28, %v3102_v46  ;;  %v3492_v43 = vsel %vm15304_vm1, %v3490_v44, %v3491_v14  ;;  %v11606_v62 = vcombine.low %v3117_v49, %v3127_v52  ;;  %v11625_v46 = vrot.slane %v3424_v9, 9  ;;  %v3427_v44 = vld [vmem:[#allocation2 + $0x48] sm:$0xe] }
 0x22a   : > { %v11605_v20 = vcombine.low %v3093_v55, %v3103_v7  ;;  %v11639_v63 = vcombine.low %v3489_v60, %v3492_v43  ;;  %v3426_v55 = vld [vmem:[#allocation2 + $0x3c] sm:$0xe]  ;;  %v3519_v13 = vrot.slane %v15497_v51, 5  ;;  %v3523_v4 = vrot.slane %v15503_v3, 5 }
 0x22b   : > { %v3503_v47 = vsel %vm15304_vm1, %v11625_v46, %v3502_v35  ;;  %v11627_v23 = vrot.slane %v3426_v55, 9  ;;  %v3530_v14 = vrot.slane %v15512_v12, 5  ;;  %v3526_v43 = vrot.slane %v15522_v40, 5  ;;  %v3432_v55 = vld [vmem:[#allocation2 + $0x84] sm:$0xe] }
 0x22c   : > { %v3525_v60 = vrot.slane %v3523_v4, 4  ;;  %v3533_v35 = vrot.slane %v15533_v58, 5  ;;  %v3544_v58 = vrot.slane %v15554_v19, 5 }
 0x22d   : > { %12864 = vmatmul.mubr.msk.bf16.gmra.mrb[20].mxu0 %vm1375_vm13, %v11602_v25  ;;  %v362_v25 = vsel %vm14808_vm5, 0, %v361_v54  ;;  %v15734_v54 = vld [vmem:[#allocation6 + $0xe] sm:$0x3]  ;;  %v3532_v41 = vrot.slane %v3530_v14, 4 }
 0x22e   : > { %12867 = vmatprep.mubr.msk.bf16.mxu0 %vm1375_vm13, %v11603_v53  ;;  %363 = vst [vmem:[#allocation2 + $0xcc] sm:$0x1] %v362_v25  ;;  %v3495_v53 = vrot.slane %v15445_v5, 5  ;;  %v3505_v5 = vrot.slane %v15475_v30, 5  ;;  %v3516_v30 = vrot.slane %v15473_v33, 5  ;;  %v3510_v33 = vsel %vm15304_vm1, %v11626_v39, %v3509_v11 }
 0x22f   : > { %v3428_v25 = vld [vmem:[#allocation2 + $0x54] sm:$0xe]  ;;  %v3527_v9 = vsel %vm15304_vm1, %v3525_v60, %v3526_v43  ;;  %v3534_v40 = vsel %vm15304_vm1, %v3532_v41, %v3533_v35  ;;  %v18804_v60 = vld [vmem:[#allocation22_spill] sm:$0xff] }
 0x230   : > { %v3497_v28 = vrot.slane %v3495_v53, 4  ;;  %v3496_v8 = vsel %vm15304_vm1, %v11624_v21, %v3495_v53  ;;  %v3506_v61 = vsel %vm15304_vm1, %v3504_v31, %v3505_v5  ;;  %v3518_v17 = vrot.slane %v3516_v30, 4  ;;  %v3429_v21 = vld [vmem:[#allocation2 + $0x60] sm:$0xe] }
 0x231   : > { %v11641_v59 = vcombine.low %v3503_v47, %v3506_v61  ;;  %v3517_v18 = vsel %vm15304_vm1, %v11627_v23, %v3516_v30  ;;  %v11628_v53 = vrot.slane %v3427_v44, 9  ;;  %v11629_v3 = vrot.slane %v3428_v25, 9  ;;  %v3431_v30 = vld [vmem:[#allocation2 + $0x78] sm:$0xe]  ;;  %v18803_v25 = vld [vmem:[#allocation21_spill] sm:$0xff] }
 0x232   : > { %v3499_v32 = vsel %vm15304_vm1, %v3497_v28, %v3498_v56  ;;  %v3520_v51 = vsel %vm15304_vm1, %v3518_v17, %v3519_v13  ;;  %v3430_v28 = vld [vmem:[#allocation2 + $0x6c] sm:$0xe]  ;;  %v11630_v31 = vrot.slane %v3429_v21, 9  ;;  %v3551_v61 = vrot.slane %v15560_v45, 5 }
 0x233   : > { %v11640_v7 = vcombine.low %v3496_v8, %v3499_v32  ;;  %v11643_v52 = vcombine.low %v3517_v18, %v3520_v51  ;;  %v3524_v12 = vsel %vm15304_vm1, %v11628_v53, %v3523_v4  ;;  %v3540_v8 = vrot.slane %v15565_v27, 5  ;;  %v3434_v4 = vld [vmem:[#allocation2 + $0x9c] sm:$0xe] }
 0x234   : > { %v11644_v56 = vcombine.low %v3524_v12, %v3527_v9  ;;  %v11631_v32 = vrot.slane %v3430_v28, 9  ;;  %v11632_v39 = vrot.slane %v3431_v30, 9  ;;  %v3561_v45 = vrot.slane %v15618_v16, 5  ;;  %v3435_v9 = vld [vmem:[#allocation2 + $0xa8] sm:$0xe] }
 0x235   : > { %12868 = vmatmul.mubr.msk.bf16.gmra.mrb[24].mxu0 %vm1375_vm13, %v11604_v38  ;;  %v3511_v38 = vrot.slane %v3509_v11, 4  ;;  %v3546_v11 = vrot.slane %v3544_v58, 4  ;;  %v3565_v13 = vrot.slane %v15612_v29, 5  ;;  %v3572_v16 = vrot.slane %v15616_v37, 5 }
 0x236   : > { %12871 = vmatprep.mubr.msk.bf16.mxu0 %vm1375_vm13, %v11605_v20  ;;  %v3512_v20 = vrot.slane %v15491_v6, 5  ;;  %v3545_v34 = vsel %vm15304_vm1, %v11631_v32, %v3544_v58  ;;  %v3552_v17 = vsel %vm15304_vm1, %v11632_v39, %v3551_v61  ;;  %v3575_v29 = vrot.slane %v18804_v60, 5  ;;  %v13960_v39 = vld [vmem:[#allocation2 + $0x30] sm:$0xff]  }
 0x237   : > { %v3574_v53 = vrot.slane %v3572_v16, 4  ;;  %v11636_v58 = vrot.slane %v3435_v9, 9  ;;  %v3593_v32 = vrot.slane %v15667_v48, 5 }
 0x238   : > { %v3513_v6 = vsel %vm15304_vm1, %v3511_v38, %v3512_v20  ;;  %v3553_v38 = vrot.slane %v3551_v61, 4  ;;  %v3554_v20 = vrot.slane %v15588_v22, 5 }
 0x239   : > { %v11642_v49 = vcombine.low %v3510_v33, %v3513_v6  ;;  %v3433_v6 = vld [vmem:[#allocation2 + $0x90] sm:$0xe]  ;;  %v3576_v12 = vsel %vm15304_vm1, %v3574_v53, %v3575_v29  ;;  %v3595_v61 = vrot.slane %v3593_v32, 4 }
 0x23a   : > { %v11634_v44 = vrot.slane %v3433_v6, 9 }
 0x23c   : > { %v3566_v43 = vsel %vm15304_vm1, %v11634_v44, %v3565_v13  ;;  %v13967_v44 = vld [vmem:[#allocation2 + $0x84] sm:$0xff]  }
 0x23d   : > { %12872 = vmatmul.mubr.msk.bf16.gmra.mrb[28].mxu0 %vm1375_vm13, %v11606_v62  ;;  %v3537_v62 = vrot.slane %v15527_v0, 5  ;;  %v3547_v0 = vrot.slane %v15577_v50, 5  ;;  %v3558_v50 = vrot.slane %v15592_v10, 5  ;;  %v3555_v10 = vsel %vm15304_vm1, %v3553_v38, %v3554_v20  ;;  %v15832_v20 = vld [vmem:[#allocation6 + $0x10] sm:$0x3] }
 0x23e   : > { %12877 = vmatprep.mubr.msk.bf16.mxu0 %vm1375_vm13, %v11639_v63  ;;  %v3531_v63 = vsel %vm15304_vm1, %v11629_v3, %v3530_v14  ;;  %v11648_v18 = vcombine.low %v3552_v17, %v3555_v10  ;;  %v3567_v14 = vrot.slane %v3565_v13, 4  ;;  %v18805_v3 = vld [vmem:[#allocation23_spill] sm:$0xff]  ;;  %v4782_v38 = vsel %vm1424_vm4, %v15734_v54, 0  ;;  %v13964_v17 = vld [vmem:[#allocation2 + $0x60] sm:$0xff]   ;;  %v13966_v10 = vld [vmem:[#allocation2 + $0x78] sm:$0xff]  }
 0x23f   : > { %v11645_v46 = vcombine.low %v3531_v63, %v3534_v40  ;;  %v3539_v5 = vrot.slane %v3537_v62, 4  ;;  %v3538_v47 = vsel %vm15304_vm1, %v11630_v31, %v3537_v62  ;;  %v3548_v27 = vsel %vm15304_vm1, %v3546_v11, %v3547_v0  ;;  %v3436_v63 = vld [vmem:[#allocation2 + $0xb4] sm:$0xe]  ;;  %v3437_v0 = vld [vmem:[#allocation2 + $0xc0] sm:$0xe] }
 0x240   : > { %v3560_v23 = vrot.slane %v3558_v50, 4  ;;  %v3579_v41 = vrot.slane %v18805_v3, 5  ;;  %v3586_v62 = vrot.slane %v15651_v24, 5  ;;  %v4251_v13 = vld [vmem:[#allocation2 + $0x18] sm:$0xf] }
 0x241   : > { %v3541_v19 = vsel %vm15304_vm1, %v3539_v5, %v3540_v8  ;;  %v3589_v5 = vrot.slane %v15675_v42, 5  ;;  %v4303_v6 = vshll.u32 %v4251_v13, 16  ;;  %v15852_v3 = vld [vmem:[#allocation2 + $0x20] sm:$0x1] }
 0x242   : > { %v3562_v22 = vsel %vm15304_vm1, %v3560_v23, %v3561_v45  ;;  %v3581_v28 = vrot.slane %v3579_v41, 4  ;;  %v3588_v31 = vrot.slane %v3586_v62, 4  ;;  %v3580_v8 = vsel %vm15304_vm1, %v11636_v58, %v3579_v41  ;;  %v13962_v23 = vld [vmem:[#allocation2 + $0x48] sm:$0xff]   ;;  %v13963_v45 = vld [vmem:[#allocation2 + $0x54] sm:$0xff]   ;;  %v4257_v41 = vld [vmem:[#allocation2 + $0x30] sm:$0xf] }
 0x245   : > { %12878 = vmatmul.mubr.msk.bf16.vlgmr.msra.gmra.mrb[0].mxu0 %vm1375_vm13, %v11640_v7  ;;  %v11646_v7 = vcombine.low %v3538_v47, %v3541_v19  ;;  %v11638_v19 = vrot.slane %v3437_v0, 9  ;;  %v15866_v0 = vld [vmem:[#allocation2 + $0x40] sm:$0xf] }
 0x246   : > { %12910 = vmatpush3.bf16.msra.mxu0 %v4056_v36  ;;  %12881 = vmatprep.mubr.msk.bf16.mxu0 %vm1375_vm13, %v11641_v59  ;;  %v11647_v59 = vcombine.low %v3545_v34, %v3548_v27  ;;  %v11633_v36 = vrot.slane %v3432_v55, 9  ;;  %v3596_v34 = vrot.slane %v15687_v26, 5  ;;  %v417_v27 = vld [vmem:[#allocation2 + $0xd4] sm:$0x1]  ;;  %v13959_v26 = vld [vmem:[#allocation2 + $0x24] sm:$0xff]  }
 0x247   : > { %13836 = vmatprep.subr.msk.bf16.mxu0 %vm1424_vm4, %v15734_v54  ;;  %v3594_v48 = vsel %vm15304_vm1, %v11638_v19, %v3593_v32  ;;  %v418_v55 = vsel %vm14813_vm6, 0, %v417_v27  ;;  %v13965_v54 = vld [vmem:[#allocation2 + $0x6c] sm:$0xff]  }
 0x248   : > { %v3559_v33 = vsel %vm15304_vm1, %v11633_v36, %v3558_v50  ;;  %v3597_v30 = vsel %vm15304_vm1, %v3595_v61, %v3596_v34  ;;  %419 = vst [vmem:[#allocation2 + $0xd4] sm:$0x1] %v418_v55  ;;  %v13961_v36 = vld [vmem:[#allocation2 + $0x3c] sm:$0xff]   ;;  %v13970_v32 = vld [vmem:[#allocation2 + $0xa8] sm:$0xff]   ;;  %v15870_v50 = vld [vmem:[#allocation2 + $0x38] sm:$0x1] }
 0x249   : > { %v11649_v51 = vcombine.low %v3559_v33, %v3562_v22  ;;  %v15842_v33 = vld [vmem:[#allocation2 + $0x1c] sm:$0xf]  ;;  %v4300_v22 = vshrl.u32 %v4251_v13, 16 }
 0x24d   : > { %12882 = vmatmul.mubr.msk.bf16.gmra.mrb[4].mxu0 %vm1375_vm13, %v11642_v49  ;;  %v3568_v49 = vrot.slane %v18803_v25, 5  ;;  %v4302_v25 = vrot.slane %v4300_v22, 4 }
 0x24e   : > { %12885 = vmatprep.mubr.msk.bf16.mxu0 %vm1375_vm13, %v11643_v52  ;;  %v11635_v52 = vrot.slane %v3434_v4, 9  ;;  %v4313_v4 = vshrl.u32 %v15842_v33, 16 }
 0x24f   : > { %v3569_v37 = vsel %vm15304_vm1, %v3567_v14, %v3568_v49  ;;  %v13968_v14 = vld [vmem:[#allocation2 + $0x90] sm:$0xff]   ;;  %v4305_v49 = vrot.slane %v4303_v6, 5  ;;  %v15888_v6 = vld [vmem:[#allocation2 + $0x4c] sm:$0xf] }
 0x250   : > { %v3573_v35 = vsel %vm15304_vm1, %v11635_v52, %v3572_v16  ;;  %v11650_v40 = vcombine.low %v3566_v43, %v3569_v37  ;;  %v4309_v16 = vshll.u32 %v15842_v33, 16  ;;  %v4315_v29 = vrot.slane %v4313_v4, 4 }
 0x251   : > { %v11651_v21 = vcombine.low %v3573_v35, %v3576_v12  ;;  %v4306_v35 = vor.u32 %v4305_v49, %v4302_v25  ;;  %v13972_v49 = vld [vmem:[#allocation2 + $0xc0] sm:$0xff]  }
 0x252   : > { %v4311_v60 = vrot.slane %v4309_v16, 5  ;;  %v13971_v16 = vld [vmem:[#allocation2 + $0xb4] sm:$0xff]  }
 0x255   : > { %12886 = vmatmul.mubr.msk.bf16.gmra.mrb[8].mxu0 %vm1375_vm13, %v11644_v56  ;;  %v3582_v56 = vrot.slane %v15665_v2, 5  ;;  %v3590_v2 = vsel %vm15304_vm1, %v3588_v31, %v3589_v5  ;;  %v13969_v31 = vld [vmem:[#allocation2 + $0x9c] sm:$0xff]  }
 0x256   : > { %12889 = vmatprep.mubr.msk.bf16.mxu0 %vm1375_vm13, %v11645_v46  ;;  %v11637_v46 = vrot.slane %v3436_v63, 9  ;;  %v4316_v63 = vor.u32 %v4315_v29, %v4311_v60  ;;  %v4405_v29 = vshll.u32 %v15888_v6, 16 }
 0x257   : > { %v3583_v24 = vsel %vm15304_vm1, %v3581_v28, %v3582_v56  ;;  %v4348_v56 = vshrl.u32 %v4257_v41, 16 }
 0x258   : > { %v3587_v11 = vsel %vm15304_vm1, %v11637_v46, %v3586_v62  ;;  %v11652_v42 = vcombine.low %v3580_v8, %v3583_v24  ;;  %v15856_v62 = vld [vmem:[#allocation2 + $0x34] sm:$0xf]  ;;  %v4351_v46 = vshll.u32 %v4257_v41, 16  ;;  %v4260_v24 = vld [vmem:[#allocation2 + $0x3c] sm:$0xf] }
 0x259   : > { %v11653_v47 = vcombine.low %v3587_v11, %v3590_v2  ;;  %v4357_v5 = vshll.u32 %v15856_v62, 16  ;;  %v4361_v8 = vshrl.u32 %v15856_v62, 16  ;;  %v4350_v34 = vrot.slane %v4348_v56, 4 }
 0x25a   : > { %v4353_v27 = vrot.slane %v4351_v46, 5  ;;  %v15910_v46 = vld [vmem:[#allocation2 + $0xd0] sm:$0xf] }
 0x25b   : > { %v15872_v55 = vrot.slane %v4357_v5, 5 }
 0x25d   : > { %12890 = vmatmul.mubr.msk.bf16.gmra.mrb[12].mxu0 %vm1375_vm13, %v11646_v7  ;;  %v11654_v7 = vcombine.low %v3594_v48, %v3597_v30  ;;  %v4372_v48 = vshrl.u32 %v4260_v24, 16  ;;  %v4375_v30 = vshll.u32 %v4260_v24, 16  ;;  %v4992_v24 = vld [vmem:[#allocation2 + $0xcc] sm:$0xe] }
 0x25e   : > { %12893 = vmatprep.mubr.msk.bf16.mxu0 %vm1375_vm13, %v11647_v59  ;;  %v13958_v59 = vld [vmem:[#allocation2 + $0x18] sm:$0xff]  }
 0x25f   : > { %v4374_v13 = vrot.slane %v4372_v48, 4  ;;  %v4377_v22 = vrot.slane %v4375_v30, 5 }
 0x265   : > { %12894 = vmatmul.mubr.msk.bf16.gmra.mrb[16].mxu0 %vm1375_vm13, %v11648_v18  ;;  %v4254_v18 = vld [vmem:[#allocation2 + $0x24] sm:$0xf] }
 0x266   : > { %12897 = vmatprep.mubr.msk.bf16.mxu0 %vm1375_vm13, %v11649_v51  ;;  %v15848_v51 = vld [vmem:[#allocation2 + $0x28] sm:$0xf]  ;;  %v4324_v52 = vshrl.u32 %v4254_v18, 16  ;;  %v4327_v53 = vshll.u32 %v4254_v18, 16  ;;  %v15891_v18 = vld [vmem:[#allocation2 + $0x44] sm:$0x1] }
 0x267   : > { %v4333_v43 = vshll.u32 %v15848_v51, 16  ;;  %v4337_v37 = vshrl.u32 %v15848_v51, 16 }
 0x268   : > { %v4326_v12 = vrot.slane %v4324_v52, 4  ;;  %v4329_v9 = vrot.slane %v4327_v53, 5 }
 0x269   : > { %v15861_v58 = vrot.slane %v4333_v43, 5  ;;  %v4339_v28 = vrot.slane %v4337_v37, 4  ;;  %v4409_v43 = vshrl.u32 %v15888_v6, 16  ;;  %v4266_v37 = vld [vmem:[#allocation2 + $0x54] sm:$0xf] }
 0x26a   : > { %v4330_v11 = vor.u32 %v4329_v9, %v4326_v12  ;;  %v4378_v12 = vor.u32 %v4377_v22, %v4374_v13  ;;  %v4391_v9 = vshll.u32 %v15891_v18, 16 }
 0x26b   : > { %v4340_v61 = vor.u32 %v4339_v28, %v15861_v58 }
 0x26c   : > { %v15924_v48 = vrot.slane %v4378_v12, 4  ;;  %v15926_v30 = vrot.slane %v4391_v9, 5 }
 0x26d   : > { %12898 = vmatmul.mubr.msk.bf16.gmra.mrb[20].mxu0 %vm1375_vm13, %v11650_v40  ;;  %v4319_v40 = vshll.u32 %v15852_v3, 16 }
 0x26e   : > { %12901 = vmatprep.mubr.msk.bf16.mxu0 %vm1375_vm13, %v11651_v21  ;;  %v15859_v21 = vld [vmem:[#allocation2 + $0x2c] sm:$0x1] }
 0x26f   : > { %v4343_v2 = vshll.u32 %v15859_v21, 16  ;;  %v4321_v19 = vrot.slane %v4319_v40, 5 }
 0x275   : > { %12902 = vmatmul.mubr.msk.bf16.gmra.mrb[24].mxu0 %vm1375_vm13, %v11652_v42  ;;  %v4307_v42 = vrot.slane %v4306_v35, 4 }
 0x276   : > { %12905 = vmatprep.mubr.msk.bf16.mxu0 %vm1375_vm13, %v11653_v47  ;;  %v4317_v47 = vrot.slane %v4316_v63, 4  ;;  %v15902_v63 = vld [vmem:[#allocation2 + $0x58] sm:$0xf] }
 0x27d   : > { %12906 = vmatmul.mubr.msk.bf16.gmra.mrb[28].mxu0 %vm1375_vm13, %v11654_v7  ;;  %v4363_v7 = vrot.slane %v4361_v8, 4  ;;  %v4420_v8 = vshrl.u32 %v4266_v37, 16 }
 0x27e   : > { %12911 = vmatprep.mubr.msk.bf16.mxu0 %vm1375_vm13, %v13958_v59  ;;  %v4381_v59 = vshll.u32 %v15866_v0, 16 }
 0x27f   : > { %v4364_v4 = vor.u32 %v4363_v7, %v15872_v55  ;;  %v4422_v13 = vrot.slane %v4420_v8, 4  ;;  %v4275_v8 = vld [vmem:[#allocation2 + $0x78] sm:$0xf] }
 0x285   : > { %12912 = vmatmul.mubr.msk.bf16.vlgmr.msra.gmra.mrb[0].mxu0 %vm1375_vm13, %v13959_v26  ;;  %v4385_v26 = vshrl.u32 %v15866_v0, 16 }
 0x286   : > { %12944 = vmatpush3.bf16.msra.mxu0 %v4782_v38  ;;  %12915 = vmatprep.mubr.msk.bf16.mxu0 %vm1375_vm13, %v13960_v39  ;;  %v15877_v39 = vrot.slane %v4330_v11, 4  ;;  %v4263_v38 = vld [vmem:[#allocation2 + $0x48] sm:$0xf] }
 0x287   : > { %13837 = vmatprep.subr.msk.bf16.mxu0 %vm1424_vm4, %v15832_v20  ;;  %v4396_v25 = vshrl.u32 %v4263_v38, 16  ;;  %v4399_v52 = vshll.u32 %v4263_v38, 16  ;;  %v4269_v38 = vld [vmem:[#allocation2 + $0x60] sm:$0xf] }
 0x289   : > { %v4398_v56 = vrot.slane %v4396_v25, 4  ;;  %v4401_v5 = vrot.slane %v4399_v52, 5  ;;  %v4447_v25 = vshll.u32 %v4269_v38, 16 }
 0x28d   : > { %12916 = vmatmul.mubr.msk.bf16.gmra.mrb[4].mxu0 %vm1375_vm13, %v13961_v36  ;;  %v4312_v36 = vsel %vm14860_vm12, %v4307_v42, %v4311_v60  ;;  %v4336_v60 = vsel %vm14860_vm12, %v15877_v39, %v15861_v58  ;;  %v4365_v58 = vrot.slane %v4364_v4, 4  ;;  %v15919_v42 = vrot.slane %v4405_v29, 5  ;;  %v15948_v4 = vld [vmem:[#allocation2 + $0x5c] sm:$0x1] }
 0x28e   : > { %12919 = vmatprep.mubr.msk.bf16.mxu0 %vm1375_vm13, %v13962_v23  ;;  %v4322_v23 = vsel %vm14860_vm12, %v4317_v47, %v4321_v19  ;;  %v4411_v47 = vrot.slane %v4409_v43, 4  ;;  %v4423_v19 = vshll.u32 %v4266_v37, 16  ;;  %v4433_v39 = vshrl.u32 %v15902_v63, 16 }
 0x28f   : > { %v11703_v53 = vcombine.low %v4312_v36, %v4322_v23  ;;  %v15932_v36 = vld [vmem:[#allocation2 + $0x64] sm:$0xf]  ;;  %v5252_v43 = vsel %vm1424_vm4, %v15832_v20, 0 }
 0x290   : > { %v4425_v22 = vrot.slane %v4423_v19, 5  ;;  %v4457_v52 = vshrl.u32 %v15932_v36, 16 }
 0x295   : > { %12920 = vmatmul.mubr.msk.bf16.gmra.mrb[8].mxu0 %vm1375_vm13, %v13963_v45  ;;  %v15883_v45 = vrot.slane %v4340_v61, 4  ;;  %v11750_v61 = vrot.slane %v4992_v24, 9 }
 0x296   : > { %12923 = vmatprep.mubr.msk.bf16.mxu0 %vm1375_vm13, %v13964_v17  ;;  %v15885_v17 = vrot.slane %v4343_v2, 5  ;;  %v15917_v2 = vld [vmem:[#allocation2 + $0x50] sm:$0x1] }
 0x298   : > { %v4346_v40 = vsel %vm14860_vm12, %v15883_v45, %v15885_v17  ;;  %v4402_v45 = vor.u32 %v4401_v5, %v4398_v56  ;;  %v4415_v17 = vshll.u32 %v15917_v2, 16  ;;  %v4272_v56 = vld [vmem:[#allocation2 + $0x6c] sm:$0xf]  ;;  %v15969_v5 = vld [vmem:[#allocation2 + $0x70] sm:$0xf] }
 0x299   : > { %v11704_v29 = vcombine.low %v4336_v60, %v4346_v40  ;;  %v4426_v40 = vor.u32 %v4425_v22, %v4422_v13  ;;  %v4278_v22 = vld [vmem:[#allocation2 + $0x84] sm:$0xf] }
 0x29a   : > { %v4403_v9 = vrot.slane %v4402_v45, 4 }
 0x29d   : > { %12924 = vmatmul.mubr.msk.bf16.gmra.mrb[12].mxu0 %vm1375_vm13, %v13965_v54  ;;  %v4354_v54 = vor.u32 %v4353_v27, %v4350_v34  ;;  %v13973_v34 = vld [vmem:[#allocation2 + $0xcc] sm:$0xff]  }
 0x29e   : > { %12927 = vmatprep.mubr.msk.bf16.mxu0 %vm1375_vm13, %v13966_v10  ;;  %v4367_v10 = vshll.u32 %v15870_v50, 16 }
 0x29f   : > { %v4355_v41 = vrot.slane %v4354_v54, 4 }
 0x2a0   : > { %v4369_v35 = vrot.slane %v4367_v10, 5  ;;  %v4412_v10 = vor.u32 %v4411_v47, %v15919_v42  ;;  %v15973_v47 = vld [vmem:[#allocation2 + $0x7c] sm:$0xf] }
 0x2a1   : > { %v4360_v27 = vsel %vm14860_vm12, %v4355_v41, %v15872_v55  ;;  %v4435_v41 = vrot.slane %v4433_v39, 4  ;;  %v15982_v39 = vrot.slane %v4426_v40, 4 }
 0x2a2   : > { %v4413_v60 = vrot.slane %v4412_v10, 4 }
 0x2a5   : > { %12928 = vmatmul.mubr.msk.bf16.gmra.mrb[16].mxu0 %vm1375_vm13, %v13967_v44  ;;  %v15893_v44 = vrot.slane %v4381_v59, 5  ;;  %v4370_v59 = vsel %vm14860_vm12, %v4365_v58, %v4369_v35  ;;  %v4417_v58 = vrot.slane %v4415_v17, 5 }
 0x2a6   : > { %12931 = vmatprep.mubr.msk.bf16.mxu0 %vm1375_vm13, %v13968_v14  ;;  %v4387_v14 = vrot.slane %v4385_v26, 4  ;;  %v4429_v26 = vshll.u32 %v15902_v63, 16  ;;  %v11705_v35 = vcombine.low %v4360_v27, %v4370_v59  ;;  %v4471_v27 = vshll.u32 %v4272_v56, 16 }
 0x2a7   : > { %v4384_v12 = vsel %vm14860_vm12, %v15924_v48, %v15893_v44  ;;  %v4477_v48 = vshll.u32 %v15969_v5, 16  ;;  %v4495_v59 = vshll.u32 %v4275_v8, 16  ;;  %v4418_v45 = vsel %vm14860_vm12, %v4413_v60, %v4417_v58  ;;  %v15995_v60 = vld [vmem:[#allocation2 + $0x74] sm:$0x1] }
 0x2a8   : > { %v4388_v28 = vor.u32 %v4387_v14, %v15893_v44  ;;  %v4444_v14 = vshrl.u32 %v4269_v38, 16  ;;  %v15955_v37 = vrot.slane %v4429_v26, 5  ;;  %v4408_v26 = vsel %vm14860_vm12, %v4403_v9, %v15919_v42 }
 0x2a9   : > { %v4501_v38 = vshll.u32 %v15973_v47, 16  ;;  %v4473_v42 = vrot.slane %v4471_v27, 5 }
 0x2aa   : > { %v15938_v55 = vrot.slane %v4388_v28, 4  ;;  %v15962_v28 = vld [vmem:[#allocation2 + $0x68] sm:$0x1]  ;;  %v4446_v24 = vrot.slane %v4444_v14, 4  ;;  %v4436_v19 = vor.u32 %v4435_v41, %v15955_v37  ;;  %v15993_v41 = vrot.slane %v4477_v48, 5 }
 0x2ab   : > { %v15997_v40 = vrot.slane %v4501_v38, 5  ;;  %v4281_v38 = vld [vmem:[#allocation2 + $0x90] sm:$0xf] }
 0x2ac   : > { %v4394_v20 = vsel %vm14860_vm12, %v15938_v55, %v15926_v30  ;;  %v4481_v30 = vshrl.u32 %v15969_v5, 16  ;;  %v4505_v55 = vshrl.u32 %v15973_v47, 16  ;;  %v4437_v14 = vrot.slane %v4436_v19, 4 }
 0x2ad   : > { %12932 = vmatmul.mubr.msk.bf16.gmra.mrb[20].mxu0 %vm1375_vm13, %v13969_v31  ;;  %v15912_v31 = vld [vmem:[#allocation2 + $0xd4] sm:$0x1]  ;;  %v11706_v19 = vcombine.low %v4384_v12, %v4394_v20 }
 0x2ae   : > { %12935 = vmatprep.mubr.msk.bf16.mxu0 %vm1375_vm13, %v13970_v32  ;;  %v5148_v32 = vrot.slane %v15910_v46, 5  ;;  %v5151_v11 = vrot.slane %v15912_v31, 5  ;;  %v4483_v9 = vrot.slane %v4481_v30, 4 }
 0x2b0   : > { %v5150_v7 = vrot.slane %v5148_v32, 4  ;;  %v15936_v23 = vsel %vm15304_vm1, %v11750_v61, %v5148_v32  ;;  %v4449_v32 = vrot.slane %v4447_v25, 5  ;;  %v4463_v61 = vshll.u32 %v15962_v28, 16 }
 0x2b1   : > { %18807 = vst [vmem:[#allocation21_spill] sm:$0xff] %v15936_v23  ;;  %v4484_v30 = vor.u32 %v4483_v9, %v15993_v41 }
 0x2b2   : > { %v15943_v54 = vsel %vm15304_vm1, %v5150_v7, %v5151_v11  ;;  %v4459_v11 = vrot.slane %v4457_v52, 4  ;;  %v4492_v7 = vshrl.u32 %v4275_v8, 16  ;;  %v4450_v10 = vor.u32 %v4449_v32, %v4446_v24  ;;  %v15990_v52 = vld [vmem:[#allocation2 + $0x88] sm:$0xf] }
 0x2b3   : > { %18808 = vst [vmem:[#allocation22_spill] sm:$0xff] %v15943_v54  ;;  %v4465_v25 = vrot.slane %v4463_v61, 5  ;;  %v4519_v8 = vshll.u32 %v4278_v22, 16  ;;  %v11707_v61 = vcombine.low %v4408_v26, %v4418_v45 }
 0x2b4   : > { %v4494_v58 = vrot.slane %v4492_v7, 4  ;;  %v4451_v24 = vrot.slane %v4450_v10, 4  ;;  %v4487_v7 = vshll.u32 %v15995_v60, 16 }
 0x2b5   : > { %12936 = vmatmul.mubr.msk.bf16.gmra.mrb[24].mxu0 %vm1375_vm13, %v13971_v16  ;;  %v4521_v45 = vrot.slane %v4519_v8, 5 }
 0x2b6   : > { %12939 = vmatprep.mubr.msk.bf16.mxu0 %vm1375_vm13, %v13972_v49  ;;  %v4453_v49 = vshll.u32 %v15932_v36, 16 }
 0x2b8   : > { %v15971_v44 = vrot.slane %v4453_v49, 5 }
 0x2ba   : > { %v4460_v13 = vor.u32 %v4459_v11, %v15971_v44  ;;  %v15999_v11 = vld [vmem:[#allocation2 + $0x80] sm:$0x1] }
 0x2bb   : > { %v4511_v20 = vshll.u32 %v15999_v11, 16 }
 0x2bc   : > { %v4461_v32 = vrot.slane %v4460_v13, 4 }
 0x2bd   : > { %12940 = vmatmul.mubr.msk.bf16.gmra.mrb[28].mxu0 %vm1375_vm13, %v13973_v34  ;;  %v4468_v34 = vshrl.u32 %v4272_v56, 16  ;;  %v4497_v56 = vrot.slane %v4495_v59, 5 }
 0x2be   : > { %12945 = vmatprep.mubr.msk.bf16.mxu0 %vm1375_vm13, %v11703_v53  ;;  %v4439_v53 = vshll.u32 %v15948_v4, 16 }
 0x2bf   : > { %v4470_v49 = vrot.slane %v4468_v34, 4  ;;  %v4432_v34 = vsel %vm14860_vm12, %v15982_v39, %v15955_v37  ;;  %v4498_v59 = vor.u32 %v4497_v56, %v4494_v58  ;;  %v4456_v37 = vsel %vm14860_vm12, %v4451_v24, %v15971_v44  ;;  %v4284_v24 = vld [vmem:[#allocation2 + $0x9c] sm:$0xf] }
 0x2c0   : > { %v4441_v17 = vrot.slane %v4439_v53, 5  ;;  %v4507_v53 = vrot.slane %v4505_v55, 4  ;;  %v16011_v55 = vld [vmem:[#allocation2 + $0x94] sm:$0xf]  ;;  %v4466_v39 = vsel %vm14860_vm12, %v4461_v32, %v4465_v25  ;;  %v4485_v44 = vrot.slane %v4484_v30, 4 }
 0x2c1   : > { %v4474_v48 = vor.u32 %v4473_v42, %v4470_v49  ;;  %v4549_v49 = vshll.u32 %v16011_v55, 16  ;;  %v4553_v42 = vshrl.u32 %v16011_v55, 16  ;;  %v4489_v58 = vrot.slane %v4487_v7, 5 }
 0x2c2   : > { %v4442_v27 = vsel %vm14860_vm12, %v4437_v14, %v4441_v17  ;;  %v4508_v12 = vor.u32 %v4507_v53, %v15997_v40  ;;  %v16020_v17 = vld [vmem:[#allocation2 + $0x8c] sm:$0x1]  ;;  %v4543_v14 = vshll.u32 %v4281_v38, 16  ;;  %v4499_v56 = vrot.slane %v4498_v59, 4 }
 0x2c3   : > { %v4475_v9 = vrot.slane %v4474_v48, 4  ;;  %v4513_v53 = vrot.slane %v4511_v20, 5  ;;  %v4535_v8 = vshll.u32 %v16020_v17, 16  ;;  %v11708_v32 = vcombine.low %v4432_v34, %v4442_v27  ;;  %v16041_v20 = vld [vmem:[#allocation2 + $0xac] sm:$0xf] }
 0x2c4   : > { %v4509_v25 = vrot.slane %v4508_v12, 4  ;;  %v16034_v48 = vrot.slane %v4549_v49, 5  ;;  %v4555_v30 = vrot.slane %v4553_v42, 4  ;;  %v4490_v59 = vsel %vm14860_vm12, %v4485_v44, %v4489_v58  ;;  %v4287_v12 = vld [vmem:[#allocation2 + $0xa8] sm:$0xf] }
 0x2c5   : > { %12946 = vmatmul.mubr.msk.bf16.vlgmr.msra.gmra.mrb[0].mxu0 %vm1375_vm13, %v11704_v29  ;;  %v4516_v29 = vshrl.u32 %v4278_v22, 16  ;;  %v4540_v22 = vshrl.u32 %v4281_v38, 16  ;;  %v16032_v38 = vld [vmem:[#allocation2 + $0x98] sm:$0x1]  ;;  %v4480_v7 = vsel %vm14860_vm12, %v4475_v9, %v15993_v41  ;;  %v4564_v34 = vshrl.u32 %v4284_v24, 16 }
 0x2c6   : > { %12978 = vmatpush3.bf16.msra.mxu0 %v5252_v43  ;;  %12949 = vmatprep.mubr.msk.bf16.mxu0 %vm1375_vm13, %v11705_v35  ;;  %v4525_v43 = vshll.u32 %v15990_v52, 16  ;;  %v4529_v35 = vshrl.u32 %v15990_v52, 16  ;;  %v4567_v27 = vshll.u32 %v4284_v24, 16  ;;  %v4559_v41 = vshll.u32 %v16032_v38, 16  ;;  %v16059_v24 = vld [vmem:[#allocation2 + $0xa4] sm:$0x1] }
 0x2c7   : > { %v4518_v26 = vrot.slane %v4516_v29, 4  ;;  %v4542_v16 = vrot.slane %v4540_v22, 4  ;;  %v4588_v49 = vshrl.u32 %v4287_v12, 16  ;;  %v4591_v42 = vshll.u32 %v4287_v12, 16 }
 0x2c8   : > { %v16022_v10 = vrot.slane %v4525_v43, 5  ;;  %v4531_v13 = vrot.slane %v4529_v35, 4  ;;  %v11709_v43 = vcombine.low %v4456_v37, %v4466_v39  ;;  %v4537_v39 = vrot.slane %v4535_v8, 5 }
 0x2c9   : > { %v4522_v29 = vor.u32 %v4521_v45, %v4518_v26  ;;  %v4504_v26 = vsel %vm14860_vm12, %v4499_v56, %v15997_v40  ;;  %v4514_v45 = vsel %vm14860_vm12, %v4509_v25, %v4513_v53  ;;  %v4597_v9 = vshll.u32 %v16041_v20, 16 }
 0x2ca   : > { %v4532_v35 = vor.u32 %v4531_v13, %v16022_v10  ;;  %v4601_v40 = vshrl.u32 %v16041_v20, 16  ;;  %v4556_v58 = vor.u32 %v4555_v30, %v16034_v48  ;;  %v4566_v56 = vrot.slane %v4564_v34, 4 }
 0x2cb   : > { %v4523_v37 = vrot.slane %v4522_v29, 4  ;;  %v4569_v25 = vrot.slane %v4567_v27, 5  ;;  %v11710_v53 = vcombine.low %v4480_v7, %v4490_v59  ;;  %v11711_v29 = vcombine.low %v4504_v26, %v4514_v45  ;;  %v4290_v59 = vld [vmem:[#allocation2 + $0xb4] sm:$0xf] }
 0x2cc   : > { %v4533_v13 = vrot.slane %v4532_v35, 4  ;;  %v4561_v35 = vrot.slane %v4559_v41, 5  ;;  %v4593_v30 = vrot.slane %v4591_v42, 5  ;;  %v16067_v34 = vrot.slane %v4597_v9, 5  ;;  %v16074_v42 = vld [vmem:[#allocation2 + $0xc4] sm:$0xf] }
 0x2cd   : > { %12950 = vmatmul.mubr.msk.bf16.gmra.mrb[4].mxu0 %vm1375_vm13, %v11706_v19  ;;  %v16030_v19 = vld [vmem:[#allocation2 + $0xa0] sm:$0xf]  ;;  %v4528_v8 = vsel %vm14860_vm12, %v4523_v37, %v16022_v10  ;;  %v4603_v7 = vrot.slane %v4601_v40, 4  ;;  %v4557_v26 = vrot.slane %v4556_v58, 4  ;;  %v4570_v10 = vor.u32 %v4569_v25, %v4566_v56  ;;  %v16070_v37 = vld [vmem:[#allocation2 + $0xb8] sm:$0xf] }
 0x2ce   : > { %12953 = vmatprep.mubr.msk.bf16.mxu0 %vm1375_vm13, %v11707_v61  ;;  %v4545_v61 = vrot.slane %v4543_v14, 5  ;;  %v4573_v22 = vshll.u32 %v16030_v19, 16  ;;  %v4577_v14 = vshrl.u32 %v16030_v19, 16  ;;  %v4583_v45 = vshll.u32 %v16059_v24, 16  ;;  %18810 = vst [vmem:[#allocation18_spill] sm:$0xff] %v16070_v37  ;;  %18811 = vst [vmem:[#allocation24_spill] sm:$0xff] %v16074_v42 }
 0x2cf   : > { %v4604_v40 = vor.u32 %v4603_v7, %v16067_v34  ;;  %v4625_v58 = vshrl.u32 %v16070_v37, 16  ;;  %v4562_v25 = vsel %vm14860_vm12, %v4557_v26, %v4561_v35 }
 0x2d0   : > { %v4546_v44 = vor.u32 %v4545_v61, %v4542_v16  ;;  %v16063_v12 = vrot.slane %v4573_v22, 5  ;;  %v16065_v16 = vld [vmem:[#allocation2 + $0xb0] sm:$0x1]  ;;  %v4590_v61 = vrot.slane %v4588_v49, 4  ;;  %v4612_v22 = vshrl.u32 %v4290_v59, 16 }
 0x2d1   : > { %18809 = vst [vmem:[#allocation23_spill] sm:$0xff] %v16065_v16  ;;  %v4293_v49 = vld [vmem:[#allocation2 + $0xc0] sm:$0xf]  ;;  %v4605_v23 = vrot.slane %v4604_v40, 4 }
 0x2d2   : > { %v4547_v27 = vrot.slane %v4546_v44, 4  ;;  %v4594_v9 = vor.u32 %v4593_v30, %v4590_v61  ;;  %v4621_v44 = vshll.u32 %v16070_v37, 16  ;;  %v4645_v61 = vshll.u32 %v16074_v42, 16 }
 0x2d3   : > { %v4649_v30 = vshrl.u32 %v16074_v42, 16  ;;  %v4614_v1 = vrot.slane %v4612_v22, 4  ;;  %v16095_v22 = vld [vmem:[#allocation2 + $0xc8] sm:$0x1] }
 0x2d4   : > { %v4552_v56 = vsel %vm14860_vm12, %v4547_v27, %v16034_v48  ;;  %v4623_v37 = vrot.slane %v4621_v44, 5  ;;  %v16088_v27 = vld [vmem:[#allocation2 + $0xbc] sm:$0x1] }
 0x2d5   : > { %12954 = vmatmul.mubr.msk.bf16.gmra.mrb[8].mxu0 %vm1375_vm13, %v11708_v32  ;;  %v4538_v32 = vsel %vm14860_vm12, %v4533_v13, %v4537_v39  ;;  %v4607_v39 = vshll.u32 %v16065_v16, 16  ;;  %v4627_v16 = vrot.slane %v4625_v58, 4  ;;  %v11713_v48 = vcombine.low %v4552_v56, %v4562_v25 }
 0x2d6   : > { %12957 = vmatprep.mubr.msk.bf16.mxu0 %vm1375_vm13, %v11709_v43  ;;  %v4579_v43 = vrot.slane %v4577_v14, 4  ;;  %v11712_v13 = vcombine.low %v4528_v8, %v4538_v32  ;;  %v4615_v14 = vshll.u32 %v4290_v59, 16  ;;  %v4571_v8 = vrot.slane %v4570_v10, 4 }
 0x2d7   : > { %v4585_v32 = vrot.slane %v4583_v45, 5  ;;  %v4609_v59 = vrot.slane %v4607_v39, 5  ;;  %v4647_v10 = vrot.slane %v4645_v61, 5  ;;  %v4651_v45 = vrot.slane %v4649_v30, 4 }
 0x2d8   : > { %v4580_v41 = vor.u32 %v4579_v43, %v16063_v12  ;;  %v4636_v43 = vshrl.u32 %v4293_v49, 16  ;;  %v4617_v54 = vrot.slane %v4615_v14, 5  ;;  %v4576_v42 = vsel %vm14860_vm12, %v4571_v8, %v16063_v12 }
 0x2d9   : > { %v4628_v40 = vor.u32 %v4627_v16, %v4623_v37  ;;  %v4631_v44 = vshll.u32 %v16088_v27, 16  ;;  %v4655_v25 = vshll.u32 %v16095_v22, 16 }
 0x2da   : > { %v4581_v7 = vrot.slane %v4580_v41, 4  ;;  %v4638_v35 = vrot.slane %v4636_v43, 4  ;;  %v4618_v41 = vor.u32 %v4617_v54, %v4614_v1  ;;  %v4669_v1 = vshll.u32 %v15910_v46, 16 }
 0x2db   : > { %v4673_v54 = vshrl.u32 %v15910_v46, 16  ;;  %v4629_v43 = vrot.slane %v4628_v40, 4 }
 0x2dc   : > { %v4586_v39 = vsel %vm14860_vm12, %v4581_v7, %v4585_v32  ;;  %v4619_v32 = vrot.slane %v4618_v41, 4  ;;  %v4671_v61 = vrot.slane %v4669_v1, 5  ;;  %v4977_v41 = vld [vmem:[#allocation2 + $0x18] sm:$0xe]  ;;  %v5046_v1 = vrot.slane %v15852_v3, 5 }
 0x2dd   : > { %12958 = vmatmul.mubr.msk.bf16.gmra.mrb[12].mxu0 %vm1375_vm13, %v11710_v53  ;;  %v4639_v53 = vshll.u32 %v4293_v49, 16  ;;  %v4296_v49 = vld [vmem:[#allocation2 + $0xcc] sm:$0xf]  ;;  %v11714_v8 = vcombine.low %v4576_v42, %v4586_v39  ;;  %v4675_v30 = vrot.slane %v4673_v54, 4  ;;  %v5043_v39 = vrot.slane %v15842_v33, 5 }
 0x2de   : > { %12961 = vmatprep.mubr.msk.bf16.mxu0 %vm1375_vm13, %v11711_v29  ;;  %v4595_v29 = vrot.slane %v4594_v9, 4  ;;  %v4610_v9 = vsel %vm14860_vm12, %v4605_v23, %v4609_v59  ;;  %v4660_v12 = vshrl.u32 %v4296_v49, 16  ;;  %v4663_v58 = vshll.u32 %v4296_v49, 16 }
 0x2df   : > { %v4641_v26 = vrot.slane %v4639_v53, 5  ;;  %v4633_v23 = vrot.slane %v4631_v44, 5  ;;  %v4624_v46 = vsel %vm14860_vm12, %v4619_v32, %v4623_v37  ;;  %v5057_v3 = vrot.slane %v15856_v62, 5 }
 0x2e0   : > { %v4600_v14 = vsel %vm14860_vm12, %v4595_v29, %v16067_v34  ;;  %v4662_v16 = vrot.slane %v4660_v12, 4  ;;  %v4665_v53 = vrot.slane %v4663_v58, 5  ;;  %v4657_v29 = vrot.slane %v4655_v25, 5  ;;  %v4979_v25 = vld [vmem:[#allocation2 + $0x30] sm:$0xe] }
 0x2e1   : > { %v4642_v56 = vor.u32 %v4641_v26, %v4638_v35  ;;  %v11715_v34 = vcombine.low %v4600_v14, %v4610_v9  ;;  %v4634_v42 = vsel %vm14860_vm12, %v4629_v43, %v4633_v23  ;;  %v4676_v35 = vor.u32 %v4675_v30, %v4671_v61 }
 0x2e2   : > { %v4679_v26 = vshll.u32 %v15912_v31, 16  ;;  %v11716_v14 = vcombine.low %v4624_v46, %v4634_v42  ;;  %v11735_v12 = vrot.slane %v4977_v41, 9  ;;  %v5045_v58 = vrot.slane %v5043_v39, 4 }
 0x2e3   : > { %v4643_v7 = vrot.slane %v4642_v56, 4  ;;  %v4677_v40 = vrot.slane %v4676_v35, 4  ;;  %v5053_v23 = vrot.slane %v15859_v21, 5  ;;  %v5064_v30 = vrot.slane %v15866_v0, 5 }
 0x2e4   : > { %v4681_v44 = vrot.slane %v4679_v26, 5  ;;  %v5044_v54 = vsel %vm15304_vm1, %v11735_v12, %v5043_v39  ;;  %v5047_v56 = vsel %vm15304_vm1, %v5045_v58, %v5046_v1  ;;  %v5067_v26 = vrot.slane %v15891_v18, 5 }
 0x2e5   : > { %12962 = vmatmul.mubr.msk.bf16.gmra.mrb[16].mxu0 %vm1375_vm13, %v11712_v13  ;;  %v4652_v13 = vor.u32 %v4651_v45, %v4647_v10  ;;  %v4648_v45 = vsel %vm14860_vm12, %v4643_v7, %v4647_v10  ;;  %v5050_v10 = vrot.slane %v15848_v51, 5  ;;  %v5060_v51 = vrot.slane %v15870_v50, 5 }
 0x2e6   : > { %12965 = vmatprep.mubr.msk.bf16.mxu0 %vm1375_vm13, %v11713_v48  ;;  %v4666_v48 = vor.u32 %v4665_v53, %v4662_v16  ;;  %v4682_v33 = vsel %vm14860_vm12, %v4677_v40, %v4681_v44  ;;  %v11737_v16 = vrot.slane %v4979_v25, 9  ;;  %v5059_v53 = vrot.slane %v5057_v3, 4 }
 0x2e7   : > { %v4653_v59 = vrot.slane %v4652_v13, 4  ;;  %v4978_v13 = vld [vmem:[#allocation2 + $0x24] sm:$0xe]  ;;  %v5052_v43 = vrot.slane %v5050_v10, 4  ;;  %v5071_v50 = vrot.slane %v15888_v6, 5  ;;  %v5066_v35 = vrot.slane %v5064_v30, 4 }
 0x2e8   : > { %v4667_v9 = vrot.slane %v4666_v48, 4  ;;  %v11736_v32 = vrot.slane %v4978_v13, 9  ;;  %v5058_v7 = vsel %vm15304_vm1, %v11737_v16, %v5057_v3  ;;  %v5061_v21 = vsel %vm15304_vm1, %v5059_v53, %v5060_v51  ;;  %v4984_v13 = vld [vmem:[#allocation2 + $0x6c] sm:$0xe]  ;;  %v4985_v3 = vld [vmem:[#allocation2 + $0x78] sm:$0xe] }
 0x2e9   : > { %v4658_v49 = vsel %vm14860_vm12, %v4653_v59, %v4657_v29  ;;  %v5054_v62 = vsel %vm15304_vm1, %v5052_v43, %v5053_v23  ;;  %v4980_v59 = vld [vmem:[#allocation2 + $0x3c] sm:$0xe]  ;;  %v4981_v29 = vld [vmem:[#allocation2 + $0x48] sm:$0xe]  ;;  %v11753_v42 = vcombine.low %v5058_v7, %v5061_v21  ;;  %v5074_v0 = vrot.slane %v15917_v2, 5 }
 0x2ea   : > { %v11717_v37 = vcombine.low %v4648_v45, %v4658_v49  ;;  %v4672_v31 = vsel %vm14860_vm12, %v4667_v9, %v4671_v61  ;;  %v5051_v61 = vsel %vm15304_vm1, %v11736_v32, %v5050_v10  ;;  %v11738_v48 = vrot.slane %v4980_v59, 9  ;;  %v4983_v9 = vld [vmem:[#allocation2 + $0x60] sm:$0xe] }
 0x2eb   : > { %v11752_v46 = vcombine.low %v5051_v61, %v5054_v62  ;;  %v11739_v45 = vrot.slane %v4981_v29, 9  ;;  %v5073_v49 = vrot.slane %v5071_v50, 4  ;;  %v5068_v6 = vsel %vm15304_vm1, %v5066_v35, %v5067_v26  ;;  %v4986_v62 = vld [vmem:[#allocation2 + $0x84] sm:$0xe] }
 0x2ec   : > { %v5065_v39 = vsel %vm15304_vm1, %v11738_v48, %v5064_v30  ;;  %v5078_v41 = vrot.slane %v15902_v63, 5  ;;  %v5085_v2 = vrot.slane %v15932_v36, 5  ;;  %v5081_v1 = vrot.slane %v15948_v4, 5  ;;  %v4987_v30 = vld [vmem:[#allocation2 + $0x90] sm:$0xe] }
 0x2ed   : > { %12966 = vmatmul.mubr.msk.bf16.gmra.mrb[20].mxu0 %vm1375_vm13, %v11714_v8  ;;  %v11718_v8 = vcombine.low %v4672_v31, %v4682_v33  ;;  %v5075_v18 = vsel %vm15304_vm1, %v5073_v49, %v5074_v0  ;;  %v11754_v40 = vcombine.low %v5065_v39, %v5068_v6  ;;  %v11741_v31 = vrot.slane %v4983_v9, 9  ;;  %v4989_v49 = vld [vmem:[#allocation2 + $0xa8] sm:$0xe] }
 0x2ee   : > { %12969 = vmatprep.mubr.msk.bf16.mxu0 %vm1375_vm13, %v11715_v34  ;;  %v11751_v34 = vcombine.low %v5044_v54, %v5047_v56  ;;  %v5080_v58 = vrot.slane %v5078_v41, 4  ;;  %v5087_v33 = vrot.slane %v5085_v2, 4  ;;  %v5088_v63 = vrot.slane %v15962_v28, 5 }
 0x2ef   : > { %v5092_v54 = vrot.slane %v15969_v5, 5  ;;  %v5086_v56 = vsel %vm15304_vm1, %v11741_v31, %v5085_v2  ;;  %v5099_v28 = vrot.slane %v15973_v47, 5  ;;  %v5095_v43 = vrot.slane %v15995_v60, 5  ;;  %v18812_v2 = vld [vmem:[#allocation23_spill] sm:$0xff] }
 0x2f0   : > { %v5082_v36 = vsel %vm15304_vm1, %v5080_v58, %v5081_v1  ;;  %v5089_v4 = vsel %vm15304_vm1, %v5087_v33, %v5088_v63  ;;  %v11743_v23 = vrot.slane %v4985_v3, 9  ;;  %v5102_v5 = vrot.slane %v15999_v11, 5  ;;  %v4990_v58 = vld [vmem:[#allocation2 + $0xb4] sm:$0xe]  ;;  %v18814_v1 = vld [vmem:[#allocation24_spill] sm:$0xff] }
 0x2f1   : > { %v5094_v32 = vrot.slane %v5092_v54, 4  ;;  %v5101_v16 = vrot.slane %v5099_v28, 4  ;;  %v5106_v51 = vrot.slane %v15990_v52, 5  ;;  %v5113_v11 = vrot.slane %v16011_v55, 5  ;;  %v4991_v33 = vld [vmem:[#allocation2 + $0xc0] sm:$0xe] }
 0x2f2   : > { %v5100_v61 = vsel %vm15304_vm1, %v11743_v23, %v5099_v28  ;;  %v11744_v59 = vrot.slane %v4986_v62, 9  ;;  %v5109_v29 = vrot.slane %v16020_v17, 5  ;;  %v5116_v52 = vrot.slane %v16032_v38, 5 }
 0x2f3   : > { %v5096_v47 = vsel %vm15304_vm1, %v5094_v32, %v5095_v43  ;;  %v5103_v60 = vsel %vm15304_vm1, %v5101_v16, %v5102_v5  ;;  %v5120_v35 = vrot.slane %v16030_v19, 5  ;;  %v5127_v38 = vrot.slane %v16041_v20, 5  ;;  %v18816_v43 = vld [vmem:[#allocation22_spill] sm:$0xff] }
 0x2f4   : > { %v11759_v21 = vcombine.low %v5100_v61, %v5103_v60  ;;  %v5107_v48 = vsel %vm15304_vm1, %v11744_v59, %v5106_v51  ;;  %v5130_v19 = vrot.slane %v18812_v2, 5  ;;  %v5141_v31 = vrot.slane %v18814_v1, 5  ;;  %v6671_v16 = vld [vmem:[#allocation9 + $0x2] sm:$0x3]  ;;  %v6270_v59 = vld [vmem:[#allocation2 + $0x8] sm:$0x1] }
 0x2f5   : > { %12970 = vmatmul.mubr.msk.bf16.gmra.mrb[24].mxu0 %vm1375_vm13, %v11716_v14  ;;  %v5072_v14 = vsel %vm15304_vm1, %v11739_v45, %v5071_v50  ;;  %v5108_v50 = vrot.slane %v5106_v51, 4  ;;  %v4988_v45 = vld [vmem:[#allocation2 + $0x9c] sm:$0xe]  ;;  %v5144_v28 = vrot.slane %v16095_v22, 5  ;;  %v18815_v22 = vld [vmem:[#allocation21_spill] sm:$0xff]  ;;  %13838 = vmatprep.subr.msk.bf16.mxu1 %vm1424_vm4, %v6671_v16  ;;  %v6769_v5 = vsel %vm1424_vm4, %v6671_v16, 0 }
 0x2f6   : > { %12973 = vmatprep.mubr.msk.bf16.mxu0 %vm1375_vm13, %v11717_v37  ;;  %v4982_v37 = vld [vmem:[#allocation2 + $0x54] sm:$0xe]  ;;  %v11755_v44 = vcombine.low %v5072_v14, %v5075_v18  ;;  %v11746_v6 = vrot.slane %v4988_v45, 9  ;;  %v5123_v14 = vrot.slane %v16059_v24, 5  ;;  %v11747_v18 = vrot.slane %v4989_v49, 9  ;;  %13012 = vmatpush3.bf16.msra.mxu1 %v6769_v5 }
 0x2f7   : > { %v11740_v12 = vrot.slane %v4982_v37, 9  ;;  %v5110_v55 = vsel %vm15304_vm1, %v5108_v50, %v5109_v29  ;;  %v5129_v37 = vrot.slane %v5127_v38, 4  ;;  %v18817_v23 = vcombine.low %v18815_v22, %v18816_v43 }
 0x2f8   : > { %v11760_v0 = vcombine.low %v5107_v48, %v5110_v55  ;;  %v5121_v9 = vsel %vm15304_vm1, %v11746_v6, %v5120_v35 }
 0x2f9   : > { %v5079_v10 = vsel %vm15304_vm1, %v11740_v12, %v5078_v41  ;;  %v5122_v41 = vrot.slane %v5120_v35, 4  ;;  %v5128_v12 = vsel %vm15304_vm1, %v11747_v18, %v5127_v38  ;;  %v5131_v24 = vsel %vm15304_vm1, %v5129_v37, %v5130_v19 }
 0x2fa   : > { %v11756_v25 = vcombine.low %v5079_v10, %v5082_v36  ;;  %v11763_v10 = vcombine.low %v5128_v12, %v5131_v24  ;;  %v11748_v36 = vrot.slane %v4990_v58, 9 }
 0x2fb   : > { %v5124_v20 = vsel %vm15304_vm1, %v5122_v41, %v5123_v14 }
 0x2fc   : > { %v11762_v63 = vcombine.low %v5121_v9, %v5124_v20 }
 0x2fd   : > { %12974 = vmatmul.mubr.msk.bf16.gmra.mrb[28].mxu0 %vm1375_vm13, %v11718_v8  ;;  %v11757_v8 = vcombine.low %v5086_v56, %v5089_v4  ;;  %v5137_v56 = vrot.slane %v16088_v27, 5  ;;  %v11749_v4 = vrot.slane %v4991_v33, 9 }
 0x2fe   : > { %12979 = vmatprep.mubr.msk.bf16.mxu0 %vm1375_vm13, %v11751_v34  ;;  %v11742_v34 = vrot.slane %v4984_v13, 9  ;;  %v5143_v13 = vrot.slane %v5141_v31, 4 }
 0x300   : > { %v5093_v53 = vsel %vm15304_vm1, %v11742_v34, %v5092_v54  ;;  %v5145_v27 = vsel %vm15304_vm1, %v5143_v13, %v5144_v28 }
 0x301   : > { %v11758_v7 = vcombine.low %v5093_v53, %v5096_v47  ;;  %v6237_v53 = vld [vmem:[#allocation2] sm:$0xf]  ;;  %v6238_v47 = vld [vmem:[#allocation2 + $0x4] sm:$0xf] }
 0x302   : > { %v6287_v51 = vshrl.u32 %v6237_v53, 16  ;;  %v6290_v61 = vshll.u32 %v6237_v53, 16  ;;  %v6296_v60 = vshll.u32 %v6238_v47, 16  ;;  %v6300_v62 = vshrl.u32 %v6238_v47, 16 }
 0x305   : > { %12980 = vmatmul.mubr.msk.bf16.vlgmr.msra.gmra.mrb[0].mxu0 %vm1375_vm13, %v11752_v46  ;;  %v11745_v46 = vrot.slane %v4987_v30, 9  ;;  %v6292_v30 = vrot.slane %v6290_v61, 5 }
 0x306   : > { %12983 = vmatprep.mubr.msk.bf16.mxu0 %vm1375_vm13, %v11753_v42  ;;  %v5115_v42 = vrot.slane %v5113_v11, 4 }
 0x307   : > { %v5114_v26 = vsel %vm15304_vm1, %v11745_v46, %v5113_v11  ;;  %v6289_v11 = vrot.slane %v6287_v51, 4  ;;  %v6306_v46 = vshll.u32 %v6270_v59, 16  ;;  %v6269_v51 = vld [vmem:[#allocation9] sm:$0x3] }
 0x308   : > { %v5117_v17 = vsel %vm15304_vm1, %v5115_v42, %v5116_v52  ;;  %13839 = vmatprep.subr.msk.bf16.mxu1 %vm1424_vm4, %v6269_v51 }
 0x309   : > { %v11761_v39 = vcombine.low %v5114_v26, %v5117_v17  ;;  %v6293_v50 = vor.u32 %v6292_v30, %v6289_v11  ;;  %v6308_v48 = vrot.slane %v6306_v46, 5  ;;  %v16242_v17 = vld [vmem:[#allocation8] ss:$0 sm:$0xff] }
 0x30b   : > { %v6294_v42 = vrot.slane %v6293_v50, 4 }
 0x30d   : > { %12984 = vmatmul.mubr.msk.bf16.gmra.mrb[4].mxu0 %vm1375_vm13, %v11754_v40  ;;  %v18813_v40 = vld [vmem:[#allocation18_spill] sm:$0xff] }
 0x30e   : > { %12987 = vmatprep.mubr.msk.bf16.mxu0 %vm1375_vm13, %v11755_v44  ;;  %v5134_v44 = vrot.slane %v18813_v40, 5 }
 0x310   : > { %v5136_v54 = vrot.slane %v5134_v44, 4  ;;  %v5135_v3 = vsel %vm15304_vm1, %v11748_v36, %v5134_v44 }
 0x315   : > { %12988 = vmatmul.mubr.msk.bf16.gmra.mrb[8].mxu0 %vm1375_vm13, %v11756_v25  ;;  %v5138_v25 = vsel %vm15304_vm1, %v5136_v54, %v5137_v56 }
 0x316   : > { %12991 = vmatprep.mubr.msk.bf16.mxu0 %vm1375_vm13, %v11757_v8  ;;  %v5142_v8 = vsel %vm15304_vm1, %v11749_v4, %v5141_v31  ;;  %v11764_v34 = vcombine.low %v5135_v3, %v5138_v25 }
 0x317   : > { %v11765_v32 = vcombine.low %v5142_v8, %v5145_v27 }
 0x31d   : > { %12992 = vmatmul.mubr.msk.bf16.gmra.mrb[12].mxu0 %vm1375_vm13, %v11758_v7  ;;  %v6298_v7 = vrot.slane %v6296_v60, 5 }
 0x31e   : > { %12995 = vmatprep.mubr.msk.bf16.mxu0 %vm1375_vm13, %v11759_v21  ;;  %v6302_v21 = vrot.slane %v6300_v62, 4 }
 0x31f   : > { %v6299_v55 = vsel %vm14860_vm12, %v6294_v42, %v6298_v7 }
 0x320   : > { %v6303_v29 = vor.u32 %v6302_v21, %v6298_v7 }
 0x322   : > { %v6304_v52 = vrot.slane %v6303_v29, 4 }
 0x324   : > { %v6309_v35 = vsel %vm14860_vm12, %v6304_v52, %v6308_v48 }
 0x325   : > { %12996 = vmatmul.mubr.msk.bf16.gmra.mrb[16].mxu0 %vm1375_vm13, %v11760_v0  ;;  %v11848_v26 = vcombine.low %v6299_v55, %v6309_v35 }
 0x326   : > { %12999 = vmatprep.mubr.msk.bf16.mxu0 %vm1375_vm13, %v11761_v39 }
 0x327   : > { %13013 = vmatprep.mubr.msk.bf16.mxu1 %vm1375_vm13, %v11848_v26 }
 0x32d   : > { %13000 = vmatmul.mubr.msk.bf16.gmra.mrb[20].mxu0 %vm1375_vm13, %v11762_v63 }
 0x32e   : > { %13003 = vmatprep.mubr.msk.bf16.mxu0 %vm1375_vm13, %v11763_v10 }
 0x335   : > { %13004 = vmatmul.mubr.msk.bf16.gmra.mrb[24].mxu0 %vm1375_vm13, %v11764_v34 }
 0x336   : > { %13007 = vmatprep.mubr.msk.bf16.mxu0 %vm1375_vm13, %v11765_v32 }
 0x33d   : > { %13008 = vmatmul.mubr.msk.bf16.gmra.mrb[28].mxu0 %vm1375_vm13, %v18817_v23 }
 0x3d8   : > { %v12981_v45 = vpop.f32.mrb[0].mxu0 }
 0x3d9   : > { %v16245_v38 = vadd.f32 %v12981_v45, %v16242_v17  ;;  %v5288_v49 = vpop.f32.mrb[1].mxu0 }
 0x3da   : > { %v16248_v0 = vadd.f32 %v16242_v17, %v5288_v49  ;;  %v12982_v39 = vpop.f32.mrb[2].mxu0 }
 0x3db   : > { %v11786_v6 = vmul.f32 -1.442695, %v16245_v38  ;;  %v16252_v41 = vadd.f32 %v12982_v39, %v16242_v17  ;;  %v5291_v14 = vpop.f32.mrb[3].mxu0 }
 0x3dc   : > { %v11784_v18 = vmul.f32 -1.442695, %v16248_v0  ;;  %v16256_v37 = vadd.f32 %v16242_v17, %v5291_v14 }
 0x3dd   : > { %14022 = vpow2.f32 %v11786_v6  ;;  %v11787_v2 = vmul.f32 -1.442695, %v16252_v41 }
 0x3de   : > { %14024 = vpow2.f32 %v11784_v18  ;;  %v11785_v19 = vmul.f32 -1.442695, %v16256_v37 }
 0x3df   : > { %14026 = vpow2.f32 %v11787_v2 }
 0x3e0   : > { %14028 = vpow2.f32 %v11785_v19  ;;  %v12985_v9 = vpop.f32.mrb[4].mxu0 }
 0x3e1   : > { %v16261_v20 = vadd.f32 %v12985_v9, %v16242_v17  ;;  %v5304_v40 = vpop.f32.mrb[5].mxu0 }
 0x3e2   : > { %v16264_v44 = vadd.f32 %v16242_v17, %v5304_v40  ;;  %v12986_v12 = vpop.f32.mrb[6].mxu0 }
 0x3e3   : > { %v11790_v24 = vmul.f32 -1.442695, %v16261_v20  ;;  %v16268_v58 = vadd.f32 %v12986_v12, %v16242_v17  ;;  %v5307_v1 = vpop.f32.mrb[7].mxu0  ;;  %v16309_v12 = vsel %vm1424_vm4, %v6269_v51, 0 }
 0x3e4   : > { %v11788_v31 = vmul.f32 -1.442695, %v16264_v44  ;;  %v16272_v33 = vadd.f32 %v16242_v17, %v5307_v1 }
 0x3e5   : > { %14030 = vpow2.f32 %v11790_v24  ;;  %v11791_v63 = vmul.f32 -1.442695, %v16268_v58 }
 0x3e6   : > { %14032 = vpow2.f32 %v11788_v31  ;;  %v11789_v10 = vmul.f32 -1.442695, %v16272_v33 }
 0x3e7   : > { %v14023_v36 = vpop.eup %14022  ;;  %14034 = vpow2.f32 %v11791_v63 }
 0x3e8   : > { %v14025_v54 = vpop.eup %14024  ;;  %v5584_v56 = vadd.f32 1.0, %v14023_v36  ;;  %14036 = vpow2.f32 %v11789_v10  ;;  %v12989_v4 = vpop.f32.mrb[8].mxu0 }
 0x3e9   : > { %v14027_v13 = vpop.eup %14026  ;;  %v5582_v28 = vadd.f32 1.0, %v14025_v54  ;;  %v16277_v3 = vadd.f32 %v12989_v4, %v16242_v17  ;;  %v5320_v25 = vpop.f32.mrb[9].mxu0 }
 0x3ea   : > { %v14029_v8 = vpop.eup %14028  ;;  %14038 = vrcp.f32 %v5584_v56  ;;  %v5585_v27 = vadd.f32 1.0, %v14027_v13  ;;  %v16280_v34 = vadd.f32 %v16242_v17, %v5320_v25  ;;  %v12990_v32 = vpop.f32.mrb[10].mxu0 }
 0x3eb   : > { %14040 = vrcp.f32 %v5582_v28  ;;  %v5583_v22 = vadd.f32 1.0, %v14029_v8  ;;  %v11794_v43 = vmul.f32 -1.442695, %v16277_v3  ;;  %v16284_v23 = vadd.f32 %v12990_v32, %v16242_v17  ;;  %v5323_v16 = vpop.f32.mrb[11].mxu0 }
 0x3ec   : > { %14042 = vrcp.f32 %v5585_v27  ;;  %v11792_v5 = vmul.f32 -1.442695, %v16280_v34  ;;  %v16288_v53 = vadd.f32 %v16242_v17, %v5323_v16 }
 0x3ed   : > { %14044 = vrcp.f32 %v5583_v22  ;;  %v11795_v47 = vmul.f32 -1.442695, %v16284_v23 }
 0x3ee   : > { %14046 = vpow2.f32 %v11794_v43  ;;  %v11793_v61 = vmul.f32 -1.442695, %v16288_v53 }
 0x3ef   : > { %v14031_v60 = vpop.eup %14030  ;;  %14048 = vpow2.f32 %v11792_v5 }
 0x3f0   : > { %v14033_v62 = vpop.eup %14032  ;;  %v5588_v11 = vadd.f32 1.0, %v14031_v60  ;;  %14050 = vpow2.f32 %v11795_v47  ;;  %v12993_v30 = vpop.f32.mrb[12].mxu0  ;;  %v6132_v47 = vld [vmem:[#allocation2 + $0x18] sm:$0xf] }
 0x3f1   : > { %v14035_v7 = vpop.eup %14034  ;;  %v5586_v21 = vadd.f32 1.0, %v14033_v62  ;;  %14052 = vpow2.f32 %v11793_v61  ;;  %v16294_v59 = vadd.f32 %v12993_v30, %v16242_v17  ;;  %v5336_v50 = vpop.f32.mrb[13].mxu0 }
 0x3f2   : > { %v14037_v29 = vpop.eup %14036  ;;  %14054 = vrcp.f32 %v5588_v11  ;;  %v5589_v46 = vadd.f32 1.0, %v14035_v7  ;;  %v16297_v42 = vadd.f32 %v16242_v17, %v5336_v50  ;;  %v12994_v52 = vpop.f32.mrb[14].mxu0 }
 0x3f3   : > { %14056 = vrcp.f32 %v5586_v21  ;;  %v5587_v48 = vadd.f32 1.0, %v14037_v29  ;;  %v11798_v55 = vmul.f32 -1.442695, %v16294_v59  ;;  %v16301_v35 = vadd.f32 %v12994_v52, %v16242_v17  ;;  %v5339_v26 = vpop.f32.mrb[15].mxu0  ;;  %v6136_v52 = vld [vmem:[#allocation2 + $0x20] sm:$0x1] }
 0x3f4   : > { %v14039_v45 = vpop.eup %14038  ;;  %14058 = vrcp.f32 %v5589_v46  ;;  %v11796_v49 = vmul.f32 -1.442695, %v16297_v42 }
 0x3f5   : > { %v14041_v39 = vpop.eup %14040  ;;  %v5680_v6 = vmul.f32 %v14039_v45, %v16245_v38  ;;  %14060 = vrcp.f32 %v5587_v48  ;;  %v11799_v14 = vmul.f32 -1.442695, %v16301_v35  ;;  %v16313_v38 = vadd.f32 %v16242_v17, %v5339_v26 }
 0x3f6   : > { %v14043_v18 = vpop.eup %14042  ;;  %v5678_v2 = vmul.f32 %v14041_v39, %v16248_v0  ;;  %14062 = vpow2.f32 %v11798_v55 }
 0x3f7   : > { %v14045_v19 = vpop.eup %14044  ;;  %v12257_v9 = vpack.c.bf16 %v5680_v6, %v5680_v6  ;;  %v5681_v40 = vmul.f32 %v14043_v18, %v16252_v41  ;;  %14064 = vpow2.f32 %v11796_v49 }
 0x3f8   : > { %v14047_v24 = vpop.eup %14046  ;;  %v12255_v1 = vpack.c.bf16 %v5678_v2, %v5678_v2  ;;  %v5679_v31 = vmul.f32 %v14045_v19, %v16256_v37  ;;  %14066 = vpow2.f32 %v11799_v14  ;;  %v16315_v63 = vpop.f32.mrb[16].mxu0  ;;  %v6129_v14 = vld [vmem:[#allocation2 + $0x14] sm:$0x1]  ;;  %v14300_v19 = vld [vmem:[#allocation2 + $0xc] sm:$0xf] }
 0x3f9   : > { %v14049_v0 = vpop.eup %14048  ;;  %v5824_v10 = vshrl.u32 %v12257_v9, 16  ;;  %v5827_v36 = vshll.u32 %v12257_v9, 16  ;;  %v12258_v54 = vpack.c.bf16 %v5681_v40, %v5681_v40  ;;  %v5592_v56 = vadd.f32 1.0, %v14047_v24  ;;  %v16317_v41 = vpop.f32.mrb[17].mxu0 }
 0x3fa   : > { %v16319_v4 = vpop.eup %14050  ;;  %v5807_v13 = vshrl.u32 %v12255_v1, 16  ;;  %v5810_v28 = vshll.u32 %v12255_v1, 16  ;;  %v12256_v25 = vpack.c.bf16 %v5679_v31, %v5679_v31  ;;  %v5590_v8 = vadd.f32 1.0, %v14049_v0  ;;  %v16321_v37 = vpop.f32.mrb[18].mxu0 }
 0x3fb   : > { %v14053_v27 = vpop.eup %14052  ;;  %v5826_v32 = vrot.slane %v5824_v10, 7  ;;  %v5832_v22 = vshrl.u32 %v12258_v54, 16  ;;  %v5835_v43 = vshll.u32 %v12258_v54, 16  ;;  %14068 = vrcp.f32 %v5592_v56  ;;  %v16323_v16 = vpop.f32.mrb[19].mxu0 }
 0x3fc   : > { %v14055_v5 = vpop.eup %14054  ;;  %v5809_v51 = vrot.slane %v5807_v13, 7  ;;  %v5815_v61 = vshrl.u32 %v12256_v25, 16  ;;  %v5818_v60 = vshll.u32 %v12256_v25, 16  ;;  %14070 = vrcp.f32 %v5590_v8 }
 0x3fd   : > { %v14057_v62 = vpop.eup %14056  ;;  %v5829_v11 = vor.u32 %v5827_v36, %v5826_v32  ;;  %v5830_v30 = vrot.slane %v5826_v32, 4  ;;  %v5834_v7 = vrot.slane %v5832_v22, 7  ;;  %v5684_v21 = vmul.f32 %v14055_v5, %v16261_v20 }
 0x3fe   : > { %v14059_v50 = vpop.eup %14058  ;;  %v5812_v29 = vor.u32 %v5810_v28, %v5809_v51  ;;  %v5813_v46 = vrot.slane %v5809_v51, 4  ;;  %v5817_v48 = vrot.slane %v5815_v61, 7  ;;  %v5682_v55 = vmul.f32 %v14057_v62, %v16264_v44  ;;  %v6146_v62 = vld [vmem:[#allocation2 + $0x30] sm:$0xf] }
 0x3ff   : > { %v14061_v26 = vpop.eup %14060  ;;  %v6133_v49 = vsel %vm14842_vm9, %v5829_v11, %v6132_v47  ;;  %v5837_v39 = vor.u32 %v5835_v43, %v5834_v7  ;;  %v5839_v6 = vrot.slane %v5834_v7, 4  ;;  %v12261_v18 = vpack.c.bf16 %v5684_v21, %v5684_v21 }
 0x400   : > { %v14063_v2 = vpop.eup %14062  ;;  %6134 = vst [vmem:[#allocation2 + $0x18] sm:$0xf] %v6133_v49  ;;  %v6126_v20 = vsel %vm14842_vm9, %v5812_v29, %v14300_v19  ;;  %v5820_v9 = vor.u32 %v5818_v60, %v5817_v48  ;;  %v5822_v40 = vrot.slane %v5817_v48, 4  ;;  %v12259_v24 = vpack.c.bf16 %v5682_v55, %v5682_v55  ;;  %v16331_v1 = vpop.f32.mrb[20].mxu0 }
 0x401   : > { %v14065_v44 = vpop.eup %14064  ;;  %6127 = vst [vmem:[#allocation2 + $0xc] sm:$0xf] %v6126_v20  ;;  %v5838_v0 = vsel %vm14850_vm11, %v5830_v30, %v5837_v39  ;;  %v6137_v36 = vsel %vm14808_vm5, %v5839_v6, %v6136_v52  ;;  %v5858_v54 = vshrl.u32 %v12261_v18, 16  ;;  %v16338_v56 = vmul.f32 -1.442695, %v16313_v38  ;;  %v16340_v13 = vpop.f32.mrb[21].mxu0 }
 0x402   : > { %v14067_v28 = vpop.eup %14066  ;;  %6135 = vst.msk [vmem:[#allocation2 + $0x1c] sm:$0xf] %vm298_vm0, %v5838_v0  ;;  %6138 = vst [vmem:[#allocation2 + $0x20] sm:$0x1] %v6137_v36  ;;  %v5821_v25 = vsel %vm14850_vm11, %v5813_v46, %v5820_v9  ;;  %v6130_v8 = vsel %vm14808_vm5, %v5822_v40, %v6129_v14  ;;  %v5861_v32 = vshll.u32 %v12261_v18, 16  ;;  %v5841_v22 = vshrl.u32 %v12259_v24, 16 }
 0x403   : > { %v16347_v43 = vpop.f32.mrb[22].mxu0  ;;  %6128 = vst.msk [vmem:[#allocation2 + $0x10] sm:$0xf] %vm298_vm0, %v5821_v25  ;;  %6131 = vst [vmem:[#allocation2 + $0x14] sm:$0x1] %v6130_v8  ;;  %v5860_v5 = vrot.slane %v5858_v54, 7  ;;  %v5685_v47 = vmul.f32 %v14059_v50, %v16268_v58  ;;  %v5683_v51 = vmul.f32 %v14061_v26, %v16272_v33 }
 0x404   : > { %v5593_v61 = vadd.f32 1.0, %v16319_v4  ;;  %v16353_v60 = vpop.f32.mrb[23].mxu0  ;;  %v5843_v11 = vrot.slane %v5841_v22, 7  ;;  %v5844_v30 = vshll.u32 %v12259_v24, 16  ;;  %v5591_v7 = vadd.f32 1.0, %v14053_v27 }
 0x405   : > { %v5596_v21 = vadd.f32 1.0, %v14063_v2  ;;  %v14069_v29 = vpop.eup %14068  ;;  %v5863_v46 = vor.u32 %v5861_v32, %v5860_v5  ;;  %v6139_v52 = vld [vmem:[#allocation2 + $0x24] sm:$0xf]  ;;  %v12262_v48 = vpack.c.bf16 %v5685_v47, %v5685_v47  ;;  %v12260_v55 = vpack.c.bf16 %v5683_v51, %v5683_v51  ;;  %v6143_v0 = vld [vmem:[#allocation2 + $0x2c] sm:$0x1] }
 0x406   : > { %v5594_v49 = vadd.f32 1.0, %v14065_v44  ;;  %v14071_v39 = vpop.eup %14070  ;;  %v5864_v6 = vrot.slane %v5860_v5, 4  ;;  %v5846_v58 = vor.u32 %v5844_v30, %v5843_v11  ;;  %v5688_v33 = vmul.f32 %v14069_v29, %v16277_v3  ;;  %v6150_v3 = vld [vmem:[#allocation2 + $0x38] sm:$0x1] }
 0x407   : > { %14072 = vrcp.f32 %v5593_v61  ;;  %v6147_v4 = vsel %vm14842_vm9, %v5863_v46, %v6146_v62  ;;  %v5847_v50 = vrot.slane %v5843_v11, 4  ;;  %v5866_v26 = vshrl.u32 %v12262_v48, 16  ;;  %v6160_v62 = vld [vmem:[#allocation2 + $0x48] sm:$0xf] }
 0x408   : > { %v5849_v14 = vshrl.u32 %v12260_v55, 16  ;;  %6148 = vst [vmem:[#allocation2 + $0x30] sm:$0xf] %v6147_v4  ;;  %v6140_v27 = vsel %vm14842_vm9, %v5846_v58, %v6139_v52  ;;  %v5869_v18 = vshll.u32 %v12262_v48, 16  ;;  %v12265_v2 = vpack.c.bf16 %v5688_v33, %v5688_v33  ;;  %v16361_v20 = vpop.f32.mrb[24].mxu0 }
 0x409   : > { %v5686_v19 = vmul.f32 %v14071_v39, %v16280_v34  ;;  %6141 = vst [vmem:[#allocation2 + $0x24] sm:$0xf] %v6140_v27  ;;  %v5868_v9 = vrot.slane %v5866_v26, 7  ;;  %v5852_v24 = vshll.u32 %v12260_v55, 16  ;;  %14074 = vrcp.f32 %v5591_v7  ;;  %v16363_v44 = vpop.f32.mrb[25].mxu0 }
 0x40a   : > { %v5851_v40 = vrot.slane %v5849_v14, 7  ;;  %v5892_v36 = vshrl.u32 %v12265_v2, 16  ;;  %14076 = vrcp.f32 %v5596_v21  ;;  %v5597_v25 = vadd.f32 1.0, %v14067_v28  ;;  %v16365_v8 = vpop.f32.mrb[26].mxu0  ;;  %v6153_v48 = vld [vmem:[#allocation2 + $0x3c] sm:$0xf] }
 0x40b   : > { %v12263_v54 = vpack.c.bf16 %v5686_v19, %v5686_v19  ;;  %v5871_v32 = vor.u32 %v5869_v18, %v5868_v9  ;;  %v5873_v22 = vrot.slane %v5868_v9, 4  ;;  %v16367_v47 = vpop.f32.mrb[27].mxu0  ;;  %v5895_v61 = vshll.u32 %v12265_v2, 16 }
 0x40c   : > { %v5854_v34 = vor.u32 %v5852_v24, %v5851_v40  ;;  %v5856_v5 = vrot.slane %v5851_v40, 4  ;;  %v16369_v51 = vrot.slane %v5892_v36, 7  ;;  %14078 = vrcp.f32 %v5594_v49 }
 0x40d   : > { %v5875_v11 = vshrl.u32 %v12263_v54, 16  ;;  %v5872_v30 = vsel %vm14850_vm11, %v5864_v6, %v5871_v32  ;;  %v6151_v28 = vsel %vm14808_vm5, %v5873_v22, %v6150_v3  ;;  %v5878_v52 = vshll.u32 %v12263_v54, 16 }
 0x40e   : > { %v5855_v7 = vsel %vm14850_vm11, %v5847_v50, %v5854_v34  ;;  %v6144_v21 = vsel %vm14808_vm5, %v5856_v5, %v6143_v0  ;;  %6149 = vst.msk [vmem:[#allocation2 + $0x34] sm:$0xf] %vm298_vm0, %v5872_v30  ;;  %6152 = vst [vmem:[#allocation2 + $0x38] sm:$0x1] %v6151_v28  ;;  %v5897_v29 = vor.u32 %v5895_v61, %v16369_v51  ;;  %14080 = vrcp.f32 %v5597_v25  ;;  %v6164_v5 = vld [vmem:[#allocation2 + $0x50] sm:$0x1] }
 0x40f   : > { %6142 = vst.msk [vmem:[#allocation2 + $0x28] sm:$0xf] %vm298_vm0, %v5855_v7  ;;  %6145 = vst [vmem:[#allocation2 + $0x2c] sm:$0x1] %v6144_v21  ;;  %v16382_v46 = vrot.slane %v5875_v11, 7  ;;  %14082 = vpow2.f32 %v16338_v56  ;;  %v16387_v55 = vadd.f32 %v16315_v63, %v16242_v17  ;;  %v16391_v49 = vadd.f32 %v16242_v17, %v16317_v41 }
 0x410   : > { %v16395_v39 = vadd.f32 %v16321_v37, %v16242_v17  ;;  %v5898_v58 = vrot.slane %v16369_v51, 4  ;;  %v6161_v33 = vsel %vm14842_vm9, %v5897_v29, %v6160_v62  ;;  %v16403_v63 = vadd.f32 %v16242_v17, %v16323_v16  ;;  %v16405_v4 = vpop.f32.mrb[28].mxu0 }
 0x411   : > { %v14073_v6 = vpop.eup %14072  ;;  %v5880_v56 = vor.u32 %v5878_v52, %v16382_v46  ;;  %6162 = vst [vmem:[#allocation2 + $0x48] sm:$0xf] %v6161_v33  ;;  %v11802_v37 = vmul.f32 -1.442695, %v16387_v55  ;;  %v11800_v50 = vmul.f32 -1.442695, %v16391_v49  ;;  %v16416_v16 = vadd.f32 %v16331_v1, %v16242_v17 }
 0x412   : > { %v5689_v41 = vmul.f32 %v14073_v6, %v16284_v23  ;;  %v11803_v26 = vmul.f32 -1.442695, %v16395_v39  ;;  %v11801_v27 = vmul.f32 -1.442695, %v16403_v63  ;;  %v16420_v18 = vadd.f32 %v16242_v17, %v16340_v13  ;;  %v16422_v23 = vpop.f32.mrb[29].mxu0 }
 0x413   : > { %v6154_v14 = vsel %vm14842_vm9, %v5880_v56, %v6153_v48  ;;  %v14075_v2 = vpop.eup %14074  ;;  %14084 = vpow2.f32 %v11802_v37  ;;  %v16426_v9 = vadd.f32 %v16347_v43, %v16242_v17  ;;  %v16430_v3 = vadd.f32 %v16242_v17, %v16353_v60  ;;  %v16432_v1 = vpop.f32.mrb[30].mxu0 }
 0x414   : > { %6155 = vst [vmem:[#allocation2 + $0x3c] sm:$0xf] %v6154_v14  ;;  %v12266_v19 = vpack.c.bf16 %v5689_v41, %v5689_v41  ;;  %v14077_v40 = vpop.eup %14076  ;;  %v5687_v13 = vmul.f32 %v14075_v2, %v16288_v53  ;;  %14086 = vpow2.f32 %v11800_v50  ;;  %v11806_v24 = vmul.f32 -1.442695, %v16416_v16  ;;  %v16437_v36 = vpop.f32.mrb[31].mxu0 }
 0x415   : > { %v11804_v0 = vmul.f32 -1.442695, %v16420_v18  ;;  %v5881_v54 = vrot.slane %v16382_v46, 4  ;;  %v5692_v25 = vmul.f32 %v14077_v40, %v16294_v59  ;;  %14088 = vpow2.f32 %v11803_v26  ;;  %v6157_v41 = vld [vmem:[#allocation2 + $0x44] sm:$0x1] }
 0x416   : > { %v5900_v43 = vshrl.u32 %v12266_v19, 16  ;;  %v14079_v60 = vpop.eup %14078  ;;  %v5903_v32 = vshll.u32 %v12266_v19, 16  ;;  %v12264_v22 = vpack.c.bf16 %v5687_v13, %v5687_v13  ;;  %14090 = vpow2.f32 %v11801_v27  ;;  %v6174_v14 = vld [vmem:[#allocation2 + $0x60] sm:$0xf] }
 0x417   : > { %v11807_v34 = vmul.f32 -1.442695, %v16426_v9  ;;  %v12269_v51 = vpack.c.bf16 %v5692_v25, %v5692_v25  ;;  %v5690_v61 = vmul.f32 %v14079_v60, %v16297_v42  ;;  %14092 = vpow2.f32 %v11806_v24  ;;  %v6167_v25 = vld [vmem:[#allocation2 + $0x54] sm:$0xf] }
 0x418   : > { %v5902_v53 = vrot.slane %v5900_v43, 7  ;;  %v14081_v62 = vpop.eup %14080  ;;  %v5883_v11 = vshrl.u32 %v12264_v22, 16  ;;  %v5886_v30 = vshll.u32 %v12264_v22, 16  ;;  %14094 = vpow2.f32 %v11804_v0 }
 0x419   : > { %v16444_v28 = vmul.f32 -1.442695, %v16430_v3  ;;  %v14083_v59 = vpop.eup %14082  ;;  %v5926_v29 = vshrl.u32 %v12269_v51, 16  ;;  %v5929_v46 = vshll.u32 %v12269_v51, 16  ;;  %v12267_v48 = vpack.c.bf16 %v5690_v61, %v5690_v61 }
 0x41a   : > { %v5905_v7 = vor.u32 %v5903_v32, %v5902_v53  ;;  %v5907_v21 = vrot.slane %v5902_v53, 4  ;;  %v5885_v52 = vrot.slane %v5883_v11, 7  ;;  %v5693_v6 = vmul.f32 %v14081_v62, %v16301_v35 }
 0x41b   : > { %v5595_v33 = vadd.f32 1.0, %v14083_v59  ;;  %v5928_v37 = vrot.slane %v5926_v29, 7  ;;  %14096 = vpow2.f32 %v11807_v34  ;;  %v5909_v27 = vshrl.u32 %v12267_v48, 16  ;;  %v6178_v29 = vld [vmem:[#allocation2 + $0x68] sm:$0x1] }
 0x41c   : > { %v5906_v42 = vsel %vm14850_vm11, %v5898_v58, %v5905_v7  ;;  %v6165_v56 = vsel %vm14808_vm5, %v5907_v21, %v6164_v5  ;;  %v5888_v50 = vor.u32 %v5886_v30, %v5885_v52  ;;  %v5890_v26 = vrot.slane %v5885_v52, 4 }
 0x41d   : > { %6163 = vst.msk [vmem:[#allocation2 + $0x4c] sm:$0xf] %vm298_vm0, %v5906_v42  ;;  %6166 = vst [vmem:[#allocation2 + $0x50] sm:$0x1] %v6165_v56  ;;  %v16454_v35 = vadd.f32 %v16361_v20, %v16242_v17  ;;  %v14085_v2 = vpop.eup %14084  ;;  %v5931_v19 = vor.u32 %v5929_v46, %v5928_v37  ;;  %v5912_v58 = vshll.u32 %v12267_v48, 16  ;;  %v12270_v40 = vpack.c.bf16 %v5693_v6, %v5693_v6 }
 0x41e   : > { %14098 = vrcp.f32 %v5595_v33  ;;  %v14087_v13 = vpop.eup %14086  ;;  %v5889_v24 = vsel %vm14850_vm11, %v5881_v54, %v5888_v50  ;;  %v6158_v0 = vsel %vm14808_vm5, %v5890_v26, %v6157_v41  ;;  %v16460_v43 = vrot.slane %v5909_v27, 7 }
 0x41f   : > { %v5600_v60 = vadd.f32 1.0, %v14085_v2  ;;  %v14089_v32 = vpop.eup %14088  ;;  %6156 = vst.msk [vmem:[#allocation2 + $0x40] sm:$0xf] %vm298_vm0, %v5889_v24  ;;  %6159 = vst [vmem:[#allocation2 + $0x44] sm:$0x1] %v6158_v0  ;;  %v5932_v20 = vrot.slane %v5928_v37, 4  ;;  %v6175_v22 = vsel %vm14842_vm9, %v5931_v19, %v6174_v14  ;;  %v16471_v52 = vadd.f32 %v16242_v17, %v16363_v44 }
 0x420   : > { %v5934_v34 = vshrl.u32 %v12270_v40, 16  ;;  %v5598_v53 = vadd.f32 1.0, %v14087_v13  ;;  %v14091_v5 = vpop.eup %14090  ;;  %6176 = vst [vmem:[#allocation2 + $0x60] sm:$0xf] %v6175_v22  ;;  %v5914_v54 = vor.u32 %v5912_v58, %v16460_v43  ;;  %v5937_v51 = vshll.u32 %v12270_v40, 16 }
 0x421   : > { %14100 = vrcp.f32 %v5600_v60  ;;  %v5601_v61 = vadd.f32 1.0, %v14089_v32  ;;  %v14093_v62 = vpop.eup %14092  ;;  %v5599_v30 = vadd.f32 1.0, %v14091_v5  ;;  %v11810_v59 = vmul.f32 -1.442695, %v16454_v35  ;;  %v6239_v14 = vld [vmem:[#allocation2 + $0xc] sm:$0xf] }
 0x422   : > { %v5936_v11 = vrot.slane %v5934_v34, 7  ;;  %14102 = vrcp.f32 %v5598_v53  ;;  %v14095_v7 = vpop.eup %14094  ;;  %v6168_v21 = vsel %vm14842_vm9, %v5914_v54, %v6167_v25  ;;  %v5604_v46 = vadd.f32 1.0, %v14093_v62  ;;  %v16510_v25 = vld [vmem:[#allocation2 + $0x10] sm:$0xf] }
 0x423   : > { %14104 = vrcp.f32 %v5601_v61  ;;  %6169 = vst [vmem:[#allocation2 + $0x54] sm:$0xf] %v6168_v21  ;;  %v5602_v33 = vadd.f32 1.0, %v14095_v7  ;;  %v11808_v42 = vmul.f32 -1.442695, %v16471_v52  ;;  %v16476_v56 = vadd.f32 %v16365_v8, %v16242_v17 }
 0x424   : > { %v5939_v48 = vor.u32 %v5937_v51, %v5936_v11  ;;  %v5941_v6 = vrot.slane %v5936_v11, 4  ;;  %14106 = vrcp.f32 %v5599_v30  ;;  %v16480_v41 = vadd.f32 %v16242_v17, %v16367_v47  ;;  %v6171_v61 = vld [vmem:[#allocation2 + $0x5c] sm:$0x1] }
 0x425   : > { %14108 = vrcp.f32 %v5604_v46  ;;  %v14097_v37 = vpop.eup %14096  ;;  %v16488_v26 = vadd.f32 %v16405_v4, %v16242_v17  ;;  %v11811_v47 = vmul.f32 -1.442695, %v16476_v56  ;;  %v16497_v58 = vadd.f32 %v16242_v17, %v16422_v23 }
 0x426   : > { %v5940_v44 = vsel %vm14850_vm11, %v5932_v20, %v5939_v48  ;;  %v6179_v50 = vsel %vm14808_vm5, %v5941_v6, %v6178_v29  ;;  %14110 = vrcp.f32 %v5602_v33  ;;  %v5605_v8 = vadd.f32 1.0, %v14097_v37 }
 0x427   : > { %6177 = vst.msk [vmem:[#allocation2 + $0x64] sm:$0xf] %vm298_vm0, %v5940_v44  ;;  %6180 = vst [vmem:[#allocation2 + $0x68] sm:$0x1] %v6179_v50  ;;  %14112 = vpow2.f32 %v16444_v28  ;;  %v11809_v27 = vmul.f32 -1.442695, %v16480_v41  ;;  %v16501_v4 = vadd.f32 %v16432_v1, %v16242_v17  ;;  %v16506_v28 = vadd.f32 %v16242_v17, %v16437_v36 }
 0x428   : > { %v14099_v2 = vpop.eup %14098  ;;  %14114 = vpow2.f32 %v11810_v59  ;;  %v11814_v19 = vmul.f32 -1.442695, %v16488_v26  ;;  %v6311_v13 = vshrl.u32 %v6239_v14, 16  ;;  %v5915_v24 = vrot.slane %v16460_v43, 4 }
 0x429   : > { %v5691_v40 = vmul.f32 %v14099_v2, %v16313_v38  ;;  %14116 = vrcp.f32 %v5605_v8  ;;  %v11812_v0 = vmul.f32 -1.442695, %v16497_v58  ;;  %v6314_v23 = vshll.u32 %v6239_v14, 16 }
 0x42a   : > { %14118 = vpow2.f32 %v11808_v42  ;;  %v11815_v1 = vmul.f32 -1.442695, %v16501_v4  ;;  %v16514_v38 = vmul.f32 -1.442695, %v16506_v28  ;;  %v16517_v36 = vrot.slane %v6311_v13, 4 }
 0x42b   : > { %v14101_v60 = vpop.eup %14100  ;;  %v12268_v32 = vpack.c.bf16 %v5691_v40, %v5691_v40  ;;  %14120 = vpow2.f32 %v11811_v47  ;;  %v16519_v43 = vrot.slane %v6314_v23, 5  ;;  %v6320_v5 = vshll.u32 %v16510_v25, 16 }
 0x42c   : > { %v14103_v20 = vpop.eup %14102  ;;  %v5696_v17 = vmul.f32 %v14101_v60, %v16387_v55  ;;  %14122 = vpow2.f32 %v11809_v27  ;;  %v6181_v60 = vld [vmem:[#allocation2 + $0x6c] sm:$0xf] }
 0x42d   : > { %v14105_v22 = vpop.eup %14104  ;;  %v5917_v34 = vshrl.u32 %v12268_v32, 16  ;;  %v5694_v53 = vmul.f32 %v14103_v20, %v16391_v49  ;;  %14124 = vpow2.f32 %v11814_v19  ;;  %v5920_v51 = vshll.u32 %v12268_v32, 16  ;;  %v6188_v19 = vld [vmem:[#allocation2 + $0x78] sm:$0xf] }
 0x42e   : > { %v14107_v54 = vpop.eup %14106  ;;  %v12273_v62 = vpack.c.bf16 %v5696_v17, %v5696_v17  ;;  %v5697_v11 = vmul.f32 %v14105_v22, %v16395_v39  ;;  %14126 = vpow2.f32 %v11812_v0 }
 0x42f   : > { %v14109_v55 = vpop.eup %14108  ;;  %v5919_v30 = vrot.slane %v5917_v34, 7  ;;  %v12271_v59 = vpack.c.bf16 %v5694_v53, %v5694_v53  ;;  %v5695_v7 = vmul.f32 %v14107_v54, %v16403_v63  ;;  %14128 = vpow2.f32 %v11815_v1  ;;  %v6192_v34 = vld [vmem:[#allocation2 + $0x80] sm:$0x1] }
 0x430   : > { %v14111_v21 = vpop.eup %14110  ;;  %v5960_v29 = vshrl.u32 %v12273_v62, 16  ;;  %v5963_v46 = vshll.u32 %v12273_v62, 16  ;;  %v12274_v49 = vpack.c.bf16 %v5697_v11, %v5697_v11  ;;  %v5700_v48 = vmul.f32 %v14109_v55, %v16416_v16 }
 0x431   : > { %v14113_v6 = vpop.eup %14112  ;;  %v5922_v33 = vor.u32 %v5920_v51, %v5919_v30  ;;  %v5924_v42 = vrot.slane %v5919_v30, 4  ;;  %v5943_v37 = vshrl.u32 %v12271_v59, 16  ;;  %v5946_v44 = vshll.u32 %v12271_v59, 16  ;;  %v6185_v59 = vld [vmem:[#allocation2 + $0x74] sm:$0x1] }
 0x432   : > { %v14115_v50 = vpop.eup %14114  ;;  %v5962_v39 = vrot.slane %v5960_v29, 7  ;;  %v5968_v14 = vshrl.u32 %v12274_v49, 16  ;;  %v5971_v8 = vshll.u32 %v12274_v49, 16  ;;  %v12272_v47 = vpack.c.bf16 %v5695_v7, %v5695_v7 }
 0x433   : > { %v14117_v27 = vpop.eup %14116  ;;  %v5923_v63 = vsel %vm14850_vm11, %v5915_v24, %v5922_v33  ;;  %v6172_v2 = vsel %vm14808_vm5, %v5924_v42, %v6171_v61  ;;  %v5945_v40 = vrot.slane %v5943_v37, 7  ;;  %v12277_v16 = vpack.c.bf16 %v5700_v48, %v5700_v48 }
 0x434   : > { %v14119_v13 = vpop.eup %14118  ;;  %6170 = vst.msk [vmem:[#allocation2 + $0x58] sm:$0xf] %vm298_vm0, %v5923_v63  ;;  %6173 = vst [vmem:[#allocation2 + $0x5c] sm:$0x1] %v6172_v2  ;;  %v5965_v0 = vor.u32 %v5963_v46, %v5962_v39  ;;  %v5966_v23 = vrot.slane %v5962_v39, 4  ;;  %v5970_v32 = vrot.slane %v5968_v14, 7  ;;  %v5698_v46 = vmul.f32 %v14111_v21, %v16420_v18 }
 0x435   : > { %v5951_v1 = vshrl.u32 %v12272_v47, 16  ;;  %v14121_v20 = vpop.eup %14120  ;;  %v5948_v17 = vor.u32 %v5946_v44, %v5945_v40  ;;  %v5949_v22 = vrot.slane %v5945_v40, 4  ;;  %v5954_v24 = vshll.u32 %v12272_v47, 16  ;;  %v6202_v44 = vld [vmem:[#allocation2 + $0x90] sm:$0xf] }
 0x436   : > { %v5994_v53 = vshrl.u32 %v12277_v16, 16  ;;  %v14123_v54 = vpop.eup %14122  ;;  %v6189_v51 = vsel %vm14842_vm9, %v5965_v0, %v6188_v19  ;;  %v5973_v61 = vor.u32 %v5971_v8, %v5970_v32  ;;  %v5975_v62 = vrot.slane %v5970_v32, 4 }
 0x437   : > { %v5953_v11 = vrot.slane %v5951_v1, 7  ;;  %v14125_v55 = vpop.eup %14124  ;;  %6190 = vst [vmem:[#allocation2 + $0x78] sm:$0xf] %v6189_v51  ;;  %v6182_v30 = vsel %vm14842_vm9, %v5948_v17, %v6181_v60  ;;  %v5997_v29 = vshll.u32 %v12277_v16, 16  ;;  %v12275_v8 = vpack.c.bf16 %v5698_v46, %v5698_v46  ;;  %v6206_v51 = vld [vmem:[#allocation2 + $0x98] sm:$0x1] }
 0x438   : > { %v16535_v7 = vrot.slane %v5994_v53, 7  ;;  %v14127_v49 = vpop.eup %14126  ;;  %6183 = vst [vmem:[#allocation2 + $0x6c] sm:$0xf] %v6182_v30  ;;  %v5974_v48 = vsel %vm14850_vm11, %v5966_v23, %v5973_v61  ;;  %v6193_v33 = vsel %vm14808_vm5, %v5975_v62, %v6192_v34  ;;  %v5701_v18 = vmul.f32 %v14117_v27, %v16426_v9  ;;  %v6271_v53 = vld [vmem:[#allocation2 + $0x14] sm:$0x1] }
 0x439   : > { %v5956_v42 = vor.u32 %v5954_v24, %v5953_v11  ;;  %v5958_v37 = vrot.slane %v5953_v11, 4  ;;  %v14129_v39 = vpop.eup %14128  ;;  %6191 = vst.msk [vmem:[#allocation2 + $0x7c] sm:$0xf] %vm298_vm0, %v5974_v48  ;;  %6194 = vst [vmem:[#allocation2 + $0x80] sm:$0x1] %v6193_v33  ;;  %v6317_v21 = vor.u32 %v16519_v43, %v16517_v36  ;;  %v5603_v2 = vadd.f32 1.0, %v14113_v6 }
 0x43a   : > { %v5999_v14 = vor.u32 %v5997_v29, %v16535_v7  ;;  %v5608_v19 = vadd.f32 1.0, %v14115_v50  ;;  %v6000_v40 = vrot.slane %v16535_v7, 4  ;;  %v5977_v9 = vshrl.u32 %v12275_v8, 16  ;;  %v6195_v50 = vld [vmem:[#allocation2 + $0x84] sm:$0xf] }
 0x43b   : > { %v5957_v47 = vsel %vm14850_vm11, %v5949_v22, %v5956_v42  ;;  %v6186_v63 = vsel %vm14808_vm5, %v5958_v37, %v6185_v59  ;;  %v12278_v27 = vpack.c.bf16 %v5701_v18, %v5701_v18  ;;  %14130 = vrcp.f32 %v5603_v2  ;;  %v16563_v59 = vld [vmem:[#allocation2 + $0x18] sm:$0xf]  ;;  %v16565_v7 = vld [vmem:[#allocation2 + $0x1c] sm:$0xf]  ;;  %v6272_v46 = vld [vmem:[#allocation2 + $0x20] sm:$0x1] }
 0x43c   : > { %6184 = vst.msk [vmem:[#allocation2 + $0x70] sm:$0xf] %vm298_vm0, %v5957_v47  ;;  %6187 = vst [vmem:[#allocation2 + $0x74] sm:$0x1] %v6186_v63  ;;  %v6203_v16 = vsel %vm14842_vm9, %v5999_v14, %v6202_v44  ;;  %v5606_v36 = vadd.f32 1.0, %v14119_v13  ;;  %v5609_v43 = vadd.f32 1.0, %v14121_v20  ;;  %14132 = vrcp.f32 %v5608_v19 }
 0x43d   : > { %6204 = vst [vmem:[#allocation2 + $0x90] sm:$0xf] %v6203_v16  ;;  %v5607_v0 = vadd.f32 1.0, %v14123_v54  ;;  %v16555_v23 = vrot.slane %v5977_v9, 7  ;;  %v5980_v60 = vshll.u32 %v12275_v8, 16  ;;  %v6002_v6 = vshrl.u32 %v12278_v27, 16 }
 0x43e   : > { %v6005_v32 = vshll.u32 %v12278_v27, 16  ;;  %14134 = vrcp.f32 %v5606_v36  ;;  %v5612_v1 = vadd.f32 1.0, %v14125_v55  ;;  %v5610_v17 = vadd.f32 1.0, %v14127_v49  ;;  %v16572_v49 = vld [vmem:[#allocation2 + $0x24] sm:$0xf] }
 0x43f   : > { %v5982_v22 = vor.u32 %v5980_v60, %v16555_v23  ;;  %v6004_v34 = vrot.slane %v6002_v6, 7  ;;  %14136 = vrcp.f32 %v5609_v43  ;;  %v5613_v24 = vadd.f32 1.0, %v14129_v39 }
 0x440   : > { %14138 = vrcp.f32 %v5607_v0  ;;  %v6318_v13 = vrot.slane %v6317_v21, 4  ;;  %v6322_v20 = vrot.slane %v6320_v5, 5  ;;  %v6324_v54 = vshrl.u32 %v16510_v25, 16 }
 0x441   : > { %v6196_v61 = vsel %vm14842_vm9, %v5982_v22, %v6195_v50  ;;  %v6007_v62 = vor.u32 %v6005_v32, %v6004_v34  ;;  %v6009_v11 = vrot.slane %v6004_v34, 4  ;;  %14140 = vrcp.f32 %v5612_v1 }
 0x442   : > { %6197 = vst [vmem:[#allocation2 + $0x84] sm:$0xf] %v6196_v61  ;;  %14142 = vrcp.f32 %v5610_v17  ;;  %v6326_v55 = vrot.slane %v6324_v54, 4  ;;  %v6330_v30 = vshll.u32 %v6271_v53, 16  ;;  %v5983_v29 = vrot.slane %v16555_v23, 4 }
 0x443   : > { %v6008_v5 = vsel %vm14850_vm11, %v6000_v40, %v6007_v62  ;;  %v6207_v25 = vsel %vm14808_vm5, %v6009_v11, %v6206_v51  ;;  %14144 = vrcp.f32 %v5613_v24  ;;  %v6323_v48 = vsel %vm14860_vm12, %v6318_v13, %v6322_v20  ;;  %v16606_v24 = vld [vmem:[#allocation9 + $0x4] sm:$0x3] }
 0x444   : > { %6205 = vst.msk [vmem:[#allocation2 + $0x94] sm:$0xf] %vm298_vm0, %v6008_v5  ;;  %6208 = vst [vmem:[#allocation2 + $0x98] sm:$0x1] %v6207_v25  ;;  %14146 = vpow2.f32 %v16514_v38  ;;  %v6327_v33 = vor.u32 %v6326_v55, %v6322_v20  ;;  %v6332_v42 = vrot.slane %v6330_v30, 5  ;;  %v6335_v37 = vshrl.u32 %v16563_v59, 16 }
 0x445   : > { %v6338_v44 = vshll.u32 %v16563_v59, 16  ;;  %v6344_v39 = vshll.u32 %v16565_v7, 16  ;;  %v6348_v14 = vshrl.u32 %v16565_v7, 16  ;;  %v14131_v8 = vpop.eup %14130  ;;  %v6354_v21 = vshll.u32 %v6272_v46, 16 }
 0x446   : > { %v6328_v18 = vrot.slane %v6327_v33, 4  ;;  %v6359_v47 = vshrl.u32 %v16572_v49, 16  ;;  %v6362_v38 = vshll.u32 %v16572_v49, 16  ;;  %v14133_v63 = vpop.eup %14132  ;;  %v5699_v2 = vmul.f32 %v14131_v8, %v16430_v3  ;;  %v6216_v8 = vld [vmem:[#allocation2 + $0xa8] sm:$0xf] }
 0x447   : > { %v16585_v19 = vrot.slane %v6335_v37, 4  ;;  %v16587_v40 = vrot.slane %v6338_v44, 5  ;;  %v16589_v16 = vrot.slane %v6344_v39, 5  ;;  %v5704_v27 = vmul.f32 %v14133_v63, %v16454_v35 }
 0x448   : > { %v14135_v9 = vpop.eup %14134  ;;  %v6333_v36 = vsel %vm14860_vm12, %v6328_v18, %v6332_v42  ;;  %v16594_v43 = vrot.slane %v6348_v14, 4  ;;  %v16596_v0 = vrot.slane %v6354_v21, 5  ;;  %v12276_v6 = vpack.c.bf16 %v5699_v2, %v5699_v2 }
 0x449   : > { %v14137_v60 = vpop.eup %14136  ;;  %v5702_v3 = vmul.f32 %v14135_v9, %v16471_v52  ;;  %v11849_v50 = vcombine.low %v6323_v48, %v6333_v36  ;;  %v6341_v32 = vor.u32 %v16587_v40, %v16585_v19  ;;  %v12281_v17 = vpack.c.bf16 %v5704_v27, %v5704_v27  ;;  %v16651_v40 = vld [vmem:[#allocation2 + $0x2c] sm:$0x1] }
 0x44a   : > { %v14139_v1 = vpop.eup %14138  ;;  %v5705_v22 = vmul.f32 %v14137_v60, %v16476_v56  ;;  %v6351_v35 = vor.u32 %v16594_v43, %v16589_v16  ;;  %v16604_v34 = vrot.slane %v6359_v47, 4  ;;  %v5985_v51 = vshrl.u32 %v12276_v6, 16  ;;  %v6209_v47 = vld [vmem:[#allocation2 + $0x9c] sm:$0xf]  ;;  %18821 = vst [vmem:[#allocation23_spill] sm:$0xff] %v16651_v40 }
 0x44b   : > { %v14141_v53 = vpop.eup %14140  ;;  %v5988_v13 = vshll.u32 %v12276_v6, 16  ;;  %v12279_v20 = vpack.c.bf16 %v5702_v3, %v5702_v3  ;;  %v5703_v52 = vmul.f32 %v14139_v1, %v16480_v41  ;;  %13014 = vmatmul.mubr.msk.bf16.vlgmr.msra.gmra.mrb[0].mxu1 %vm1375_vm13, %v11849_v50  ;;  %v6028_v61 = vshrl.u32 %v12281_v17, 16  ;;  %v6199_v41 = vld [vmem:[#allocation2 + $0x8c] sm:$0x1]  ;;  %v6220_v6 = vld [vmem:[#allocation2 + $0xb0] sm:$0x1] }
 0x44c   : > { %v14143_v54 = vpop.eup %14142  ;;  %v6031_v62 = vshll.u32 %v12281_v17, 16  ;;  %v12282_v11 = vpack.c.bf16 %v5705_v22, %v5705_v22  ;;  %v5708_v56 = vmul.f32 %v14141_v53, %v16488_v26  ;;  %13046 = vmatpush3.bf16.msra.mxu1 %v16309_v12  ;;  %v5987_v30 = vrot.slane %v5985_v51, 7 }
 0x44d   : > { %v14145_v55 = vpop.eup %14144  ;;  %v6011_v5 = vshrl.u32 %v12279_v20, 16  ;;  %v6014_v25 = vshll.u32 %v12279_v20, 16  ;;  %v12280_v46 = vpack.c.bf16 %v5703_v52, %v5703_v52  ;;  %13840 = vmatprep.subr.msk.bf16.mxu1 %vm1424_vm4, %v16606_v24  ;;  %v6030_v33 = vrot.slane %v6028_v61, 7 }
 0x44e   : > { %v14147_v48 = vpop.eup %14146  ;;  %v6036_v42 = vshrl.u32 %v12282_v11, 16  ;;  %v6039_v37 = vshll.u32 %v12282_v11, 16  ;;  %v12285_v44 = vpack.c.bf16 %v5708_v56, %v5708_v56  ;;  %v5990_v39 = vor.u32 %v5988_v13, %v5987_v30  ;;  %v6230_v11 = vld [vmem:[#allocation2 + $0xc0] sm:$0xf] }
 0x44f   : > { %v5992_v14 = vrot.slane %v5987_v30, 4  ;;  %v6013_v26 = vrot.slane %v6011_v5, 7  ;;  %v6019_v18 = vshrl.u32 %v12280_v46, 16  ;;  %v6033_v12 = vor.u32 %v6031_v62, %v6030_v33 }
 0x450   : > { %v6034_v21 = vrot.slane %v6030_v33, 4  ;;  %v6038_v63 = vrot.slane %v6036_v42, 7  ;;  %v6022_v2 = vshll.u32 %v12280_v46, 16  ;;  %v5991_v9 = vsel %vm14850_vm11, %v5983_v29, %v5990_v39  ;;  %v6213_v29 = vld [vmem:[#allocation2 + $0xa4] sm:$0x1] }
 0x451   : > { %v6200_v27 = vsel %vm14808_vm5, %v5992_v14, %v6199_v41  ;;  %v6016_v36 = vor.u32 %v6014_v25, %v6013_v26  ;;  %v6017_v60 = vrot.slane %v6013_v26, 4  ;;  %6198 = vst.msk [vmem:[#allocation2 + $0x88] sm:$0xf] %vm298_vm0, %v5991_v9  ;;  %v6217_v3 = vsel %vm14842_vm9, %v6033_v12, %v6216_v8  ;;  %v16632_v25 = vld [vmem:[#allocation2 + $0x28] sm:$0xf] }
 0x452   : > { %6201 = vst [vmem:[#allocation2 + $0x8c] sm:$0x1] %v6200_v27  ;;  %v6041_v50 = vor.u32 %v6039_v37, %v6038_v63  ;;  %v6043_v1 = vrot.slane %v6038_v63, 4  ;;  %v6021_v17 = vrot.slane %v6019_v18, 7  ;;  %6218 = vst [vmem:[#allocation2 + $0xa8] sm:$0xf] %v6217_v3  ;;  %v5706_v51 = vmul.f32 %v14143_v54, %v16497_v58 }
 0x453   : > { %v6210_v23 = vsel %vm14842_vm9, %v6016_v36, %v6209_v47  ;;  %v6062_v22 = vshrl.u32 %v12285_v44, 16  ;;  %v6065_v53 = vshll.u32 %v12285_v44, 16  ;;  %v5709_v30 = vmul.f32 %v14145_v55, %v16501_v4  ;;  %v16659_v39 = vld [vmem:[#allocation2 + $0x30] sm:$0xf]  ;;  %v6223_v14 = vld [vmem:[#allocation2 + $0xb4] sm:$0xf] }
 0x454   : > { %6211 = vst [vmem:[#allocation2 + $0x9c] sm:$0xf] %v6210_v23  ;;  %v6042_v13 = vsel %vm14850_vm11, %v6034_v21, %v6041_v50  ;;  %v6221_v20 = vsel %vm14808_vm5, %v6043_v1, %v6220_v6  ;;  %v6024_v52 = vor.u32 %v6022_v2, %v6021_v17  ;;  %v6026_v61 = vrot.slane %v6021_v17, 4  ;;  %v6234_v21 = vld [vmem:[#allocation2 + $0xc8] sm:$0x1] }
 0x455   : > { %6219 = vst.msk [vmem:[#allocation2 + $0xac] sm:$0xf] %vm298_vm0, %v6042_v13  ;;  %6222 = vst [vmem:[#allocation2 + $0xb0] sm:$0x1] %v6221_v20  ;;  %v6064_v62 = vrot.slane %v6062_v22, 7  ;;  %v12283_v56 = vpack.c.bf16 %v5706_v51, %v5706_v51  ;;  %v5611_v5 = vadd.f32 1.0, %v14147_v48  ;;  %v12286_v42 = vpack.c.bf16 %v5709_v30, %v5709_v30 }
 0x456   : > { %v6025_v58 = vsel %vm14850_vm11, %v6017_v60, %v6024_v52  ;;  %v6214_v54 = vsel %vm14808_vm5, %v6026_v61, %v6213_v29  ;;  %v6342_v46 = vrot.slane %v6341_v32, 4  ;;  %v6352_v41 = vrot.slane %v6351_v35, 4  ;;  %v16668_v27 = vld [vmem:[#allocation2 + $0x34] sm:$0xf]  ;;  %v16673_v50 = vld [vmem:[#allocation2 + $0x38] sm:$0x1] }
 0x457   : > { %6212 = vst.msk [vmem:[#allocation2 + $0xa0] sm:$0xf] %vm298_vm0, %v6025_v58  ;;  %6215 = vst [vmem:[#allocation2 + $0xa4] sm:$0x1] %v6214_v54  ;;  %v6067_v4 = vor.u32 %v6065_v53, %v6064_v62  ;;  %v6068_v55 = vrot.slane %v6064_v62, 4  ;;  %v6045_v48 = vshrl.u32 %v12283_v56, 16  ;;  %14148 = vrcp.f32 %v5611_v5 }
 0x458   : > { %v6048_v33 = vshll.u32 %v12283_v56, 16  ;;  %v6347_v37 = vsel %vm14860_vm12, %v6342_v46, %v16589_v16  ;;  %v6357_v19 = vsel %vm14860_vm12, %v6352_v41, %v16596_v0  ;;  %v6364_v44 = vrot.slane %v6362_v38, 5  ;;  %v16676_v22 = vld [vmem:[#allocation2 + $0x3c] sm:$0xf]  ;;  %v16682_v20 = vld [vmem:[#allocation2 + $0x40] sm:$0xf] }
 0x459   : > { %v6231_v43 = vsel %vm14842_vm9, %v6067_v4, %v6230_v11  ;;  %v16655_v32 = vrot.slane %v6045_v48, 7  ;;  %v11850_v35 = vcombine.low %v6347_v37, %v6357_v19  ;;  %v6070_v16 = vshrl.u32 %v12286_v42, 16  ;;  %v16689_v56 = vld [vmem:[#allocation2 + $0x44] sm:$0x1]  ;;  %v16693_v46 = vld [vmem:[#allocation2 + $0x48] sm:$0xf] }
 0x45a   : > { %6232 = vst [vmem:[#allocation2 + $0xc0] sm:$0xf] %v6231_v43  ;;  %v6073_v8 = vshll.u32 %v12286_v42, 16  ;;  %v6368_v26 = vshll.u32 %v16632_v25, 16  ;;  %v6372_v0 = vshrl.u32 %v16632_v25, 16  ;;  %v6365_v47 = vor.u32 %v6364_v44, %v16604_v34 }
 0x45b   : > { %v6050_v18 = vor.u32 %v6048_v33, %v16655_v32  ;;  %v6051_v12 = vrot.slane %v16655_v32, 4  ;;  %13017 = vmatprep.mubr.msk.bf16.mxu1 %vm1375_vm13, %v11850_v35  ;;  %v6378_v38 = vshll.u32 %v16651_v40, 16  ;;  %v6072_v63 = vrot.slane %v6070_v16, 7 }
 0x45c   : > { %v6370_v2 = vrot.slane %v6368_v26, 5  ;;  %v6374_v9 = vrot.slane %v6372_v0, 4  ;;  %v6383_v36 = vshrl.u32 %v16659_v39, 16  ;;  %v6366_v6 = vrot.slane %v6365_v47, 4  ;;  %v16709_v47 = vld [vmem:[#allocation2 + $0x54] sm:$0xf] }
 0x45d   : > { %v6224_v60 = vsel %vm14842_vm9, %v6050_v18, %v6223_v14  ;;  %v6380_v3 = vrot.slane %v6378_v38, 5  ;;  %v6386_v1 = vshll.u32 %v16659_v39, 16  ;;  %v6075_v34 = vor.u32 %v6073_v8, %v6072_v63  ;;  %v16701_v8 = vld [vmem:[#allocation2 + $0x4c] sm:$0xf] }
 0x45e   : > { %6225 = vst [vmem:[#allocation2 + $0xb4] sm:$0xf] %v6224_v60  ;;  %v6077_v17 = vrot.slane %v6072_v63, 4  ;;  %v6375_v23 = vor.u32 %v6374_v9, %v6370_v2  ;;  %v6385_v29 = vrot.slane %v6383_v36, 4  ;;  %v6371_v53 = vsel %vm14860_vm12, %v6366_v6, %v6370_v2 }
 0x45f   : > { %v6388_v51 = vrot.slane %v6386_v1, 5  ;;  %v6392_v45 = vshll.u32 %v16668_v27, 16  ;;  %v6396_v13 = vshrl.u32 %v16668_v27, 16  ;;  %v6076_v52 = vsel %vm14850_vm11, %v6068_v55, %v6075_v34 }
 0x460   : > { %v6235_v61 = vsel %vm14808_vm5, %v6077_v17, %v6234_v21  ;;  %v6376_v62 = vrot.slane %v6375_v23, 4  ;;  %v6402_v11 = vshll.u32 %v16673_v50, 16  ;;  %6233 = vst.msk [vmem:[#allocation2 + $0xc4] sm:$0xf] %vm298_vm0, %v6076_v52  ;;  %v6407_v54 = vshrl.u32 %v16676_v22, 16 }
 0x461   : > { %6236 = vst [vmem:[#allocation2 + $0xc8] sm:$0x1] %v6235_v61  ;;  %v6389_v30 = vor.u32 %v6388_v51, %v6385_v29  ;;  %v6394_v5 = vrot.slane %v6392_v45, 5  ;;  %v6398_v58 = vrot.slane %v6396_v13, 4  ;;  %v14149_v41 = vpop.eup %14148  ;;  %v6410_v48 = vshll.u32 %v16676_v22, 16 }
 0x462   : > { %v6381_v4 = vsel %vm14860_vm12, %v6376_v62, %v6380_v3  ;;  %v6404_v55 = vrot.slane %v6402_v11, 5  ;;  %v6416_v33 = vshll.u32 %v16682_v20, 16  ;;  %v5707_v42 = vmul.f32 %v14149_v41, %v16506_v28  ;;  %v16707_v28 = vld [vmem:[#allocation2 + $0x50] sm:$0x1]  ;;  %v6227_v13 = vld [vmem:[#allocation2 + $0xbc] sm:$0x1] }
 0x463   : > { %v11851_v37 = vcombine.low %v6371_v53, %v6381_v4  ;;  %v6390_v19 = vrot.slane %v6389_v30, 4  ;;  %v6399_v43 = vor.u32 %v6398_v58, %v6394_v5  ;;  %v6409_v35 = vrot.slane %v6407_v54, 4  ;;  %v16722_v41 = vld [vmem:[#allocation2 + $0x58] sm:$0xf]  ;;  %v16724_v4 = vld [vmem:[#allocation2 + $0x60] sm:$0xf] }
 0x464   : > { %v6412_v44 = vrot.slane %v6410_v48, 5  ;;  %v6418_v14 = vrot.slane %v6416_v33, 5  ;;  %v6420_v16 = vshrl.u32 %v16682_v20, 16  ;;  %v12284_v26 = vpack.c.bf16 %v5707_v42, %v5707_v42  ;;  %v16728_v42 = vld [vmem:[#allocation2 + $0x5c] sm:$0x1] }
 0x465   : > { %13018 = vmatmul.mubr.msk.bf16.gmra.mrb[4].mxu1 %vm1375_vm13, %v11851_v37  ;;  %v6395_v0 = vsel %vm14860_vm12, %v6390_v19, %v6394_v5  ;;  %v6400_v18 = vrot.slane %v6399_v43, 4  ;;  %v6426_v21 = vshll.u32 %v16689_v56, 16  ;;  %v6431_v2 = vshrl.u32 %v16693_v46, 16 }
 0x466   : > { %v6413_v38 = vor.u32 %v6412_v44, %v6409_v35  ;;  %v6422_v63 = vrot.slane %v6420_v16, 4  ;;  %v6434_v9 = vshll.u32 %v16693_v46, 16  ;;  %v6053_v36 = vshrl.u32 %v12284_v26, 16 }
 0x467   : > { %v6056_v60 = vshll.u32 %v12284_v26, 16  ;;  %v6405_v6 = vsel %vm14860_vm12, %v6400_v18, %v6404_v55  ;;  %v6428_v3 = vrot.slane %v6426_v21, 5  ;;  %v6433_v23 = vrot.slane %v6431_v2, 4  ;;  %v16740_v18 = vld [vmem:[#allocation2 + $0x64] sm:$0xf] }
 0x468   : > { %v11852_v1 = vcombine.low %v6395_v0, %v6405_v6  ;;  %v6414_v34 = vrot.slane %v6413_v38, 4  ;;  %v6423_v17 = vor.u32 %v6422_v63, %v6418_v14  ;;  %v6055_v29 = vrot.slane %v6053_v36, 7 }
 0x469   : > { %v6436_v53 = vrot.slane %v6434_v9, 5  ;;  %v6440_v51 = vshll.u32 %v16701_v8, 16  ;;  %v6444_v45 = vshrl.u32 %v16701_v8, 16  ;;  %v6450_v62 = vshll.u32 %v16707_v28, 16  ;;  %v16748_v9 = vld [vmem:[#allocation2 + $0x68] sm:$0x1] }
 0x46a   : > { %13021 = vmatprep.mubr.msk.bf16.mxu1 %vm1375_vm13, %v11852_v1  ;;  %v6419_v52 = vsel %vm14860_vm12, %v6414_v34, %v6418_v14  ;;  %v6424_v61 = vrot.slane %v6423_v17, 4  ;;  %v6455_v11 = vshrl.u32 %v16709_v47, 16  ;;  %v6058_v30 = vor.u32 %v6056_v60, %v6055_v29  ;;  %v16751_v1 = vld [vmem:[#allocation2 + $0x6c] sm:$0xf] }
 0x46b   : > { %v6060_v5 = vrot.slane %v6055_v29, 4  ;;  %v6437_v58 = vor.u32 %v6436_v53, %v6433_v23  ;;  %v6442_v54 = vrot.slane %v6440_v51, 5  ;;  %v6446_v48 = vrot.slane %v6444_v45, 4  ;;  %v16756_v53 = vld [vmem:[#allocation2 + $0x70] sm:$0xf] }
 0x46c   : > { %v6429_v55 = vsel %vm14860_vm12, %v6424_v61, %v6428_v3  ;;  %v6452_v33 = vrot.slane %v6450_v62, 5  ;;  %v6457_v37 = vrot.slane %v6455_v11, 4  ;;  %v6059_v19 = vsel %vm14850_vm11, %v6051_v12, %v6058_v30 }
 0x46d   : > { %v6228_v43 = vsel %vm14808_vm5, %v6060_v5, %v6227_v13  ;;  %v11853_v35 = vcombine.low %v6419_v52, %v6429_v55  ;;  %v6438_v44 = vrot.slane %v6437_v58, 4  ;;  %6226 = vst.msk [vmem:[#allocation2 + $0xb8] sm:$0xf] %vm298_vm0, %v6059_v19  ;;  %v6447_v14 = vor.u32 %v6446_v48, %v6442_v54  ;;  %v16760_v5 = vld [vmem:[#allocation2 + $0x78] sm:$0xf] }
 0x46e   : > { %6229 = vst [vmem:[#allocation2 + $0xbc] sm:$0x1] %v6228_v43  ;;  %v6458_v16 = vshll.u32 %v16709_v47, 16  ;;  %v6464_v26 = vshll.u32 %v16722_v41, 16  ;;  %v6468_v0 = vshrl.u32 %v16722_v41, 16  ;;  %v6474_v10 = vshll.u32 %v16728_v42, 16 }
 0x46f   : > { %13022 = vmatmul.mubr.msk.bf16.gmra.mrb[8].mxu1 %vm1375_vm13, %v11853_v35  ;;  %v6443_v31 = vsel %vm14860_vm12, %v6438_v44, %v6442_v54  ;;  %v6479_v32 = vshrl.u32 %v16724_v4, 16  ;;  %v6482_v12 = vshll.u32 %v16724_v4, 16  ;;  %v6448_v21 = vrot.slane %v6447_v14, 4  ;;  %v16763_v55 = vld [vmem:[#allocation2 + $0x74] sm:$0x1] }
 0x470   : > { %v6460_v38 = vrot.slane %v6458_v16, 5  ;;  %v6466_v63 = vrot.slane %v6464_v26, 5  ;;  %v6470_v2 = vrot.slane %v6468_v0, 4  ;;  %v6476_v36 = vrot.slane %v6474_v10, 5  ;;  %v16771_v44 = vld [vmem:[#allocation2 + $0x7c] sm:$0xf] }
 0x471   : > { %v6481_v60 = vrot.slane %v6479_v32, 4  ;;  %v6484_v6 = vrot.slane %v6482_v12, 5  ;;  %v6488_v3 = vshll.u32 %v16740_v18, 16  ;;  %v6453_v34 = vsel %vm14860_vm12, %v6448_v21, %v6452_v33  ;;  %v16777_v12 = vld [vmem:[#allocation2 + $0x80] sm:$0x1] }
 0x472   : > { %v6461_v17 = vor.u32 %v6460_v38, %v6457_v37  ;;  %v6471_v23 = vor.u32 %v6470_v2, %v6466_v63  ;;  %v6492_v29 = vshrl.u32 %v16740_v18, 16  ;;  %v11854_v51 = vcombine.low %v6443_v31, %v6453_v34 }
 0x473   : > { %v6485_v45 = vor.u32 %v6484_v6, %v6481_v60  ;;  %v6490_v13 = vrot.slane %v6488_v3, 5  ;;  %v6498_v52 = vshll.u32 %v16748_v9, 16  ;;  %v6503_v30 = vshrl.u32 %v16751_v1, 16  ;;  %v16784_v60 = vld [vmem:[#allocation2 + $0x84] sm:$0xf] }
 0x474   : > { %v6462_v61 = vrot.slane %v6461_v17, 4  ;;  %v6472_v62 = vrot.slane %v6471_v23, 4  ;;  %v6494_v11 = vrot.slane %v6492_v29, 4  ;;  %13025 = vmatprep.mubr.msk.bf16.mxu1 %vm1375_vm13, %v11854_v51  ;;  %v6506_v48 = vshll.u32 %v16751_v1, 16  ;;  %v16788_v23 = vld [vmem:[#allocation2 + $0x88] sm:$0xf] }
 0x475   : > { %v6486_v58 = vrot.slane %v6485_v45, 4  ;;  %v6500_v54 = vrot.slane %v6498_v52, 5  ;;  %v6512_v33 = vshll.u32 %v16756_v53, 16  ;;  %v6505_v35 = vrot.slane %v6503_v30, 4  ;;  %v16792_v30 = vld [vmem:[#allocation2 + $0x90] sm:$0xf] }
 0x476   : > { %v6467_v37 = vsel %vm14860_vm12, %v6462_v61, %v6466_v63  ;;  %v6477_v19 = vsel %vm14860_vm12, %v6472_v62, %v6476_v36  ;;  %v6495_v43 = vor.u32 %v6494_v11, %v6490_v13  ;;  %v6508_v26 = vrot.slane %v6506_v48, 5  ;;  %v16797_v48 = vld [vmem:[#allocation2 + $0x8c] sm:$0x1]  ;;  %v16857_v40 = vld [vmem:[#allocation2 + $0xbc] sm:$0x1] }
 0x477   : > { %v11855_v14 = vcombine.low %v6467_v37, %v6477_v19  ;;  %v6491_v16 = vsel %vm14860_vm12, %v6486_v58, %v6490_v13  ;;  %v6514_v0 = vrot.slane %v6512_v33, 5  ;;  %v6516_v10 = vshrl.u32 %v16756_v53, 16 }
 0x478   : > { %v6496_v31 = vrot.slane %v6495_v43, 4  ;;  %v6522_v32 = vshll.u32 %v16763_v55, 16  ;;  %v6527_v21 = vshrl.u32 %v16760_v5, 16  ;;  %v6509_v38 = vor.u32 %v6508_v26, %v6505_v35 }
 0x479   : > { %13026 = vmatmul.mubr.msk.bf16.gmra.mrb[12].mxu1 %vm1375_vm13, %v11855_v14  ;;  %v6530_v63 = vshll.u32 %v16760_v5, 16  ;;  %v6536_v2 = vshll.u32 %v16771_v44, 16  ;;  %v6540_v36 = vshrl.u32 %v16771_v44, 16  ;;  %v6518_v3 = vrot.slane %v6516_v10, 4 }
 0x47a   : > { %v6501_v6 = vsel %vm14860_vm12, %v6496_v31, %v6500_v54  ;;  %v6524_v34 = vrot.slane %v6522_v32, 5  ;;  %v6529_v17 = vrot.slane %v6527_v21, 4  ;;  %v6510_v51 = vrot.slane %v6509_v38, 4  ;;  %v16802_v32 = vld [vmem:[#allocation2 + $0x94] sm:$0xf] }
 0x47b   : > { %v11856_v29 = vcombine.low %v6491_v16, %v6501_v6  ;;  %v6532_v45 = vrot.slane %v6530_v63, 5  ;;  %v6538_v13 = vrot.slane %v6536_v2, 5  ;;  %v6519_v52 = vor.u32 %v6518_v3, %v6514_v0  ;;  %v16807_v63 = vld [vmem:[#allocation2 + $0x98] sm:$0x1] }
 0x47c   : > { %v6542_v61 = vrot.slane %v6540_v36, 4  ;;  %v6546_v62 = vshll.u32 %v16777_v12, 16  ;;  %v6551_v11 = vshrl.u32 %v16784_v60, 16  ;;  %v6515_v58 = vsel %vm14860_vm12, %v6510_v51, %v6514_v0  ;;  %v16810_v36 = vld [vmem:[#allocation2 + $0x9c] sm:$0xf] }
 0x47d   : > { %13029 = vmatprep.mubr.msk.bf16.mxu1 %vm1375_vm13, %v11856_v29  ;;  %v6533_v54 = vor.u32 %v6532_v45, %v6529_v17  ;;  %v6554_v33 = vshll.u32 %v16784_v60, 16  ;;  %v6560_v37 = vshll.u32 %v16788_v23, 16  ;;  %v6520_v19 = vrot.slane %v6519_v52, 4  ;;  %v16817_v52 = vld [vmem:[#allocation2 + $0xa0] sm:$0xf] }
 0x47e   : > { %v6543_v43 = vor.u32 %v6542_v61, %v6538_v13  ;;  %v6548_v35 = vrot.slane %v6546_v62, 5  ;;  %v6553_v14 = vrot.slane %v6551_v11, 4  ;;  %v6564_v10 = vshrl.u32 %v16788_v23, 16 }
 0x47f   : > { %v6534_v16 = vrot.slane %v6533_v54, 4  ;;  %v6556_v26 = vrot.slane %v6554_v33, 5  ;;  %v6562_v31 = vrot.slane %v6560_v37, 5  ;;  %v6525_v0 = vsel %vm14860_vm12, %v6520_v19, %v6524_v34  ;;  %v16821_v54 = vld [vmem:[#allocation2 + $0xa4] sm:$0x1] }
 0x480   : > { %v6544_v21 = vrot.slane %v6543_v43, 4  ;;  %v6570_v38 = vshll.u32 %v16797_v48, 16  ;;  %v6575_v2 = vshrl.u32 %v16792_v30, 16  ;;  %v11857_v6 = vcombine.low %v6515_v58, %v6525_v0  ;;  %18822 = vst [vmem:[#allocation18_spill] sm:$0xff] %v16821_v54 }
 0x481   : > { %v6557_v3 = vor.u32 %v6556_v26, %v6553_v14  ;;  %v6566_v17 = vrot.slane %v6564_v10, 4  ;;  %v6539_v29 = vsel %vm14860_vm12, %v6534_v16, %v6538_v13  ;;  %v6578_v34 = vshll.u32 %v16792_v30, 16 }
 0x482   : > { %v6549_v51 = vsel %vm14860_vm12, %v6544_v21, %v6548_v35  ;;  %v6577_v45 = vrot.slane %v6575_v2, 4  ;;  %13030 = vmatmul.mubr.msk.bf16.gmra.mrb[16].mxu1 %vm1375_vm13, %v11857_v6  ;;  %v6584_v58 = vshll.u32 %v16802_v32, 16  ;;  %v6572_v33 = vrot.slane %v6570_v38, 5  ;;  %v16830_v38 = vld [vmem:[#allocation2 + $0xa8] sm:$0xf] }
 0x483   : > { %v11858_v61 = vcombine.low %v6539_v29, %v6549_v51  ;;  %v6558_v62 = vrot.slane %v6557_v3, 4  ;;  %v6567_v11 = vor.u32 %v6566_v17, %v6562_v31  ;;  %v6580_v37 = vrot.slane %v6578_v34, 5 }
 0x484   : > { %v6588_v13 = vshrl.u32 %v16802_v32, 16  ;;  %v6599_v19 = vshrl.u32 %v16810_v36, 16  ;;  %v6586_v35 = vrot.slane %v6584_v58, 5  ;;  %v6594_v14 = vshll.u32 %v16807_v63, 16 }
 0x485   : > { %13033 = vmatprep.mubr.msk.bf16.mxu1 %vm1375_vm13, %v11858_v61  ;;  %v6568_v43 = vrot.slane %v6567_v11, 4  ;;  %v6602_v16 = vshll.u32 %v16810_v36, 16  ;;  %v6563_v26 = vsel %vm14860_vm12, %v6558_v62, %v6562_v31  ;;  %v6581_v10 = vor.u32 %v6580_v37, %v6577_v45  ;;  %v16837_v11 = vld [vmem:[#allocation2 + $0xac] sm:$0xf] }
 0x486   : > { %v6590_v0 = vrot.slane %v6588_v13, 4  ;;  %v6601_v21 = vrot.slane %v6599_v19, 4  ;;  %v6608_v3 = vshll.u32 %v16817_v52, 16  ;;  %v6612_v17 = vshrl.u32 %v16817_v52, 16  ;;  %v16842_v19 = vld [vmem:[#allocation2 + $0xb0] sm:$0x1] }
 0x487   : > { %v6573_v2 = vsel %vm14860_vm12, %v6568_v43, %v6572_v33  ;;  %v6604_v6 = vrot.slane %v6602_v16, 5  ;;  %v6582_v51 = vrot.slane %v6581_v10, 4  ;;  %v6618_v61 = vshll.u32 %v16821_v54, 16  ;;  %18823 = vst [vmem:[#allocation24_spill] sm:$0xff] %v16842_v19 }
 0x488   : > { %v11859_v29 = vcombine.low %v6563_v26, %v6573_v2  ;;  %v6591_v34 = vor.u32 %v6590_v0, %v6586_v35  ;;  %v6610_v45 = vrot.slane %v6608_v3, 5  ;;  %v6614_v62 = vrot.slane %v6612_v17, 4  ;;  %v16852_v3 = vld [vmem:[#allocation2 + $0xb8] sm:$0xf] }
 0x489   : > { %v6605_v31 = vor.u32 %v6604_v6, %v6601_v21  ;;  %v6623_v58 = vshrl.u32 %v16830_v38, 16  ;;  %v6587_v33 = vsel %vm14860_vm12, %v6582_v51, %v6586_v35  ;;  %v6596_v13 = vrot.slane %v6594_v14, 5  ;;  %v16847_v21 = vld [vmem:[#allocation2 + $0xb4] sm:$0xf] }
 0x48a   : > { %v6592_v37 = vrot.slane %v6591_v34, 4  ;;  %v6626_v43 = vshll.u32 %v16830_v38, 16  ;;  %13034 = vmatmul.mubr.msk.bf16.gmra.mrb[20].mxu1 %vm1375_vm13, %v11859_v29  ;;  %v6615_v26 = vor.u32 %v6614_v62, %v6610_v45  ;;  %v6632_v0 = vshll.u32 %v16837_v11, 16 }
 0x48b   : > { %v6606_v16 = vrot.slane %v6605_v31, 4  ;;  %v6625_v10 = vrot.slane %v6623_v58, 4  ;;  %v6620_v6 = vrot.slane %v6618_v61, 5  ;;  %v6636_v14 = vshrl.u32 %v16837_v11, 16 }
 0x48c   : > { %v6597_v2 = vsel %vm14860_vm12, %v6592_v37, %v6596_v13  ;;  %v6628_v35 = vrot.slane %v6626_v43, 5  ;;  %v6616_v51 = vrot.slane %v6615_v26, 4  ;;  %v6634_v34 = vrot.slane %v6632_v0, 5 }
 0x48d   : > { %v11860_v17 = vcombine.low %v6587_v33, %v6597_v2  ;;  %v6642_v29 = vshll.u32 %v16842_v19, 16  ;;  %v6611_v31 = vsel %vm14860_vm12, %v6606_v16, %v6610_v45  ;;  %v6638_v58 = vrot.slane %v6636_v14, 4 }
 0x48e   : > { %v6629_v62 = vor.u32 %v6628_v35, %v6625_v10  ;;  %v6647_v37 = vshrl.u32 %v16847_v21, 16  ;;  %v6621_v61 = vsel %vm14860_vm12, %v6616_v51, %v6620_v6  ;;  %v6650_v33 = vshll.u32 %v16847_v21, 16 }
 0x48f   : > { %13037 = vmatprep.mubr.msk.bf16.mxu1 %vm1375_vm13, %v11860_v17  ;;  %v6656_v13 = vshll.u32 %v16852_v3, 16  ;;  %v6660_v43 = vshrl.u32 %v16852_v3, 16  ;;  %v11861_v26 = vcombine.low %v6611_v31, %v6621_v61  ;;  %v6639_v45 = vor.u32 %v6638_v58, %v6634_v34  ;;  %v14301_v58 = vld [vmem:[#allocation2] sm:$0xf] }
 0x490   : > { %v6630_v0 = vrot.slane %v6629_v62, 4  ;;  %v6649_v16 = vrot.slane %v6647_v37, 4  ;;  %v6652_v10 = vrot.slane %v6650_v33, 5  ;;  %v6666_v14 = vshll.u32 %v16857_v40, 16  ;;  %v16872_v37 = vld [vmem:[#allocation2 + $0x4] sm:$0xf] }
 0x491   : > { %v6658_v2 = vrot.slane %v6656_v13, 5  ;;  %v6662_v35 = vrot.slane %v6660_v43, 4  ;;  %v6640_v19 = vrot.slane %v6639_v45, 4  ;;  %v6644_v17 = vrot.slane %v6642_v29, 5  ;;  %v16923_v45 = vld [vmem:[#allocation9 + $0x6] sm:$0x3] }
 0x492   : > { %13038 = vmatmul.mubr.msk.bf16.gmra.mrb[24].mxu1 %vm1375_vm13, %v11861_v26  ;;  %v6635_v6 = vsel %vm14860_vm12, %v6630_v0, %v6634_v34  ;;  %v6653_v51 = vor.u32 %v6652_v10, %v6649_v16  ;;  %v6668_v62 = vrot.slane %v6666_v14, 5  ;;  %v11880_v61 = vcombine.low %v14301_v58, %v16872_v37  ;;  %v7229_v58 = vld [vmem:[#allocation2 + $0x3c] sm:$0xe]  ;;  %v7232_v10 = vld [vmem:[#allocation2 + $0x60] sm:$0xe] }
 0x493   : > { %v6663_v54 = vor.u32 %v6662_v35, %v6658_v2  ;;  %v6645_v31 = vsel %vm14860_vm12, %v6640_v19, %v6644_v17  ;;  %v11884_v33 = vcombine.low %v16659_v39, %v16668_v27  ;;  %v11883_v17 = vcombine.low %v16572_v49, %v16632_v25  ;;  %v7235_v49 = vld [vmem:[#allocation2 + $0x84] sm:$0xe]  ;;  %v18824_v19 = vld [vmem:[#allocation18_spill] sm:$0xff] }
 0x494   : > { %v11862_v29 = vcombine.low %v6635_v6, %v6645_v31  ;;  %v6654_v13 = vrot.slane %v6653_v51, 4  ;;  %v7228_v31 = vld [vmem:[#allocation2 + $0x30] sm:$0xe]  ;;  %v7230_v51 = vld [vmem:[#allocation2 + $0x48] sm:$0xe]  ;;  %v7309_v6 = vrot.slane %v16682_v20, 5 }
 0x495   : > { %v6664_v43 = vrot.slane %v6663_v54, 4  ;;  %v11918_v0 = vrot.slane %v7230_v51, 9 }
 0x496   : > { %13041 = vmatprep.mubr.msk.bf16.mxu1 %vm1375_vm13, %v11862_v29  ;;  %v6659_v54 = vsel %vm14860_vm12, %v6654_v13, %v6658_v2  ;;  %v14303_v29 = vld [vmem:[#allocation2 + $0xc] sm:$0xf]  ;;  %v16907_v13 = vld [vmem:[#allocation2 + $0x10] sm:$0xf]  ;;  %v11882_v2 = vcombine.low %v16563_v59, %v16565_v7  ;;  %v7311_v7 = vrot.slane %v7309_v6, 4 }
 0x497   : > { %v6669_v16 = vsel %vm14860_vm12, %v6664_v43, %v6668_v62  ;;  %v7302_v62 = vrot.slane %v16668_v27, 5  ;;  %v11881_v43 = vcombine.low %v14303_v29, %v16907_v13  ;;  %v11917_v29 = vrot.slane %v7229_v58, 9 }
 0x498   : > { %v11863_v14 = vcombine.low %v6659_v54, %v6669_v16  ;;  %v7483_v54 = vsel %vm1424_vm4, %v16606_v24, 0  ;;  %v11916_v16 = vrot.slane %v7228_v31, 9  ;;  %v7316_v24 = vrot.slane %v16701_v8, 5  ;;  %v7231_v31 = vld [vmem:[#allocation2 + $0x54] sm:$0xe] }
 0x499   : > { %v11919_v51 = vrot.slane %v7231_v31, 9  ;;  %v7326_v31 = vrot.slane %v16728_v42, 5  ;;  %v7368_v42 = vrot.slane %v18824_v19, 5  ;;  %v18826_v19 = vcombine.low %v16676_v22, %v16682_v20  ;;  %v17291_v22 = vld [vmem:[#allocation2 + $0xa4] sm:$0x1] }
 0x49a   : > { %13042 = vmatmul.mubr.msk.bf16.gmra.mrb[28].mxu1 %vm1375_vm13, %v11863_v14  ;;  %v7304_v14 = vrot.slane %v7302_v62, 4  ;;  %v16920_v35 = vsel %vm15304_vm1, %v11916_v16, %v7302_v62  ;;  %v16935_v62 = vsel %vm15304_vm1, %v11917_v29, %v7309_v6  ;;  %v7318_v58 = vrot.slane %v7316_v24, 4 }
 0x49b   : > { %13047 = vmatprep.mubr.msk.bf16.mxu1 %vm1375_vm13, %v11880_v61  ;;  %v7305_v61 = vrot.slane %v16673_v50, 5  ;;  %v7312_v50 = vrot.slane %v16689_v56, 5  ;;  %v7319_v16 = vrot.slane %v16707_v28, 5  ;;  %v16945_v56 = vsel %vm15304_vm1, %v11918_v0, %v7316_v24 }
 0x49d   : > { %v16927_v59 = vsel %vm15304_vm1, %v7304_v14, %v7305_v61  ;;  %v16941_v14 = vsel %vm15304_vm1, %v7311_v7, %v7312_v50  ;;  %v16954_v6 = vsel %vm15304_vm1, %v7318_v58, %v7319_v16  ;;  %v7233_v61 = vld [vmem:[#allocation2 + $0x6c] sm:$0xe]  ;;  %v7234_v7 = vld [vmem:[#allocation2 + $0x78] sm:$0xe]  ;;  %v7337_v16 = vrot.slane %v16756_v53, 5 }
 0x49e   : > { %v11921_v28 = vrot.slane %v7233_v61, 9  ;;  %v7347_v61 = vrot.slane %v16777_v12, 5  ;;  %v7361_v12 = vrot.slane %v16807_v63, 5 }
 0x4a2   : > { %13048 = vmatmul.mubr.msk.bf16.vlgmr.msra.gmra.mrb[0].mxu1 %vm1375_vm13, %v11881_v43  ;;  %v7323_v43 = vrot.slane %v16722_v41, 5 }
 0x4a3   : > { %13080 = vmatpush3.bf16.msra.mxu1 %v7483_v54  ;;  %13051 = vmatprep.mubr.msk.bf16.mxu1 %vm1375_vm13, %v11882_v2  ;;  %v11920_v2 = vrot.slane %v7232_v10, 9  ;;  %v7330_v54 = vrot.slane %v16740_v18, 5  ;;  %v7333_v10 = vrot.slane %v16748_v9, 5  ;;  %v11922_v9 = vrot.slane %v7234_v7, 9 }
 0x4a4   : > { %13841 = vmatprep.subr.msk.bf16.mxu1 %vm1424_vm4, %v16923_v45  ;;  %v16961_v29 = vsel %vm15304_vm1, %v11919_v51, %v7323_v43  ;;  %v7325_v24 = vrot.slane %v7323_v43, 4  ;;  %v7340_v51 = vrot.slane %v16763_v55, 5  ;;  %v7344_v43 = vrot.slane %v16771_v44, 5 }
 0x4a5   : > { %v16966_v50 = vsel %vm15304_vm1, %v11920_v2, %v7330_v54  ;;  %v7332_v58 = vrot.slane %v7330_v54, 4  ;;  %v7339_v54 = vrot.slane %v7337_v16, 4  ;;  %v16988_v55 = vsel %vm15304_vm1, %v11921_v28, %v7337_v16 }
 0x4a6   : > { %v16972_v0 = vsel %vm15304_vm1, %v7325_v24, %v7326_v31  ;;  %v7346_v24 = vrot.slane %v7344_v43, 4  ;;  %v7236_v31 = vld [vmem:[#allocation2 + $0x90] sm:$0xe]  ;;  %v16996_v7 = vsel %vm15304_vm1, %v11922_v9, %v7344_v43  ;;  %v11923_v28 = vrot.slane %v7235_v49, 9  ;;  %v7238_v49 = vld [vmem:[#allocation2 + $0xa8] sm:$0xe] }
 0x4a7   : > { %v16980_v2 = vsel %vm15304_vm1, %v7332_v58, %v7333_v10  ;;  %v16992_v58 = vsel %vm15304_vm1, %v7339_v54, %v7340_v51  ;;  %v7351_v10 = vrot.slane %v16788_v23, 5  ;;  %v7358_v16 = vrot.slane %v16802_v32, 5  ;;  %v7237_v51 = vld [vmem:[#allocation2 + $0x9c] sm:$0xe] }
 0x4a8   : > { %v7354_v9 = vrot.slane %v16797_v48, 5  ;;  %v11924_v39 = vrot.slane %v7236_v31, 9  ;;  %v11925_v48 = vrot.slane %v7237_v51, 9  ;;  %v7372_v31 = vrot.slane %v16837_v11, 5  ;;  %v7239_v51 = vld [vmem:[#allocation2 + $0xb4] sm:$0xe] }
 0x4a9   : > { %v7353_v54 = vrot.slane %v7351_v10, 4  ;;  %v17015_v27 = vsel %vm15304_vm1, %v11923_v28, %v7351_v10  ;;  %v11927_v20 = vrot.slane %v7239_v51, 9 }
 0x4aa   : > { %13052 = vmatmul.mubr.msk.bf16.gmra.mrb[4].mxu1 %vm1375_vm13, %v11883_v17  ;;  %v17007_v17 = vsel %vm15304_vm1, %v7346_v24, %v7347_v61  ;;  %v7365_v24 = vrot.slane %v16817_v52, 5  ;;  %v17025_v43 = vsel %vm15304_vm1, %v11924_v39, %v7358_v16  ;;  %v7374_v26 = vrot.slane %v7372_v31, 4 }
 0x4ab   : > { %13055 = vmatprep.mubr.msk.bf16.mxu1 %vm1375_vm13, %v11884_v33  ;;  %v7360_v33 = vrot.slane %v7358_v16, 4  ;;  %v17021_v61 = vsel %vm15304_vm1, %v7353_v54, %v7354_v9  ;;  %v11926_v9 = vrot.slane %v7238_v49, 9  ;;  %v18825_v16 = vld [vmem:[#allocation24_spill] sm:$0xff] }
 0x4ac   : > { %v7367_v28 = vrot.slane %v7365_v24, 4  ;;  %v7375_v39 = vrot.slane %v18825_v16, 5  ;;  %v17040_v34 = vsel %vm15304_vm1, %v11925_v48, %v7365_v24  ;;  %v18831_v16 = vcombine.low %v16760_v5, %v16771_v44 }
 0x4ad   : > { %v17032_v63 = vsel %vm15304_vm1, %v7360_v33, %v7361_v12  ;;  %v7379_v12 = vrot.slane %v16852_v3, 5  ;;  %v17055_v49 = vsel %vm15304_vm1, %v11926_v9, %v7372_v31  ;;  %v18829_v9 = vcombine.low %v16724_v4, %v16740_v18  ;;  %v7224_v18 = vld [vmem:[#allocation2] sm:$0xe] }
 0x4ae   : > { %v17044_v10 = vsel %vm15304_vm1, %v7367_v28, %v7368_v42  ;;  %v17059_v24 = vsel %vm15304_vm1, %v7374_v26, %v7375_v39  ;;  %v18827_v42 = vcombine.low %v16693_v46, %v16701_v8  ;;  %v7382_v28 = vrot.slane %v16857_v40, 5  ;;  %v8773_v46 = vld [vmem:[#allocation2 + $0x90] sm:$0xe] }
 0x4af   : > { %v7381_v48 = vrot.slane %v7379_v12, 4  ;;  %v17070_v31 = vsel %vm15304_vm1, %v11927_v20, %v7379_v12  ;;  %v18828_v8 = vcombine.low %v16709_v47, %v16722_v41  ;;  %v18830_v40 = vcombine.low %v16751_v1, %v16756_v53  ;;  %v14305_v1 = vld [vmem:[#allocation2 + $0x8] sm:$0x1]  ;;  %v7226_v20 = vld [vmem:[#allocation2 + $0x18] sm:$0xe] }
 0x4b0   : > { %v18832_v47 = vcombine.low %v16784_v60, %v16788_v23  ;;  %v18833_v41 = vcombine.low %v16792_v30, %v16802_v32  ;;  %v7274_v4 = vrot.slane %v16872_v37, 5  ;;  %v7277_v53 = vrot.slane %v14305_v1, 5  ;;  %v14306_v32 = vld [vmem:[#allocation2 + $0x1c] sm:$0xf]  ;;  %v17132_v1 = vld [vmem:[#allocation9 + $0x8] sm:$0x3] }
 0x4b1   : > { %v17074_v26 = vsel %vm15304_vm1, %v7381_v48, %v7382_v28  ;;  %v11912_v39 = vrot.slane %v7224_v18, 9  ;;  %v18834_v5 = vcombine.low %v16810_v36, %v16817_v52  ;;  %v18835_v44 = vcombine.low %v16830_v38, %v16837_v11  ;;  %v7225_v52 = vld [vmem:[#allocation2 + $0xc] sm:$0xe]  ;;  %v14307_v11 = vld [vmem:[#allocation2 + $0x14] sm:$0x1] }
 0x4b2   : > { %13056 = vmatmul.mubr.msk.bf16.gmra.mrb[8].mxu1 %vm1375_vm13, %v18826_v19  ;;  %v7276_v51 = vrot.slane %v7274_v4, 4  ;;  %v7281_v30 = vrot.slane %v16907_v13, 5  ;;  %v7288_v37 = vrot.slane %v14306_v32, 5  ;;  %v18836_v36 = vcombine.low %v16847_v21, %v16852_v3  ;;  %v14308_v48 = vld [vmem:[#allocation2 + $0x20] sm:$0x1] }
 0x4b3   : > { %13059 = vmatprep.mubr.msk.bf16.mxu1 %vm1375_vm13, %v18827_v42  ;;  %v7275_v60 = vsel %vm15304_vm1, %v11912_v39, %v7274_v4  ;;  %v7284_v42 = vrot.slane %v14307_v11, 5  ;;  %v7291_v28 = vrot.slane %v14308_v48, 5  ;;  %v17156_v32 = vld [vmem:[#allocation2 + $0x28] sm:$0xf]  ;;  %v17183_v48 = vld [vmem:[#allocation2 + $0x58] sm:$0xf]  ;;  %v18858_v54 = vcombine.low %v17015_v27, %v17021_v61 }
 0x4b4   : > { %v7278_v23 = vsel %vm15304_vm1, %v7276_v51, %v7277_v53  ;;  %v7283_v19 = vrot.slane %v7281_v30, 4  ;;  %v7290_v38 = vrot.slane %v7288_v37, 4  ;;  %v18837_v53 = vld [vmem:[#allocation23_spill] sm:$0xff]  ;;  %v18862_v27 = vcombine.low %v17025_v43, %v17032_v63  ;;  %v17321_v61 = vld [vmem:[#allocation2 + $0xb8] sm:$0xf] }
 0x4b5   : > { %v11928_v12 = vcombine.low %v7275_v60, %v7278_v23  ;;  %v7298_v39 = vrot.slane %v18837_v53, 5  ;;  %v18838_v60 = vcombine.low %v16920_v35, %v16927_v59  ;;  %v18839_v23 = vcombine.low %v16935_v62, %v16941_v14  ;;  %v17167_v62 = vld [vmem:[#allocation2 + $0x38] sm:$0x1]  ;;  %v17169_v14 = vld [vmem:[#allocation2 + $0x40] sm:$0xf] }
 0x4b6   : > { %v7285_v13 = vsel %vm15304_vm1, %v7283_v19, %v7284_v42  ;;  %v7292_v21 = vsel %vm15304_vm1, %v7290_v38, %v7291_v28  ;;  %v17160_v19 = vld [vmem:[#allocation2 + $0x34] sm:$0xf]  ;;  %v8842_v35 = vrot.slane %v17156_v32, 5  ;;  %v18841_v59 = vcombine.low %v16961_v29, %v16972_v0  ;;  %v17180_v29 = vld [vmem:[#allocation2 + $0x50] sm:$0x1] }
 0x4b7   : > { %v8849_v42 = vrot.slane %v17160_v19, 5  ;;  %v8915_v43 = vrot.slane %v17291_v22, 5 }
 0x4b8   : > { %v8844_v11 = vrot.slane %v8842_v35, 4 }
 0x4ba   : > { %13060 = vmatmul.mubr.msk.bf16.gmra.mrb[12].mxu1 %vm1375_vm13, %v18828_v8  ;;  %v11913_v8 = vrot.slane %v7225_v52, 9  ;;  %v17177_v52 = vld [vmem:[#allocation2 + $0x4c] sm:$0xf] }
 0x4bb   : > { %13063 = vmatprep.mubr.msk.bf16.mxu1 %vm1375_vm13, %v18829_v9  ;;  %v7295_v9 = vrot.slane %v16632_v25, 5  ;;  %v7227_v25 = vld [vmem:[#allocation2 + $0x24] sm:$0xe] }
 0x4bc   : > { %v7282_v3 = vsel %vm15304_vm1, %v11913_v8, %v7281_v30  ;;  %v11915_v51 = vrot.slane %v7227_v25, 9  ;;  %v18840_v30 = vcombine.low %v16945_v56, %v16954_v6  ;;  %v8765_v56 = vld [vmem:[#allocation2 + $0x30] sm:$0xe]  ;;  %v18842_v6 = vcombine.low %v16966_v50, %v16980_v2  ;;  %v8767_v8 = vld [vmem:[#allocation2 + $0x48] sm:$0xe] }
 0x4bd   : > { %v7297_v18 = vrot.slane %v7295_v9, 4  ;;  %v12027_v28 = vrot.slane %v8765_v56, 9  ;;  %v17206_v25 = vld [vmem:[#allocation2 + $0x68] sm:$0x1]  ;;  %v17225_v56 = vld [vmem:[#allocation2 + $0x7c] sm:$0xf] }
 0x4c2   : > { %13064 = vmatmul.mubr.msk.bf16.gmra.mrb[16].mxu1 %vm1375_vm13, %v18830_v40  ;;  %v11914_v40 = vrot.slane %v7226_v20, 9  ;;  %v8766_v20 = vld [vmem:[#allocation2 + $0x3c] sm:$0xe] }
 0x4c3   : > { %13067 = vmatprep.mubr.msk.bf16.mxu1 %vm1375_vm13, %v18831_v16  ;;  %v11929_v16 = vcombine.low %v7282_v3, %v7285_v13  ;;  %v17193_v13 = vld [vmem:[#allocation2 + $0x5c] sm:$0x1]  ;;  %v8768_v3 = vld [vmem:[#allocation2 + $0x54] sm:$0xe] }
 0x4ca   : > { %13068 = vmatmul.mubr.msk.bf16.gmra.mrb[20].mxu1 %vm1375_vm13, %v18832_v47  ;;  %v7841_v47 = vsel %vm1424_vm4, %v16923_v45, 0  ;;  %v7299_v45 = vsel %vm15304_vm1, %v7297_v18, %v7298_v39  ;;  %v8863_v18 = vrot.slane %v17177_v52, 5 }
 0x4cb   : > { %13071 = vmatprep.mubr.msk.bf16.mxu1 %vm1375_vm13, %v18833_v41  ;;  %v7289_v41 = vsel %vm15304_vm1, %v11914_v40, %v7288_v37  ;;  %v17158_v37 = vld [vmem:[#allocation2 + $0x2c] sm:$0x1]  ;;  %v8851_v40 = vrot.slane %v8849_v42, 4 }
 0x4cc   : > { %v11930_v4 = vcombine.low %v7289_v41, %v7292_v21  ;;  %v8845_v0 = vrot.slane %v17158_v37, 5  ;;  %v8852_v21 = vrot.slane %v17167_v62, 5  ;;  %v12028_v41 = vrot.slane %v8766_v20, 9 }
 0x4ce   : > { %v17191_v2 = vsel %vm15304_vm1, %v8844_v11, %v8845_v0  ;;  %v17210_v53 = vsel %vm15304_vm1, %v8851_v40, %v8852_v21  ;;  %v8873_v0 = vrot.slane %v17193_v13, 5  ;;  %v8770_v40 = vld [vmem:[#allocation2 + $0x6c] sm:$0xe] }
 0x4cf   : > { %18844 = vst [vmem:[#allocation22_spill] sm:$0xff] %v17191_v2  ;;  %18846 = vst [vmem:[#allocation20_spill] sm:$0xff] %v17210_v53 }
 0x4d2   : > { %13072 = vmatmul.mubr.msk.bf16.gmra.mrb[24].mxu1 %vm1375_vm13, %v18834_v5  ;;  %v7296_v5 = vsel %vm15304_vm1, %v11915_v51, %v7295_v9  ;;  %v12029_v51 = vrot.slane %v8767_v8, 9 }
 0x4d3   : > { %13075 = vmatprep.mubr.msk.bf16.mxu1 %vm1375_vm13, %v18835_v44  ;;  %v11931_v44 = vcombine.low %v7296_v5, %v7299_v45  ;;  %v8870_v45 = vrot.slane %v17183_v48, 5  ;;  %v17214_v5 = vld [vmem:[#allocation2 + $0x70] sm:$0xf] }
 0x4d4   : > { %v17244_v20 = vsel %vm15304_vm1, %v12029_v51, %v8863_v18 }
 0x4d5   : > { %v8872_v11 = vrot.slane %v8870_v45, 4  ;;  %18851 = vst [vmem:[#allocation24_spill] sm:$0xff] %v17244_v20 }
 0x4da   : > { %13076 = vmatmul.mubr.msk.bf16.gmra.mrb[28].mxu1 %vm1375_vm13, %v18836_v36  ;;  %v17175_v36 = vld [vmem:[#allocation2 + $0x44] sm:$0x1] }
 0x4db   : > { %13081 = vmatprep.mubr.msk.bf16.mxu1 %vm1375_vm13, %v11928_v12  ;;  %v8764_v12 = vld [vmem:[#allocation2 + $0x24] sm:$0xe]  ;;  %v8859_v39 = vrot.slane %v17175_v36, 5 }
 0x4dc   : > { %v12026_v38 = vrot.slane %v8764_v12, 9  ;;  %v8769_v12 = vld [vmem:[#allocation2 + $0x60] sm:$0xe] }
 0x4de   : > { %v17187_v50 = vsel %vm15304_vm1, %v12026_v38, %v8842_v35  ;;  %v18847_v35 = vcombine.low %v16988_v55, %v16992_v58  ;;  %v8865_v38 = vrot.slane %v8863_v18, 4  ;;  %v17236_v55 = vld [vmem:[#allocation2 + $0x80] sm:$0x1]  ;;  %v17263_v18 = vld [vmem:[#allocation2 + $0x8c] sm:$0x1] }
 0x4df   : > { %18843 = vst [vmem:[#allocation21_spill] sm:$0xff] %v17187_v50  ;;  %v8901_v33 = vrot.slane %v17263_v18, 5  ;;  %v10318_v50 = vld [vmem:[#allocation2 + $0x30] sm:$0xe] }
 0x4e2   : > { %13082 = vmatmul.mubr.msk.bf16.vlgmr.msra.gmra.mrb[0].mxu1 %vm1375_vm13, %v11929_v16  ;;  %v17198_v16 = vld [vmem:[#allocation2 + $0x64] sm:$0xf] }
 0x4e3   : > { %13114 = vmatpush3.bf16.msra.mxu1 %v7841_v47  ;;  %13085 = vmatprep.mubr.msk.bf16.mxu1 %vm1375_vm13, %v11930_v4  ;;  %v17202_v47 = vsel %vm15304_vm1, %v12027_v28, %v8849_v42  ;;  %v8856_v4 = vrot.slane %v17169_v14, 5  ;;  %v18849_v42 = vcombine.low %v16996_v7, %v17007_v17  ;;  %v8877_v8 = vrot.slane %v17198_v16, 5  ;;  %v17251_v7 = vld [vmem:[#allocation2 + $0x88] sm:$0xf] }
 0x4e4   : > { %13842 = vmatprep.subr.msk.bf16.mxu1 %vm1424_vm4, %v17132_v1  ;;  %18845 = vst [vmem:[#allocation19_spill] sm:$0xff] %v17202_v47  ;;  %v8898_v17 = vrot.slane %v17251_v7, 5 }
 0x4ea   : > { %13086 = vmatmul.mubr.msk.bf16.gmra.mrb[4].mxu1 %vm1375_vm13, %v11931_v44  ;;  %v17286_v44 = vld [vmem:[#allocation2 + $0xa0] sm:$0xf] }
 0x4eb   : > { %13089 = vmatprep.mubr.msk.bf16.mxu1 %vm1375_vm13, %v18838_v60  ;;  %v8858_v60 = vrot.slane %v8856_v4, 4 }
 0x4ed   : > { %v17240_v58 = vsel %vm15304_vm1, %v8858_v60, %v8859_v39  ;;  %v8880_v60 = vrot.slane %v17206_v25, 5 }
 0x4ee   : > { %18850 = vst [vmem:[#allocation18_spill] sm:$0xff] %v17240_v58 }
 0x4f2   : > { %13090 = vmatmul.mubr.msk.bf16.gmra.mrb[8].mxu1 %vm1375_vm13, %v18839_v23  ;;  %v8866_v23 = vrot.slane %v17180_v29, 5 }
 0x4f3   : > { %13093 = vmatprep.mubr.msk.bf16.mxu1 %vm1375_vm13, %v18840_v30  ;;  %v12030_v30 = vrot.slane %v8768_v3, 9  ;;  %v17261_v3 = vsel %vm15304_vm1, %v8872_v11, %v8873_v0  ;;  %v8891_v11 = vrot.slane %v17225_v56, 5  ;;  %v17278_v0 = vld [vmem:[#allocation2 + $0x98] sm:$0x1] }
 0x4f4   : > { %v17257_v21 = vsel %vm15304_vm1, %v8865_v38, %v8866_v23  ;;  %18854 = vst [vmem:[#allocation26_spill] sm:$0xff] %v17261_v3  ;;  %v17270_v23 = vld [vmem:[#allocation2 + $0x94] sm:$0xf]  ;;  %v8884_v38 = vrot.slane %v17214_v5, 5 }
 0x4f5   : > { %v17248_v28 = vsel %vm15304_vm1, %v12030_v30, %v8870_v45  ;;  %18853 = vst [vmem:[#allocation25_spill] sm:$0xff] %v17257_v21  ;;  %v8879_v45 = vrot.slane %v8877_v8, 4  ;;  %v8772_v30 = vld [vmem:[#allocation2 + $0x84] sm:$0xe]  ;;  %v17438_v21 = vld [vmem:[#allocation2 + $0x14] sm:$0x1] }
 0x4f6   : > { %18852 = vst [vmem:[#allocation23_spill] sm:$0xff] %v17248_v28  ;;  %v12034_v9 = vrot.slane %v8772_v30, 9  ;;  %18883 = vst [vmem:[#allocation50_spill] sm:$0xff] %v17438_v21 }
 0x4fa   : > { %13094 = vmatmul.mubr.msk.bf16.gmra.mrb[12].mxu1 %vm1375_vm13, %v18841_v59  ;;  %v17223_v59 = vld [vmem:[#allocation2 + $0x74] sm:$0x1] }
 0x4fb   : > { %13097 = vmatprep.mubr.msk.bf16.mxu1 %vm1375_vm13, %v18842_v6  ;;  %v17229_v6 = vsel %vm15304_vm1, %v12028_v41, %v8856_v4  ;;  %v12031_v41 = vrot.slane %v8769_v12, 9  ;;  %v8771_v4 = vld [vmem:[#allocation2 + $0x78] sm:$0xe]  ;;  %v12032_v12 = vrot.slane %v8770_v40, 9  ;;  %v8887_v51 = vrot.slane %v17223_v59, 5 }
 0x4fc   : > { %18848 = vst [vmem:[#allocation17_spill] sm:$0xff] %v17229_v6  ;;  %v12033_v39 = vrot.slane %v8771_v4, 9  ;;  %v8886_v40 = vrot.slane %v8884_v38, 4  ;;  %v8900_v4 = vrot.slane %v8898_v17, 4 }
 0x4fe   : > { %v17306_v30 = vsel %vm15304_vm1, %v8886_v40, %v8887_v51  ;;  %v8775_v51 = vld [vmem:[#allocation2 + $0xa8] sm:$0xe] }
 0x4ff   : > { %18859 = vst [vmem:[#allocation30_spill] sm:$0xff] %v17306_v30  ;;  %v17348_v30 = vld [vmem:[#allocation2 + $0xc4] sm:$0xf] }
 0x502   : > { %13098 = vmatmul.mubr.msk.bf16.gmra.mrb[16].mxu1 %vm1375_vm13, %v18847_v35  ;;  %v17274_v35 = vsel %vm15304_vm1, %v12031_v41, %v8877_v8  ;;  %v8894_v41 = vrot.slane %v17236_v55, 5  ;;  %v17302_v8 = vld [vmem:[#allocation2 + $0xac] sm:$0xf] }
 0x503   : > { %13101 = vmatprep.mubr.msk.bf16.mxu1 %vm1375_vm13, %v18849_v42  ;;  %18855 = vst [vmem:[#allocation27_spill] sm:$0xff] %v17274_v35  ;;  %v17282_v42 = vsel %vm15304_vm1, %v8879_v45, %v8880_v60  ;;  %v17295_v45 = vsel %vm15304_vm1, %v12032_v12, %v8884_v38  ;;  %v8893_v60 = vrot.slane %v8891_v11, 4  ;;  %v17314_v12 = vsel %vm15304_vm1, %v12034_v9, %v8898_v17  ;;  %v8774_v35 = vld [vmem:[#allocation2 + $0x9c] sm:$0xe] }
 0x504   : > { %18856 = vst [vmem:[#allocation28_spill] sm:$0xff] %v17282_v42  ;;  %18857 = vst [vmem:[#allocation29_spill] sm:$0xff] %v17295_v45  ;;  %v17310_v42 = vsel %vm15304_vm1, %v12033_v39, %v8891_v11  ;;  %v8905_v38 = vrot.slane %v17270_v23, 5  ;;  %v17331_v9 = vsel %vm15304_vm1, %v8900_v4, %v8901_v33  ;;  %v12035_v17 = vrot.slane %v8773_v46, 9  ;;  %v17333_v11 = vld [vmem:[#allocation2 + $0xb0] sm:$0x1] }
 0x505   : > { %18860 = vst [vmem:[#allocation31_spill] sm:$0xff] %v17310_v42  ;;  %18861 = vst [vmem:[#allocation32_spill] sm:$0xff] %v17314_v12  ;;  %v17327_v39 = vsel %vm15304_vm1, %v8893_v60, %v8894_v41  ;;  %v17340_v41 = vld [vmem:[#allocation2 + $0xbc] sm:$0x1]  ;;  %v12036_v46 = vrot.slane %v8774_v35, 9  ;;  %v8912_v60 = vrot.slane %v17286_v44, 5 }
 0x506   : > { %18863 = vst [vmem:[#allocation33_spill] sm:$0xff] %v17327_v39  ;;  %18864 = vst [vmem:[#allocation34_spill] sm:$0xff] %v17331_v9  ;;  %v8907_v40 = vrot.slane %v8905_v38, 4  ;;  %v17344_v33 = vsel %vm15304_vm1, %v12035_v17, %v8905_v38  ;;  %v8919_v4 = vrot.slane %v17302_v8, 5  ;;  %v12037_v9 = vrot.slane %v8775_v51, 9 }
 0x507   : > { %18865 = vst [vmem:[#allocation35_spill] sm:$0xff] %v17333_v11  ;;  %18866 = vst [vmem:[#allocation36_spill] sm:$0xff] %v17340_v41  ;;  %v8926_v12 = vrot.slane %v17321_v61, 5  ;;  %v8914_v17 = vrot.slane %v8912_v60, 4  ;;  %v8922_v35 = vrot.slane %v17333_v11, 5  ;;  %v17363_v3 = vsel %vm15304_vm1, %v12036_v46, %v8912_v60 }
 0x508   : > { %18867 = vst [vmem:[#allocation37_spill] sm:$0xff] %v17344_v33  ;;  %v8777_v42 = vld [vmem:[#allocation2 + $0xc0] sm:$0xe]  ;;  %v17359_v45 = vld [vmem:[#allocation2 + $0xc8] sm:$0x1]  ;;  %18870 = vst [vmem:[#allocation40_spill] sm:$0xff] %v17363_v3  ;;  %v17372_v38 = vsel %vm15304_vm1, %v12037_v9, %v8919_v4  ;;  %v18874_v46 = vcombine.low %v17040_v34, %v17044_v10 }
 0x509   : > { %18869 = vst [vmem:[#allocation39_spill] sm:$0xff] %v17359_v45  ;;  %v8929_v51 = vrot.slane %v17340_v41, 5  ;;  %v17368_v28 = vsel %vm15304_vm1, %v8914_v17, %v8915_v43  ;;  %18872 = vst [vmem:[#allocation42_spill] sm:$0xff] %v17372_v38  ;;  %v8936_v17 = vrot.slane %v17359_v45, 5  ;;  %v8042_v34 = vld [vmem:[#allocation2 + $0x24] sm:$0xf] }
 0x50a   : > { %13102 = vmatmul.mubr.msk.bf16.gmra.mrb[20].mxu1 %vm1375_vm13, %v18858_v54  ;;  %v8776_v54 = vld [vmem:[#allocation2 + $0xb4] sm:$0xe]  ;;  %18871 = vst [vmem:[#allocation41_spill] sm:$0xff] %v17368_v28  ;;  %v8133_v38 = vshrl.u32 %v8042_v34, 16  ;;  %v8136_v28 = vshll.u32 %v8042_v34, 16  ;;  %v13995_v3 = vld [vmem:[#allocation2 + $0x48] sm:$0xff]  }
 0x50b   : > { %13105 = vmatprep.mubr.msk.bf16.mxu1 %vm1375_vm13, %v18862_v27  ;;  %v8908_v27 = vrot.slane %v17278_v0, 5  ;;  %v12038_v39 = vrot.slane %v8776_v54, 9  ;;  %v13996_v33 = vld [vmem:[#allocation2 + $0x54] sm:$0xff]   ;;  %v10319_v45 = vld [vmem:[#allocation2 + $0x3c] sm:$0xe]  ;;  %v14005_v41 = vld [vmem:[#allocation2 + $0xc0] sm:$0xff]  }
 0x50c   : > { %v8138_v34 = vrot.slane %v8136_v28, 5 }
 0x50d   : > { %v17352_v63 = vsel %vm15304_vm1, %v8907_v40, %v8908_v27  ;;  %v8921_v40 = vrot.slane %v8919_v4, 4  ;;  %v8928_v27 = vrot.slane %v8926_v12, 4  ;;  %v17376_v54 = vsel %vm15304_vm1, %v12038_v39, %v8926_v12 }
 0x50e   : > { %18868 = vst [vmem:[#allocation38_spill] sm:$0xff] %v17352_v63  ;;  %18873 = vst [vmem:[#allocation43_spill] sm:$0xff] %v17376_v54  ;;  %v8933_v63 = vrot.slane %v17348_v30, 5  ;;  %v12039_v12 = vrot.slane %v8777_v42, 9  ;;  %v18877_v39 = vcombine.low %v17055_v49, %v17059_v24  ;;  %v13990_v24 = vld [vmem:[#allocation2 + $0xc] sm:$0xff]  }
 0x50f   : > { %v17387_v43 = vsel %vm15304_vm1, %v8921_v40, %v8922_v35  ;;  %v17391_v9 = vsel %vm15304_vm1, %v8928_v27, %v8929_v51  ;;  %v18880_v40 = vcombine.low %v17070_v31, %v17074_v26  ;;  %v13991_v27 = vld [vmem:[#allocation2 + $0x18] sm:$0xff]   ;;  %v13992_v51 = vld [vmem:[#allocation2 + $0x24] sm:$0xff]   ;;  %v8036_v31 = vld [vmem:[#allocation2 + $0xc] sm:$0xf] }
 0x510   : > { %18875 = vst [vmem:[#allocation44_spill] sm:$0xff] %v17387_v43  ;;  %18876 = vst [vmem:[#allocation45_spill] sm:$0xff] %v17391_v9  ;;  %v8935_v4 = vrot.slane %v8933_v63, 4  ;;  %v17404_v35 = vsel %vm15304_vm1, %v12039_v12, %v8933_v63  ;;  %v8567_v63 = vsel %vm1424_vm4, %v17132_v1, 0  ;;  %v17425_v26 = vld [vmem:[#allocation2 + $0x10] sm:$0xf] }
 0x511   : > { %18878 = vst [vmem:[#allocation46_spill] sm:$0xff] %v17404_v35  ;;  %18881 = vst [vmem:[#allocation48_spill] sm:$0xff] %v17425_v26  ;;  %v8039_v12 = vld [vmem:[#allocation2 + $0x18] sm:$0xf]  ;;  %v8085_v1 = vshrl.u32 %v8036_v31, 16 }
 0x512   : > { %13106 = vmatmul.mubr.msk.bf16.gmra.mrb[24].mxu1 %vm1375_vm13, %v18874_v46  ;;  %v17408_v42 = vsel %vm15304_vm1, %v8935_v4, %v8936_v17  ;;  %v17419_v46 = vld [vmem:[#allocation9 + $0xa] sm:$0x3]  ;;  %v17427_v4 = vld [vmem:[#allocation2 + $0x1c] sm:$0xf] }
 0x513   : > { %13109 = vmatprep.mubr.msk.bf16.mxu1 %vm1375_vm13, %v18877_v39  ;;  %18879 = vst [vmem:[#allocation47_spill] sm:$0xff] %v17408_v42  ;;  %v13993_v39 = vld [vmem:[#allocation2 + $0x30] sm:$0xff]   ;;  %18882 = vst [vmem:[#allocation49_spill] sm:$0xff] %v17427_v4  ;;  %v13994_v17 = vld [vmem:[#allocation2 + $0x3c] sm:$0xff]   ;;  %v8118_v49 = vshll.u32 %v17427_v4, 16  ;;  %v8122_v10 = vshrl.u32 %v17427_v4, 16 }
 0x514   : > { %v8087_v60 = vrot.slane %v8085_v1, 4  ;;  %v17586_v4 = vld [vmem:[#allocation2 + $0x40] sm:$0xf]  ;;  %v17614_v11 = vsel %vm1424_vm4, %v17419_v46, 0 }
 0x515   : > { %v8124_v43 = vrot.slane %v8122_v10, 4  ;;  %18891 = vst [vmem:[#allocation58_spill] sm:$0xff] %v17586_v4 }
 0x51a   : > { %13110 = vmatmul.mubr.msk.bf16.gmra.mrb[28].mxu1 %vm1375_vm13, %v18880_v40  ;;  %v8094_v40 = vshll.u32 %v17425_v26, 16 }
 0x51b   : > { %13115 = vmatprep.mubr.msk.bf16.mxu1 %vm1375_vm13, %v13990_v24  ;;  %v8088_v24 = vshll.u32 %v8036_v31, 16 }
 0x51c   : > { %v8096_v35 = vrot.slane %v8094_v40, 5  ;;  %v17440_v40 = vld [vmem:[#allocation2 + $0x20] sm:$0x1] }
 0x51d   : > { %v8090_v42 = vrot.slane %v8088_v24, 5  ;;  %18884 = vst [vmem:[#allocation51_spill] sm:$0xff] %v17440_v40 }
 0x51f   : > { %v8091_v1 = vor.u32 %v8090_v42, %v8087_v60  ;;  %v8166_v60 = vshll.u32 %v17160_v19, 16 }
 0x521   : > { %v8092_v58 = vrot.slane %v8091_v1, 4  ;;  %v8152_v1 = vshll.u32 %v17158_v37, 16  ;;  %v8190_v37 = vshll.u32 %v17169_v14, 16 }
 0x522   : > { %13116 = vmatmul.mubr.msk.bf16.vlgmr.msra.gmra.mrb[0].mxu1 %vm1375_vm13, %v13991_v27  ;;  %v8098_v27 = vshrl.u32 %v17425_v26, 16  ;;  %v17605_v26 = vld [vmem:[#allocation2 + $0x50] sm:$0x1] }
 0x523   : > { %13148 = vmatpush3.bf16.msra.mxu1 %v8567_v63  ;;  %13119 = vmatprep.mubr.msk.bf16.mxu1 %vm1375_vm13, %v13992_v51  ;;  %v8109_v63 = vshrl.u32 %v8039_v12, 16  ;;  %v8112_v51 = vshll.u32 %v8039_v12, 16  ;;  %v8142_v12 = vshll.u32 %v17156_v32, 16  ;;  %18896 = vst [vmem:[#allocation63_spill] sm:$0xff] %v17605_v26 }
 0x524   : > { %13843 = vmatprep.subr.msk.bf16.mxu1 %vm1424_vm4, %v17419_v46  ;;  %v8100_v9 = vrot.slane %v8098_v27, 4  ;;  %v8135_v27 = vrot.slane %v8133_v38, 4 }
 0x525   : > { %v8111_v31 = vrot.slane %v8109_v63, 4  ;;  %v8114_v54 = vrot.slane %v8112_v51, 5  ;;  %v8104_v63 = vshll.u32 %v17438_v21, 16  ;;  %v8128_v51 = vshll.u32 %v17440_v40, 16 }
 0x526   : > { %v8101_v24 = vor.u32 %v8100_v9, %v8096_v35  ;;  %v17445_v20 = vrot.slane %v8142_v12, 5  ;;  %v8170_v9 = vshrl.u32 %v17160_v19, 16  ;;  %v17454_v19 = vrot.slane %v8166_v60, 5 }
 0x527   : > { %v8106_v53 = vrot.slane %v8104_v63, 5  ;;  %v8130_v47 = vrot.slane %v8128_v51, 5  ;;  %v8176_v60 = vshll.u32 %v17167_v62, 16 }
 0x528   : > { %v8102_v42 = vrot.slane %v8101_v24, 4  ;;  %v8172_v24 = vrot.slane %v8170_v9, 4 }
 0x52a   : > { %13120 = vmatmul.mubr.msk.bf16.gmra.mrb[4].mxu1 %vm1375_vm13, %v13993_v39  ;;  %v8120_v39 = vrot.slane %v8118_v49, 5  ;;  %v8115_v49 = vor.u32 %v8114_v54, %v8111_v31  ;;  %v8139_v54 = vor.u32 %v8138_v34, %v8135_v27  ;;  %v13998_v31 = vld [vmem:[#allocation2 + $0x6c] sm:$0xff]  }
 0x52b   : > { %13123 = vmatprep.mubr.msk.bf16.mxu1 %vm1375_vm13, %v13994_v17  ;;  %v8146_v17 = vshrl.u32 %v17156_v32, 16 }
 0x52c   : > { %v8125_v10 = vor.u32 %v8124_v43, %v8120_v39  ;;  %v8116_v6 = vrot.slane %v8115_v49, 4  ;;  %v13997_v43 = vld [vmem:[#allocation2 + $0x60] sm:$0xff]   ;;  %v8048_v49 = vld [vmem:[#allocation2 + $0x3c] sm:$0xf]  ;;  %v8140_v63 = vrot.slane %v8139_v54, 4  ;;  %v8214_v54 = vshll.u32 %v17177_v52, 16 }
 0x52d   : > { %v8148_v32 = vrot.slane %v8146_v17, 4  ;;  %v8097_v17 = vsel %vm14860_vm12, %v8092_v58, %v8096_v35  ;;  %v8194_v35 = vshrl.u32 %v17169_v14, 16  ;;  %v8181_v9 = vshrl.u32 %v8048_v49, 16  ;;  %v13999_v14 = vld [vmem:[#allocation2 + $0x78] sm:$0xff]  }
 0x52e   : > { %v8121_v27 = vsel %vm14860_vm12, %v8116_v6, %v8120_v39  ;;  %v8154_v6 = vrot.slane %v8152_v1, 5  ;;  %v8145_v62 = vsel %vm14860_vm12, %v8140_v63, %v17445_v20  ;;  %v8057_v63 = vld [vmem:[#allocation2 + $0x60] sm:$0xf] }
 0x52f   : > { %v8149_v12 = vor.u32 %v8148_v32, %v17445_v20  ;;  %v8051_v32 = vld [vmem:[#allocation2 + $0x48] sm:$0xf]  ;;  %v8242_v20 = vshrl.u32 %v17183_v48, 16 }
 0x530   : > { %v8205_v39 = vshrl.u32 %v8051_v32, 16 }
 0x532   : > { %13124 = vmatmul.mubr.msk.bf16.gmra.mrb[8].mxu1 %vm1375_vm13, %v13995_v3  ;;  %v8045_v3 = vld [vmem:[#allocation2 + $0x30] sm:$0xf] }
 0x533   : > { %13127 = vmatprep.mubr.msk.bf16.mxu1 %vm1375_vm13, %v13996_v33  ;;  %v8126_v33 = vrot.slane %v8125_v10, 4  ;;  %v8157_v38 = vshrl.u32 %v8045_v3, 16  ;;  %v8160_v28 = vshll.u32 %v8045_v3, 16  ;;  %v8107_v10 = vsel %vm14860_vm12, %v8102_v42, %v8106_v53 }
 0x534   : > { %v8150_v3 = vrot.slane %v8149_v12, 4  ;;  %v17466_v53 = vcombine.low %v8097_v17, %v8107_v10  ;;  %v8196_v12 = vrot.slane %v8194_v35, 4  ;;  %v14000_v17 = vld [vmem:[#allocation2 + $0x84] sm:$0xff]  }
 0x535   : > { %v8131_v34 = vsel %vm14860_vm12, %v8126_v33, %v8130_v47  ;;  %v8159_v51 = vrot.slane %v8157_v38, 4  ;;  %v8162_v58 = vrot.slane %v8160_v28, 5  ;;  %v8173_v47 = vor.u32 %v8172_v24, %v17454_v19 }
 0x536   : > { %v17468_v42 = vcombine.low %v8121_v27, %v8131_v34  ;;  %v8208_v33 = vshll.u32 %v8051_v32, 16  ;;  %v8218_v38 = vshrl.u32 %v17177_v52, 16  ;;  %v8155_v1 = vsel %vm14860_vm12, %v8150_v3, %v8154_v6  ;;  %v8054_v27 = vld [vmem:[#allocation2 + $0x54] sm:$0xf] }
 0x537   : > { %v8163_v28 = vor.u32 %v8162_v58, %v8159_v51  ;;  %v8178_v24 = vrot.slane %v8176_v60, 5  ;;  %v8174_v52 = vrot.slane %v8173_v47, 4  ;;  %v8200_v34 = vshll.u32 %v17175_v36, 16 }
 0x538   : > { %v8238_v32 = vshll.u32 %v17183_v48, 16  ;;  %v8207_v51 = vrot.slane %v8205_v39, 4  ;;  %v8210_v58 = vrot.slane %v8208_v33, 5  ;;  %v8220_v35 = vrot.slane %v8218_v38, 4 }
 0x539   : > { %v8164_v3 = vrot.slane %v8163_v28, 4  ;;  %v17488_v6 = vcombine.low %v8145_v62, %v8155_v1  ;;  %v8253_v47 = vshrl.u32 %v8057_v63, 16  ;;  %v8179_v48 = vsel %vm14860_vm12, %v8174_v52, %v8178_v24  ;;  %v14001_v62 = vld [vmem:[#allocation2 + $0x90] sm:$0xff]  }
 0x53a   : > { %13128 = vmatmul.mubr.msk.bf16.gmra.mrb[12].mxu1 %vm1375_vm13, %v13997_v43  ;;  %v8184_v43 = vshll.u32 %v8048_v49, 16  ;;  %v8183_v49 = vrot.slane %v8181_v9, 4  ;;  %v8229_v9 = vshrl.u32 %v8054_v27, 16  ;;  %v8202_v2 = vrot.slane %v8200_v34, 5 }
 0x53b   : > { %13131 = vmatprep.mubr.msk.bf16.mxu1 %vm1375_vm13, %v13998_v31  ;;  %v17476_v31 = vrot.slane %v8190_v37, 5  ;;  %v17485_v37 = vrot.slane %v8214_v54, 5  ;;  %v8244_v39 = vrot.slane %v8242_v20, 4  ;;  %v8211_v33 = vor.u32 %v8210_v58, %v8207_v51 }
 0x53c   : > { %v8186_v10 = vrot.slane %v8184_v43, 5  ;;  %v8232_v43 = vshll.u32 %v8054_v27, 16  ;;  %v8262_v38 = vshll.u32 %v17198_v16, 16  ;;  %v8266_v28 = vshrl.u32 %v17198_v16, 16  ;;  %v14002_v27 = vld [vmem:[#allocation2 + $0x9c] sm:$0xff]  }
 0x53d   : > { %v8197_v60 = vor.u32 %v8196_v12, %v17476_v31  ;;  %v8221_v54 = vor.u32 %v8220_v35, %v17485_v37  ;;  %v8060_v12 = vld [vmem:[#allocation2 + $0x6c] sm:$0xf]  ;;  %v8169_v1 = vsel %vm14860_vm12, %v8164_v3, %v17454_v19  ;;  %v8224_v34 = vshll.u32 %v17180_v29, 16 }
 0x53e   : > { %v8187_v36 = vor.u32 %v8186_v10, %v8183_v49  ;;  %v8231_v10 = vrot.slane %v8229_v9, 4  ;;  %v8234_v24 = vrot.slane %v8232_v43, 5  ;;  %v8277_v51 = vshrl.u32 %v8060_v12, 16 }
 0x53f   : > { %v8198_v49 = vrot.slane %v8197_v60, 4  ;;  %v8280_v58 = vshll.u32 %v8060_v12, 16  ;;  %v17506_v19 = vrot.slane %v8211_v33, 4  ;;  %v17508_v35 = vrot.slane %v8221_v54, 4  ;;  %v8063_v33 = vld [vmem:[#allocation2 + $0x78] sm:$0xf] }
 0x540   : > { %v8188_v52 = vrot.slane %v8187_v36, 4  ;;  %v17510_v3 = vrot.slane %v8262_v38, 5  ;;  %v8268_v60 = vrot.slane %v8266_v28, 4  ;;  %v8235_v9 = vor.u32 %v8234_v24, %v8231_v10  ;;  %v14003_v54 = vld [vmem:[#allocation2 + $0xa8] sm:$0xff]   ;;  %v14004_v12 = vld [vmem:[#allocation2 + $0xb4] sm:$0xff]  }
 0x541   : > { %v8203_v29 = vsel %vm14860_vm12, %v8198_v49, %v8202_v2  ;;  %v8248_v43 = vshll.u32 %v17193_v13, 16  ;;  %v8272_v36 = vshll.u32 %v17206_v25, 16  ;;  %v17524_v28 = vrot.slane %v8277_v51, 4  ;;  %v17529_v25 = vld [vmem:[#allocation2 + $0x1c] sm:$0xf] }
 0x542   : > { %13132 = vmatmul.mubr.msk.bf16.gmra.mrb[16].mxu1 %vm1375_vm13, %v13999_v14  ;;  %v8256_v14 = vshll.u32 %v8057_v63, 16  ;;  %v17502_v63 = vcombine.low %v8169_v1, %v8179_v48  ;;  %v17526_v2 = vrot.slane %v8280_v58, 5  ;;  %v8290_v13 = vshrl.u32 %v17214_v5, 16  ;;  %18885 = vst [vmem:[#allocation52_spill] sm:$0xff] %v17529_v25  ;;  %v17542_v10 = vld [vmem:[#allocation2 + $0x20] sm:$0x1] }
 0x543   : > { %13135 = vmatprep.mubr.msk.bf16.mxu1 %vm1375_vm13, %v14000_v17  ;;  %v17492_v17 = vrot.slane %v8238_v32, 5  ;;  %v8255_v32 = vrot.slane %v8253_v47, 4  ;;  %v8193_v47 = vsel %vm14860_vm12, %v8188_v52, %v17476_v31  ;;  %v8269_v49 = vor.u32 %v8268_v60, %v17510_v3  ;;  %18886 = vst [vmem:[#allocation53_spill] sm:$0xff] %v17542_v10  ;;  %v17556_v58 = vld [vmem:[#allocation2 + $0x84] sm:$0xf] }
 0x544   : > { %v8258_v20 = vrot.slane %v8256_v14, 5  ;;  %v17519_v14 = vrot.slane %v8224_v34, 5  ;;  %v17544_v24 = vrot.slane %v8235_v9, 4  ;;  %v17548_v52 = vrot.slane %v8272_v36, 5  ;;  %v17558_v60 = vld [vmem:[#allocation2 + $0x28] sm:$0xf] }
 0x545   : > { %v8245_v16 = vor.u32 %v8244_v39, %v17492_v17  ;;  %v8286_v39 = vshll.u32 %v17214_v5, 16  ;;  %v10316_v5 = vld [vmem:[#allocation2 + $0x18] sm:$0xe]  ;;  %v8301_v34 = vshrl.u32 %v8063_v33, 16  ;;  %v8304_v51 = vshll.u32 %v8063_v33, 16  ;;  %18888 = vst [vmem:[#allocation55_spill] sm:$0xff] %v17558_v60 }
 0x546   : > { %v8259_v48 = vor.u32 %v8258_v20, %v8255_v32  ;;  %v17550_v32 = vld [vmem:[#allocation2 + $0x34] sm:$0xf]  ;;  %v17568_v36 = vrot.slane %v8290_v13, 4  ;;  %v17576_v33 = vrot.slane %v8269_v49, 4  ;;  %v10385_v1 = vrot.slane %v17542_v10, 5 }
 0x547   : > { %v17522_v38 = vrot.slane %v8245_v16, 4  ;;  %18887 = vst [vmem:[#allocation54_spill] sm:$0xff] %v17550_v32  ;;  %v17554_v16 = vrot.slane %v8286_v39, 5  ;;  %v17573_v39 = vld [vmem:[#allocation2 + $0x38] sm:$0x1]  ;;  %v8310_v13 = vshll.u32 %v17225_v56, 16 }
 0x548   : > { %v17552_v20 = vrot.slane %v8259_v48, 4  ;;  %v17571_v48 = vld [vmem:[#allocation2 + $0x2c] sm:$0x1]  ;;  %18890 = vst [vmem:[#allocation57_spill] sm:$0xff] %v17573_v39  ;;  %v10317_v9 = vld [vmem:[#allocation2 + $0x24] sm:$0xe] }
 0x549   : > { %18889 = vst [vmem:[#allocation56_spill] sm:$0xff] %v17571_v48  ;;  %v17584_v40 = vrot.slane %v8304_v51, 5  ;;  %v17600_v10 = vld [vmem:[#allocation2 + $0x4c] sm:$0xf]  ;;  %v10392_v21 = vrot.slane %v17571_v48, 5 }
 0x54a   : > { %13136 = vmatmul.mubr.msk.bf16.gmra.mrb[20].mxu1 %vm1375_vm13, %v14001_v62  ;;  %v17531_v62 = vcombine.low %v8193_v47, %v8203_v29  ;;  %v10382_v29 = vrot.slane %v17529_v25, 5  ;;  %v17579_v25 = vrot.slane %v8301_v34, 4  ;;  %v10389_v47 = vrot.slane %v17558_v60, 5  ;;  %18895 = vst [vmem:[#allocation62_spill] sm:$0xff] %v17600_v10  ;;  %v17623_v48 = vld [vmem:[#allocation2 + $0x5c] sm:$0x1] }
 0x54b   : > { %13139 = vmatprep.mubr.msk.bf16.mxu1 %vm1375_vm13, %v14002_v27  ;;  %v17546_v27 = vrot.slane %v8248_v43, 5  ;;  %v10396_v34 = vrot.slane %v17550_v32, 5  ;;  %v12137_v60 = vrot.slane %v10317_v9, 9  ;;  %v10399_v43 = vrot.slane %v17573_v39, 5  ;;  %18900 = vst [vmem:[#allocation67_spill] sm:$0xff] %v17623_v48 }
 0x54c   : > { %v10384_v31 = vrot.slane %v10382_v29, 4  ;;  %v17616_v9 = vrot.slane %v8310_v13, 5  ;;  %v12139_v13 = vrot.slane %v10319_v45, 9 }
 0x54d   : > { %v10398_v32 = vrot.slane %v10396_v34, 4  ;;  %v17620_v51 = vsel %vm15304_vm1, %v12137_v60, %v10389_v47  ;;  %v10321_v60 = vld [vmem:[#allocation2 + $0x54] sm:$0xe] }
 0x54e   : > { %18899 = vst [vmem:[#allocation66_spill] sm:$0xff] %v17620_v51  ;;  %v17663_v51 = vld [vmem:[#allocation2 + $0x7c] sm:$0xf] }
 0x54f   : > { %v17635_v46 = vsel %vm15304_vm1, %v10398_v32, %v10399_v43  ;;  %v17647_v32 = vld [vmem:[#allocation2 + $0x70] sm:$0xf]  ;;  %v10410_v43 = vrot.slane %v17600_v10, 5  ;;  %v17668_v10 = vld [vmem:[#allocation2 + $0x80] sm:$0x1] }
 0x550   : > { %18903 = vst [vmem:[#allocation70_spill] sm:$0xff] %v17635_v46  ;;  %18905 = vst [vmem:[#allocation72_spill] sm:$0xff] %v17647_v32  ;;  %v10413_v46 = vrot.slane %v17605_v26, 5  ;;  %v17675_v26 = vld [vmem:[#allocation2 + $0x94] sm:$0xf] }
 0x551   : > { %18908 = vst [vmem:[#allocation75_spill] sm:$0xff] %v17668_v10  ;;  %18910 = vst [vmem:[#allocation77_spill] sm:$0xff] %v17675_v26 }
 0x552   : > { %13140 = vmatmul.mubr.msk.bf16.gmra.mrb[24].mxu1 %vm1375_vm13, %v14003_v54  ;;  %v12136_v54 = vrot.slane %v10316_v5, 9  ;;  %v17596_v5 = vsel %vm15304_vm1, %v10384_v31, %v10385_v1  ;;  %v10391_v31 = vrot.slane %v10389_v47, 4  ;;  %v12138_v1 = vrot.slane %v10318_v50, 9  ;;  %v17638_v47 = vld [vmem:[#allocation2 + $0x68] sm:$0x1] }
 0x553   : > { %13143 = vmatprep.mubr.msk.bf16.mxu1 %vm1375_vm13, %v14004_v12  ;;  %v17588_v12 = vld [vmem:[#allocation2 + $0x44] sm:$0x1]  ;;  %18894 = vst [vmem:[#allocation61_spill] sm:$0xff] %v17596_v5  ;;  %v10403_v5 = vrot.slane %v17586_v4, 5  ;;  %18904 = vst [vmem:[#allocation71_spill] sm:$0xff] %v17638_v47 }
 0x554   : > { %18892 = vst [vmem:[#allocation59_spill] sm:$0xff] %v17588_v12  ;;  %v17592_v49 = vsel %vm15304_vm1, %v12136_v54, %v10382_v29  ;;  %v17607_v29 = vld [vmem:[#allocation2 + $0x58] sm:$0xf]  ;;  %v17609_v54 = vld [vmem:[#allocation2 + $0x64] sm:$0xf]  ;;  %v17627_v50 = vsel %vm15304_vm1, %v10391_v31, %v10392_v21  ;;  %v17631_v39 = vsel %vm15304_vm1, %v12138_v1, %v10396_v34  ;;  %v10406_v34 = vrot.slane %v17588_v12, 5 }
 0x555   : > { %18893 = vst [vmem:[#allocation60_spill] sm:$0xff] %v17592_v49  ;;  %18897 = vst [vmem:[#allocation64_spill] sm:$0xff] %v17607_v29  ;;  %v10320_v49 = vld [vmem:[#allocation2 + $0x48] sm:$0xe]  ;;  %v10405_v31 = vrot.slane %v10403_v5, 4  ;;  %v17651_v45 = vsel %vm15304_vm1, %v12139_v13, %v10403_v5  ;;  %v10417_v4 = vrot.slane %v17607_v29, 5 }
 0x556   : > { %18898 = vst [vmem:[#allocation65_spill] sm:$0xff] %v17609_v54  ;;  %18901 = vst [vmem:[#allocation68_spill] sm:$0xff] %v17627_v50  ;;  %v10322_v1 = vld [vmem:[#allocation2 + $0x60] sm:$0xe]  ;;  %v17655_v50 = vld [vmem:[#allocation2 + $0x74] sm:$0x1] }
 0x557   : > { %18902 = vst [vmem:[#allocation69_spill] sm:$0xff] %v17631_v39  ;;  %18906 = vst [vmem:[#allocation73_spill] sm:$0xff] %v17651_v45  ;;  %v17659_v21 = vsel %vm15304_vm1, %v10405_v31, %v10406_v34  ;;  %v10424_v39 = vrot.slane %v17609_v54, 5  ;;  %v10412_v5 = vrot.slane %v10410_v43, 4  ;;  %v10420_v13 = vrot.slane %v17623_v48, 5 }
 0x558   : > { %18907 = vst [vmem:[#allocation74_spill] sm:$0xff] %v17659_v21  ;;  %v12142_v12 = vrot.slane %v10322_v1, 9  ;;  %v10323_v29 = vld [vmem:[#allocation2 + $0x6c] sm:$0xe]  ;;  %v10419_v34 = vrot.slane %v10417_v4, 4  ;;  %v10427_v54 = vrot.slane %v17638_v47, 5 }
 0x559   : > { %v17690_v45 = vld [vmem:[#allocation2 + $0x88] sm:$0xf]  ;;  %v10438_v48 = vrot.slane %v17663_v51, 5  ;;  %v17727_v47 = vld [vmem:[#allocation2 + $0xa0] sm:$0xf] }
 0x55a   : > { %13144 = vmatmul.mubr.msk.bf16.gmra.mrb[28].mxu1 %vm1375_vm13, %v14005_v41  ;;  %v12140_v41 = vrot.slane %v10320_v49, 9  ;;  %v17679_v49 = vsel %vm15304_vm1, %v10412_v5, %v10413_v46  ;;  %v17687_v21 = vsel %vm15304_vm1, %v12142_v12, %v10424_v39  ;;  %v17696_v46 = vsel %vm15304_vm1, %v10419_v34, %v10420_v13  ;;  %v10325_v5 = vld [vmem:[#allocation2 + $0x84] sm:$0xe]  ;;  %v17704_v12 = vld [vmem:[#allocation2 + $0x8c] sm:$0x1]  ;;  %18920 = vst [vmem:[#allocation86_spill] sm:$0xff] %v17727_v47 }
 0x55b   : > { %13149 = vmatprep.mubr.msk.bf16.mxu1 %vm1375_vm13, %v17466_v53  ;;  %v12141_v53 = vrot.slane %v10321_v60, 9  ;;  %v10426_v60 = vrot.slane %v10424_v39, 4  ;;  %18911 = vst [vmem:[#allocation78_spill] sm:$0xff] %v17679_v49  ;;  %18913 = vst [vmem:[#allocation80_spill] sm:$0xff] %v17687_v21  ;;  %v17702_v39 = vld [vmem:[#allocation9 + $0xc] sm:$0x3] }
 0x55c   : > { %v17672_v31 = vsel %vm15304_vm1, %v12140_v41, %v10410_v43  ;;  %v10431_v41 = vrot.slane %v17647_v32, 5  ;;  %v10324_v43 = vld [vmem:[#allocation2 + $0x78] sm:$0xe]  ;;  %18914 = vst [vmem:[#allocation81_spill] sm:$0xff] %v17696_v46  ;;  %18916 = vst [vmem:[#allocation83_spill] sm:$0xff] %v17704_v12  ;;  %v10434_v34 = vrot.slane %v17655_v50, 5 }
 0x55d   : > { %18909 = vst [vmem:[#allocation76_spill] sm:$0xff] %v17672_v31  ;;  %v17683_v1 = vsel %vm15304_vm1, %v12141_v53, %v10417_v4  ;;  %v17700_v4 = vsel %vm15304_vm1, %v10426_v60, %v10427_v54  ;;  %v12143_v53 = vrot.slane %v10323_v29, 9  ;;  %v17706_v32 = vld [vmem:[#allocation2 + $0x98] sm:$0x1]  ;;  %v18918_v29 = vshrl.u32 %v17225_v56, 16 }
 0x55e   : > { %18912 = vst [vmem:[#allocation79_spill] sm:$0xff] %v17683_v1  ;;  %18915 = vst [vmem:[#allocation82_spill] sm:$0xff] %v17700_v4  ;;  %v10433_v13 = vrot.slane %v10431_v41, 4  ;;  %v12144_v49 = vrot.slane %v10324_v43, 9  ;;  %v10326_v46 = vld [vmem:[#allocation2 + $0x90] sm:$0xe] }
 0x55f   : > { %18917 = vst [vmem:[#allocation84_spill] sm:$0xff] %v17706_v32  ;;  %v17717_v54 = vrot.slane %v18918_v29, 4  ;;  %v17721_v60 = vsel %vm15304_vm1, %v12143_v53, %v10431_v41  ;;  %v12145_v29 = vrot.slane %v10325_v5, 9  ;;  %v10445_v41 = vrot.slane %v17690_v45, 5  ;;  %v10327_v4 = vld [vmem:[#allocation2 + $0x9c] sm:$0xe] }
 0x560   : > { %18919 = vst [vmem:[#allocation85_spill] sm:$0xff] %v17721_v60  ;;  %v17731_v56 = vsel %vm15304_vm1, %v10433_v13, %v10434_v34  ;;  %v10440_v43 = vrot.slane %v10438_v48, 4  ;;  %v10452_v53 = vrot.slane %v17675_v26, 5  ;;  %v17741_v21 = vld [vmem:[#allocation2 + $0xa4] sm:$0x1]  ;;  %v17747_v5 = vsel %vm15304_vm1, %v12144_v49, %v10438_v48 }
 0x561   : > { %18921 = vst [vmem:[#allocation87_spill] sm:$0xff] %v17731_v56  ;;  %18922 = vst [vmem:[#allocation88_spill] sm:$0xff] %v17741_v21  ;;  %v17743_v13 = vld [vmem:[#allocation2 + $0xac] sm:$0xf]  ;;  %v17751_v34 = vsel %vm15304_vm1, %v12145_v29, %v10445_v41  ;;  %v10447_v1 = vrot.slane %v10445_v41, 4  ;;  %v19015_v57 = vld [vmem:[#allocation73_spill] sm:$0xff] }
 0x562   : > { %13150 = vmatmul.mubr.msk.bf16.vlgmr.msra.gmra.mrb[0].mxu1 %vm1375_vm13, %v17468_v42  ;;  %v10441_v42 = vrot.slane %v17668_v10, 5  ;;  %18923 = vst [vmem:[#allocation89_spill] sm:$0xff] %v17747_v5  ;;  %18924 = vst [vmem:[#allocation90_spill] sm:$0xff] %v17751_v34  ;;  %v17753_v56 = vld [vmem:[#allocation2 + $0xb0] sm:$0x1]  ;;  %v10454_v31 = vrot.slane %v10452_v53, 4 }
 0x563   : > { %13182 = vmatpush3.bf16.msra.mxu1 %v17614_v11  ;;  %13153 = vmatprep.mubr.msk.bf16.mxu1 %vm1375_vm13, %v17488_v6  ;;  %v10448_v6 = vrot.slane %v17704_v12, 5  ;;  %v12146_v11 = vrot.slane %v10326_v46, 9  ;;  %v10455_v12 = vrot.slane %v17706_v32, 5  ;;  %v10459_v10 = vrot.slane %v17727_v47, 5  ;;  %v17761_v26 = vld [vmem:[#allocation2 + $0xb8] sm:$0xf] }
 0x564   : > { %13844 = vmatprep.subr.msk.bf16.mxu1 %vm1424_vm4, %v17702_v39  ;;  %v17757_v60 = vsel %vm15304_vm1, %v10440_v43, %v10441_v42  ;;  %v12147_v42 = vrot.slane %v10327_v4, 9  ;;  %v10328_v29 = vld [vmem:[#allocation2 + $0xa8] sm:$0xe]  ;;  %v9631_v41 = vld [vmem:[#allocation2 + $0xbc] sm:$0x1]  ;;  %v8338_v4 = vshrl.u32 %v17251_v7, 16 }
 0x565   : > { %18925 = vst [vmem:[#allocation91_spill] sm:$0xff] %v17757_v60  ;;  %v17767_v49 = vsel %vm15304_vm1, %v10447_v1, %v10448_v6  ;;  %v17771_v46 = vsel %vm15304_vm1, %v12146_v11, %v10452_v53  ;;  %v17773_v43 = vld [vmem:[#allocation2 + $0xc4] sm:$0xf]  ;;  %v17779_v47 = vsel %vm15304_vm1, %v10454_v31, %v10455_v12  ;;  %v10461_v48 = vrot.slane %v10459_v10, 4  ;;  %v10329_v60 = vld [vmem:[#allocation2 + $0xb4] sm:$0xe] }
 0x566   : > { %18926 = vst [vmem:[#allocation92_spill] sm:$0xff] %v17767_v49  ;;  %18927 = vst [vmem:[#allocation93_spill] sm:$0xff] %v17771_v46  ;;  %v10462_v1 = vrot.slane %v17741_v21, 5  ;;  %v8293_v6 = vor.u32 %v17568_v36, %v17554_v16  ;;  %v8334_v11 = vshll.u32 %v17251_v7, 16  ;;  %v10466_v53 = vrot.slane %v17743_v13, 5 }
 0x567   : > { %18928 = vst [vmem:[#allocation94_spill] sm:$0xff] %v17779_v47  ;;  %v10330_v5 = vld [vmem:[#allocation2 + $0xc0] sm:$0xe]  ;;  %v9634_v31 = vld [vmem:[#allocation2 + $0xc8] sm:$0x1]  ;;  %v17792_v12 = vsel %vm15304_vm1, %v12147_v42, %v10459_v10  ;;  %v12148_v32 = vrot.slane %v10328_v29, 9 }
 0x568   : > { %v17796_v36 = vsel %vm15304_vm1, %v10461_v48, %v10462_v1  ;;  %v10473_v49 = vrot.slane %v17761_v26, 5  ;;  %v10468_v47 = vrot.slane %v10466_v53, 4  ;;  %v10480_v46 = vrot.slane %v17773_v43, 5 }
 0x569   : > { %18929 = vst [vmem:[#allocation95_spill] sm:$0xff] %v17796_v36  ;;  %v12149_v10 = vrot.slane %v10329_v60, 9  ;;  %v10476_v34 = vrot.slane %v9631_v41, 5  ;;  %v12150_v21 = vrot.slane %v10330_v5, 9  ;;  %v17807_v48 = vsel %vm15304_vm1, %v12148_v32, %v10466_v53 }
 0x56a   : > { %13154 = vmatmul.mubr.msk.bf16.gmra.mrb[4].mxu1 %vm1375_vm13, %v17502_v63  ;;  %v10469_v63 = vrot.slane %v17753_v56, 5  ;;  %v10475_v42 = vrot.slane %v10473_v49, 4  ;;  %v10483_v1 = vrot.slane %v9634_v31, 5  ;;  %v8328_v32 = vshll.u32 %v17556_v58, 16 }
 0x56b   : > { %13157 = vmatprep.mubr.msk.bf16.mxu1 %vm1375_vm13, %v17531_v62  ;;  %v10482_v62 = vrot.slane %v10480_v46, 4  ;;  %v17818_v60 = vsel %vm15304_vm1, %v12149_v10, %v10473_v49  ;;  %v17829_v41 = vsel %vm15304_vm1, %v12150_v21, %v10480_v46  ;;  %v18930_v49 = vsel %vm14860_vm12, %v17508_v35, %v17519_v14 }
 0x56c   : > { %v17811_v29 = vsel %vm15304_vm1, %v10468_v47, %v10469_v63  ;;  %v17822_v5 = vsel %vm15304_vm1, %v10475_v42, %v10476_v34  ;;  %v18931_v34 = vsel %vm14860_vm12, %v17506_v19, %v17485_v37  ;;  %v8241_v21 = vsel %vm14860_vm12, %v17544_v24, %v17492_v17  ;;  %v8069_v24 = vld [vmem:[#allocation2 + $0x90] sm:$0xf] }
 0x56d   : > { %v12164_v36 = vcombine.low %v17807_v48, %v17811_v29  ;;  %v12165_v47 = vcombine.low %v17818_v60, %v17822_v5  ;;  %v17833_v7 = vsel %vm15304_vm1, %v10482_v62, %v10483_v1  ;;  %v11997_v53 = vcombine.low %v18931_v34, %v18930_v49  ;;  %v8072_v49 = vld [vmem:[#allocation2 + $0x9c] sm:$0xf] }
 0x56e   : > { %v8294_v46 = vrot.slane %v8293_v6, 4  ;;  %v12166_v31 = vcombine.low %v17829_v41, %v17833_v7  ;;  %v18932_v35 = vsel %vm14860_vm12, %v17522_v38, %v17546_v27  ;;  %v8265_v37 = vsel %vm14860_vm12, %v17552_v20, %v17510_v3 }
 0x56f   : > { %v11998_v14 = vcombine.low %v8241_v21, %v18932_v35  ;;  %v8275_v17 = vsel %vm14860_vm12, %v17576_v33, %v17548_v52  ;;  %v8317_v19 = vor.u32 %v17717_v54, %v17616_v9  ;;  %v18933_v38 = vor.u32 %v17526_v2, %v17524_v28 }
 0x570   : > { %v18934_v6 = vshll.u32 %v17223_v59, 16  ;;  %v8336_v10 = vrot.slane %v8334_v11, 5  ;;  %v8340_v3 = vrot.slane %v8338_v4, 4  ;;  %v8307_v52 = vor.u32 %v17584_v40, %v17579_v25 }
 0x571   : > { %v8284_v27 = vrot.slane %v18933_v38, 4  ;;  %v8320_v20 = vshll.u32 %v17236_v55, 16  ;;  %v18935_v33 = vshrl.u32 %v17556_v58, 16  ;;  %v8330_v42 = vrot.slane %v8328_v32, 5 }
 0x572   : > { %13158 = vmatmul.mubr.msk.bf16.gmra.mrb[8].mxu1 %vm1375_vm13, %v11997_v53  ;;  %v8298_v63 = vrot.slane %v18934_v6, 5  ;;  %v11999_v62 = vcombine.low %v8265_v37, %v8275_v17  ;;  %v8349_v2 = vshrl.u32 %v8069_v24, 16  ;;  %v8318_v59 = vrot.slane %v8317_v19, 4 }
 0x573   : > { %13161 = vmatprep.mubr.msk.bf16.mxu1 %vm1375_vm13, %v11998_v14  ;;  %v8327_v54 = vrot.slane %v18935_v33, 4  ;;  %v8352_v1 = vshll.u32 %v8069_v24, 16  ;;  %v8358_v11 = vshll.u32 %v17270_v23, 16  ;;  %v8362_v4 = vshrl.u32 %v17270_v23, 16 }
 0x574   : > { %v8299_v28 = vsel %vm14860_vm12, %v8294_v46, %v8298_v63  ;;  %v8289_v55 = vsel %vm14860_vm12, %v8284_v27, %v17554_v16  ;;  %v8341_v40 = vor.u32 %v8340_v3, %v8336_v10  ;;  %v8382_v25 = vshll.u32 %v17286_v44, 16 }
 0x575   : > { %v8386_v58 = vshrl.u32 %v17286_v44, 16  ;;  %v12000_v32 = vcombine.low %v8289_v55, %v8299_v28  ;;  %v8308_v34 = vrot.slane %v8307_v52, 4  ;;  %v8322_v53 = vrot.slane %v8320_v20, 5  ;;  %v8075_v20 = vld [vmem:[#allocation2 + $0xa8] sm:$0xf] }
 0x576   : > { %v8331_v21 = vor.u32 %v8330_v42, %v8327_v54  ;;  %v8344_v46 = vshll.u32 %v17263_v18, 16  ;;  %v8351_v35 = vrot.slane %v8349_v2, 4  ;;  %v8373_v14 = vshrl.u32 %v8072_v49, 16  ;;  %v8078_v28 = vld [vmem:[#allocation2 + $0xb4] sm:$0xf] }
 0x577   : > { %v8376_v37 = vshll.u32 %v8072_v49, 16  ;;  %v8323_v23 = vsel %vm14860_vm12, %v8318_v59, %v8322_v53  ;;  %v8354_v17 = vrot.slane %v8352_v1, 5  ;;  %v8360_v19 = vrot.slane %v8358_v11, 5 }
 0x578   : > { %v8364_v16 = vrot.slane %v8362_v4, 4  ;;  %v8342_v24 = vrot.slane %v8341_v40, 4  ;;  %v8384_v38 = vrot.slane %v8382_v25, 5  ;;  %v8388_v44 = vrot.slane %v8386_v58, 4 }
 0x579   : > { %v8313_v18 = vsel %vm14860_vm12, %v8308_v34, %v17616_v9  ;;  %v8332_v27 = vrot.slane %v8331_v21, 4  ;;  %v8346_v63 = vrot.slane %v8344_v46, 5  ;;  %v8375_v3 = vrot.slane %v8373_v14, 4 }
 0x57a   : > { %13162 = vmatmul.mubr.msk.bf16.gmra.mrb[12].mxu1 %vm1375_vm13, %v11999_v62  ;;  %v12001_v6 = vcombine.low %v8313_v18, %v8323_v23  ;;  %v8378_v52 = vrot.slane %v8376_v37, 5  ;;  %v8355_v33 = vor.u32 %v8354_v17, %v8351_v35  ;;  %v8365_v54 = vor.u32 %v8364_v16, %v8360_v19 }
 0x57b   : > { %13165 = vmatprep.mubr.msk.bf16.mxu1 %vm1375_vm13, %v12000_v32  ;;  %v8406_v42 = vshll.u32 %v17302_v8, 16  ;;  %v8410_v62 = vshrl.u32 %v17302_v8, 16  ;;  %v8347_v2 = vsel %vm14860_vm12, %v8342_v24, %v8346_v63  ;;  %v8389_v59 = vor.u32 %v8388_v44, %v8384_v38  ;;  %v8081_v24 = vld [vmem:[#allocation2 + $0xc0] sm:$0xf] }
 0x57c   : > { %v8430_v1 = vshll.u32 %v17321_v61, 16  ;;  %v8434_v9 = vshrl.u32 %v17321_v61, 16  ;;  %v8337_v11 = vsel %vm14860_vm12, %v8332_v27, %v8336_v10  ;;  %v8368_v4 = vshll.u32 %v17278_v0, 16 }
 0x57d   : > { %v8397_v49 = vshrl.u32 %v8075_v20, 16  ;;  %v8400_v55 = vshll.u32 %v8075_v20, 16  ;;  %v8379_v40 = vor.u32 %v8378_v52, %v8375_v3  ;;  %v8392_v25 = vshll.u32 %v17291_v22, 16 }
 0x57e   : > { %v8421_v8 = vshrl.u32 %v8078_v28, 16  ;;  %v8424_v58 = vshll.u32 %v8078_v28, 16  ;;  %v12002_v32 = vcombine.low %v8337_v11, %v8347_v2  ;;  %v8366_v34 = vrot.slane %v8365_v54, 4 }
 0x57f   : > { %v8408_v53 = vrot.slane %v8406_v42, 5  ;;  %v8412_v21 = vrot.slane %v8410_v62, 4  ;;  %v8356_v46 = vrot.slane %v8355_v33, 4  ;;  %v8390_v61 = vrot.slane %v8389_v59, 4  ;;  %v18936_v33 = vld [vmem:[#allocation35_spill] sm:$0xff] }
 0x580   : > { %v8432_v35 = vrot.slane %v8430_v1, 5  ;;  %v8436_v14 = vrot.slane %v8434_v9, 4  ;;  %v8370_v0 = vrot.slane %v8368_v4, 5  ;;  %v8399_v10 = vrot.slane %v8397_v49, 4  ;;  %v18937_v1 = vld [vmem:[#allocation36_spill] sm:$0xff] }
 0x581   : > { %v8402_v37 = vrot.slane %v8400_v55, 5  ;;  %v8380_v23 = vrot.slane %v8379_v40, 4  ;;  %v8394_v17 = vrot.slane %v8392_v25, 5  ;;  %v8423_v22 = vrot.slane %v8421_v8, 4 }
 0x582   : > { %13166 = vmatmul.mubr.msk.bf16.gmra.mrb[16].mxu1 %vm1375_vm13, %v12001_v6  ;;  %v8426_v16 = vrot.slane %v8424_v58, 5  ;;  %v8371_v44 = vsel %vm14860_vm12, %v8366_v34, %v8370_v0  ;;  %v8413_v18 = vor.u32 %v8412_v21, %v8408_v53  ;;  %v8454_v27 = vshll.u32 %v17348_v30, 16 }
 0x583   : > { %13169 = vmatprep.mubr.msk.bf16.mxu1 %vm1375_vm13, %v12002_v32  ;;  %v8458_v6 = vshrl.u32 %v17348_v30, 16  ;;  %v8361_v63 = vsel %vm14860_vm12, %v8356_v46, %v8360_v19  ;;  %v8395_v3 = vsel %vm14860_vm12, %v8390_v61, %v8394_v17  ;;  %v8437_v52 = vor.u32 %v8436_v14, %v8432_v35  ;;  %v18938_v46 = vld [vmem:[#allocation48_spill] sm:$0xff] }
 0x584   : > { %v8403_v20 = vor.u32 %v8402_v37, %v8399_v10  ;;  %v8416_v54 = vshll.u32 %v18936_v33, 16  ;;  %v8445_v42 = vshrl.u32 %v8081_v24, 16  ;;  %v8448_v62 = vshll.u32 %v8081_v24, 16  ;;  %v18939_v10 = vld [vmem:[#allocation39_spill] sm:$0xff] }
 0x585   : > { %v12003_v28 = vcombine.low %v8361_v63, %v8371_v44  ;;  %v8385_v2 = vsel %vm14860_vm12, %v8380_v23, %v8384_v38  ;;  %v8427_v59 = vor.u32 %v8426_v16, %v8423_v22  ;;  %v8440_v9 = vshll.u32 %v18937_v1, 16 }
 0x586   : > { %v12004_v30 = vcombine.low %v8385_v2, %v8395_v3  ;;  %v8414_v11 = vrot.slane %v8413_v18, 4  ;;  %v8456_v4 = vrot.slane %v8454_v27, 5  ;;  %v8460_v19 = vrot.slane %v8458_v6, 4  ;;  %v8762_v27 = vld [vmem:[#allocation2 + $0xc] sm:$0xe]  ;;  %v18941_v3 = vld [vmem:[#allocation49_spill] sm:$0xff] }
 0x587   : > { %v8438_v49 = vrot.slane %v8437_v52, 4  ;;  %v8404_v55 = vrot.slane %v8403_v20, 4  ;;  %v8418_v40 = vrot.slane %v8416_v54, 5  ;;  %v8447_v25 = vrot.slane %v8445_v42, 4  ;;  %v18940_v6 = vld [vmem:[#allocation50_spill] sm:$0xff] }
 0x588   : > { %v8450_v8 = vrot.slane %v8448_v62, 5  ;;  %v8428_v58 = vrot.slane %v8427_v59, 4  ;;  %v8442_v32 = vrot.slane %v8440_v9, 5  ;;  %v8461_v34 = vor.u32 %v8460_v19, %v8456_v4  ;;  %v8763_v2 = vld [vmem:[#allocation2 + $0x18] sm:$0xe]  ;;  %v18942_v59 = vld [vmem:[#allocation51_spill] sm:$0xff] }
 0x589   : > { %v8419_v38 = vsel %vm14860_vm12, %v8414_v11, %v8418_v40  ;;  %v8828_v61 = vrot.slane %v18938_v46, 5  ;;  %v8409_v14 = vsel %vm14860_vm12, %v8404_v55, %v8408_v53  ;;  %v8464_v37 = vshll.u32 %v18939_v10, 16  ;;  %v18943_v55 = vld [vmem:[#allocation21_spill] sm:$0xff]  ;;  %v18944_v40 = vld [vmem:[#allocation22_spill] sm:$0xff] }
 0x58a   : > { %13170 = vmatmul.mubr.msk.bf16.gmra.mrb[20].mxu1 %vm1375_vm13, %v12003_v28  ;;  %v8443_v21 = vsel %vm14860_vm12, %v8438_v49, %v8442_v32  ;;  %v8451_v0 = vor.u32 %v8450_v8, %v8447_v25  ;;  %v12005_v23 = vcombine.low %v8409_v14, %v8419_v38  ;;  %v8433_v17 = vsel %vm14860_vm12, %v8428_v58, %v8432_v35  ;;  %v10023_v49 = vld [vmem:[#allocation9 + $0xe] sm:$0x3]  ;;  %v18946_v8 = vld [vmem:[#allocation19_spill] sm:$0xff]  ;;  %v18949_v38 = vld [vmem:[#allocation17_spill] sm:$0xff] }
 0x58b   : > { %13173 = vmatprep.mubr.msk.bf16.mxu1 %vm1375_vm13, %v12004_v30  ;;  %v12006_v22 = vcombine.low %v8433_v17, %v8443_v21  ;;  %v8462_v16 = vrot.slane %v8461_v34, 4  ;;  %v8830_v24 = vrot.slane %v8828_v61, 4  ;;  %v8466_v18 = vrot.slane %v8464_v37, 5  ;;  %v18947_v58 = vld [vmem:[#allocation20_spill] sm:$0xff]  ;;  %v18950_v34 = vld [vmem:[#allocation18_spill] sm:$0xff]  ;;  %v18953_v46 = vld [vmem:[#allocation25_spill] sm:$0xff] }
 0x58c   : > { %v8452_v44 = vrot.slane %v8451_v0, 4  ;;  %v8831_v63 = vrot.slane %v18940_v6, 5  ;;  %v8835_v52 = vrot.slane %v18941_v3, 5  ;;  %v12024_v20 = vrot.slane %v8762_v27, 9  ;;  %v18955_v14 = vld [vmem:[#allocation23_spill] sm:$0xff]  ;;  %v18956_v0 = vld [vmem:[#allocation26_spill] sm:$0xff] }
 0x58d   : > { %v8467_v53 = vsel %vm14860_vm12, %v8462_v16, %v8466_v18  ;;  %v8838_v1 = vrot.slane %v18942_v59, 5  ;;  %v12025_v9 = vrot.slane %v8763_v2, 9  ;;  %v9395_v19 = vsel %vm1424_vm4, %v17702_v39, 0  ;;  %v18952_v39 = vld [vmem:[#allocation24_spill] sm:$0xff]  ;;  %v18958_v37 = vld [vmem:[#allocation27_spill] sm:$0xff]  ;;  %v18962_v16 = vld [vmem:[#allocation30_spill] sm:$0xff] }
 0x58e   : > { %v8832_v35 = vsel %vm15304_vm1, %v8830_v24, %v8831_v63  ;;  %v8457_v33 = vsel %vm14860_vm12, %v8452_v44, %v8456_v4  ;;  %v8829_v42 = vsel %vm15304_vm1, %v12024_v20, %v8828_v61  ;;  %v8837_v28 = vrot.slane %v8835_v52, 4  ;;  %v18964_v44 = vld [vmem:[#allocation31_spill] sm:$0xff]  ;;  %v18965_v18 = vld [vmem:[#allocation33_spill] sm:$0xff]  ;;  %v18967_v6 = vld [vmem:[#allocation32_spill] sm:$0xff] }
 0x58f   : > { %v12007_v54 = vcombine.low %v8457_v33, %v8467_v53  ;;  %v12040_v62 = vcombine.low %v8829_v42, %v8832_v35  ;;  %v8836_v11 = vsel %vm15304_vm1, %v12025_v9, %v8835_v52  ;;  %v18945_v25 = vcombine.low %v18943_v55, %v18944_v40  ;;  %v18968_v63 = vld [vmem:[#allocation34_spill] sm:$0xff]  ;;  %v18970_v3 = vld [vmem:[#allocation37_spill] sm:$0xff]  ;;  %v18973_v35 = vld [vmem:[#allocation40_spill] sm:$0xff] }
 0x590   : > { %v8839_v30 = vsel %vm15304_vm1, %v8837_v28, %v8838_v1  ;;  %v18948_v32 = vcombine.low %v18946_v8, %v18947_v58  ;;  %v18951_v21 = vcombine.low %v18949_v38, %v18950_v34  ;;  %v18954_v61 = vcombine.low %v18952_v39, %v18953_v46  ;;  %v18971_v52 = vld [vmem:[#allocation38_spill] sm:$0xff]  ;;  %v18974_v33 = vld [vmem:[#allocation41_spill] sm:$0xff]  ;;  %v18979_v2 = vld [vmem:[#allocation43_spill] sm:$0xff] }
 0x591   : > { %v12041_v4 = vcombine.low %v8836_v11, %v8839_v30  ;;  %v18957_v10 = vcombine.low %v18955_v14, %v18956_v0  ;;  %v18966_v27 = vcombine.low %v18964_v44, %v18965_v18  ;;  %v18969_v53 = vcombine.low %v18967_v6, %v18968_v63  ;;  %v18976_v42 = vld [vmem:[#allocation42_spill] sm:$0xff]  ;;  %v18980_v59 = vld [vmem:[#allocation45_spill] sm:$0xff]  ;;  %v14006_v9 = vld [vmem:[#allocation2 + $0x18] sm:$0xff]  }
 0x592   : > { %13174 = vmatmul.mubr.msk.bf16.gmra.mrb[24].mxu1 %vm1375_vm13, %v12005_v23  ;;  %v18959_v23 = vld [vmem:[#allocation28_spill] sm:$0xff]  ;;  %v18972_v20 = vcombine.low %v18970_v3, %v18971_v52  ;;  %v18981_v1 = vcombine.low %v18979_v2, %v18980_v59  ;;  %v18982_v30 = vld [vmem:[#allocation46_spill] sm:$0xff]  ;;  %v18983_v11 = vld [vmem:[#allocation47_spill] sm:$0xff]  ;;  %v10121_v55 = vsel %vm1424_vm4, %v10023_v49, 0 }
 0x593   : > { %13177 = vmatprep.mubr.msk.bf16.mxu1 %vm1375_vm13, %v12006_v22  ;;  %v18960_v17 = vcombine.low %v18958_v37, %v18959_v23  ;;  %v18961_v22 = vld [vmem:[#allocation29_spill] sm:$0xff]  ;;  %v14008_v40 = vld [vmem:[#allocation2 + $0x30] sm:$0xff]   ;;  %v14010_v58 = vld [vmem:[#allocation2 + $0x48] sm:$0xff]  }
 0x594   : > { %v18963_v24 = vcombine.low %v18961_v22, %v18962_v16  ;;  %v14009_v8 = vld [vmem:[#allocation2 + $0x3c] sm:$0xff]   ;;  %v14015_v14 = vld [vmem:[#allocation2 + $0x84] sm:$0xff]   ;;  %v14016_v23 = vld [vmem:[#allocation2 + $0x90] sm:$0xff]  }
 0x595   : > { %v14012_v38 = vld [vmem:[#allocation2 + $0x60] sm:$0xff]   ;;  %v14014_v34 = vld [vmem:[#allocation2 + $0x78] sm:$0xff]  }
 0x596   : > { %v18985_v39 = vld [vmem:[#allocation52_spill] sm:$0xff]  ;;  %v9593_v37 = vld [vmem:[#allocation2 + $0x24] sm:$0xf] }
 0x597   : > { %v9648_v46 = vshll.u32 %v18985_v39, 16  ;;  %v9663_v16 = vshrl.u32 %v9593_v37, 16  ;;  %v18988_v2 = vld [vmem:[#allocation53_spill] sm:$0xff] }
 0x598   : > { %v9658_v59 = vshll.u32 %v18988_v2, 16  ;;  %v10331_v2 = vld [vmem:[#allocation2 + $0xcc] sm:$0xe] }
 0x599   : > { %v9665_v3 = vrot.slane %v9663_v16, 4 }
 0x59a   : > { %13178 = vmatmul.mubr.msk.bf16.gmra.mrb[28].mxu1 %vm1375_vm13, %v12007_v54  ;;  %v18975_v54 = vcombine.low %v18973_v35, %v18974_v33  ;;  %v14017_v35 = vld [vmem:[#allocation2 + $0x9c] sm:$0xff]  }
 0x59b   : > { %13183 = vmatprep.mubr.msk.bf16.mxu1 %vm1375_vm13, %v12040_v62  ;;  %v18977_v62 = vld [vmem:[#allocation44_spill] sm:$0xff] }
 0x59c   : > { %v18978_v28 = vcombine.low %v18976_v42, %v18977_v62 }
 0x5a2   : > { %13184 = vmatmul.mubr.msk.bf16.vlgmr.msra.gmra.mrb[0].mxu1 %vm1375_vm13, %v12041_v4  ;;  %v18984_v4 = vcombine.low %v18982_v30, %v18983_v11 }
 0x5a3   : > { %13216 = vmatpush3.bf16.msra.mxu1 %v9395_v19  ;;  %13187 = vmatprep.mubr.msk.bf16.mxu1 %vm1375_vm13, %v18945_v25  ;;  %v14007_v19 = vld [vmem:[#allocation2 + $0x24] sm:$0xff]   ;;  %v18012_v25 = vld [vmem:[#allocation9 + $0x10] sm:$0x3] }
 0x5a4   : > { %13845 = vmatprep.subr.msk.bf16.mxu1 %vm1424_vm4, %v10023_v49  ;;  %v14013_v49 = vld [vmem:[#allocation2 + $0x6c] sm:$0xff]  }
 0x5aa   : > { %13188 = vmatmul.mubr.msk.bf16.gmra.mrb[4].mxu1 %vm1375_vm13, %v18948_v32  ;;  %v14011_v32 = vld [vmem:[#allocation2 + $0x54] sm:$0xff]  }
 0x5ab   : > { %13191 = vmatprep.mubr.msk.bf16.mxu1 %vm1375_vm13, %v18951_v21  ;;  %v9590_v21 = vld [vmem:[#allocation2 + $0x18] sm:$0xf] }
 0x5ac   : > { %v9639_v0 = vshrl.u32 %v9590_v21, 16 }
 0x5ae   : > { %v9641_v44 = vrot.slane %v9639_v0, 4 }
 0x5b2   : > { %13192 = vmatmul.mubr.msk.bf16.gmra.mrb[8].mxu1 %vm1375_vm13, %v18954_v61  ;;  %v9652_v61 = vshrl.u32 %v18985_v39, 16 }
 0x5b3   : > { %13195 = vmatprep.mubr.msk.bf16.mxu1 %vm1375_vm13, %v18957_v10  ;;  %v9642_v10 = vshll.u32 %v9590_v21, 16 }
 0x5b4   : > { %v9654_v22 = vrot.slane %v9652_v61, 4 }
 0x5b5   : > { %v9644_v18 = vrot.slane %v9642_v10, 5 }
 0x5b7   : > { %v9645_v33 = vor.u32 %v9644_v18, %v9641_v44  ;;  %v14020_v18 = vld [vmem:[#allocation2 + $0xc0] sm:$0xff]  }
 0x5ba   : > { %13196 = vmatmul.mubr.msk.bf16.gmra.mrb[12].mxu1 %vm1375_vm13, %v18960_v17  ;;  %v9650_v17 = vrot.slane %v9648_v46, 5  ;;  %v9602_v46 = vld [vmem:[#allocation2 + $0x48] sm:$0xf] }
 0x5bb   : > { %13199 = vmatprep.mubr.msk.bf16.mxu1 %vm1375_vm13, %v18963_v24  ;;  %v9666_v24 = vshll.u32 %v9593_v37, 16  ;;  %v14019_v37 = vld [vmem:[#allocation2 + $0xb4] sm:$0xff]  }
 0x5bd   : > { %v9668_v52 = vrot.slane %v9666_v24, 5  ;;  %v18990_v24 = vld [vmem:[#allocation58_spill] sm:$0xff] }
 0x5be   : > { %v9720_v44 = vshll.u32 %v18990_v24, 16 }
 0x5c2   : > { %13200 = vmatmul.mubr.msk.bf16.gmra.mrb[16].mxu1 %vm1375_vm13, %v18966_v27  ;;  %v18986_v27 = vld [vmem:[#allocation55_spill] sm:$0xff] }
 0x5c3   : > { %13203 = vmatprep.mubr.msk.bf16.mxu1 %vm1375_vm13, %v18969_v53  ;;  %v9672_v6 = vshll.u32 %v18986_v27, 16  ;;  %v9676_v63 = vshrl.u32 %v18986_v27, 16  ;;  %v9655_v53 = vor.u32 %v9654_v22, %v9650_v17 }
 0x5ca   : > { %13204 = vmatmul.mubr.msk.bf16.gmra.mrb[20].mxu1 %vm1375_vm13, %v18972_v20  ;;  %v9596_v20 = vld [vmem:[#allocation2 + $0x30] sm:$0xf] }
 0x5cb   : > { %13207 = vmatprep.mubr.msk.bf16.mxu1 %vm1375_vm13, %v18975_v54  ;;  %v18987_v54 = vld [vmem:[#allocation54_spill] sm:$0xff]  ;;  %v9687_v30 = vshrl.u32 %v9596_v20, 16  ;;  %v9690_v11 = vshll.u32 %v9596_v20, 16  ;;  %v18991_v20 = vld [vmem:[#allocation57_spill] sm:$0xff] }
 0x5cc   : > { %v9696_v42 = vshll.u32 %v18987_v54, 16  ;;  %v9700_v62 = vshrl.u32 %v18987_v54, 16 }
 0x5cd   : > { %v9689_v21 = vrot.slane %v9687_v30, 4  ;;  %v9692_v39 = vrot.slane %v9690_v11, 5 }
 0x5d2   : > { %13208 = vmatmul.mubr.msk.bf16.gmra.mrb[24].mxu1 %vm1375_vm13, %v18978_v28  ;;  %v14018_v28 = vld [vmem:[#allocation2 + $0xa8] sm:$0xff]  }
 0x5d3   : > { %13211 = vmatprep.mubr.msk.bf16.mxu1 %vm1375_vm13, %v18981_v1  ;;  %v18033_v1 = vrot.slane %v9672_v6, 5  ;;  %v9724_v6 = vshrl.u32 %v18990_v24, 16 }
 0x5da   : > { %13212 = vmatmul.mubr.msk.bf16.gmra.mrb[28].mxu1 %vm1375_vm13, %v18984_v4  ;;  %v9656_v4 = vrot.slane %v9655_v53, 4  ;;  %v9738_v53 = vshll.u32 %v9602_v46, 16 }
 0x5db   : > { %13217 = vmatprep.mubr.msk.bf16.mxu1 %vm1375_vm13, %v14006_v9  ;;  %v9678_v9 = vrot.slane %v9676_v63, 4  ;;  %v9735_v63 = vshrl.u32 %v9602_v46, 16 }
 0x5e2   : > { %13218 = vmatmul.mubr.msk.bf16.vlgmr.msra.gmra.mrb[0].mxu1 %vm1375_vm13, %v14007_v19  ;;  %v9669_v19 = vor.u32 %v9668_v52, %v9665_v3  ;;  %v9693_v52 = vor.u32 %v9692_v39, %v9689_v21  ;;  %v18993_v21 = vld [vmem:[#allocation64_spill] sm:$0xff] }
 0x5e3   : > { %13250 = vmatpush3.bf16.msra.mxu1 %v10121_v55  ;;  %13221 = vmatprep.mubr.msk.bf16.mxu1 %vm1375_vm13, %v14008_v40  ;;  %v18989_v55 = vld [vmem:[#allocation56_spill] sm:$0xff]  ;;  %v9768_v39 = vshll.u32 %v18993_v21, 16  ;;  %v9772_v46 = vshrl.u32 %v18993_v21, 16 }
 0x5e4   : > { %13846 = vmatprep.subr.msk.bf16.mxu1 %vm1424_vm4, %v18012_v25  ;;  %v9682_v40 = vshll.u32 %v18989_v55, 16  ;;  %v12151_v55 = vrot.slane %v10331_v2, 9 }
 0x5e6   : > { %v18045_v0 = vrot.slane %v9682_v40, 5  ;;  %v9726_v40 = vrot.slane %v9724_v6, 4  ;;  %v9608_v6 = vld [vmem:[#allocation2 + $0x60] sm:$0xf] }
 0x5ea   : > { %13222 = vmatmul.mubr.msk.bf16.gmra.mrb[4].mxu1 %vm1375_vm13, %v14009_v8  ;;  %v9646_v8 = vrot.slane %v9645_v33, 4  ;;  %v18992_v33 = vld [vmem:[#allocation62_spill] sm:$0xff] }
 0x5eb   : > { %13225 = vmatprep.mubr.msk.bf16.mxu1 %vm1375_vm13, %v14010_v58  ;;  %v18038_v58 = vrot.slane %v9696_v42, 5  ;;  %v9744_v54 = vshll.u32 %v18992_v33, 16  ;;  %v18057_v42 = vld [vmem:[#allocation2 + $0xd4] sm:$0x1] }
 0x5f2   : > { %13226 = vmatmul.mubr.msk.bf16.gmra.mrb[8].mxu1 %vm1375_vm13, %v14011_v32  ;;  %v9702_v32 = vrot.slane %v9700_v62, 4 }
 0x5f3   : > { %13229 = vmatprep.mubr.msk.bf16.mxu1 %vm1375_vm13, %v14012_v38  ;;  %v9599_v38 = vld [vmem:[#allocation2 + $0x3c] sm:$0xf] }
 0x5f4   : > { %v9711_v10 = vshrl.u32 %v9599_v38, 16  ;;  %v9703_v22 = vor.u32 %v9702_v32, %v18038_v58  ;;  %v9714_v16 = vshll.u32 %v9599_v38, 16  ;;  %v9740_v32 = vrot.slane %v9738_v53, 5 }
 0x5f6   : > { %v9713_v62 = vrot.slane %v9711_v10, 4  ;;  %v9704_v30 = vrot.slane %v9703_v22, 4  ;;  %v9716_v11 = vrot.slane %v9714_v16, 5  ;;  %v9694_v16 = vrot.slane %v9693_v52, 4 }
 0x5f8   : > { %v9717_v15 = vor.u32 %v9716_v11, %v9713_v62 }
 0x5fa   : > { %13230 = vmatmul.mubr.msk.bf16.gmra.mrb[12].mxu1 %vm1375_vm13, %v14013_v49  ;;  %v9660_v49 = vrot.slane %v9658_v59, 5 }
 0x5fb   : > { %13233 = vmatprep.mubr.msk.bf16.mxu1 %vm1375_vm13, %v14014_v34  ;;  %v9679_v34 = vor.u32 %v9678_v9, %v18033_v1  ;;  %v10490_v9 = vrot.slane %v18057_v42, 5 }
 0x5fc   : > { %v9661_v61 = vsel %vm14860_vm12, %v9656_v4, %v9660_v49  ;;  %v18063_v4 = vrot.slane %v9720_v44, 5  ;;  %v14021_v49 = vld [vmem:[#allocation2 + $0xcc] sm:$0xff]  }
 0x5fd   : > { %v9680_v27 = vrot.slane %v9679_v34, 4  ;;  %v18065_v34 = vrot.slane %v9744_v54, 5  ;;  %v18994_v44 = vld [vmem:[#allocation59_spill] sm:$0xff]  ;;  %v18091_v54 = vrot.slane %v9768_v39, 5 }
 0x602   : > { %13234 = vmatmul.mubr.msk.bf16.gmra.mrb[16].mxu1 %vm1375_vm13, %v14015_v14  ;;  %v18043_v14 = vrot.slane %v9669_v19, 4  ;;  %v9605_v19 = vld [vmem:[#allocation2 + $0x54] sm:$0xf] }
 0x603   : > { %13237 = vmatprep.mubr.msk.bf16.mxu1 %vm1375_vm13, %v14016_v23  ;;  %v9651_v23 = vsel %vm14860_vm12, %v9646_v8, %v9650_v17  ;;  %v18055_v17 = vld [vmem:[#allocation2 + $0xd0] sm:$0xf]  ;;  %v9737_v8 = vrot.slane %v9735_v63, 4 }
 0x604   : > { %v12104_v3 = vcombine.low %v9651_v23, %v9661_v61  ;;  %v10487_v59 = vrot.slane %v18055_v17, 5  ;;  %v9762_v23 = vshll.u32 %v9605_v19, 16  ;;  %v9675_v53 = vsel %vm14860_vm12, %v18043_v14, %v18033_v1 }
 0x606   : > { %v10489_v38 = vrot.slane %v10487_v59, 4  ;;  %v18071_v61 = vsel %vm15304_vm1, %v12151_v55, %v10487_v59  ;;  %v9764_v2 = vrot.slane %v9762_v23, 5  ;;  %v9783_v59 = vshrl.u32 %v9608_v6, 16  ;;  %v18995_v55 = vld [vmem:[#allocation63_spill] sm:$0xff] }
 0x607   : > { %v10591_v23 = vsel %vm1424_vm4, %v18012_v25, 0 }
 0x608   : > { %v18075_v22 = vsel %vm15304_vm1, %v10489_v38, %v10490_v9  ;;  %v9786_v9 = vshll.u32 %v9608_v6, 16  ;;  %v18996_v38 = vld [vmem:[#allocation65_spill] sm:$0xff] }
 0x609   : > { %v12167_v63 = vcombine.low %v18071_v61, %v18075_v22  ;;  %v9796_v21 = vshrl.u32 %v18996_v38, 16 }
 0x60a   : > { %13238 = vmatmul.mubr.msk.bf16.gmra.mrb[20].mxu1 %vm1375_vm13, %v14017_v35  ;;  %v9706_v35 = vshll.u32 %v18991_v20, 16  ;;  %v9685_v20 = vsel %vm14860_vm12, %v9680_v27, %v18045_v0  ;;  %v9699_v27 = vsel %vm14860_vm12, %v9694_v16, %v18038_v58  ;;  %v9785_v58 = vrot.slane %v9783_v59, 4 }
 0x60b   : > { %13241 = vmatprep.mubr.msk.bf16.mxu1 %vm1375_vm13, %v14018_v28  ;;  %v9748_v28 = vshrl.u32 %v18992_v33, 16  ;;  %v9727_v33 = vor.u32 %v9726_v40, %v18063_v4  ;;  %v12105_v0 = vcombine.low %v9675_v53, %v9685_v20  ;;  %v9754_v40 = vshll.u32 %v18995_v55, 16  ;;  %v18998_v53 = vld [vmem:[#allocation72_spill] sm:$0xff] }
 0x60c   : > { %v9708_v24 = vrot.slane %v9706_v35, 5  ;;  %v9741_v35 = vor.u32 %v9740_v32, %v9737_v8  ;;  %v9611_v8 = vld [vmem:[#allocation2 + $0x6c] sm:$0xf]  ;;  %v9788_v16 = vrot.slane %v9786_v9, 5  ;;  %v9816_v20 = vshll.u32 %v18998_v53, 16 }
 0x60d   : > { %v9750_v10 = vrot.slane %v9748_v28, 4  ;;  %v9774_v28 = vrot.slane %v9772_v46, 4  ;;  %v9756_v6 = vrot.slane %v9754_v40, 5  ;;  %v9798_v25 = vrot.slane %v9796_v21, 4 }
 0x60e   : > { %v9709_v52 = vsel %vm14860_vm12, %v9704_v30, %v9708_v24  ;;  %v9718_v30 = vrot.slane %v9717_v15, 4  ;;  %v9742_v32 = vrot.slane %v9741_v35, 4  ;;  %v9807_v24 = vshrl.u32 %v9611_v8, 16 }
 0x60f   : > { %v9751_v1 = vor.u32 %v9750_v10, %v18065_v34  ;;  %v12106_v11 = vcombine.low %v9699_v27, %v9709_v52  ;;  %v18997_v10 = vld [vmem:[#allocation67_spill] sm:$0xff]  ;;  %v9820_v15 = vshrl.u32 %v18998_v53, 16  ;;  %v9789_v59 = vor.u32 %v9788_v16, %v9785_v58 }
 0x611   : > { %v9752_v39 = vrot.slane %v9751_v1, 4  ;;  %v9790_v21 = vrot.slane %v9789_v59, 4 }
 0x612   : > { %13242 = vmatmul.mubr.msk.bf16.gmra.mrb[24].mxu1 %vm1375_vm13, %v14019_v37  ;;  %v9759_v37 = vshrl.u32 %v9605_v19, 16  ;;  %v9728_v19 = vrot.slane %v9727_v33, 4 }
 0x613   : > { %13245 = vmatprep.mubr.msk.bf16.mxu1 %vm1375_vm13, %v14020_v18  ;;  %v9730_v18 = vshll.u32 %v18994_v44, 16  ;;  %v9810_v44 = vshll.u32 %v9611_v8, 16  ;;  %v9757_v1 = vsel %vm14860_vm12, %v9752_v39, %v9756_v6  ;;  %v9840_v8 = vshll.u32 %v17663_v51, 16 }
 0x614   : > { %v9761_v14 = vrot.slane %v9759_v37, 4  ;;  %v9778_v37 = vshll.u32 %v18997_v10, 16  ;;  %v9617_v10 = vld [vmem:[#allocation2 + $0x84] sm:$0xf] }
 0x615   : > { %v9732_v62 = vrot.slane %v9730_v18, 5  ;;  %v9723_v18 = vsel %vm14860_vm12, %v9718_v30, %v18063_v4  ;;  %v9747_v4 = vsel %vm14860_vm12, %v9742_v32, %v18065_v34  ;;  %v9812_v9 = vrot.slane %v9810_v44, 5 }
 0x616   : > { %v9765_v46 = vor.u32 %v9764_v2, %v9761_v14  ;;  %v9780_v2 = vrot.slane %v9778_v37, 5  ;;  %v18122_v30 = vrot.slane %v9816_v20, 5  ;;  %v9844_v32 = vshrl.u32 %v17663_v51, 16 }
 0x617   : > { %v9733_v33 = vsel %vm14860_vm12, %v9728_v19, %v9732_v62  ;;  %v9809_v62 = vrot.slane %v9807_v24, 4  ;;  %v9822_v19 = vrot.slane %v9820_v15, 4  ;;  %v9620_v24 = vld [vmem:[#allocation2 + $0x90] sm:$0xf]  ;;  %v9858_v53 = vshll.u32 %v9617_v10, 16 }
 0x618   : > { %v9766_v14 = vrot.slane %v9765_v46, 4  ;;  %v9826_v46 = vshll.u32 %v17655_v50, 16  ;;  %v9846_v6 = vrot.slane %v9844_v32, 4  ;;  %v9864_v20 = vshll.u32 %v17690_v45, 16  ;;  %v9623_v32 = vld [vmem:[#allocation2 + $0x9c] sm:$0xf] }
 0x619   : > { %v9823_v58 = vor.u32 %v9822_v19, %v18122_v30  ;;  %v9813_v44 = vor.u32 %v9812_v9, %v9809_v62  ;;  %v9868_v50 = vshrl.u32 %v17690_v45, 16  ;;  %v9879_v15 = vshrl.u32 %v9620_v24, 16  ;;  %v19001_v62 = vld [vmem:[#allocation75_spill] sm:$0xff] }
 0x61a   : > { %13246 = vmatmul.mubr.msk.bf16.gmra.mrb[28].mxu1 %vm1375_vm13, %v14021_v49  ;;  %v9792_v49 = vshll.u32 %v18996_v38, 16  ;;  %v12108_v38 = vcombine.low %v9747_v4, %v9757_v1  ;;  %v9850_v45 = vshll.u32 %v19001_v62, 16  ;;  %v9860_v19 = vrot.slane %v9858_v53, 5  ;;  %v19003_v53 = vld [vmem:[#allocation86_spill] sm:$0xff] }
 0x61b   : > { %13251 = vmatprep.mubr.msk.bf16.mxu1 %vm1375_vm13, %v12104_v3  ;;  %v9775_v3 = vor.u32 %v9774_v28, %v18091_v54  ;;  %v9614_v28 = vld [vmem:[#allocation2 + $0x78] sm:$0xf]  ;;  %v9824_v1 = vrot.slane %v9823_v58, 4  ;;  %v9903_v58 = vshrl.u32 %v9623_v32, 16 }
 0x61c   : > { %v18113_v35 = vrot.slane %v9792_v49, 5  ;;  %v9831_v55 = vshrl.u32 %v9614_v28, 16  ;;  %v9834_v40 = vshll.u32 %v9614_v28, 16  ;;  %v9771_v49 = vsel %vm14860_vm12, %v9766_v14, %v18091_v54 }
 0x61d   : > { %v9776_v52 = vrot.slane %v9775_v3, 4  ;;  %v12107_v3 = vcombine.low %v9723_v18, %v9733_v33  ;;  %v9842_v18 = vrot.slane %v9840_v8, 5  ;;  %v9855_v54 = vshrl.u32 %v9617_v10, 16 }
 0x61e   : > { %v9799_v34 = vor.u32 %v9798_v25, %v18113_v35  ;;  %v9836_v16 = vrot.slane %v9834_v40, 5  ;;  %v9882_v33 = vshll.u32 %v9620_v24, 16  ;;  %v9795_v4 = vsel %vm14860_vm12, %v9790_v21, %v18113_v35 }
 0x61f   : > { %v9828_v14 = vrot.slane %v9826_v46, 5  ;;  %v9857_v9 = vrot.slane %v9855_v54, 4  ;;  %v9870_v40 = vrot.slane %v9868_v50, 4  ;;  %v9852_v24 = vrot.slane %v9850_v45, 5  ;;  %v9626_v50 = vld [vmem:[#allocation2 + $0xa8] sm:$0xf] }
 0x620   : > { %v9800_v51 = vrot.slane %v9799_v34, 4  ;;  %v9884_v34 = vrot.slane %v9882_v33, 5  ;;  %v19004_v33 = vld [vmem:[#allocation84_spill] sm:$0xff] }
 0x621   : > { %v9861_v46 = vor.u32 %v9860_v19, %v9857_v9 }
 0x622   : > { %13252 = vmatmul.mubr.msk.bf16.vlgmr.msra.gmra.mrb[0].mxu1 %vm1375_vm13, %v12105_v0  ;;  %v18999_v0 = vld [vmem:[#allocation71_spill] sm:$0xff] }
 0x623   : > { %13284 = vmatpush3.bf16.msra.mxu1 %v10591_v23  ;;  %13255 = vmatprep.mubr.msk.bf16.mxu1 %vm1375_vm13, %v12106_v11  ;;  %v9802_v27 = vshll.u32 %v18999_v0, 16  ;;  %v9781_v11 = vsel %vm14860_vm12, %v9776_v52, %v9780_v2  ;;  %v9833_v23 = vrot.slane %v9831_v55, 4  ;;  %v19000_v52 = vld [vmem:[#allocation77_spill] sm:$0xff]  ;;  %v9814_v0 = vrot.slane %v9813_v44, 4 }
 0x624   : > { %v12109_v37 = vcombine.low %v9771_v49, %v9781_v11  ;;  %v9888_v25 = vshll.u32 %v19000_v52, 16  ;;  %v9892_v28 = vshrl.u32 %v19000_v52, 16  ;;  %v18146_v55 = vrot.slane %v9864_v20, 5 }
 0x625   : > { %v9804_v39 = vrot.slane %v9802_v27, 5  ;;  %v9837_v2 = vor.u32 %v9836_v16, %v9833_v23  ;;  %v9847_v27 = vor.u32 %v9846_v6, %v9842_v18  ;;  %v9881_v11 = vrot.slane %v9879_v15, 4  ;;  %v19002_v6 = vld [vmem:[#allocation83_spill] sm:$0xff] }
 0x626   : > { %v18148_v8 = vrot.slane %v9888_v25, 5  ;;  %v9894_v35 = vrot.slane %v9892_v28, 4  ;;  %v9819_v21 = vsel %vm14860_vm12, %v9814_v0, %v18122_v30  ;;  %v9871_v10 = vor.u32 %v9870_v40, %v18146_v55 }
 0x627   : > { %v9805_v59 = vsel %vm14860_vm12, %v9800_v51, %v9804_v39  ;;  %v9838_v49 = vrot.slane %v9837_v2, 4  ;;  %v9848_v39 = vrot.slane %v9847_v27, 4  ;;  %v9906_v23 = vshll.u32 %v9623_v32, 16 }
 0x628   : > { %v9885_v51 = vor.u32 %v9884_v34, %v9881_v11  ;;  %v9895_v44 = vor.u32 %v9894_v35, %v18148_v8  ;;  %v9874_v54 = vshll.u32 %v19002_v6, 16  ;;  %v9912_v30 = vshll.u32 %v19003_v53, 16 }
 0x629   : > { %v9916_v20 = vshrl.u32 %v19003_v53, 16  ;;  %v9853_v15 = vsel %vm14860_vm12, %v9848_v39, %v9852_v24  ;;  %v9898_v52 = vshll.u32 %v19004_v33, 16  ;;  %v9936_v25 = vshll.u32 %v17743_v13, 16  ;;  %v9632_v24 = vld [vmem:[#allocation2 + $0xc0] sm:$0xf] }
 0x62a   : > { %13256 = vmatmul.mubr.msk.bf16.gmra.mrb[4].mxu1 %vm1375_vm13, %v12107_v3  ;;  %v12110_v3 = vcombine.low %v9795_v4, %v9805_v59  ;;  %v9940_v28 = vshrl.u32 %v17743_v13, 16  ;;  %v9862_v4 = vrot.slane %v9861_v46, 4  ;;  %v9886_v2 = vrot.slane %v9885_v51, 4  ;;  %v9629_v13 = vld [vmem:[#allocation2 + $0xb4] sm:$0xf] }
 0x62b   : > { %13259 = vmatprep.mubr.msk.bf16.mxu1 %vm1375_vm13, %v12108_v38  ;;  %v9829_v38 = vsel %vm14860_vm12, %v9824_v1, %v9828_v14  ;;  %v9872_v1 = vrot.slane %v9871_v10, 4  ;;  %v9905_v14 = vrot.slane %v9903_v58, 4  ;;  %v9896_v59 = vrot.slane %v9895_v44, 4 }
 0x62c   : > { %v12111_v16 = vcombine.low %v9819_v21, %v9829_v38  ;;  %v9927_v0 = vshrl.u32 %v9626_v50, 16  ;;  %v9930_v27 = vshll.u32 %v9626_v50, 16  ;;  %v9876_v45 = vrot.slane %v9874_v54, 5  ;;  %v19005_v38 = vld [vmem:[#allocation88_spill] sm:$0xff] }
 0x62d   : > { %v18169_v9 = vrot.slane %v9912_v30, 5  ;;  %v9918_v19 = vrot.slane %v9916_v20, 4  ;;  %v9900_v40 = vrot.slane %v9898_v52, 5  ;;  %v18172_v11 = vrot.slane %v9936_v25, 5  ;;  %v9635_v52 = vld [vmem:[#allocation2 + $0xcc] sm:$0xf] }
 0x62e   : > { %v9942_v34 = vrot.slane %v9940_v28, 4  ;;  %v9867_v35 = vsel %vm14860_vm12, %v9862_v4, %v18146_v55  ;;  %v9877_v32 = vsel %vm14860_vm12, %v9872_v1, %v9876_v45  ;;  %v9891_v21 = vsel %vm14860_vm12, %v9886_v2, %v18148_v8 }
 0x62f   : > { %v9901_v39 = vsel %vm14860_vm12, %v9896_v59, %v9900_v40  ;;  %v9929_v46 = vrot.slane %v9927_v0, 4  ;;  %v9932_v10 = vrot.slane %v9930_v27, 5  ;;  %v9919_v58 = vor.u32 %v9918_v19, %v18169_v9 }
 0x630   : > { %v9960_v55 = vshll.u32 %v17761_v26, 16  ;;  %v9943_v51 = vor.u32 %v9942_v34, %v18172_v11  ;;  %v9954_v44 = vshll.u32 %v9629_v13, 16  ;;  %v9988_v8 = vshrl.u32 %v17773_v43, 16 }
 0x631   : > { %v12113_v6 = vcombine.low %v9867_v35, %v9877_v32  ;;  %v12114_v54 = vcombine.low %v9891_v21, %v9901_v39  ;;  %v9933_v20 = vor.u32 %v9932_v10, %v9929_v46  ;;  %v9946_v50 = vshll.u32 %v17753_v56, 16 }
 0x632   : > { %13260 = vmatmul.mubr.msk.bf16.gmra.mrb[8].mxu1 %vm1375_vm13, %v12109_v37  ;;  %v9843_v37 = vsel %vm14860_vm12, %v9838_v49, %v9842_v18  ;;  %v9908_v18 = vrot.slane %v9906_v23, 5  ;;  %v9922_v49 = vshll.u32 %v19005_v38, 16  ;;  %v9951_v23 = vshrl.u32 %v9629_v13, 16 }
 0x633   : > { %13263 = vmatprep.mubr.msk.bf16.mxu1 %vm1375_vm13, %v12110_v3  ;;  %v12112_v62 = vcombine.low %v9843_v37, %v9853_v15  ;;  %v9984_v37 = vshll.u32 %v17773_v43, 16  ;;  %v9975_v15 = vshrl.u32 %v9632_v24, 16  ;;  %v9978_v33 = vshll.u32 %v9632_v24, 16 }
 0x634   : > { %v9909_v3 = vor.u32 %v9908_v18, %v9905_v14  ;;  %v9924_v30 = vrot.slane %v9922_v49, 5  ;;  %v9920_v25 = vrot.slane %v9919_v58, 4  ;;  %v9962_v28 = vrot.slane %v9960_v55, 5 }
 0x635   : > { %v9944_v1 = vrot.slane %v9943_v51, 4  ;;  %v9956_v14 = vrot.slane %v9954_v44, 5  ;;  %v9986_v18 = vrot.slane %v9984_v37, 5  ;;  %v9990_v43 = vrot.slane %v9988_v8, 4 }
 0x636   : > { %v9910_v53 = vrot.slane %v9909_v3, 4  ;;  %v9999_v2 = vshrl.u32 %v9635_v52, 16  ;;  %v10002_v59 = vshll.u32 %v9635_v52, 16  ;;  %v10008_v0 = vshll.u32 %v18055_v17, 16  ;;  %v14309_v3 = vld [vmem:[#allocation2 + $0xbc] sm:$0x1] }
 0x637   : > { %v10012_v56 = vshrl.u32 %v18055_v17, 16  ;;  %v9934_v27 = vrot.slane %v9933_v20, 4  ;;  %v9977_v45 = vrot.slane %v9975_v15, 4  ;;  %v9980_v19 = vrot.slane %v9978_v33, 5 }
 0x638   : > { %v9915_v40 = vsel %vm14860_vm12, %v9910_v53, %v18169_v9  ;;  %v9925_v34 = vsel %vm14860_vm12, %v9920_v25, %v9924_v30  ;;  %v9970_v38 = vshll.u32 %v14309_v3, 16  ;;  %v9991_v49 = vor.u32 %v9990_v43, %v9986_v18  ;;  %v19007_v43 = vld [vmem:[#allocation61_spill] sm:$0xff] }
 0x639   : > { %v10001_v17 = vrot.slane %v9999_v2, 4  ;;  %v10004_v21 = vrot.slane %v10002_v59, 5  ;;  %v10010_v39 = vrot.slane %v10008_v0, 5  ;;  %v10014_v46 = vrot.slane %v10012_v56, 4  ;;  %v19010_v59 = vld [vmem:[#allocation68_spill] sm:$0xff]  ;;  %v19012_v56 = vld [vmem:[#allocation69_spill] sm:$0xff] }
 0x63a   : > { %13264 = vmatmul.mubr.msk.bf16.gmra.mrb[12].mxu1 %vm1375_vm13, %v12111_v16  ;;  %v9964_v16 = vshrl.u32 %v17761_v26, 16  ;;  %v9953_v26 = vrot.slane %v9951_v23, 4  ;;  %v12115_v10 = vcombine.low %v9915_v40, %v9925_v34  ;;  %v9939_v9 = vsel %vm14860_vm12, %v9934_v27, %v18172_v11  ;;  %v14310_v23 = vld [vmem:[#allocation2 + $0xc8] sm:$0x1]  ;;  %v19018_v40 = vld [vmem:[#allocation76_spill] sm:$0xff] }
 0x63b   : > { %13267 = vmatprep.mubr.msk.bf16.mxu1 %vm1375_vm13, %v12112_v62  ;;  %v9948_v62 = vrot.slane %v9946_v50, 5  ;;  %v9981_v58 = vor.u32 %v9980_v19, %v9977_v45  ;;  %v9994_v55 = vshll.u32 %v14310_v23, 16  ;;  %v9972_v51 = vrot.slane %v9970_v38, 5  ;;  %v19013_v27 = vld [vmem:[#allocation70_spill] sm:$0xff]  ;;  %v19024_v38 = vld [vmem:[#allocation80_spill] sm:$0xff] }
 0x63c   : > { %v9966_v4 = vrot.slane %v9964_v16, 4  ;;  %v9957_v32 = vor.u32 %v9956_v14, %v9953_v26  ;;  %v9992_v44 = vrot.slane %v9991_v49, 4  ;;  %v10005_v8 = vor.u32 %v10004_v21, %v10001_v17  ;;  %v19016_v45 = vld [vmem:[#allocation74_spill] sm:$0xff]  ;;  %v19027_v21 = vld [vmem:[#allocation85_spill] sm:$0xff] }
 0x63d   : > { %v9949_v35 = vsel %vm14860_vm12, %v9944_v1, %v9948_v62  ;;  %v9982_v53 = vrot.slane %v9981_v58, 4  ;;  %v9996_v30 = vrot.slane %v9994_v55, 5  ;;  %v19014_v62 = vcombine.low %v19012_v56, %v19013_v27  ;;  %v19019_v34 = vld [vmem:[#allocation78_spill] sm:$0xff]  ;;  %v19034_v55 = vld [vmem:[#allocation92_spill] sm:$0xff] }
 0x63e   : > { %v9967_v13 = vor.u32 %v9966_v4, %v9962_v28  ;;  %v12116_v16 = vcombine.low %v9939_v9, %v9949_v35  ;;  %v9958_v37 = vrot.slane %v9957_v32, 4  ;;  %v10006_v15 = vrot.slane %v10005_v8, 4  ;;  %v19021_v35 = vld [vmem:[#allocation79_spill] sm:$0xff]  ;;  %v19022_v32 = vld [vmem:[#allocation81_spill] sm:$0xff]  ;;  %v19025_v49 = vld [vmem:[#allocation82_spill] sm:$0xff] }
 0x63f   : > { %v9997_v20 = vsel %vm14860_vm12, %v9992_v44, %v9996_v30  ;;  %v9987_v26 = vsel %vm14860_vm12, %v9982_v53, %v9986_v18  ;;  %v19009_v18 = vld [vmem:[#allocation66_spill] sm:$0xff]  ;;  %v19017_v19 = vcombine.low %v19015_v57, %v19016_v45  ;;  %v19023_v3 = vcombine.low %v19021_v35, %v19022_v32  ;;  %v19031_v9 = vld [vmem:[#allocation91_spill] sm:$0xff]  ;;  %v18333_v57 = vld [vmem:[%s14789_s17] sm:$0xff]  }
 0x640   : > { %v9968_v24 = vrot.slane %v9967_v13, 4  ;;  %v9963_v50 = vsel %vm14860_vm12, %v9958_v37, %v9962_v28  ;;  %v12118_v4 = vcombine.low %v9987_v26, %v9997_v20  ;;  %v19006_v28 = vld [vmem:[#allocation60_spill] sm:$0xff]  ;;  %v19011_v0 = vcombine.low %v19009_v18, %v19010_v59  ;;  %v19033_v23 = vld [vmem:[#allocation90_spill] sm:$0xff]  ;;  %v19039_v37 = vld [vmem:[#allocation95_spill] sm:$0xff] }
 0x641   : > { %v19008_v2 = vcombine.low %v19006_v28, %v19007_v43  ;;  %v19020_v13 = vcombine.low %v19018_v40, %v19019_v34  ;;  %v19026_v17 = vcombine.low %v19024_v38, %v19025_v49  ;;  %v19040_v8 = vcombine.low %v17792_v12, %v19039_v37  ;;  %v18289_v12 = vld [vmem:[#allocation11] ss:$0 sm:$0xff] }
 0x642   : > { %13268 = vmatmul.mubr.msk.bf16.gmra.mrb[16].mxu1 %vm1375_vm13, %v12113_v6  ;;  %v10015_v6 = vor.u32 %v10014_v46, %v10010_v39  ;;  %v9973_v11 = vsel %vm14860_vm12, %v9968_v24, %v9972_v51  ;;  %v19036_v24 = vld [vmem:[#allocation93_spill] sm:$0xff]  ;;  %v19037_v51 = vld [vmem:[#allocation94_spill] sm:$0xff] }
 0x643   : > { %13271 = vmatprep.mubr.msk.bf16.mxu1 %vm1375_vm13, %v12114_v54  ;;  %v10018_v54 = vshll.u32 %v18057_v42, 16  ;;  %v12117_v25 = vcombine.low %v9963_v50, %v9973_v11  ;;  %v10011_v42 = vsel %vm14860_vm12, %v10006_v15, %v10010_v39  ;;  %v19028_v39 = vld [vmem:[#allocation87_spill] sm:$0xff]  ;;  %v19038_v44 = vcombine.low %v19036_v24, %v19037_v51 }
 0x644   : > { %v10016_v33 = vrot.slane %v10015_v6, 4  ;;  %v19029_v46 = vcombine.low %v19027_v21, %v19028_v39 }
 0x645   : > { %v10020_v52 = vrot.slane %v10018_v54, 5 }
 0x647   : > { %v10021_v1 = vsel %vm14860_vm12, %v10016_v33, %v10020_v52 }
 0x648   : > { %v12119_v14 = vcombine.low %v10011_v42, %v10021_v1 }
 0x64a   : > { %13272 = vmatmul.mubr.msk.bf16.gmra.mrb[20].mxu1 %vm1375_vm13, %v12115_v10  ;;  %v19030_v10 = vld [vmem:[#allocation89_spill] sm:$0xff] }
 0x64b   : > { %13275 = vmatprep.mubr.msk.bf16.mxu1 %vm1375_vm13, %v12116_v16  ;;  %v19032_v58 = vcombine.low %v19030_v10, %v19031_v9  ;;  %v19035_v16 = vcombine.low %v19033_v23, %v19034_v55  ;;  %v12323_v10 = vunpack.c.h.bf16 %v18333_v57 }
 0x652   : > { %13276 = vmatmul.mubr.msk.bf16.gmra.mrb[24].mxu1 %vm1375_vm13, %v12117_v25 }
 0x653   : > { %13279 = vmatprep.mubr.msk.bf16.mxu1 %vm1375_vm13, %v12118_v4 }
 0x65a   : > { %13280 = vmatmul.mubr.msk.bf16.gmra.mrb[28].mxu1 %vm1375_vm13, %v12119_v14 }
 0x65b   : > { %13285 = vmatprep.mubr.msk.bf16.mxu1 %vm1375_vm13, %v19008_v2 }
 0x662   : > { %13286 = vmatmul.mubr.msk.bf16.vlgmr.msra.gmra.mrb[0].mxu1 %vm1375_vm13, %v19011_v0 }
 0x663   : > { %13289 = vmatprep.mubr.msk.bf16.mxu1 %vm1375_vm13, %v19014_v62  ;;  %v18330_v62 = vld [vmem:[%s14789_s17 + $0x8] sm:$0xff]  }
 0x664   : > { %v12326_v49 = vunpack.c.l.bf16 %v18330_v62 }
 0x66a   : > { %13290 = vmatmul.mubr.msk.bf16.gmra.mrb[4].mxu1 %vm1375_vm13, %v19017_v19 }
 0x66b   : > { %13293 = vmatprep.mubr.msk.bf16.mxu1 %vm1375_vm13, %v19020_v13  ;;  %v18340_v13 = vld [vmem:[%s14789_s17 + $0x18] sm:$0xff]  }
 0x66c   : > { %v12334_v9 = vunpack.c.l.bf16 %v18340_v13  ;;  %v12335_v24 = vunpack.c.h.bf16 %v18340_v13 }
 0x672   : > { %13294 = vmatmul.mubr.msk.bf16.gmra.mrb[8].mxu1 %vm1375_vm13, %v19023_v3  ;;  %v18347_v3 = vld [vmem:[%s14789_s17 + $0x10] sm:$0xff]  }
 0x673   : > { %13297 = vmatprep.mubr.msk.bf16.mxu1 %vm1375_vm13, %v19026_v17  ;;  %v12322_v17 = vunpack.c.l.bf16 %v18333_v57 }
 0x67a   : > { %13298 = vmatmul.mubr.msk.bf16.gmra.mrb[12].mxu1 %vm1375_vm13, %v19029_v46  ;;  %v12327_v46 = vunpack.c.h.bf16 %v18330_v62 }
 0x67b   : > { %13301 = vmatprep.mubr.msk.bf16.mxu1 %vm1375_vm13, %v19032_v58  ;;  %v18357_v58 = vld [vmem:[%s14789_s17 + $0x28] sm:$0xff]  }
 0x682   : > { %13302 = vmatmul.mubr.msk.bf16.gmra.mrb[16].mxu1 %vm1375_vm13, %v19035_v16  ;;  %v12330_v16 = vunpack.c.l.bf16 %v18347_v3 }
 0x683   : > { %13305 = vmatprep.mubr.msk.bf16.mxu1 %vm1375_vm13, %v19038_v44 }
 0x68a   : > { %13306 = vmatmul.mubr.msk.bf16.gmra.mrb[20].mxu1 %vm1375_vm13, %v19040_v8  ;;  %v12331_v8 = vunpack.c.h.bf16 %v18347_v3 }
 0x68b   : > { %13309 = vmatprep.mubr.msk.bf16.mxu1 %vm1375_vm13, %v12164_v36 }
 0x692   : > { %13310 = vmatmul.mubr.msk.bf16.gmra.mrb[24].mxu1 %vm1375_vm13, %v12165_v47 }
 0x693   : > { %13313 = vmatprep.mubr.msk.bf16.mxu1 %vm1375_vm13, %v12166_v31 }
 0x69a   : > { %13314 = vmatmul.mubr.msk.bf16.gmra.mrb[28].mxu1 %vm1375_vm13, %v12167_v63 }
 0x735   : > { %v13287_v48 = vpop.f32.mrb[0].mxu1 }
 0x736   : > { %v18292_v36 = vadd.f32 %v13287_v48, %v18289_v12  ;;  %v10627_v29 = vpop.f32.mrb[1].mxu1  ;;  %v18363_v48 = vld [vmem:[%s14789_s17 + $0x20] sm:$0xff]  }
 0x737   : > { %v18295_v60 = vadd.f32 %v18289_v12, %v10627_v29  ;;  %v13288_v5 = vpop.f32.mrb[2].mxu1 }
 0x738   : > { %v12187_v47 = vmul.f32 -1.442695, %v18292_v36  ;;  %v18299_v41 = vadd.f32 %v13288_v5, %v18289_v12  ;;  %v10630_v7 = vpop.f32.mrb[3].mxu1 }
 0x739   : > { %v12185_v31 = vmul.f32 -1.442695, %v18295_v60  ;;  %v18303_v61 = vadd.f32 %v18289_v12, %v10630_v7 }
 0x73a   : > { %14150 = vpow2.f32 %v12187_v47  ;;  %v12188_v22 = vmul.f32 -1.442695, %v18299_v41 }
 0x73b   : > { %14152 = vpow2.f32 %v12185_v31  ;;  %v12186_v63 = vmul.f32 -1.442695, %v18303_v61  ;;  %v12342_v31 = vunpack.c.l.bf16 %v18357_v58 }
 0x73c   : > { %14154 = vpow2.f32 %v12188_v22 }
 0x73d   : > { %14156 = vpow2.f32 %v12186_v63  ;;  %v13291_v6 = vpop.f32.mrb[4].mxu1 }
 0x73e   : > { %v18308_v54 = vadd.f32 %v13291_v6, %v18289_v12  ;;  %v10643_v53 = vpop.f32.mrb[5].mxu1 }
 0x73f   : > { %v18311_v30 = vadd.f32 %v18289_v12, %v10643_v53  ;;  %v13292_v11 = vpop.f32.mrb[6].mxu1 }
 0x740   : > { %v12191_v20 = vmul.f32 -1.442695, %v18308_v54  ;;  %v18315_v50 = vadd.f32 %v13292_v11, %v18289_v12  ;;  %v10646_v15 = vpop.f32.mrb[7].mxu1 }
 0x741   : > { %v12189_v33 = vmul.f32 -1.442695, %v18311_v30  ;;  %v18319_v52 = vadd.f32 %v18289_v12, %v10646_v15 }
 0x742   : > { %14158 = vpow2.f32 %v12191_v20  ;;  %v12192_v25 = vmul.f32 -1.442695, %v18315_v50 }
 0x743   : > { %14160 = vpow2.f32 %v12189_v33  ;;  %v12190_v26 = vmul.f32 -1.442695, %v18319_v52  ;;  %v12338_v33 = vunpack.c.l.bf16 %v18363_v48 }
 0x744   : > { %v14151_v4 = vpop.eup %14150  ;;  %14162 = vpow2.f32 %v12192_v25  ;;  %v18378_v25 = vld [vmem:[%s14789_s17 + $0x38] sm:$0xff]  }
 0x745   : > { %v14153_v42 = vpop.eup %14152  ;;  %v10923_v1 = vadd.f32 1.0, %v14151_v4  ;;  %14164 = vpow2.f32 %v12190_v26  ;;  %v13295_v14 = vpop.f32.mrb[8].mxu1 }
 0x746   : > { %v14155_v28 = vpop.eup %14154  ;;  %v10921_v43 = vadd.f32 1.0, %v14153_v42  ;;  %v18324_v2 = vadd.f32 %v13295_v14, %v18289_v12  ;;  %v10659_v18 = vpop.f32.mrb[9].mxu1  ;;  %v12343_v14 = vunpack.c.h.bf16 %v18357_v58  ;;  %v18488_v58 = vld [vmem:[%s14789_s17 + $0x40] sm:$0xff]  }
 0x747   : > { %v14157_v59 = vpop.eup %14156  ;;  %14166 = vrcp.f32 %v10923_v1  ;;  %v10924_v0 = vadd.f32 1.0, %v14155_v28  ;;  %v18327_v56 = vadd.f32 %v18289_v12, %v10659_v18  ;;  %v13296_v27 = vpop.f32.mrb[10].mxu1  ;;  %v18387_v28 = vld [vmem:[%s14789_s17 + $0x30] sm:$0xff]  }
 0x748   : > { %14168 = vrcp.f32 %v10921_v43  ;;  %v10922_v45 = vadd.f32 1.0, %v14157_v59  ;;  %v12195_v19 = vmul.f32 -1.442695, %v18324_v2  ;;  %v18337_v40 = vadd.f32 %v13296_v27, %v18289_v12  ;;  %v10662_v34 = vpop.f32.mrb[11].mxu1 }
 0x749   : > { %14170 = vrcp.f32 %v10924_v0  ;;  %v12193_v35 = vmul.f32 -1.442695, %v18327_v56  ;;  %v18344_v32 = vadd.f32 %v18289_v12, %v10662_v34  ;;  %v12339_v0 = vunpack.c.h.bf16 %v18363_v48 }
 0x74a   : > { %14172 = vrcp.f32 %v10922_v45  ;;  %v12196_v38 = vmul.f32 -1.442695, %v18337_v40 }
 0x74b   : > { %14174 = vpow2.f32 %v12195_v19  ;;  %v12194_v21 = vmul.f32 -1.442695, %v18344_v32 }
 0x74c   : > { %v14159_v39 = vpop.eup %14158  ;;  %14176 = vpow2.f32 %v12193_v35 }
 0x74d   : > { %v14161_v23 = vpop.eup %14160  ;;  %v10927_v55 = vadd.f32 1.0, %v14159_v39  ;;  %14178 = vpow2.f32 %v12196_v38  ;;  %v13299_v51 = vpop.f32.mrb[12].mxu1 }
 0x74e   : > { %v14163_v44 = vpop.eup %14162  ;;  %v10925_v37 = vadd.f32 1.0, %v14161_v23  ;;  %14180 = vpow2.f32 %v12194_v21  ;;  %v18366_v29 = vadd.f32 %v13299_v51, %v18289_v12  ;;  %v10675_v5 = vpop.f32.mrb[13].mxu1  ;;  %v12346_v21 = vunpack.c.l.bf16 %v18387_v28 }
 0x74f   : > { %v14165_v47 = vpop.eup %14164  ;;  %14182 = vrcp.f32 %v10927_v55  ;;  %v10928_v7 = vadd.f32 1.0, %v14163_v44  ;;  %v18370_v22 = vadd.f32 %v18289_v12, %v10675_v5  ;;  %v13300_v63 = vpop.f32.mrb[14].mxu1 }
 0x750   : > { %14184 = vrcp.f32 %v10925_v37  ;;  %v10926_v6 = vadd.f32 1.0, %v14165_v47  ;;  %v12199_v53 = vmul.f32 -1.442695, %v18366_v29  ;;  %v18374_v11 = vadd.f32 %v13300_v63, %v18289_v12  ;;  %v10678_v20 = vpop.f32.mrb[15].mxu1 }
 0x751   : > { %v14167_v15 = vpop.eup %14166  ;;  %14186 = vrcp.f32 %v10928_v7  ;;  %v12197_v26 = vmul.f32 -1.442695, %v18370_v22  ;;  %v18382_v4 = vadd.f32 %v18289_v12, %v10678_v20 }
 0x752   : > { %v14169_v42 = vpop.eup %14168  ;;  %v11019_v1 = vmul.f32 %v14167_v15, %v18292_v36  ;;  %14188 = vrcp.f32 %v10926_v6  ;;  %v12200_v43 = vmul.f32 -1.442695, %v18374_v11  ;;  %v12350_v36 = vunpack.c.l.bf16 %v18378_v25 }
 0x753   : > { %v14171_v18 = vpop.eup %14170  ;;  %v11017_v59 = vmul.f32 %v14169_v42, %v18295_v60  ;;  %14190 = vpow2.f32 %v12199_v53  ;;  %v12198_v27 = vmul.f32 -1.442695, %v18382_v4 }
 0x754   : > { %v14173_v62 = vpop.eup %14172  ;;  %v11115_v45 = vadd.f32 %v12326_v49, %v11019_v1  ;;  %v11020_v19 = vmul.f32 %v14171_v18, %v18299_v41  ;;  %14192 = vpow2.f32 %v12197_v26 }
 0x755   : > { %v14175_v34 = vpop.eup %14174  ;;  %v11113_v35 = vadd.f32 %v12322_v17, %v11017_v59  ;;  %v11018_v38 = vmul.f32 %v14173_v62, %v18303_v61  ;;  %14194 = vpow2.f32 %v12200_v43  ;;  %v13303_v60 = vpop.f32.mrb[16].mxu1  ;;  %v12351_v59 = vunpack.c.h.bf16 %v18378_v25 }
 0x756   : > { %v14177_v39 = vpop.eup %14176  ;;  %v12289_v23 = vpack.c.bf16 %v11115_v45, %v11115_v45  ;;  %v11116_v55 = vadd.f32 %v12327_v46, %v11020_v19  ;;  %v10931_v51 = vadd.f32 1.0, %v14175_v34  ;;  %14196 = vpow2.f32 %v12198_v27  ;;  %v10691_v49 = vpop.f32.mrb[17].mxu1 }
 0x757   : > { %v14179_v44 = vpop.eup %14178  ;;  %v12287_v41 = vpack.c.bf16 %v11113_v35, %v11113_v35  ;;  %v11114_v37 = vadd.f32 %v12323_v10, %v11018_v38  ;;  %v10929_v5 = vadd.f32 1.0, %v14177_v39  ;;  %v18400_v17 = vadd.f32 %v13303_v60, %v18289_v12  ;;  %v13304_v61 = vpop.f32.mrb[18].mxu1 }
 0x758   : > { %v14181_v47 = vpop.eup %14180  ;;  %11275 = vst.msk [vmem:[%s18404_s24 + $0x8] sm:$0xf] %vm298_vm0, %v12289_v23  ;;  %v12290_v46 = vpack.c.bf16 %v11116_v55, %v11116_v55  ;;  %14198 = vrcp.f32 %v10931_v51  ;;  %v10932_v7 = vadd.f32 1.0, %v14179_v44  ;;  %v18409_v57 = vadd.f32 %v18289_v12, %v10691_v49  ;;  %v10694_v10 = vpop.f32.mrb[19].mxu1 }
 0x759   : > { %v14183_v63 = vpop.eup %14182  ;;  %11273 = vst.msk [vmem:[%s18404_s24] sm:$0xf] %vm298_vm0, %v12287_v41  ;;  %v12288_v6 = vpack.c.bf16 %v11114_v37, %v11114_v37  ;;  %14200 = vrcp.f32 %v10929_v5  ;;  %v10930_v53 = vadd.f32 1.0, %v14181_v47  ;;  %v12203_v20 = vmul.f32 -1.442695, %v18400_v17 }
 0x75a   : > { %v14185_v15 = vpop.eup %14184  ;;  %11276 = vst.msk [vmem:[%s18404_s24 + $0xc] sm:$0xf] %vm298_vm0, %v12290_v46  ;;  %v11023_v26 = vmul.f32 %v14183_v63, %v18308_v54  ;;  %14202 = vrcp.f32 %v10932_v7  ;;  %v12201_v42 = vmul.f32 -1.442695, %v18409_v57  ;;  %v18419_v1 = vadd.f32 %v13304_v61, %v18289_v12  ;;  %v18453_v46 = vld [vmem:[%s14789_s17 + $0x48] sm:$0xff]  }
 0x75b   : > { %v14187_v43 = vpop.eup %14186  ;;  %11274 = vst.msk [vmem:[%s18404_s24 + $0x4] sm:$0xf] %vm298_vm0, %v12288_v6  ;;  %v11021_v18 = vmul.f32 %v14185_v15, %v18311_v30  ;;  %14204 = vrcp.f32 %v10930_v53  ;;  %v18426_v27 = vadd.f32 %v18289_v12, %v10694_v10 }
 0x75c   : > { %v14189_v62 = vpop.eup %14188  ;;  %v11119_v54 = vadd.f32 %v12334_v9, %v11023_v26  ;;  %v11024_v45 = vmul.f32 %v14187_v43, %v18315_v50  ;;  %14206 = vpow2.f32 %v12203_v20  ;;  %v12204_v19 = vmul.f32 -1.442695, %v18419_v1 }
 0x75d   : > { %v14191_v34 = vpop.eup %14190  ;;  %v11117_v35 = vadd.f32 %v12330_v16, %v11021_v18  ;;  %v11022_v30 = vmul.f32 %v14189_v62, %v18319_v52  ;;  %14208 = vpow2.f32 %v12201_v42  ;;  %v12202_v38 = vmul.f32 -1.442695, %v18426_v27  ;;  %v13307_v60 = vpop.f32.mrb[20].mxu1 }
 0x75e   : > { %v14193_v39 = vpop.eup %14192  ;;  %v12293_v23 = vpack.c.bf16 %v11119_v54, %v11119_v54  ;;  %v11120_v9 = vadd.f32 %v12335_v24, %v11024_v45  ;;  %v10935_v50 = vadd.f32 1.0, %v14191_v34  ;;  %14210 = vpow2.f32 %v12204_v19  ;;  %v10707_v55 = vpop.f32.mrb[21].mxu1 }
 0x75f   : > { %v14195_v51 = vpop.eup %14194  ;;  %v12291_v49 = vpack.c.bf16 %v11117_v35, %v11117_v35  ;;  %v11118_v16 = vadd.f32 %v12331_v8, %v11022_v30  ;;  %v10933_v52 = vadd.f32 1.0, %v14193_v39  ;;  %14212 = vpow2.f32 %v12202_v38  ;;  %v13308_v44 = vpop.f32.mrb[22].mxu1 }
 0x760   : > { %v14197_v41 = vpop.eup %14196  ;;  %11279 = vst.msk [vmem:[%s18404_s24 + $0x18] sm:$0xf] %vm298_vm0, %v12293_v23  ;;  %v12294_v37 = vpack.c.bf16 %v11120_v9, %v11120_v9  ;;  %14214 = vrcp.f32 %v10935_v50  ;;  %v10936_v13 = vadd.f32 1.0, %v14195_v51  ;;  %v18443_v24 = vadd.f32 %v13307_v60, %v18289_v12  ;;  %v10710_v5 = vpop.f32.mrb[23].mxu1 }
 0x761   : > { %11277 = vst.msk [vmem:[%s18404_s24 + $0x10] sm:$0xf] %vm298_vm0, %v12291_v49  ;;  %v12292_v3 = vpack.c.bf16 %v11118_v16, %v11118_v16  ;;  %14216 = vrcp.f32 %v10933_v52  ;;  %v10934_v8 = vadd.f32 1.0, %v14197_v41  ;;  %v18448_v61 = vadd.f32 %v18289_v12, %v10707_v55 }
 0x762   : > { %v14199_v47 = vpop.eup %14198  ;;  %11280 = vst.msk [vmem:[%s18404_s24 + $0x1c] sm:$0xf] %vm298_vm0, %v12294_v37  ;;  %14218 = vrcp.f32 %v10936_v13  ;;  %v12207_v7 = vmul.f32 -1.442695, %v18443_v24  ;;  %v18457_v10 = vadd.f32 %v13308_v44, %v18289_v12  ;;  %v18460_v63 = vadd.f32 %v18289_v12, %v10710_v5 }
 0x763   : > { %v14201_v6 = vpop.eup %14200  ;;  %11278 = vst.msk [vmem:[%s18404_s24 + $0x14] sm:$0xf] %vm298_vm0, %v12292_v3  ;;  %v11027_v53 = vmul.f32 %v14199_v47, %v18324_v2  ;;  %14220 = vrcp.f32 %v10934_v8  ;;  %v12347_v20 = vunpack.c.h.bf16 %v18387_v28  ;;  %v12205_v15 = vmul.f32 -1.442695, %v18448_v61 }
 0x764   : > { %v14203_v26 = vpop.eup %14202  ;;  %v11025_v42 = vmul.f32 %v14201_v6, %v18327_v56  ;;  %14222 = vpow2.f32 %v12207_v7  ;;  %v12208_v43 = vmul.f32 -1.442695, %v18457_v10  ;;  %v12206_v18 = vmul.f32 -1.442695, %v18460_v63 }
 0x765   : > { %v14205_v62 = vpop.eup %14204  ;;  %v11123_v54 = vadd.f32 %v12342_v31, %v11027_v53  ;;  %v11028_v45 = vmul.f32 %v14203_v26, %v18337_v40  ;;  %v12358_v2 = vunpack.c.l.bf16 %v18453_v46  ;;  %14224 = vpow2.f32 %v12205_v15  ;;  %v13311_v19 = vpop.f32.mrb[24].mxu1 }
 0x766   : > { %v14207_v34 = vpop.eup %14206  ;;  %v11121_v35 = vadd.f32 %v12338_v33, %v11025_v42  ;;  %v11026_v56 = vmul.f32 %v14205_v62, %v18344_v32  ;;  %14226 = vpow2.f32 %v12208_v43  ;;  %v18478_v30 = vadd.f32 %v13311_v19, %v18289_v12  ;;  %v10723_v38 = vpop.f32.mrb[25].mxu1 }
 0x767   : > { %v14209_v60 = vpop.eup %14208  ;;  %v12297_v31 = vpack.c.bf16 %v11123_v54, %v11123_v54  ;;  %v11124_v40 = vadd.f32 %v12343_v14, %v11028_v45  ;;  %v10939_v39 = vadd.f32 1.0, %v14207_v34  ;;  %14228 = vpow2.f32 %v12206_v18  ;;  %v13312_v23 = vpop.f32.mrb[26].mxu1 }
 0x768   : > { %v14211_v9 = vpop.eup %14210  ;;  %v12295_v33 = vpack.c.bf16 %v11121_v35, %v11121_v35  ;;  %v11122_v32 = vadd.f32 %v12339_v0, %v11026_v56  ;;  %v10937_v50 = vadd.f32 1.0, %v14209_v60  ;;  %v12211_v55 = vmul.f32 -1.442695, %v18478_v30  ;;  %v10726_v51 = vpop.f32.mrb[27].mxu1 }
 0x769   : > { %v14213_v49 = vpop.eup %14212  ;;  %11283 = vst.msk [vmem:[%s18404_s24 + $0x28] sm:$0xf] %vm298_vm0, %v12297_v31  ;;  %v12298_v16 = vpack.c.bf16 %v11124_v40, %v11124_v40  ;;  %14230 = vrcp.f32 %v10939_v39  ;;  %v10940_v14 = vadd.f32 1.0, %v14211_v9  ;;  %v18491_v52 = vadd.f32 %v18289_v12, %v10723_v38 }
 0x76a   : > { %v14215_v44 = vpop.eup %14214  ;;  %11281 = vst.msk [vmem:[%s18404_s24 + $0x20] sm:$0xf] %vm298_vm0, %v12295_v33  ;;  %v12296_v48 = vpack.c.bf16 %v11122_v32, %v11122_v32  ;;  %14232 = vrcp.f32 %v10937_v50  ;;  %v10938_v0 = vadd.f32 1.0, %v14213_v49  ;;  %v18496_v41 = vadd.f32 %v13312_v23, %v18289_v12 }
 0x76b   : > { %v14217_v37 = vpop.eup %14216  ;;  %11284 = vst.msk [vmem:[%s18404_s24 + $0x2c] sm:$0xf] %vm298_vm0, %v12298_v16  ;;  %v11031_v13 = vmul.f32 %v14215_v44, %v18366_v29  ;;  %14234 = vrcp.f32 %v10940_v14  ;;  %v12209_v5 = vmul.f32 -1.442695, %v18491_v52  ;;  %v18503_v3 = vadd.f32 %v18289_v12, %v10726_v51 }
 0x76c   : > { %v14219_v8 = vpop.eup %14218  ;;  %11282 = vst.msk [vmem:[%s18404_s24 + $0x24] sm:$0xf] %vm298_vm0, %v12296_v48  ;;  %v11029_v47 = vmul.f32 %v14217_v37, %v18370_v22  ;;  %v12354_v7 = vunpack.c.l.bf16 %v18488_v58  ;;  %14236 = vrcp.f32 %v10938_v0  ;;  %v12212_v6 = vmul.f32 -1.442695, %v18496_v41 }
 0x76d   : > { %v14221_v53 = vpop.eup %14220  ;;  %v11127_v29 = vadd.f32 %v12350_v36, %v11031_v13  ;;  %v11032_v15 = vmul.f32 %v14219_v8, %v18374_v11  ;;  %14238 = vpow2.f32 %v12211_v55  ;;  %v12210_v26 = vmul.f32 -1.442695, %v18503_v3  ;;  %v13315_v42 = vpop.f32.mrb[28].mxu1  ;;  %v12394_v13 = vld [vmem:[%s14789_s17 + $0x58] sm:$0xff]  }
 0x76e   : > { %v14223_v43 = vpop.eup %14222  ;;  %v11125_v18 = vadd.f32 %v12346_v21, %v11029_v47  ;;  %v11030_v22 = vmul.f32 %v14221_v53, %v18382_v4  ;;  %14240 = vpow2.f32 %v12209_v5  ;;  %v18518_v62 = vadd.f32 %v13315_v42, %v18289_v12  ;;  %v10739_v54 = vpop.f32.mrb[29].mxu1  ;;  %v12393_v47 = vld [vmem:[%s14789_s17 + $0x50] sm:$0xff]  }
 0x76f   : > { %v14225_v45 = vpop.eup %14224  ;;  %v12301_v36 = vpack.c.bf16 %v11127_v29, %v11127_v29  ;;  %v11128_v11 = vadd.f32 %v12351_v59, %v11032_v15  ;;  %v10943_v19 = vadd.f32 1.0, %v14223_v43  ;;  %14242 = vpow2.f32 %v12212_v6  ;;  %v13316_v34 = vpop.f32.mrb[30].mxu1 }
 0x770   : > { %v14227_v35 = vpop.eup %14226  ;;  %v12299_v56 = vpack.c.bf16 %v11125_v18, %v11125_v18  ;;  %v11126_v4 = vadd.f32 %v12347_v20, %v11030_v22  ;;  %v10941_v21 = vadd.f32 1.0, %v14225_v45  ;;  %14244 = vpow2.f32 %v12210_v26  ;;  %v10742_v38 = vpop.f32.mrb[31].mxu1 }
 0x771   : > { %v14229_v60 = vpop.eup %14228  ;;  %11287 = vst.msk [vmem:[%s18404_s24 + $0x38] sm:$0xf] %vm298_vm0, %v12301_v36  ;;  %v12302_v31 = vpack.c.bf16 %v11128_v11, %v11128_v11  ;;  %14246 = vrcp.f32 %v10943_v19  ;;  %v10944_v25 = vadd.f32 1.0, %v14227_v35  ;;  %v12215_v59 = vmul.f32 -1.442695, %v18518_v62 }
 0x772   : > { %11285 = vst.msk [vmem:[%s18404_s24 + $0x30] sm:$0xf] %vm298_vm0, %v12299_v56  ;;  %v12300_v40 = vpack.c.bf16 %v11126_v4, %v11126_v4  ;;  %14248 = vrcp.f32 %v10941_v21  ;;  %v10942_v39 = vadd.f32 1.0, %v14229_v60  ;;  %v18530_v28 = vadd.f32 %v18289_v12, %v10739_v54 }
 0x773   : > { %v14231_v20 = vpop.eup %14230  ;;  %11288 = vst.msk [vmem:[%s18404_s24 + $0x3c] sm:$0xf] %vm298_vm0, %v12302_v31  ;;  %v12359_v23 = vunpack.c.h.bf16 %v18453_v46  ;;  %14250 = vrcp.f32 %v10944_v25  ;;  %v18536_v9 = vadd.f32 %v13316_v34, %v18289_v12  ;;  %v18539_v33 = vadd.f32 %v18289_v12, %v10742_v38  ;;  %v12396_v25 = vld [vmem:[%s14789_s17 + $0x68] sm:$0xff]  }
 0x774   : > { %v14233_v32 = vpop.eup %14232  ;;  %11286 = vst.msk [vmem:[%s18404_s24 + $0x34] sm:$0xf] %vm298_vm0, %v12300_v40  ;;  %v11035_v50 = vmul.f32 %v14231_v20, %v18400_v17  ;;  %v12355_v55 = vunpack.c.h.bf16 %v18488_v58  ;;  %14252 = vrcp.f32 %v10942_v39  ;;  %v12213_v51 = vmul.f32 -1.442695, %v18530_v28  ;;  %v12395_v20 = vld [vmem:[%s14789_s17 + $0x60] sm:$0xff]  }
 0x775   : > { %v14235_v49 = vpop.eup %14234  ;;  %v11033_v16 = vmul.f32 %v14233_v32, %v18409_v57  ;;  %14254 = vpow2.f32 %v12215_v59  ;;  %v12216_v14 = vmul.f32 -1.442695, %v18536_v9  ;;  %v12214_v12 = vmul.f32 -1.442695, %v18539_v33 }
 0x776   : > { %v14237_v44 = vpop.eup %14236  ;;  %v11131_v48 = vadd.f32 %v12358_v2, %v11035_v50  ;;  %v11036_v17 = vmul.f32 %v14235_v49, %v18419_v1  ;;  %14256 = vpow2.f32 %v12213_v51  ;;  %v12362_v43 = vunpack.c.l.bf16 %v12393_v47 }
 0x777   : > { %v14239_v58 = vpop.eup %14238  ;;  %v11129_v0 = vadd.f32 %v12354_v7, %v11033_v16  ;;  %v11034_v37 = vmul.f32 %v14237_v44, %v18426_v27  ;;  %14258 = vpow2.f32 %v12216_v14  ;;  %v12366_v27 = vunpack.c.l.bf16 %v12394_v13 }
 0x778   : > { %v14241_v57 = vpop.eup %14240  ;;  %v12305_v5 = vpack.c.bf16 %v11131_v48, %v11131_v48  ;;  %v11132_v8 = vadd.f32 %v12359_v23, %v11036_v17  ;;  %v10947_v6 = vadd.f32 1.0, %v14239_v58  ;;  %14260 = vpow2.f32 %v12214_v12 }
 0x779   : > { %v14243_v53 = vpop.eup %14242  ;;  %v12303_v46 = vpack.c.bf16 %v11129_v0, %v11129_v0  ;;  %v11130_v2 = vadd.f32 %v12355_v55, %v11034_v37  ;;  %v10945_v1 = vadd.f32 1.0, %v14241_v57  ;;  %v12367_v45 = vunpack.c.h.bf16 %v12394_v13 }
 0x77a   : > { %v14245_v29 = vpop.eup %14244  ;;  %11291 = vst.msk [vmem:[%s18404_s24 + $0x48] sm:$0xf] %vm298_vm0, %v12305_v5  ;;  %v12306_v7 = vpack.c.bf16 %v11132_v8, %v11132_v8  ;;  %14262 = vrcp.f32 %v10947_v6  ;;  %v10948_v15 = vadd.f32 1.0, %v14243_v53  ;;  %v12363_v19 = vunpack.c.h.bf16 %v12393_v47  ;;  %v12398_v8 = vld [vmem:[%s14789_s17 + $0x78] sm:$0xff]  }
 0x77b   : > { %v14247_v26 = vpop.eup %14246  ;;  %11289 = vst.msk [vmem:[%s18404_s24 + $0x40] sm:$0xf] %vm298_vm0, %v12303_v46  ;;  %v12304_v42 = vpack.c.bf16 %v11130_v2, %v11130_v2  ;;  %14264 = vrcp.f32 %v10945_v1  ;;  %v10946_v18 = vadd.f32 1.0, %v14245_v29  ;;  %v12374_v55 = vunpack.c.l.bf16 %v12396_v25 }
 0x77c   : > { %v14249_v22 = vpop.eup %14248  ;;  %11292 = vst.msk [vmem:[%s18404_s24 + $0x4c] sm:$0xf] %vm298_vm0, %v12306_v7  ;;  %v11039_v54 = vmul.f32 %v14247_v26, %v18443_v24  ;;  %14266 = vrcp.f32 %v10948_v15  ;;  %v12370_v16 = vunpack.c.l.bf16 %v12395_v20  ;;  %v12375_v44 = vunpack.c.h.bf16 %v12396_v25 }
 0x77d   : > { %v14251_v36 = vpop.eup %14250  ;;  %11290 = vst.msk [vmem:[%s18404_s24 + $0x44] sm:$0xf] %vm298_vm0, %v12304_v42  ;;  %v11037_v11 = vmul.f32 %v14249_v22, %v18448_v61  ;;  %14268 = vrcp.f32 %v10946_v18  ;;  %v12371_v58 = vunpack.c.h.bf16 %v12395_v20  ;;  %v12382_v2 = vunpack.c.l.bf16 %v12398_v8 }
 0x77e   : > { %v14253_v34 = vpop.eup %14252  ;;  %v11135_v35 = vadd.f32 %v12366_v27, %v11039_v54  ;;  %v11040_v56 = vmul.f32 %v14251_v36, %v18457_v10  ;;  %v12383_v27 = vunpack.c.h.bf16 %v12398_v8 }
 0x77f   : > { %v14255_v4 = vpop.eup %14254  ;;  %v11133_v21 = vadd.f32 %v12362_v43, %v11037_v11  ;;  %v11038_v24 = vmul.f32 %v14253_v34, %v18460_v63 }
 0x780   : > { %v14257_v38 = vpop.eup %14256  ;;  %v12309_v60 = vpack.c.bf16 %v11135_v35, %v11135_v35  ;;  %v11136_v31 = vadd.f32 %v12367_v45, %v11040_v56  ;;  %v10951_v59 = vadd.f32 1.0, %v14255_v4 }
 0x781   : > { %v14259_v40 = vpop.eup %14258  ;;  %v12307_v61 = vpack.c.bf16 %v11133_v21, %v11133_v21  ;;  %v11134_v39 = vadd.f32 %v12363_v19, %v11038_v24  ;;  %v10949_v23 = vadd.f32 1.0, %v14257_v38 }
 0x782   : > { %v14261_v32 = vpop.eup %14260  ;;  %11295 = vst.msk [vmem:[%s18404_s24 + $0x58] sm:$0xf] %vm298_vm0, %v12309_v60  ;;  %v12310_v10 = vpack.c.bf16 %v11136_v31, %v11136_v31  ;;  %14270 = vrcp.f32 %v10951_v59  ;;  %v10952_v50 = vadd.f32 1.0, %v14259_v40 }
 0x783   : > { %11293 = vst.msk [vmem:[%s18404_s24 + $0x50] sm:$0xf] %vm298_vm0, %v12307_v61  ;;  %v12308_v63 = vpack.c.bf16 %v11134_v39, %v11134_v39  ;;  %14272 = vrcp.f32 %v10949_v23  ;;  %v10950_v51 = vadd.f32 1.0, %v14261_v32 }
 0x784   : > { %v14263_v49 = vpop.eup %14262  ;;  %11296 = vst.msk [vmem:[%s18404_s24 + $0x5c] sm:$0xf] %vm298_vm0, %v12310_v10  ;;  %14274 = vrcp.f32 %v10952_v50 }
 0x785   : > { %v14265_v14 = vpop.eup %14264  ;;  %11294 = vst.msk [vmem:[%s18404_s24 + $0x54] sm:$0xf] %vm298_vm0, %v12308_v63  ;;  %v11043_v12 = vmul.f32 %v14263_v49, %v18478_v30  ;;  %14276 = vrcp.f32 %v10950_v51  ;;  %v12397_v30 = vld [vmem:[%s14789_s17 + $0x70] sm:$0xff]  }
 0x786   : > { %v14267_v48 = vpop.eup %14266  ;;  %v11041_v17 = vmul.f32 %v14265_v14, %v18491_v52  ;;  %v12378_v29 = vunpack.c.l.bf16 %v12397_v30  ;;  %v12379_v42 = vunpack.c.h.bf16 %v12397_v30 }
 0x787   : > { %v14269_v0 = vpop.eup %14268  ;;  %v11139_v37 = vadd.f32 %v12374_v55, %v11043_v12  ;;  %v11044_v13 = vmul.f32 %v14267_v48, %v18496_v41 }
 0x788   : > { %v11137_v57 = vadd.f32 %v12370_v16, %v11041_v17  ;;  %v11042_v5 = vmul.f32 %v14269_v0, %v18503_v3 }
 0x789   : > { %v12313_v47 = vpack.c.bf16 %v11139_v37, %v11139_v37  ;;  %v11140_v6 = vadd.f32 %v12375_v44, %v11044_v13 }
 0x78a   : > { %v12311_v53 = vpack.c.bf16 %v11137_v57, %v11137_v57  ;;  %v11138_v46 = vadd.f32 %v12371_v58, %v11042_v5 }
 0x78b   : > { %11299 = vst.msk [vmem:[%s18404_s24 + $0x68] sm:$0xf] %vm298_vm0, %v12313_v47  ;;  %v12314_v52 = vpack.c.bf16 %v11140_v6, %v11140_v6 }
 0x78c   : > { %v14271_v1 = vpop.eup %14270  ;;  %11297 = vst.msk [vmem:[%s18404_s24 + $0x60] sm:$0xf] %vm298_vm0, %v12311_v53  ;;  %v12312_v41 = vpack.c.bf16 %v11138_v46, %v11138_v46 }
 0x78d   : > { %v14273_v7 = vpop.eup %14272  ;;  %11300 = vst.msk [vmem:[%s18404_s24 + $0x6c] sm:$0xf] %vm298_vm0, %v12314_v52  ;;  %v11047_v3 = vmul.f32 %v14271_v1, %v18518_v62 }
 0x78e   : > { %v14275_v15 = vpop.eup %14274  ;;  %11298 = vst.msk [vmem:[%s18404_s24 + $0x64] sm:$0xf] %vm298_vm0, %v12312_v41  ;;  %v11045_v26 = vmul.f32 %v14273_v7, %v18530_v28 }
 0x78f   : > { %v14277_v43 = vpop.eup %14276  ;;  %v11143_v18 = vadd.f32 %v12382_v2, %v11047_v3  ;;  %v11048_v22 = vmul.f32 %v14275_v15, %v18536_v9 }
 0x790   : > { %v11141_v54 = vadd.f32 %v12378_v29, %v11045_v26  ;;  %v11046_v45 = vmul.f32 %v14277_v43, %v18539_v33 }
 0x791   : > { %v12317_v62 = vpack.c.bf16 %v11143_v18, %v11143_v18  ;;  %v11144_v36 = vadd.f32 %v12383_v27, %v11048_v22 }
 0x792   : > { %v12315_v11 = vpack.c.bf16 %v11141_v54, %v11141_v54  ;;  %v11142_v19 = vadd.f32 %v12379_v42, %v11046_v45 }
 0x793   : > { %11303 = vst.msk [vmem:[%s18404_s24 + $0x78] sm:$0xf] %vm298_vm0, %v12317_v62  ;;  %v12318_v28 = vpack.c.bf16 %v11144_v36, %v11144_v36 }
 0x794   : > { %11301 = vst.msk [vmem:[%s18404_s24 + $0x70] sm:$0xf] %vm298_vm0, %v12315_v11  ;;  %v12316_v9 = vpack.c.bf16 %v11142_v19, %v11142_v19 }
 0x795   : > { %11304 = vst.msk [vmem:[%s18404_s24 + $0x7c] sm:$0xf] %vm298_vm0, %v12318_v28 }
 0x796   : > { %11302 = vst.msk [vmem:[%s18404_s24 + $0x74] sm:$0xf] %vm298_vm0, %v12316_v9 }
 0x797   : > { %14466 = shalt.err (!%p14463_p13)
}
 0x798   : > { %s14467_s16 = scalar_lea.hbm %s18602_s15, 2048  ;;  %s14471_s7 = scalar_lea.hbm %s18659_s5, 4096 }
 0x799   : > { %p14468_p9 = scmp.ne.s32.totalorder %s18602_s15, %s14467_s16  ;;  %p14472_p6 = scmp.lt.u32.totalorder %s18602_s15, %s18659_s5 }
 0x79a   : > { %p14473_p4 = scmp.lt.u32.totalorder %s14471_s7, %s14467_s16  ;;  %p14475_p3 = scmp.lt.u32.totalorder %s14467_s16, %s18602_s15 }
 0x79b   : > { %p14469_p0 = pnand %p14468_p9, %p14731_p10 }
 0x79c   : > { %p14474_p8 = por %p14473_p4, %p14472_p6 }
 0x79d   : > { %p14470_p11 = pneg %p14469_p0 }
 0x79e   : > { %p14476_p5 = por %p14475_p3, %p14474_p8 }
 0x7a0   : > { %p14477_p7 = pnand %p14476_p5, %p14470_p11 }
 0x7a2   : > { %14480 = shalt.err (!%p14477_p7)
}
 0x7a3   : > { %s14540_s26 = smov 64   ;;  %s14541_s13 = smov 4  }
 0x7a4   : > { %13865 = dma.vmem_to_hbm [thread:$0]  (%p14731_p10), %s18604_s11, 2048, %s18602_s15, %s11306_s22, %s14540_s26, %s14540_s26, %s14541_s13  }
 0x7a5 PF: > { %s11334_s8 = sand.u32 1, %s14515_s18   ;;  %p19041_p12 = scmp.ne.s32.totalorder %s18771_s25, 0 }
 0x7a6   : > { %p19042_p2 = scmp.ge.s32.totalorder %s14527_s21, 2  ;;  %s11335_s30 = scalar_lea.sflag [#allocation5], %s11334_s8 }
 0x7a8   : > { %p13885_p1 = pnand %p19042_p2, %p19041_p12 }
 0x7aa   : > { %14510 = dma.done.wait (!%p13885_p1), %s11335_s30, 2048  }
 0x7ab   : > { %14512 = vsyncadd (!%p13885_p1), %s11335_s30, 4294965248  ;;  %p20_p13 = scmp.ge.s32.totalorder %s14721_s14, 4   ;;  %s19043_s18 = smov %s14519_s19 }
 0x7ac   : > { %s19044_s19 = smov %s14523_s20  ;;  %s19045_s20 = smov %s14737_s28 }
 0x7ad   : > { %s19046_s21 = smov %s14721_s14  ;;  %22 = sbr.rel (!%p20_p13) target bundleno = 7 (0x7), region = 120 }
 0x7b4   :  { %11340 = vsyncpa [#allocation4], 1 }
 0x7b5   :  { %11342 = vsyncpa [#allocation4 + $0x1], 1 }
 0x7b6   :  { %11343 = vsyncpa [#allocation7], 1 }
 0x7b7   :  { %11344 = vsyncpa [#allocation10], 1 }
 0x7b8   :  { %11345 = vsyncpa [#allocation5], 1 }
 0x7b9   :  { %11347 = vsyncpa [#allocation5 + $0x1], 1 }

</bundles_post_ra>
